<compile_context>
chip_gen: v7x
topology: tpu7x:2x2x1
jax: 0.10.0
libtpu: 0.0.40
codegen_flags: <defaults>
</compile_context>

<pallas_src>
import jax
import jax.numpy as jnp
from jax.experimental import pallas as pl
from jax.experimental.pallas import tpu as pltpu


def _attn_model_kernel(
    embs_ref, q_ref, mask_ref,
    wih_ref, whh_f_ref, whh_b_ref, bih_ref, bhh_ref,
    wq_ref, wk_ref, wv_ref,
    w1c_ref, w1q_ref, b1_ref, w2_ref, b2_ref,
    out_ref, attn_ref):
  B, S, E = embs_ref.shape
  H = whh_f_ref.shape[0]
  H3 = 3 * H
  embs = embs_ref[...]                                       # (B,S,E)

  # ---- hoisted input projection for BOTH directions: one MXU matmul ----
  # gi_all[:, :, :3H] -> forward gates, gi_all[:, :, 3H:] -> backward gates.
  gi_all = (jnp.dot(embs.reshape(B * S, E), wih_ref[...],
                    preferred_element_type=jnp.float32)
            + bih_ref[...]).reshape(B, S, 2 * H3)

  whh_f = whh_f_ref[...]
  whh_b = whh_b_ref[...]
  bhh = jnp.broadcast_to(bhh_ref[...], (B, 2 * H3))          # hoisted (no per-step bcast)
  bhh_f = bhh[:, :H3]
  bhh_b = bhh[:, H3:]

  def gru_step(h, gi, whh_t, bhh_d):
    # PyTorch gate order (r, z, n); only the recurrent matmul stays in the loop.
    gh = jnp.dot(h, whh_t, preferred_element_type=jnp.float32) + bhh_d
    r = jax.nn.sigmoid(gi[:, :H] + gh[:, :H])
    z = jax.nn.sigmoid(gi[:, H:2 * H] + gh[:, H:2 * H])
    n = jnp.tanh(gi[:, 2 * H:] + r * gh[:, 2 * H:])
    return (1.0 - z) * n + z * h

  # ---- interleaved bidirectional GRU: both directions each iteration ----
  h_f = jnp.zeros((B, H), jnp.float32)
  h_b = jnp.zeros((B, H), jnp.float32)
  fwd = [None] * S
  bwd = [None] * S
  for t in range(S):                        # static unroll (S small)
    h_f = gru_step(h_f, gi_all[:, t, :H3], whh_f, bhh_f)
    h_b = gru_step(h_b, gi_all[:, S - 1 - t, H3:], whh_b, bhh_b)
    fwd[t] = h_f
    bwd[S - 1 - t] = h_b
  hiddens = jnp.concatenate(
      [jnp.stack(fwd, axis=1), jnp.stack(bwd, axis=1)], axis=-1)   # (B,S,2H), in vregs

  # ---- additive attention ----
  queries = q_ref[...]                                       # (B,E)
  tq = jnp.dot(queries, wq_ref[...],
               preferred_element_type=jnp.float32)           # (B,H)
  tk = jnp.dot(hiddens.reshape(B * S, 2 * H), wk_ref[...],
               preferred_element_type=jnp.float32).reshape(B, S, H)
  feats = jnp.tanh(tq[:, None, :] + tk)                      # (B,S,H)
  scores = jnp.sum(feats * wv_ref[...], axis=-1)             # (B,S) == feats @ w_v^T
  neg = jnp.float32(-1e30)                                   # finite sentinel, no NaN
  scores = jnp.where(mask_ref[...] != 0, neg, scores)        # scores[pad_mask] = -big
  m = jnp.max(scores, axis=-1, keepdims=True)
  e = jnp.exp(scores - m)
  attn = e / jnp.sum(e, axis=-1, keepdims=True)              # softmax over S
  attn_ref[...] = attn

  # ---- context (MXU contraction) + split-concat output head ----
  context = jnp.einsum('bqs,bsh->bqh', attn[:, None, :], hiddens,
                       preferred_element_type=jnp.float32)[:, 0, :]   # (B,2H)
  hl = jnp.tanh(
      jnp.dot(context, w1c_ref[...], preferred_element_type=jnp.float32)
      + jnp.dot(queries, w1q_ref[...], preferred_element_type=jnp.float32)
      + b1_ref[...])
  out_ref[...] = (jnp.dot(hl, w2_ref[...],
                          preferred_element_type=jnp.float32) + b2_ref[...])


def init_params(key, vocab, E, H, O):
  ks = jax.random.split(key, 16)
  def rn(k, shape, scale=0.1):
    return jax.random.normal(k, shape, jnp.float32) * scale
  emb = rn(ks[0], (vocab, E), 0.5).at[0].set(0.0)            # padding row 0
  return dict(
      emb=emb,
      wih_f=rn(ks[1], (E, 3 * H)), whh_f=rn(ks[2], (H, 3 * H)),
      bih_f=rn(ks[3], (1, 3 * H)), bhh_f=rn(ks[4], (1, 3 * H)),
      wih_b=rn(ks[5], (E, 3 * H)), whh_b=rn(ks[6], (H, 3 * H)),
      bih_b=rn(ks[7], (1, 3 * H)), bhh_b=rn(ks[8], (1, 3 * H)),
      wq=rn(ks[9], (E, H)), wk=rn(ks[10], (2 * H, H)), wv=rn(ks[11], (1, H)),
      w1=rn(ks[12], (2 * H + E, H)), b1=rn(ks[13], (1, H)),
      w2=rn(ks[14], (H, O)), b2=rn(ks[15], (1, O)),
  )


def attn_model_forward(inp, pie_idxs, p):
  B, S = inp.shape
  H = p['whh_f'].shape[0]
  O = p['w2'].shape[1]

  # Glue (plain JAX): embedding gather, pie-mean queries, pad mask.
  embs = p['emb'][inp]                                          # (B,S,E)
  pad_mask = (inp == 0).astype(jnp.int32)                       # (B,S)
  pie = jnp.take_along_axis(embs, pie_idxs[:, :, None], axis=1) # (B,P,E)
  queries = jnp.mean(pie, axis=1)                               # (B,E)

  # Fuse direction weights / biases and pre-split linear_1 (avoids in-kernel
  # lane-axis concatenation of activations).
  wih = jnp.concatenate([p['wih_f'], p['wih_b']], axis=1)       # (E,6H)
  bih = jnp.concatenate([p['bih_f'], p['bih_b']], axis=1)       # (1,6H)
  bhh = jnp.concatenate([p['bhh_f'], p['bhh_b']], axis=1)       # (1,6H)
  w1c = p['w1'][:2 * H, :]                                      # (2H,H) for context
  w1q = p['w1'][2 * H:, :]                                      # (E,H)  for queries

  # Pad batch to a sublane multiple (8) so (B,.) operands fill vregs / MXU rows.
  B_pad = ((B + 7) // 8) * 8
  pb = B_pad - B
  embs_k = jnp.pad(embs, ((0, pb), (0, 0), (0, 0)))
  q_k = jnp.pad(queries, ((0, pb), (0, 0)))
  mask_k = jnp.pad(pad_mask, ((0, pb), (0, 0)), constant_values=1)

  vmem = pl.BlockSpec(memory_space=pltpu.MemorySpace.VMEM)
  out_p, attn_p = pl.pallas_call(
      _attn_model_kernel,
      out_shape=(jax.ShapeDtypeStruct((B_pad, O), jnp.float32),
                 jax.ShapeDtypeStruct((B_pad, S), jnp.float32)),
      in_specs=[vmem] * 16,
      out_specs=(vmem, vmem),
  )(embs_k, q_k, mask_k,
    wih, p['whh_f'], p['whh_b'], bih, bhh,
    p['wq'], p['wk'], p['wv'],
    w1c, w1q, p['b1'], p['w2'], p['b2'])
  return out_p[:B], attn_p[:B, :, None]     # out (B,O), attn_weights (B,S,1)


def reference_forward(inp, pie_idxs, p):
  """Pure-JAX mirror of the PyTorch forward (for verification)."""
  embs = p['emb'][inp]
  B, S, _ = embs.shape
  H = p['whh_f'].shape[0]
  pad_mask = inp == 0
  pie = jnp.take_along_axis(embs, pie_idxs[:, :, None], axis=1)
  queries = jnp.mean(pie, axis=1)[:, None, :]                   # (B,1,E)

  def run(wih, whh, bih, bhh, reverse):
    h = jnp.zeros((B, H), jnp.float32)
    outs = [None] * S
    order = range(S - 1, -1, -1) if reverse else range(S)
    for t in order:
      xt = embs[:, t, :]
      gi = xt @ wih + bih
      gh = h @ whh + bhh
      r = jax.nn.sigmoid(gi[:, :H] + gh[:, :H])
      z = jax.nn.sigmoid(gi[:, H:2 * H] + gh[:, H:2 * H])
      n = jnp.tanh(gi[:, 2 * H:] + r * gh[:, 2 * H:])
      h = (1.0 - z) * n + z * h
      outs[t] = h
    return jnp.stack(outs, axis=1)

  hiddens = jnp.concatenate(
      [run(p['wih_f'], p['whh_f'], p['bih_f'], p['bhh_f'], False),
       run(p['wih_b'], p['whh_b'], p['bih_b'], p['bhh_b'], True)], axis=-1)

  tq = queries @ p['wq']                                        # (B,1,H)
  tk = jnp.einsum('bsk,kh->bsh', hiddens, p['wk'])              # (B,S,H)
  feats = jnp.tanh(tq + tk)
  scores = jnp.sum(feats * p['wv'], axis=-1, keepdims=True)     # (B,S,1)
  scores = jnp.where(pad_mask[:, :, None], -jnp.inf, scores)
  attn_weights = jax.nn.softmax(scores, axis=1)
  context = jnp.einsum('bsk,bsl->bkl', hiddens, attn_weights)   # (B,2H,1)
  concat = jnp.concatenate([jnp.swapaxes(context, 1, 2), queries], axis=2)
  hl = jnp.tanh(concat @ p['w1'] + p['b1'])
  out = (hl @ p['w2'] + p['b2'])[:, 0, :]
  return out, attn_weights


if __name__ == "__main__":
  key = jax.random.PRNGKey(0)
  B, S, E, H, O, V = 2, 8, 32, 16, 4, 20

  params = init_params(key, V, E, H, O)
  inp = jnp.array([[3, 5, 7, 2, 9, 0, 0, 0],
                   [4, 1, 6, 8, 2, 5, 3, 0]], dtype=jnp.int32)
  pie_idxs = jnp.array([[1, 3], [0, 2]], dtype=jnp.int32)

  out, attn_w = jax.jit(attn_model_forward)(inp, pie_idxs, params)
  out = jax.block_until_ready(out)
  attn_w = jax.block_until_ready(attn_w)

  ref_out, ref_attn = reference_forward(inp, pie_idxs, params)
  assert out.shape == (B, O) and attn_w.shape == (B, S, 1)
  assert jnp.allclose(out, ref_out, atol=2e-3, rtol=2e-3)
  assert jnp.allclose(attn_w, ref_attn, atol=2e-3, rtol=2e-3)
  print("KERNEL_OK")
</pallas_src>

<mosaic_0001>
module attributes {stable_mosaic.version = 11 : i64} {
  func.func @_attn_model_kernel(%arg0: memref<8x8x32xf32, #tpu.memory_space<vmem>>, %arg1: memref<8x32xf32, #tpu.memory_space<vmem>>, %arg2: memref<8x8xi32, #tpu.memory_space<vmem>>, %arg3: memref<32x96xf32, #tpu.memory_space<vmem>>, %arg4: memref<16x48xf32, #tpu.memory_space<vmem>>, %arg5: memref<16x48xf32, #tpu.memory_space<vmem>>, %arg6: memref<1x96xf32, #tpu.memory_space<vmem>>, %arg7: memref<1x96xf32, #tpu.memory_space<vmem>>, %arg8: memref<32x16xf32, #tpu.memory_space<vmem>>, %arg9: memref<32x16xf32, #tpu.memory_space<vmem>>, %arg10: memref<1x16xf32, #tpu.memory_space<vmem>>, %arg11: memref<32x16xf32, #tpu.memory_space<vmem>>, %arg12: memref<32x16xf32, #tpu.memory_space<vmem>>, %arg13: memref<1x16xf32, #tpu.memory_space<vmem>>, %arg14: memref<16x4xf32, #tpu.memory_space<vmem>>, %arg15: memref<1x4xf32, #tpu.memory_space<vmem>>, %arg16: memref<8x4xf32, #tpu.memory_space<vmem>>, %arg17: memref<8x8xf32, #tpu.memory_space<vmem>>) attributes {dimension_semantics = [], scalar_prefetch = 0 : i64, scratch_operands = 0 : i64, tpu.core_type = #tpu.core_type<tc>} {
    %c0 = arith.constant 0 : index
    %c0_0 = arith.constant 0 : index
    %c0_1 = arith.constant 0 : index
    %0 = vector.load %arg0[%c0, %c0_0, %c0_1] : memref<8x8x32xf32, #tpu.memory_space<vmem>>, vector<8x8x32xf32>
    %1 = vector.shape_cast %0 : vector<8x8x32xf32> to vector<64x32xf32>
    %c0_2 = arith.constant 0 : index
    %c0_3 = arith.constant 0 : index
    %2 = vector.load %arg3[%c0_2, %c0_3] : memref<32x96xf32, #tpu.memory_space<vmem>>, vector<32x96xf32>
    %cst = arith.constant dense<0.000000e+00> : vector<64x96xf32>
    %3 = tpu.matmul %1, %2, %cst {dimension_numbers = #tpu.dot_dimension_numbers<[1], [0], [0], [1], [0, 0, 1, 1], [], []>} : vector<64x32xf32>, vector<32x96xf32>, vector<64x96xf32> -> vector<64x96xf32>
    %c0_4 = arith.constant 0 : index
    %c0_5 = arith.constant 0 : index
    %4 = vector.load %arg6[%c0_4, %c0_5] : memref<1x96xf32, #tpu.memory_space<vmem>>, vector<1x96xf32>
    %5 = vector.broadcast %4 : vector<1x96xf32> to vector<64x96xf32>
    %6 = arith.addf %3, %5 : vector<64x96xf32>
    %7 = vector.shape_cast %6 : vector<64x96xf32> to vector<8x8x96xf32>
    %c0_6 = arith.constant 0 : index
    %c0_7 = arith.constant 0 : index
    %8 = vector.load %arg4[%c0_6, %c0_7] : memref<16x48xf32, #tpu.memory_space<vmem>>, vector<16x48xf32>
    %c0_8 = arith.constant 0 : index
    %c0_9 = arith.constant 0 : index
    %9 = vector.load %arg5[%c0_8, %c0_9] : memref<16x48xf32, #tpu.memory_space<vmem>>, vector<16x48xf32>
    %c0_10 = arith.constant 0 : index
    %c0_11 = arith.constant 0 : index
    %10 = vector.load %arg7[%c0_10, %c0_11] : memref<1x96xf32, #tpu.memory_space<vmem>>, vector<1x96xf32>
    %11 = vector.shape_cast %10 : vector<1x96xf32> to vector<1x96xf32>
    %12 = vector.broadcast %11 : vector<1x96xf32> to vector<8x96xf32>
    %13 = vector.extract_strided_slice %12 {offsets = [0, 0], sizes = [8, 48], strides = [1, 1]} : vector<8x96xf32> to vector<8x48xf32>
    %14 = vector.extract_strided_slice %12 {offsets = [0, 48], sizes = [8, 48], strides = [1, 1]} : vector<8x96xf32> to vector<8x48xf32>
    %cst_12 = arith.constant 0.000000e+00 : f32
    %15 = vector.broadcast %cst_12 : f32 to vector<8x16xf32>
    %cst_13 = arith.constant 0.000000e+00 : f32
    %16 = vector.broadcast %cst_13 : f32 to vector<8x16xf32>
    %17 = vector.extract_strided_slice %7 {offsets = [0, 0, 0], sizes = [8, 1, 48], strides = [1, 1, 1]} : vector<8x8x96xf32> to vector<8x1x48xf32>
    %18 = vector.shape_cast %17 : vector<8x1x48xf32> to vector<8x48xf32>
    %cst_14 = arith.constant dense<0.000000e+00> : vector<8x48xf32>
    %19 = tpu.matmul %15, %8, %cst_14 {dimension_numbers = #tpu.dot_dimension_numbers<[1], [0], [0], [1], [0, 0, 1, 1], [], []>} : vector<8x16xf32>, vector<16x48xf32>, vector<8x48xf32> -> vector<8x48xf32>
    %20 = arith.addf %19, %13 : vector<8x48xf32>
    %21 = vector.extract_strided_slice %18 {offsets = [0, 0], sizes = [8, 16], strides = [1, 1]} : vector<8x48xf32> to vector<8x16xf32>
    %22 = vector.extract_strided_slice %20 {offsets = [0, 0], sizes = [8, 16], strides = [1, 1]} : vector<8x48xf32> to vector<8x16xf32>
    %23 = arith.addf %21, %22 : vector<8x16xf32>
    %24 = arith.negf %23 : vector<8x16xf32>
    %25 = math.exp %24 : vector<8x16xf32>
    %cst_15 = arith.constant 1.000000e+00 : f32
    %26 = vector.broadcast %cst_15 : f32 to vector<8x16xf32>
    %27 = arith.addf %26, %25 : vector<8x16xf32>
    %28 = arith.divf %26, %27 : vector<8x16xf32>
    %29 = vector.extract_strided_slice %18 {offsets = [0, 16], sizes = [8, 16], strides = [1, 1]} : vector<8x48xf32> to vector<8x16xf32>
    %30 = vector.extract_strided_slice %20 {offsets = [0, 16], sizes = [8, 16], strides = [1, 1]} : vector<8x48xf32> to vector<8x16xf32>
    %31 = arith.addf %29, %30 : vector<8x16xf32>
    %32 = arith.negf %31 : vector<8x16xf32>
    %33 = math.exp %32 : vector<8x16xf32>
    %cst_16 = arith.constant 1.000000e+00 : f32
    %34 = vector.broadcast %cst_16 : f32 to vector<8x16xf32>
    %35 = arith.addf %34, %33 : vector<8x16xf32>
    %36 = arith.divf %34, %35 : vector<8x16xf32>
    %37 = vector.extract_strided_slice %18 {offsets = [0, 32], sizes = [8, 16], strides = [1, 1]} : vector<8x48xf32> to vector<8x16xf32>
    %38 = vector.extract_strided_slice %20 {offsets = [0, 32], sizes = [8, 16], strides = [1, 1]} : vector<8x48xf32> to vector<8x16xf32>
    %39 = arith.mulf %28, %38 : vector<8x16xf32>
    %40 = arith.addf %37, %39 : vector<8x16xf32>
    %41 = math.tanh %40 : vector<8x16xf32>
    %cst_17 = arith.constant 1.000000e+00 : f32
    %42 = vector.broadcast %cst_17 : f32 to vector<8x16xf32>
    %43 = arith.subf %42, %36 : vector<8x16xf32>
    %44 = arith.mulf %43, %41 : vector<8x16xf32>
    %45 = arith.mulf %36, %15 : vector<8x16xf32>
    %46 = arith.addf %44, %45 : vector<8x16xf32>
    %47 = vector.extract_strided_slice %7 {offsets = [0, 7, 48], sizes = [8, 1, 48], strides = [1, 1, 1]} : vector<8x8x96xf32> to vector<8x1x48xf32>
    %48 = vector.shape_cast %47 : vector<8x1x48xf32> to vector<8x48xf32>
    %cst_18 = arith.constant dense<0.000000e+00> : vector<8x48xf32>
    %49 = tpu.matmul %16, %9, %cst_18 {dimension_numbers = #tpu.dot_dimension_numbers<[1], [0], [0], [1], [0, 0, 1, 1], [], []>} : vector<8x16xf32>, vector<16x48xf32>, vector<8x48xf32> -> vector<8x48xf32>
    %50 = arith.addf %49, %14 : vector<8x48xf32>
    %51 = vector.extract_strided_slice %48 {offsets = [0, 0], sizes = [8, 16], strides = [1, 1]} : vector<8x48xf32> to vector<8x16xf32>
    %52 = vector.extract_strided_slice %50 {offsets = [0, 0], sizes = [8, 16], strides = [1, 1]} : vector<8x48xf32> to vector<8x16xf32>
    %53 = arith.addf %51, %52 : vector<8x16xf32>
    %54 = arith.negf %53 : vector<8x16xf32>
    %55 = math.exp %54 : vector<8x16xf32>
    %cst_19 = arith.constant 1.000000e+00 : f32
    %56 = vector.broadcast %cst_19 : f32 to vector<8x16xf32>
    %57 = arith.addf %56, %55 : vector<8x16xf32>
    %58 = arith.divf %56, %57 : vector<8x16xf32>
    %59 = vector.extract_strided_slice %48 {offsets = [0, 16], sizes = [8, 16], strides = [1, 1]} : vector<8x48xf32> to vector<8x16xf32>
    %60 = vector.extract_strided_slice %50 {offsets = [0, 16], sizes = [8, 16], strides = [1, 1]} : vector<8x48xf32> to vector<8x16xf32>
    %61 = arith.addf %59, %60 : vector<8x16xf32>
    %62 = arith.negf %61 : vector<8x16xf32>
    %63 = math.exp %62 : vector<8x16xf32>
    %cst_20 = arith.constant 1.000000e+00 : f32
    %64 = vector.broadcast %cst_20 : f32 to vector<8x16xf32>
    %65 = arith.addf %64, %63 : vector<8x16xf32>
    %66 = arith.divf %64, %65 : vector<8x16xf32>
    %67 = vector.extract_strided_slice %48 {offsets = [0, 32], sizes = [8, 16], strides = [1, 1]} : vector<8x48xf32> to vector<8x16xf32>
    %68 = vector.extract_strided_slice %50 {offsets = [0, 32], sizes = [8, 16], strides = [1, 1]} : vector<8x48xf32> to vector<8x16xf32>
    %69 = arith.mulf %58, %68 : vector<8x16xf32>
    %70 = arith.addf %67, %69 : vector<8x16xf32>
    %71 = math.tanh %70 : vector<8x16xf32>
    %cst_21 = arith.constant 1.000000e+00 : f32
    %72 = vector.broadcast %cst_21 : f32 to vector<8x16xf32>
    %73 = arith.subf %72, %66 : vector<8x16xf32>
    %74 = arith.mulf %73, %71 : vector<8x16xf32>
    %75 = arith.mulf %66, %16 : vector<8x16xf32>
    %76 = arith.addf %74, %75 : vector<8x16xf32>
    %77 = vector.extract_strided_slice %7 {offsets = [0, 1, 0], sizes = [8, 1, 48], strides = [1, 1, 1]} : vector<8x8x96xf32> to vector<8x1x48xf32>
    %78 = vector.shape_cast %77 : vector<8x1x48xf32> to vector<8x48xf32>
    %cst_22 = arith.constant dense<0.000000e+00> : vector<8x48xf32>
    %79 = tpu.matmul %46, %8, %cst_22 {dimension_numbers = #tpu.dot_dimension_numbers<[1], [0], [0], [1], [0, 0, 1, 1], [], []>} : vector<8x16xf32>, vector<16x48xf32>, vector<8x48xf32> -> vector<8x48xf32>
    %80 = arith.addf %79, %13 : vector<8x48xf32>
    %81 = vector.extract_strided_slice %78 {offsets = [0, 0], sizes = [8, 16], strides = [1, 1]} : vector<8x48xf32> to vector<8x16xf32>
    %82 = vector.extract_strided_slice %80 {offsets = [0, 0], sizes = [8, 16], strides = [1, 1]} : vector<8x48xf32> to vector<8x16xf32>
    %83 = arith.addf %81, %82 : vector<8x16xf32>
    %84 = arith.negf %83 : vector<8x16xf32>
    %85 = math.exp %84 : vector<8x16xf32>
    %cst_23 = arith.constant 1.000000e+00 : f32
    %86 = vector.broadcast %cst_23 : f32 to vector<8x16xf32>
    %87 = arith.addf %86, %85 : vector<8x16xf32>
    %88 = arith.divf %86, %87 : vector<8x16xf32>
    %89 = vector.extract_strided_slice %78 {offsets = [0, 16], sizes = [8, 16], strides = [1, 1]} : vector<8x48xf32> to vector<8x16xf32>
    %90 = vector.extract_strided_slice %80 {offsets = [0, 16], sizes = [8, 16], strides = [1, 1]} : vector<8x48xf32> to vector<8x16xf32>
    %91 = arith.addf %89, %90 : vector<8x16xf32>
    %92 = arith.negf %91 : vector<8x16xf32>
    %93 = math.exp %92 : vector<8x16xf32>
    %cst_24 = arith.constant 1.000000e+00 : f32
    %94 = vector.broadcast %cst_24 : f32 to vector<8x16xf32>
    %95 = arith.addf %94, %93 : vector<8x16xf32>
    %96 = arith.divf %94, %95 : vector<8x16xf32>
    %97 = vector.extract_strided_slice %78 {offsets = [0, 32], sizes = [8, 16], strides = [1, 1]} : vector<8x48xf32> to vector<8x16xf32>
    %98 = vector.extract_strided_slice %80 {offsets = [0, 32], sizes = [8, 16], strides = [1, 1]} : vector<8x48xf32> to vector<8x16xf32>
    %99 = arith.mulf %88, %98 : vector<8x16xf32>
    %100 = arith.addf %97, %99 : vector<8x16xf32>
    %101 = math.tanh %100 : vector<8x16xf32>
    %cst_25 = arith.constant 1.000000e+00 : f32
    %102 = vector.broadcast %cst_25 : f32 to vector<8x16xf32>
    %103 = arith.subf %102, %96 : vector<8x16xf32>
    %104 = arith.mulf %103, %101 : vector<8x16xf32>
    %105 = arith.mulf %96, %46 : vector<8x16xf32>
    %106 = arith.addf %104, %105 : vector<8x16xf32>
    %107 = vector.extract_strided_slice %7 {offsets = [0, 6, 48], sizes = [8, 1, 48], strides = [1, 1, 1]} : vector<8x8x96xf32> to vector<8x1x48xf32>
    %108 = vector.shape_cast %107 : vector<8x1x48xf32> to vector<8x48xf32>
    %cst_26 = arith.constant dense<0.000000e+00> : vector<8x48xf32>
    %109 = tpu.matmul %76, %9, %cst_26 {dimension_numbers = #tpu.dot_dimension_numbers<[1], [0], [0], [1], [0, 0, 1, 1], [], []>} : vector<8x16xf32>, vector<16x48xf32>, vector<8x48xf32> -> vector<8x48xf32>
    %110 = arith.addf %109, %14 : vector<8x48xf32>
    %111 = vector.extract_strided_slice %108 {offsets = [0, 0], sizes = [8, 16], strides = [1, 1]} : vector<8x48xf32> to vector<8x16xf32>
    %112 = vector.extract_strided_slice %110 {offsets = [0, 0], sizes = [8, 16], strides = [1, 1]} : vector<8x48xf32> to vector<8x16xf32>
    %113 = arith.addf %111, %112 : vector<8x16xf32>
    %114 = arith.negf %113 : vector<8x16xf32>
    %115 = math.exp %114 : vector<8x16xf32>
    %cst_27 = arith.constant 1.000000e+00 : f32
    %116 = vector.broadcast %cst_27 : f32 to vector<8x16xf32>
    %117 = arith.addf %116, %115 : vector<8x16xf32>
    %118 = arith.divf %116, %117 : vector<8x16xf32>
    %119 = vector.extract_strided_slice %108 {offsets = [0, 16], sizes = [8, 16], strides = [1, 1]} : vector<8x48xf32> to vector<8x16xf32>
    %120 = vector.extract_strided_slice %110 {offsets = [0, 16], sizes = [8, 16], strides = [1, 1]} : vector<8x48xf32> to vector<8x16xf32>
    %121 = arith.addf %119, %120 : vector<8x16xf32>
    %122 = arith.negf %121 : vector<8x16xf32>
    %123 = math.exp %122 : vector<8x16xf32>
    %cst_28 = arith.constant 1.000000e+00 : f32
    %124 = vector.broadcast %cst_28 : f32 to vector<8x16xf32>
    %125 = arith.addf %124, %123 : vector<8x16xf32>
    %126 = arith.divf %124, %125 : vector<8x16xf32>
    %127 = vector.extract_strided_slice %108 {offsets = [0, 32], sizes = [8, 16], strides = [1, 1]} : vector<8x48xf32> to vector<8x16xf32>
    %128 = vector.extract_strided_slice %110 {offsets = [0, 32], sizes = [8, 16], strides = [1, 1]} : vector<8x48xf32> to vector<8x16xf32>
    %129 = arith.mulf %118, %128 : vector<8x16xf32>
    %130 = arith.addf %127, %129 : vector<8x16xf32>
    %131 = math.tanh %130 : vector<8x16xf32>
    %cst_29 = arith.constant 1.000000e+00 : f32
    %132 = vector.broadcast %cst_29 : f32 to vector<8x16xf32>
    %133 = arith.subf %132, %126 : vector<8x16xf32>
    %134 = arith.mulf %133, %131 : vector<8x16xf32>
    %135 = arith.mulf %126, %76 : vector<8x16xf32>
    %136 = arith.addf %134, %135 : vector<8x16xf32>
    %137 = vector.extract_strided_slice %7 {offsets = [0, 2, 0], sizes = [8, 1, 48], strides = [1, 1, 1]} : vector<8x8x96xf32> to vector<8x1x48xf32>
    %138 = vector.shape_cast %137 : vector<8x1x48xf32> to vector<8x48xf32>
    %cst_30 = arith.constant dense<0.000000e+00> : vector<8x48xf32>
    %139 = tpu.matmul %106, %8, %cst_30 {dimension_numbers = #tpu.dot_dimension_numbers<[1], [0], [0], [1], [0, 0, 1, 1], [], []>} : vector<8x16xf32>, vector<16x48xf32>, vector<8x48xf32> -> vector<8x48xf32>
    %140 = arith.addf %139, %13 : vector<8x48xf32>
    %141 = vector.extract_strided_slice %138 {offsets = [0, 0], sizes = [8, 16], strides = [1, 1]} : vector<8x48xf32> to vector<8x16xf32>
    %142 = vector.extract_strided_slice %140 {offsets = [0, 0], sizes = [8, 16], strides = [1, 1]} : vector<8x48xf32> to vector<8x16xf32>
    %143 = arith.addf %141, %142 : vector<8x16xf32>
    %144 = arith.negf %143 : vector<8x16xf32>
    %145 = math.exp %144 : vector<8x16xf32>
    %cst_31 = arith.constant 1.000000e+00 : f32
    %146 = vector.broadcast %cst_31 : f32 to vector<8x16xf32>
    %147 = arith.addf %146, %145 : vector<8x16xf32>
    %148 = arith.divf %146, %147 : vector<8x16xf32>
    %149 = vector.extract_strided_slice %138 {offsets = [0, 16], sizes = [8, 16], strides = [1, 1]} : vector<8x48xf32> to vector<8x16xf32>
    %150 = vector.extract_strided_slice %140 {offsets = [0, 16], sizes = [8, 16], strides = [1, 1]} : vector<8x48xf32> to vector<8x16xf32>
    %151 = arith.addf %149, %150 : vector<8x16xf32>
    %152 = arith.negf %151 : vector<8x16xf32>
    %153 = math.exp %152 : vector<8x16xf32>
    %cst_32 = arith.constant 1.000000e+00 : f32
    %154 = vector.broadcast %cst_32 : f32 to vector<8x16xf32>
    %155 = arith.addf %154, %153 : vector<8x16xf32>
    %156 = arith.divf %154, %155 : vector<8x16xf32>
    %157 = vector.extract_strided_slice %138 {offsets = [0, 32], sizes = [8, 16], strides = [1, 1]} : vector<8x48xf32> to vector<8x16xf32>
    %158 = vector.extract_strided_slice %140 {offsets = [0, 32], sizes = [8, 16], strides = [1, 1]} : vector<8x48xf32> to vector<8x16xf32>
    %159 = arith.mulf %148, %158 : vector<8x16xf32>
    %160 = arith.addf %157, %159 : vector<8x16xf32>
    %161 = math.tanh %160 : vector<8x16xf32>
    %cst_33 = arith.constant 1.000000e+00 : f32
    %162 = vector.broadcast %cst_33 : f32 to vector<8x16xf32>
    %163 = arith.subf %162, %156 : vector<8x16xf32>
    %164 = arith.mulf %163, %161 : vector<8x16xf32>
    %165 = arith.mulf %156, %106 : vector<8x16xf32>
    %166 = arith.addf %164, %165 : vector<8x16xf32>
    %167 = vector.extract_strided_slice %7 {offsets = [0, 5, 48], sizes = [8, 1, 48], strides = [1, 1, 1]} : vector<8x8x96xf32> to vector<8x1x48xf32>
    %168 = vector.shape_cast %167 : vector<8x1x48xf32> to vector<8x48xf32>
    %cst_34 = arith.constant dense<0.000000e+00> : vector<8x48xf32>
    %169 = tpu.matmul %136, %9, %cst_34 {dimension_numbers = #tpu.dot_dimension_numbers<[1], [0], [0], [1], [0, 0, 1, 1], [], []>} : vector<8x16xf32>, vector<16x48xf32>, vector<8x48xf32> -> vector<8x48xf32>
    %170 = arith.addf %169, %14 : vector<8x48xf32>
    %171 = vector.extract_strided_slice %168 {offsets = [0, 0], sizes = [8, 16], strides = [1, 1]} : vector<8x48xf32> to vector<8x16xf32>
    %172 = vector.extract_strided_slice %170 {offsets = [0, 0], sizes = [8, 16], strides = [1, 1]} : vector<8x48xf32> to vector<8x16xf32>
    %173 = arith.addf %171, %172 : vector<8x16xf32>
    %174 = arith.negf %173 : vector<8x16xf32>
    %175 = math.exp %174 : vector<8x16xf32>
    %cst_35 = arith.constant 1.000000e+00 : f32
    %176 = vector.broadcast %cst_35 : f32 to vector<8x16xf32>
    %177 = arith.addf %176, %175 : vector<8x16xf32>
    %178 = arith.divf %176, %177 : vector<8x16xf32>
    %179 = vector.extract_strided_slice %168 {offsets = [0, 16], sizes = [8, 16], strides = [1, 1]} : vector<8x48xf32> to vector<8x16xf32>
    %180 = vector.extract_strided_slice %170 {offsets = [0, 16], sizes = [8, 16], strides = [1, 1]} : vector<8x48xf32> to vector<8x16xf32>
    %181 = arith.addf %179, %180 : vector<8x16xf32>
    %182 = arith.negf %181 : vector<8x16xf32>
    %183 = math.exp %182 : vector<8x16xf32>
    %cst_36 = arith.constant 1.000000e+00 : f32
    %184 = vector.broadcast %cst_36 : f32 to vector<8x16xf32>
    %185 = arith.addf %184, %183 : vector<8x16xf32>
    %186 = arith.divf %184, %185 : vector<8x16xf32>
    %187 = vector.extract_strided_slice %168 {offsets = [0, 32], sizes = [8, 16], strides = [1, 1]} : vector<8x48xf32> to vector<8x16xf32>
    %188 = vector.extract_strided_slice %170 {offsets = [0, 32], sizes = [8, 16], strides = [1, 1]} : vector<8x48xf32> to vector<8x16xf32>
    %189 = arith.mulf %178, %188 : vector<8x16xf32>
    %190 = arith.addf %187, %189 : vector<8x16xf32>
    %191 = math.tanh %190 : vector<8x16xf32>
    %cst_37 = arith.constant 1.000000e+00 : f32
    %192 = vector.broadcast %cst_37 : f32 to vector<8x16xf32>
    %193 = arith.subf %192, %186 : vector<8x16xf32>
    %194 = arith.mulf %193, %191 : vector<8x16xf32>
    %195 = arith.mulf %186, %136 : vector<8x16xf32>
    %196 = arith.addf %194, %195 : vector<8x16xf32>
    %197 = vector.extract_strided_slice %7 {offsets = [0, 3, 0], sizes = [8, 1, 48], strides = [1, 1, 1]} : vector<8x8x96xf32> to vector<8x1x48xf32>
    %198 = vector.shape_cast %197 : vector<8x1x48xf32> to vector<8x48xf32>
    %cst_38 = arith.constant dense<0.000000e+00> : vector<8x48xf32>
    %199 = tpu.matmul %166, %8, %cst_38 {dimension_numbers = #tpu.dot_dimension_numbers<[1], [0], [0], [1], [0, 0, 1, 1], [], []>} : vector<8x16xf32>, vector<16x48xf32>, vector<8x48xf32> -> vector<8x48xf32>
    %200 = arith.addf %199, %13 : vector<8x48xf32>
    %201 = vector.extract_strided_slice %198 {offsets = [0, 0], sizes = [8, 16], strides = [1, 1]} : vector<8x48xf32> to vector<8x16xf32>
    %202 = vector.extract_strided_slice %200 {offsets = [0, 0], sizes = [8, 16], strides = [1, 1]} : vector<8x48xf32> to vector<8x16xf32>
    %203 = arith.addf %201, %202 : vector<8x16xf32>
    %204 = arith.negf %203 : vector<8x16xf32>
    %205 = math.exp %204 : vector<8x16xf32>
    %cst_39 = arith.constant 1.000000e+00 : f32
    %206 = vector.broadcast %cst_39 : f32 to vector<8x16xf32>
    %207 = arith.addf %206, %205 : vector<8x16xf32>
    %208 = arith.divf %206, %207 : vector<8x16xf32>
    %209 = vector.extract_strided_slice %198 {offsets = [0, 16], sizes = [8, 16], strides = [1, 1]} : vector<8x48xf32> to vector<8x16xf32>
    %210 = vector.extract_strided_slice %200 {offsets = [0, 16], sizes = [8, 16], strides = [1, 1]} : vector<8x48xf32> to vector<8x16xf32>
    %211 = arith.addf %209, %210 : vector<8x16xf32>
    %212 = arith.negf %211 : vector<8x16xf32>
    %213 = math.exp %212 : vector<8x16xf32>
    %cst_40 = arith.constant 1.000000e+00 : f32
    %214 = vector.broadcast %cst_40 : f32 to vector<8x16xf32>
    %215 = arith.addf %214, %213 : vector<8x16xf32>
    %216 = arith.divf %214, %215 : vector<8x16xf32>
    %217 = vector.extract_strided_slice %198 {offsets = [0, 32], sizes = [8, 16], strides = [1, 1]} : vector<8x48xf32> to vector<8x16xf32>
    %218 = vector.extract_strided_slice %200 {offsets = [0, 32], sizes = [8, 16], strides = [1, 1]} : vector<8x48xf32> to vector<8x16xf32>
    %219 = arith.mulf %208, %218 : vector<8x16xf32>
    %220 = arith.addf %217, %219 : vector<8x16xf32>
    %221 = math.tanh %220 : vector<8x16xf32>
    %cst_41 = arith.constant 1.000000e+00 : f32
    %222 = vector.broadcast %cst_41 : f32 to vector<8x16xf32>
    %223 = arith.subf %222, %216 : vector<8x16xf32>
    %224 = arith.mulf %223, %221 : vector<8x16xf32>
    %225 = arith.mulf %216, %166 : vector<8x16xf32>
    %226 = arith.addf %224, %225 : vector<8x16xf32>
    %227 = vector.extract_strided_slice %7 {offsets = [0, 4, 48], sizes = [8, 1, 48], strides = [1, 1, 1]} : vector<8x8x96xf32> to vector<8x1x48xf32>
    %228 = vector.shape_cast %227 : vector<8x1x48xf32> to vector<8x48xf32>
    %cst_42 = arith.constant dense<0.000000e+00> : vector<8x48xf32>
    %229 = tpu.matmul %196, %9, %cst_42 {dimension_numbers = #tpu.dot_dimension_numbers<[1], [0], [0], [1], [0, 0, 1, 1], [], []>} : vector<8x16xf32>, vector<16x48xf32>, vector<8x48xf32> -> vector<8x48xf32>
    %230 = arith.addf %229, %14 : vector<8x48xf32>
    %231 = vector.extract_strided_slice %228 {offsets = [0, 0], sizes = [8, 16], strides = [1, 1]} : vector<8x48xf32> to vector<8x16xf32>
    %232 = vector.extract_strided_slice %230 {offsets = [0, 0], sizes = [8, 16], strides = [1, 1]} : vector<8x48xf32> to vector<8x16xf32>
    %233 = arith.addf %231, %232 : vector<8x16xf32>
    %234 = arith.negf %233 : vector<8x16xf32>
    %235 = math.exp %234 : vector<8x16xf32>
    %cst_43 = arith.constant 1.000000e+00 : f32
    %236 = vector.broadcast %cst_43 : f32 to vector<8x16xf32>
    %237 = arith.addf %236, %235 : vector<8x16xf32>
    %238 = arith.divf %236, %237 : vector<8x16xf32>
    %239 = vector.extract_strided_slice %228 {offsets = [0, 16], sizes = [8, 16], strides = [1, 1]} : vector<8x48xf32> to vector<8x16xf32>
    %240 = vector.extract_strided_slice %230 {offsets = [0, 16], sizes = [8, 16], strides = [1, 1]} : vector<8x48xf32> to vector<8x16xf32>
    %241 = arith.addf %239, %240 : vector<8x16xf32>
    %242 = arith.negf %241 : vector<8x16xf32>
    %243 = math.exp %242 : vector<8x16xf32>
    %cst_44 = arith.constant 1.000000e+00 : f32
    %244 = vector.broadcast %cst_44 : f32 to vector<8x16xf32>
    %245 = arith.addf %244, %243 : vector<8x16xf32>
    %246 = arith.divf %244, %245 : vector<8x16xf32>
    %247 = vector.extract_strided_slice %228 {offsets = [0, 32], sizes = [8, 16], strides = [1, 1]} : vector<8x48xf32> to vector<8x16xf32>
    %248 = vector.extract_strided_slice %230 {offsets = [0, 32], sizes = [8, 16], strides = [1, 1]} : vector<8x48xf32> to vector<8x16xf32>
    %249 = arith.mulf %238, %248 : vector<8x16xf32>
    %250 = arith.addf %247, %249 : vector<8x16xf32>
    %251 = math.tanh %250 : vector<8x16xf32>
    %cst_45 = arith.constant 1.000000e+00 : f32
    %252 = vector.broadcast %cst_45 : f32 to vector<8x16xf32>
    %253 = arith.subf %252, %246 : vector<8x16xf32>
    %254 = arith.mulf %253, %251 : vector<8x16xf32>
    %255 = arith.mulf %246, %196 : vector<8x16xf32>
    %256 = arith.addf %254, %255 : vector<8x16xf32>
    %257 = vector.extract_strided_slice %7 {offsets = [0, 4, 0], sizes = [8, 1, 48], strides = [1, 1, 1]} : vector<8x8x96xf32> to vector<8x1x48xf32>
    %258 = vector.shape_cast %257 : vector<8x1x48xf32> to vector<8x48xf32>
    %cst_46 = arith.constant dense<0.000000e+00> : vector<8x48xf32>
    %259 = tpu.matmul %226, %8, %cst_46 {dimension_numbers = #tpu.dot_dimension_numbers<[1], [0], [0], [1], [0, 0, 1, 1], [], []>} : vector<8x16xf32>, vector<16x48xf32>, vector<8x48xf32> -> vector<8x48xf32>
    %260 = arith.addf %259, %13 : vector<8x48xf32>
    %261 = vector.extract_strided_slice %258 {offsets = [0, 0], sizes = [8, 16], strides = [1, 1]} : vector<8x48xf32> to vector<8x16xf32>
    %262 = vector.extract_strided_slice %260 {offsets = [0, 0], sizes = [8, 16], strides = [1, 1]} : vector<8x48xf32> to vector<8x16xf32>
    %263 = arith.addf %261, %262 : vector<8x16xf32>
    %264 = arith.negf %263 : vector<8x16xf32>
    %265 = math.exp %264 : vector<8x16xf32>
    %cst_47 = arith.constant 1.000000e+00 : f32
    %266 = vector.broadcast %cst_47 : f32 to vector<8x16xf32>
    %267 = arith.addf %266, %265 : vector<8x16xf32>
    %268 = arith.divf %266, %267 : vector<8x16xf32>
    %269 = vector.extract_strided_slice %258 {offsets = [0, 16], sizes = [8, 16], strides = [1, 1]} : vector<8x48xf32> to vector<8x16xf32>
    %270 = vector.extract_strided_slice %260 {offsets = [0, 16], sizes = [8, 16], strides = [1, 1]} : vector<8x48xf32> to vector<8x16xf32>
    %271 = arith.addf %269, %270 : vector<8x16xf32>
    %272 = arith.negf %271 : vector<8x16xf32>
    %273 = math.exp %272 : vector<8x16xf32>
    %cst_48 = arith.constant 1.000000e+00 : f32
    %274 = vector.broadcast %cst_48 : f32 to vector<8x16xf32>
    %275 = arith.addf %274, %273 : vector<8x16xf32>
    %276 = arith.divf %274, %275 : vector<8x16xf32>
    %277 = vector.extract_strided_slice %258 {offsets = [0, 32], sizes = [8, 16], strides = [1, 1]} : vector<8x48xf32> to vector<8x16xf32>
    %278 = vector.extract_strided_slice %260 {offsets = [0, 32], sizes = [8, 16], strides = [1, 1]} : vector<8x48xf32> to vector<8x16xf32>
    %279 = arith.mulf %268, %278 : vector<8x16xf32>
    %280 = arith.addf %277, %279 : vector<8x16xf32>
    %281 = math.tanh %280 : vector<8x16xf32>
    %cst_49 = arith.constant 1.000000e+00 : f32
    %282 = vector.broadcast %cst_49 : f32 to vector<8x16xf32>
    %283 = arith.subf %282, %276 : vector<8x16xf32>
    %284 = arith.mulf %283, %281 : vector<8x16xf32>
    %285 = arith.mulf %276, %226 : vector<8x16xf32>
    %286 = arith.addf %284, %285 : vector<8x16xf32>
    %287 = vector.extract_strided_slice %7 {offsets = [0, 3, 48], sizes = [8, 1, 48], strides = [1, 1, 1]} : vector<8x8x96xf32> to vector<8x1x48xf32>
    %288 = vector.shape_cast %287 : vector<8x1x48xf32> to vector<8x48xf32>
    %cst_50 = arith.constant dense<0.000000e+00> : vector<8x48xf32>
    %289 = tpu.matmul %256, %9, %cst_50 {dimension_numbers = #tpu.dot_dimension_numbers<[1], [0], [0], [1], [0, 0, 1, 1], [], []>} : vector<8x16xf32>, vector<16x48xf32>, vector<8x48xf32> -> vector<8x48xf32>
    %290 = arith.addf %289, %14 : vector<8x48xf32>
    %291 = vector.extract_strided_slice %288 {offsets = [0, 0], sizes = [8, 16], strides = [1, 1]} : vector<8x48xf32> to vector<8x16xf32>
    %292 = vector.extract_strided_slice %290 {offsets = [0, 0], sizes = [8, 16], strides = [1, 1]} : vector<8x48xf32> to vector<8x16xf32>
    %293 = arith.addf %291, %292 : vector<8x16xf32>
    %294 = arith.negf %293 : vector<8x16xf32>
    %295 = math.exp %294 : vector<8x16xf32>
    %cst_51 = arith.constant 1.000000e+00 : f32
    %296 = vector.broadcast %cst_51 : f32 to vector<8x16xf32>
    %297 = arith.addf %296, %295 : vector<8x16xf32>
    %298 = arith.divf %296, %297 : vector<8x16xf32>
    %299 = vector.extract_strided_slice %288 {offsets = [0, 16], sizes = [8, 16], strides = [1, 1]} : vector<8x48xf32> to vector<8x16xf32>
    %300 = vector.extract_strided_slice %290 {offsets = [0, 16], sizes = [8, 16], strides = [1, 1]} : vector<8x48xf32> to vector<8x16xf32>
    %301 = arith.addf %299, %300 : vector<8x16xf32>
    %302 = arith.negf %301 : vector<8x16xf32>
    %303 = math.exp %302 : vector<8x16xf32>
    %cst_52 = arith.constant 1.000000e+00 : f32
    %304 = vector.broadcast %cst_52 : f32 to vector<8x16xf32>
    %305 = arith.addf %304, %303 : vector<8x16xf32>
    %306 = arith.divf %304, %305 : vector<8x16xf32>
    %307 = vector.extract_strided_slice %288 {offsets = [0, 32], sizes = [8, 16], strides = [1, 1]} : vector<8x48xf32> to vector<8x16xf32>
    %308 = vector.extract_strided_slice %290 {offsets = [0, 32], sizes = [8, 16], strides = [1, 1]} : vector<8x48xf32> to vector<8x16xf32>
    %309 = arith.mulf %298, %308 : vector<8x16xf32>
    %310 = arith.addf %307, %309 : vector<8x16xf32>
    %311 = math.tanh %310 : vector<8x16xf32>
    %cst_53 = arith.constant 1.000000e+00 : f32
    %312 = vector.broadcast %cst_53 : f32 to vector<8x16xf32>
    %313 = arith.subf %312, %306 : vector<8x16xf32>
    %314 = arith.mulf %313, %311 : vector<8x16xf32>
    %315 = arith.mulf %306, %256 : vector<8x16xf32>
    %316 = arith.addf %314, %315 : vector<8x16xf32>
    %317 = vector.extract_strided_slice %7 {offsets = [0, 5, 0], sizes = [8, 1, 48], strides = [1, 1, 1]} : vector<8x8x96xf32> to vector<8x1x48xf32>
    %318 = vector.shape_cast %317 : vector<8x1x48xf32> to vector<8x48xf32>
    %cst_54 = arith.constant dense<0.000000e+00> : vector<8x48xf32>
    %319 = tpu.matmul %286, %8, %cst_54 {dimension_numbers = #tpu.dot_dimension_numbers<[1], [0], [0], [1], [0, 0, 1, 1], [], []>} : vector<8x16xf32>, vector<16x48xf32>, vector<8x48xf32> -> vector<8x48xf32>
    %320 = arith.addf %319, %13 : vector<8x48xf32>
    %321 = vector.extract_strided_slice %318 {offsets = [0, 0], sizes = [8, 16], strides = [1, 1]} : vector<8x48xf32> to vector<8x16xf32>
    %322 = vector.extract_strided_slice %320 {offsets = [0, 0], sizes = [8, 16], strides = [1, 1]} : vector<8x48xf32> to vector<8x16xf32>
    %323 = arith.addf %321, %322 : vector<8x16xf32>
    %324 = arith.negf %323 : vector<8x16xf32>
    %325 = math.exp %324 : vector<8x16xf32>
    %cst_55 = arith.constant 1.000000e+00 : f32
    %326 = vector.broadcast %cst_55 : f32 to vector<8x16xf32>
    %327 = arith.addf %326, %325 : vector<8x16xf32>
    %328 = arith.divf %326, %327 : vector<8x16xf32>
    %329 = vector.extract_strided_slice %318 {offsets = [0, 16], sizes = [8, 16], strides = [1, 1]} : vector<8x48xf32> to vector<8x16xf32>
    %330 = vector.extract_strided_slice %320 {offsets = [0, 16], sizes = [8, 16], strides = [1, 1]} : vector<8x48xf32> to vector<8x16xf32>
    %331 = arith.addf %329, %330 : vector<8x16xf32>
    %332 = arith.negf %331 : vector<8x16xf32>
    %333 = math.exp %332 : vector<8x16xf32>
    %cst_56 = arith.constant 1.000000e+00 : f32
    %334 = vector.broadcast %cst_56 : f32 to vector<8x16xf32>
    %335 = arith.addf %334, %333 : vector<8x16xf32>
    %336 = arith.divf %334, %335 : vector<8x16xf32>
    %337 = vector.extract_strided_slice %318 {offsets = [0, 32], sizes = [8, 16], strides = [1, 1]} : vector<8x48xf32> to vector<8x16xf32>
    %338 = vector.extract_strided_slice %320 {offsets = [0, 32], sizes = [8, 16], strides = [1, 1]} : vector<8x48xf32> to vector<8x16xf32>
    %339 = arith.mulf %328, %338 : vector<8x16xf32>
    %340 = arith.addf %337, %339 : vector<8x16xf32>
    %341 = math.tanh %340 : vector<8x16xf32>
    %cst_57 = arith.constant 1.000000e+00 : f32
    %342 = vector.broadcast %cst_57 : f32 to vector<8x16xf32>
    %343 = arith.subf %342, %336 : vector<8x16xf32>
    %344 = arith.mulf %343, %341 : vector<8x16xf32>
    %345 = arith.mulf %336, %286 : vector<8x16xf32>
    %346 = arith.addf %344, %345 : vector<8x16xf32>
    %347 = vector.extract_strided_slice %7 {offsets = [0, 2, 48], sizes = [8, 1, 48], strides = [1, 1, 1]} : vector<8x8x96xf32> to vector<8x1x48xf32>
    %348 = vector.shape_cast %347 : vector<8x1x48xf32> to vector<8x48xf32>
    %cst_58 = arith.constant dense<0.000000e+00> : vector<8x48xf32>
    %349 = tpu.matmul %316, %9, %cst_58 {dimension_numbers = #tpu.dot_dimension_numbers<[1], [0], [0], [1], [0, 0, 1, 1], [], []>} : vector<8x16xf32>, vector<16x48xf32>, vector<8x48xf32> -> vector<8x48xf32>
    %350 = arith.addf %349, %14 : vector<8x48xf32>
    %351 = vector.extract_strided_slice %348 {offsets = [0, 0], sizes = [8, 16], strides = [1, 1]} : vector<8x48xf32> to vector<8x16xf32>
    %352 = vector.extract_strided_slice %350 {offsets = [0, 0], sizes = [8, 16], strides = [1, 1]} : vector<8x48xf32> to vector<8x16xf32>
    %353 = arith.addf %351, %352 : vector<8x16xf32>
    %354 = arith.negf %353 : vector<8x16xf32>
    %355 = math.exp %354 : vector<8x16xf32>
    %cst_59 = arith.constant 1.000000e+00 : f32
    %356 = vector.broadcast %cst_59 : f32 to vector<8x16xf32>
    %357 = arith.addf %356, %355 : vector<8x16xf32>
    %358 = arith.divf %356, %357 : vector<8x16xf32>
    %359 = vector.extract_strided_slice %348 {offsets = [0, 16], sizes = [8, 16], strides = [1, 1]} : vector<8x48xf32> to vector<8x16xf32>
    %360 = vector.extract_strided_slice %350 {offsets = [0, 16], sizes = [8, 16], strides = [1, 1]} : vector<8x48xf32> to vector<8x16xf32>
    %361 = arith.addf %359, %360 : vector<8x16xf32>
    %362 = arith.negf %361 : vector<8x16xf32>
    %363 = math.exp %362 : vector<8x16xf32>
    %cst_60 = arith.constant 1.000000e+00 : f32
    %364 = vector.broadcast %cst_60 : f32 to vector<8x16xf32>
    %365 = arith.addf %364, %363 : vector<8x16xf32>
    %366 = arith.divf %364, %365 : vector<8x16xf32>
    %367 = vector.extract_strided_slice %348 {offsets = [0, 32], sizes = [8, 16], strides = [1, 1]} : vector<8x48xf32> to vector<8x16xf32>
    %368 = vector.extract_strided_slice %350 {offsets = [0, 32], sizes = [8, 16], strides = [1, 1]} : vector<8x48xf32> to vector<8x16xf32>
    %369 = arith.mulf %358, %368 : vector<8x16xf32>
    %370 = arith.addf %367, %369 : vector<8x16xf32>
    %371 = math.tanh %370 : vector<8x16xf32>
    %cst_61 = arith.constant 1.000000e+00 : f32
    %372 = vector.broadcast %cst_61 : f32 to vector<8x16xf32>
    %373 = arith.subf %372, %366 : vector<8x16xf32>
    %374 = arith.mulf %373, %371 : vector<8x16xf32>
    %375 = arith.mulf %366, %316 : vector<8x16xf32>
    %376 = arith.addf %374, %375 : vector<8x16xf32>
    %377 = vector.extract_strided_slice %7 {offsets = [0, 6, 0], sizes = [8, 1, 48], strides = [1, 1, 1]} : vector<8x8x96xf32> to vector<8x1x48xf32>
    %378 = vector.shape_cast %377 : vector<8x1x48xf32> to vector<8x48xf32>
    %cst_62 = arith.constant dense<0.000000e+00> : vector<8x48xf32>
    %379 = tpu.matmul %346, %8, %cst_62 {dimension_numbers = #tpu.dot_dimension_numbers<[1], [0], [0], [1], [0, 0, 1, 1], [], []>} : vector<8x16xf32>, vector<16x48xf32>, vector<8x48xf32> -> vector<8x48xf32>
    %380 = arith.addf %379, %13 : vector<8x48xf32>
    %381 = vector.extract_strided_slice %378 {offsets = [0, 0], sizes = [8, 16], strides = [1, 1]} : vector<8x48xf32> to vector<8x16xf32>
    %382 = vector.extract_strided_slice %380 {offsets = [0, 0], sizes = [8, 16], strides = [1, 1]} : vector<8x48xf32> to vector<8x16xf32>
    %383 = arith.addf %381, %382 : vector<8x16xf32>
    %384 = arith.negf %383 : vector<8x16xf32>
    %385 = math.exp %384 : vector<8x16xf32>
    %cst_63 = arith.constant 1.000000e+00 : f32
    %386 = vector.broadcast %cst_63 : f32 to vector<8x16xf32>
    %387 = arith.addf %386, %385 : vector<8x16xf32>
    %388 = arith.divf %386, %387 : vector<8x16xf32>
    %389 = vector.extract_strided_slice %378 {offsets = [0, 16], sizes = [8, 16], strides = [1, 1]} : vector<8x48xf32> to vector<8x16xf32>
    %390 = vector.extract_strided_slice %380 {offsets = [0, 16], sizes = [8, 16], strides = [1, 1]} : vector<8x48xf32> to vector<8x16xf32>
    %391 = arith.addf %389, %390 : vector<8x16xf32>
    %392 = arith.negf %391 : vector<8x16xf32>
    %393 = math.exp %392 : vector<8x16xf32>
    %cst_64 = arith.constant 1.000000e+00 : f32
    %394 = vector.broadcast %cst_64 : f32 to vector<8x16xf32>
    %395 = arith.addf %394, %393 : vector<8x16xf32>
    %396 = arith.divf %394, %395 : vector<8x16xf32>
    %397 = vector.extract_strided_slice %378 {offsets = [0, 32], sizes = [8, 16], strides = [1, 1]} : vector<8x48xf32> to vector<8x16xf32>
    %398 = vector.extract_strided_slice %380 {offsets = [0, 32], sizes = [8, 16], strides = [1, 1]} : vector<8x48xf32> to vector<8x16xf32>
    %399 = arith.mulf %388, %398 : vector<8x16xf32>
    %400 = arith.addf %397, %399 : vector<8x16xf32>
    %401 = math.tanh %400 : vector<8x16xf32>
    %cst_65 = arith.constant 1.000000e+00 : f32
    %402 = vector.broadcast %cst_65 : f32 to vector<8x16xf32>
    %403 = arith.subf %402, %396 : vector<8x16xf32>
    %404 = arith.mulf %403, %401 : vector<8x16xf32>
    %405 = arith.mulf %396, %346 : vector<8x16xf32>
    %406 = arith.addf %404, %405 : vector<8x16xf32>
    %407 = vector.extract_strided_slice %7 {offsets = [0, 1, 48], sizes = [8, 1, 48], strides = [1, 1, 1]} : vector<8x8x96xf32> to vector<8x1x48xf32>
    %408 = vector.shape_cast %407 : vector<8x1x48xf32> to vector<8x48xf32>
    %cst_66 = arith.constant dense<0.000000e+00> : vector<8x48xf32>
    %409 = tpu.matmul %376, %9, %cst_66 {dimension_numbers = #tpu.dot_dimension_numbers<[1], [0], [0], [1], [0, 0, 1, 1], [], []>} : vector<8x16xf32>, vector<16x48xf32>, vector<8x48xf32> -> vector<8x48xf32>
    %410 = arith.addf %409, %14 : vector<8x48xf32>
    %411 = vector.extract_strided_slice %408 {offsets = [0, 0], sizes = [8, 16], strides = [1, 1]} : vector<8x48xf32> to vector<8x16xf32>
    %412 = vector.extract_strided_slice %410 {offsets = [0, 0], sizes = [8, 16], strides = [1, 1]} : vector<8x48xf32> to vector<8x16xf32>
    %413 = arith.addf %411, %412 : vector<8x16xf32>
    %414 = arith.negf %413 : vector<8x16xf32>
    %415 = math.exp %414 : vector<8x16xf32>
    %cst_67 = arith.constant 1.000000e+00 : f32
    %416 = vector.broadcast %cst_67 : f32 to vector<8x16xf32>
    %417 = arith.addf %416, %415 : vector<8x16xf32>
    %418 = arith.divf %416, %417 : vector<8x16xf32>
    %419 = vector.extract_strided_slice %408 {offsets = [0, 16], sizes = [8, 16], strides = [1, 1]} : vector<8x48xf32> to vector<8x16xf32>
    %420 = vector.extract_strided_slice %410 {offsets = [0, 16], sizes = [8, 16], strides = [1, 1]} : vector<8x48xf32> to vector<8x16xf32>
    %421 = arith.addf %419, %420 : vector<8x16xf32>
    %422 = arith.negf %421 : vector<8x16xf32>
    %423 = math.exp %422 : vector<8x16xf32>
    %cst_68 = arith.constant 1.000000e+00 : f32
    %424 = vector.broadcast %cst_68 : f32 to vector<8x16xf32>
    %425 = arith.addf %424, %423 : vector<8x16xf32>
    %426 = arith.divf %424, %425 : vector<8x16xf32>
    %427 = vector.extract_strided_slice %408 {offsets = [0, 32], sizes = [8, 16], strides = [1, 1]} : vector<8x48xf32> to vector<8x16xf32>
    %428 = vector.extract_strided_slice %410 {offsets = [0, 32], sizes = [8, 16], strides = [1, 1]} : vector<8x48xf32> to vector<8x16xf32>
    %429 = arith.mulf %418, %428 : vector<8x16xf32>
    %430 = arith.addf %427, %429 : vector<8x16xf32>
    %431 = math.tanh %430 : vector<8x16xf32>
    %cst_69 = arith.constant 1.000000e+00 : f32
    %432 = vector.broadcast %cst_69 : f32 to vector<8x16xf32>
    %433 = arith.subf %432, %426 : vector<8x16xf32>
    %434 = arith.mulf %433, %431 : vector<8x16xf32>
    %435 = arith.mulf %426, %376 : vector<8x16xf32>
    %436 = arith.addf %434, %435 : vector<8x16xf32>
    %437 = vector.extract_strided_slice %7 {offsets = [0, 7, 0], sizes = [8, 1, 48], strides = [1, 1, 1]} : vector<8x8x96xf32> to vector<8x1x48xf32>
    %438 = vector.shape_cast %437 : vector<8x1x48xf32> to vector<8x48xf32>
    %cst_70 = arith.constant dense<0.000000e+00> : vector<8x48xf32>
    %439 = tpu.matmul %406, %8, %cst_70 {dimension_numbers = #tpu.dot_dimension_numbers<[1], [0], [0], [1], [0, 0, 1, 1], [], []>} : vector<8x16xf32>, vector<16x48xf32>, vector<8x48xf32> -> vector<8x48xf32>
    %440 = arith.addf %439, %13 : vector<8x48xf32>
    %441 = vector.extract_strided_slice %438 {offsets = [0, 0], sizes = [8, 16], strides = [1, 1]} : vector<8x48xf32> to vector<8x16xf32>
    %442 = vector.extract_strided_slice %440 {offsets = [0, 0], sizes = [8, 16], strides = [1, 1]} : vector<8x48xf32> to vector<8x16xf32>
    %443 = arith.addf %441, %442 : vector<8x16xf32>
    %444 = arith.negf %443 : vector<8x16xf32>
    %445 = math.exp %444 : vector<8x16xf32>
    %cst_71 = arith.constant 1.000000e+00 : f32
    %446 = vector.broadcast %cst_71 : f32 to vector<8x16xf32>
    %447 = arith.addf %446, %445 : vector<8x16xf32>
    %448 = arith.divf %446, %447 : vector<8x16xf32>
    %449 = vector.extract_strided_slice %438 {offsets = [0, 16], sizes = [8, 16], strides = [1, 1]} : vector<8x48xf32> to vector<8x16xf32>
    %450 = vector.extract_strided_slice %440 {offsets = [0, 16], sizes = [8, 16], strides = [1, 1]} : vector<8x48xf32> to vector<8x16xf32>
    %451 = arith.addf %449, %450 : vector<8x16xf32>
    %452 = arith.negf %451 : vector<8x16xf32>
    %453 = math.exp %452 : vector<8x16xf32>
    %cst_72 = arith.constant 1.000000e+00 : f32
    %454 = vector.broadcast %cst_72 : f32 to vector<8x16xf32>
    %455 = arith.addf %454, %453 : vector<8x16xf32>
    %456 = arith.divf %454, %455 : vector<8x16xf32>
    %457 = vector.extract_strided_slice %438 {offsets = [0, 32], sizes = [8, 16], strides = [1, 1]} : vector<8x48xf32> to vector<8x16xf32>
    %458 = vector.extract_strided_slice %440 {offsets = [0, 32], sizes = [8, 16], strides = [1, 1]} : vector<8x48xf32> to vector<8x16xf32>
    %459 = arith.mulf %448, %458 : vector<8x16xf32>
    %460 = arith.addf %457, %459 : vector<8x16xf32>
    %461 = math.tanh %460 : vector<8x16xf32>
    %cst_73 = arith.constant 1.000000e+00 : f32
    %462 = vector.broadcast %cst_73 : f32 to vector<8x16xf32>
    %463 = arith.subf %462, %456 : vector<8x16xf32>
    %464 = arith.mulf %463, %461 : vector<8x16xf32>
    %465 = arith.mulf %456, %406 : vector<8x16xf32>
    %466 = arith.addf %464, %465 : vector<8x16xf32>
    %467 = vector.extract_strided_slice %7 {offsets = [0, 0, 48], sizes = [8, 1, 48], strides = [1, 1, 1]} : vector<8x8x96xf32> to vector<8x1x48xf32>
    %468 = vector.shape_cast %467 : vector<8x1x48xf32> to vector<8x48xf32>
    %cst_74 = arith.constant dense<0.000000e+00> : vector<8x48xf32>
    %469 = tpu.matmul %436, %9, %cst_74 {dimension_numbers = #tpu.dot_dimension_numbers<[1], [0], [0], [1], [0, 0, 1, 1], [], []>} : vector<8x16xf32>, vector<16x48xf32>, vector<8x48xf32> -> vector<8x48xf32>
    %470 = arith.addf %469, %14 : vector<8x48xf32>
    %471 = vector.extract_strided_slice %468 {offsets = [0, 0], sizes = [8, 16], strides = [1, 1]} : vector<8x48xf32> to vector<8x16xf32>
    %472 = vector.extract_strided_slice %470 {offsets = [0, 0], sizes = [8, 16], strides = [1, 1]} : vector<8x48xf32> to vector<8x16xf32>
    %473 = arith.addf %471, %472 : vector<8x16xf32>
    %474 = arith.negf %473 : vector<8x16xf32>
    %475 = math.exp %474 : vector<8x16xf32>
    %cst_75 = arith.constant 1.000000e+00 : f32
    %476 = vector.broadcast %cst_75 : f32 to vector<8x16xf32>
    %477 = arith.addf %476, %475 : vector<8x16xf32>
    %478 = arith.divf %476, %477 : vector<8x16xf32>
    %479 = vector.extract_strided_slice %468 {offsets = [0, 16], sizes = [8, 16], strides = [1, 1]} : vector<8x48xf32> to vector<8x16xf32>
    %480 = vector.extract_strided_slice %470 {offsets = [0, 16], sizes = [8, 16], strides = [1, 1]} : vector<8x48xf32> to vector<8x16xf32>
    %481 = arith.addf %479, %480 : vector<8x16xf32>
    %482 = arith.negf %481 : vector<8x16xf32>
    %483 = math.exp %482 : vector<8x16xf32>
    %cst_76 = arith.constant 1.000000e+00 : f32
    %484 = vector.broadcast %cst_76 : f32 to vector<8x16xf32>
    %485 = arith.addf %484, %483 : vector<8x16xf32>
    %486 = arith.divf %484, %485 : vector<8x16xf32>
    %487 = vector.extract_strided_slice %468 {offsets = [0, 32], sizes = [8, 16], strides = [1, 1]} : vector<8x48xf32> to vector<8x16xf32>
    %488 = vector.extract_strided_slice %470 {offsets = [0, 32], sizes = [8, 16], strides = [1, 1]} : vector<8x48xf32> to vector<8x16xf32>
    %489 = arith.mulf %478, %488 : vector<8x16xf32>
    %490 = arith.addf %487, %489 : vector<8x16xf32>
    %491 = math.tanh %490 : vector<8x16xf32>
    %cst_77 = arith.constant 1.000000e+00 : f32
    %492 = vector.broadcast %cst_77 : f32 to vector<8x16xf32>
    %493 = arith.subf %492, %486 : vector<8x16xf32>
    %494 = arith.mulf %493, %491 : vector<8x16xf32>
    %495 = arith.mulf %486, %436 : vector<8x16xf32>
    %496 = arith.addf %494, %495 : vector<8x16xf32>
    %497 = vector.shape_cast %46 : vector<8x16xf32> to vector<8x1x16xf32>
    %498 = vector.shape_cast %106 : vector<8x16xf32> to vector<8x1x16xf32>
    %499 = vector.shape_cast %166 : vector<8x16xf32> to vector<8x1x16xf32>
    %500 = vector.shape_cast %226 : vector<8x16xf32> to vector<8x1x16xf32>
    %501 = vector.shape_cast %286 : vector<8x16xf32> to vector<8x1x16xf32>
    %502 = vector.shape_cast %346 : vector<8x16xf32> to vector<8x1x16xf32>
    %503 = vector.shape_cast %406 : vector<8x16xf32> to vector<8x1x16xf32>
    %504 = vector.shape_cast %466 : vector<8x16xf32> to vector<8x1x16xf32>
    %505 = tpu.concatenate %497, %498, %499, %500, %501, %502, %503, %504 in 1 : vector<8x1x16xf32>, vector<8x1x16xf32>, vector<8x1x16xf32>, vector<8x1x16xf32>, vector<8x1x16xf32>, vector<8x1x16xf32>, vector<8x1x16xf32>, vector<8x1x16xf32> -> vector<8x8x16xf32>
    %506 = vector.shape_cast %496 : vector<8x16xf32> to vector<8x1x16xf32>
    %507 = vector.shape_cast %436 : vector<8x16xf32> to vector<8x1x16xf32>
    %508 = vector.shape_cast %376 : vector<8x16xf32> to vector<8x1x16xf32>
    %509 = vector.shape_cast %316 : vector<8x16xf32> to vector<8x1x16xf32>
    %510 = vector.shape_cast %256 : vector<8x16xf32> to vector<8x1x16xf32>
    %511 = vector.shape_cast %196 : vector<8x16xf32> to vector<8x1x16xf32>
    %512 = vector.shape_cast %136 : vector<8x16xf32> to vector<8x1x16xf32>
    %513 = vector.shape_cast %76 : vector<8x16xf32> to vector<8x1x16xf32>
    %514 = tpu.concatenate %506, %507, %508, %509, %510, %511, %512, %513 in 1 : vector<8x1x16xf32>, vector<8x1x16xf32>, vector<8x1x16xf32>, vector<8x1x16xf32>, vector<8x1x16xf32>, vector<8x1x16xf32>, vector<8x1x16xf32>, vector<8x1x16xf32> -> vector<8x8x16xf32>
    %515 = tpu.concatenate %505, %514 in 2 : vector<8x8x16xf32>, vector<8x8x16xf32> -> vector<8x8x32xf32>
    %c0_78 = arith.constant 0 : index
    %c0_79 = arith.constant 0 : index
    %516 = vector.load %arg1[%c0_78, %c0_79] : memref<8x32xf32, #tpu.memory_space<vmem>>, vector<8x32xf32>
    %c0_80 = arith.constant 0 : index
    %c0_81 = arith.constant 0 : index
    %517 = vector.load %arg8[%c0_80, %c0_81] : memref<32x16xf32, #tpu.memory_space<vmem>>, vector<32x16xf32>
    %cst_82 = arith.constant dense<0.000000e+00> : vector<8x16xf32>
    %518 = tpu.matmul %516, %517, %cst_82 {dimension_numbers = #tpu.dot_dimension_numbers<[1], [0], [0], [1], [0, 0, 1, 1], [], []>} : vector<8x32xf32>, vector<32x16xf32>, vector<8x16xf32> -> vector<8x16xf32>
    %519 = vector.shape_cast %515 : vector<8x8x32xf32> to vector<64x32xf32>
    %c0_83 = arith.constant 0 : index
    %c0_84 = arith.constant 0 : index
    %520 = vector.load %arg9[%c0_83, %c0_84] : memref<32x16xf32, #tpu.memory_space<vmem>>, vector<32x16xf32>
    %cst_85 = arith.constant dense<0.000000e+00> : vector<64x16xf32>
    %521 = tpu.matmul %519, %520, %cst_85 {dimension_numbers = #tpu.dot_dimension_numbers<[1], [0], [0], [1], [0, 0, 1, 1], [], []>} : vector<64x32xf32>, vector<32x16xf32>, vector<64x16xf32> -> vector<64x16xf32>
    %522 = vector.shape_cast %521 : vector<64x16xf32> to vector<8x8x16xf32>
    %523 = vector.shape_cast %518 : vector<8x16xf32> to vector<8x1x16xf32>
    %524 = vector.broadcast %523 : vector<8x1x16xf32> to vector<8x8x16xf32>
    %525 = arith.addf %524, %522 : vector<8x8x16xf32>
    %526 = math.tanh %525 : vector<8x8x16xf32>
    %c0_86 = arith.constant 0 : index
    %c0_87 = arith.constant 0 : index
    %527 = vector.load %arg10[%c0_86, %c0_87] : memref<1x16xf32, #tpu.memory_space<vmem>>, vector<1x16xf32>
    %528 = vector.shape_cast %527 : vector<1x16xf32> to vector<1x1x16xf32>
    %529 = vector.broadcast %528 : vector<1x1x16xf32> to vector<8x8x16xf32>
    %530 = arith.mulf %526, %529 : vector<8x8x16xf32>
    %cst_88 = arith.constant dense<0.000000e+00> : vector<8x8xf32>
    %531 = vector.multi_reduction <add>, %530, %cst_88 [2] : vector<8x8x16xf32> to vector<8x8xf32>
    %c0_89 = arith.constant 0 : index
    %c0_90 = arith.constant 0 : index
    %532 = vector.load %arg2[%c0_89, %c0_90] : memref<8x8xi32, #tpu.memory_space<vmem>>, vector<8x8xi32>
    %c0_i32 = arith.constant 0 : i32
    %533 = vector.broadcast %c0_i32 : i32 to vector<8x8xi32>
    %534 = arith.cmpi ne, %532, %533 : vector<8x8xi32>
    %cst_91 = arith.constant -1.000000e+30 : f32
    %535 = vector.broadcast %cst_91 : f32 to vector<8x8xf32>
    %536 = arith.select %534, %535, %531 : vector<8x8xi1>, vector<8x8xf32>
    %cst_92 = arith.constant dense<0xFF800000> : vector<8xf32>
    %537 = vector.multi_reduction <maximumf>, %536, %cst_92 [1] : vector<8x8xf32> to vector<8xf32>
    %538 = vector.shape_cast %537 : vector<8xf32> to vector<8x1xf32>
    %539 = vector.broadcast %538 : vector<8x1xf32> to vector<8x8xf32>
    %540 = arith.subf %536, %539 : vector<8x8xf32>
    %541 = math.exp %540 : vector<8x8xf32>
    %cst_93 = arith.constant dense<0.000000e+00> : vector<8xf32>
    %542 = vector.multi_reduction <add>, %541, %cst_93 [1] : vector<8x8xf32> to vector<8xf32>
    %543 = vector.shape_cast %542 : vector<8xf32> to vector<8x1xf32>
    %544 = vector.broadcast %543 : vector<8x1xf32> to vector<8x8xf32>
    %545 = arith.divf %541, %544 : vector<8x8xf32>
    %c0_94 = arith.constant 0 : index
    %c0_95 = arith.constant 0 : index
    %546 = vector.load %arg17[%c0_94, %c0_95] : memref<8x8xf32, #tpu.memory_space<vmem>>, vector<8x8xf32>
    tpu.vector_store %arg17[%c0_94, %c0_95], %545 {strides = array<i32>} : memref<8x8xf32, #tpu.memory_space<vmem>>, vector<8x8xf32>,
    %547 = vector.shape_cast %545 : vector<8x8xf32> to vector<8x1x8xf32>
    "tpu.trace_start"() <{level = 10 : i32, message = "bqs,bsh->bqh"}> : () -> ()
    %cst_96 = arith.constant dense<0.000000e+00> : vector<8x1x32xf32>
    %548 = tpu.matmul %547, %515, %cst_96 {dimension_numbers = #tpu.dot_dimension_numbers<[2], [1], [1], [2], [0, 0, 0, 1, 1, 2], [0], [0]>} : vector<8x1x8xf32>, vector<8x8x32xf32>, vector<8x1x32xf32> -> vector<8x1x32xf32>
    "tpu.trace_stop"() : () -> ()
    %549 = vector.shape_cast %548 : vector<8x1x32xf32> to vector<8x32xf32>
    %c0_97 = arith.constant 0 : index
    %c0_98 = arith.constant 0 : index
    %550 = vector.load %arg11[%c0_97, %c0_98] : memref<32x16xf32, #tpu.memory_space<vmem>>, vector<32x16xf32>
    %cst_99 = arith.constant dense<0.000000e+00> : vector<8x16xf32>
    %551 = tpu.matmul %549, %550, %cst_99 {dimension_numbers = #tpu.dot_dimension_numbers<[1], [0], [0], [1], [0, 0, 1, 1], [], []>} : vector<8x32xf32>, vector<32x16xf32>, vector<8x16xf32> -> vector<8x16xf32>
    %c0_100 = arith.constant 0 : index
    %c0_101 = arith.constant 0 : index
    %552 = vector.load %arg12[%c0_100, %c0_101] : memref<32x16xf32, #tpu.memory_space<vmem>>, vector<32x16xf32>
    %cst_102 = arith.constant dense<0.000000e+00> : vector<8x16xf32>
    %553 = tpu.matmul %516, %552, %cst_102 {dimension_numbers = #tpu.dot_dimension_numbers<[1], [0], [0], [1], [0, 0, 1, 1], [], []>} : vector<8x32xf32>, vector<32x16xf32>, vector<8x16xf32> -> vector<8x16xf32>
    %554 = arith.addf %551, %553 : vector<8x16xf32>
    %c0_103 = arith.constant 0 : index
    %c0_104 = arith.constant 0 : index
    %555 = vector.load %arg13[%c0_103, %c0_104] : memref<1x16xf32, #tpu.memory_space<vmem>>, vector<1x16xf32>
    %556 = vector.broadcast %555 : vector<1x16xf32> to vector<8x16xf32>
    %557 = arith.addf %554, %556 : vector<8x16xf32>
    %558 = math.tanh %557 : vector<8x16xf32>
    %c0_105 = arith.constant 0 : index
    %c0_106 = arith.constant 0 : index
    %559 = vector.load %arg14[%c0_105, %c0_106] : memref<16x4xf32, #tpu.memory_space<vmem>>, vector<16x4xf32>
    %cst_107 = arith.constant dense<0.000000e+00> : vector<8x4xf32>
    %560 = tpu.matmul %558, %559, %cst_107 {dimension_numbers = #tpu.dot_dimension_numbers<[1], [0], [0], [1], [0, 0, 1, 1], [], []>} : vector<8x16xf32>, vector<16x4xf32>, vector<8x4xf32> -> vector<8x4xf32>
    %c0_108 = arith.constant 0 : index
    %c0_109 = arith.constant 0 : index
    %561 = vector.load %arg15[%c0_108, %c0_109] : memref<1x4xf32, #tpu.memory_space<vmem>>, vector<1x4xf32>
    %562 = vector.broadcast %561 : vector<1x4xf32> to vector<8x4xf32>
    %563 = arith.addf %560, %562 : vector<8x4xf32>
    %c0_110 = arith.constant 0 : index
    %c0_111 = arith.constant 0 : index
    %564 = vector.load %arg16[%c0_110, %c0_111] : memref<8x4xf32, #tpu.memory_space<vmem>>, vector<8x4xf32>
    tpu.vector_store %arg16[%c0_110, %c0_111], %563 {strides = array<i32>} : memref<8x4xf32, #tpu.memory_space<vmem>>, vector<8x4xf32>,
    return
  }
}

</mosaic_0001>

<bundles_post_ra>
// kernel: attn_model_forward.1
= control target key start
LH: loop header
LB: loop body
LE: loop exit
PB: predicated region body
PF: predicated region fallthrough
CT: control target
= control target key end

     0   :  { %v11369_v0 = vmov 0.0|0.0   ;;  %vm8423_vm0 = vmmov 0   ;;  %v11372_v4 = vmov 0.0   ;;  %vm74_vm1 = vcmask 261120   ;;  %s8431_s20 = smov 64   ;;  %s11348_s3 = inlined_call_operand.vmem [shape: f32[32,96], index: 3, kind: input, shape index: {}]   ;;  %s11349_s4 = inlined_call_operand.vmem [shape: f32[16,48], index: 4, kind: input, shape index: {}]   ;;  %s11350_s5 = inlined_call_operand.vmem [shape: f32[16,48], index: 5, kind: input, shape index: {}]   ;;  %s11351_s0 = inlined_call_operand.vmem [shape: f32[8,8,32], index: 0, kind: input, shape index: {}]   ;;  %s11352_s7 = inlined_call_operand.vmem [shape: f32[1,96], index: 7, kind: input, shape index: {}]   ;;  %s11353_s6 = inlined_call_operand.vmem [shape: f32[1,96], index: 6, kind: input, shape index: {}]   ;;  %s11354_s8 = inlined_call_operand.vmem [shape: f32[32,16], index: 8, kind: input, shape index: {}]   ;;  %s11355_s9 = inlined_call_operand.vmem [shape: f32[32,16], index: 9, kind: input, shape index: {}]   ;;  %s11356_s1 = inlined_call_operand.vmem [shape: f32[8,32], index: 1, kind: input, shape index: {}]   ;;  %s11357_s10 = inlined_call_operand.vmem [shape: f32[1,16], index: 10, kind: input, shape index: {}]   ;;  %s11358_s2 = inlined_call_operand.vmem [shape: s32[8,8], index: 2, kind: input, shape index: {}]   ;;  %s11359_s17 = inlined_call_operand.vmem [shape: f32[8,8], index: 17, kind: output, shape index: {1}]   ;;  %s11360_s12 = inlined_call_operand.vmem [shape: f32[32,16], index: 12, kind: input, shape index: {}]   ;;  %s11361_s11 = inlined_call_operand.vmem [shape: f32[32,16], index: 11, kind: input, shape index: {}]   ;;  %s11362_s14 = inlined_call_operand.vmem [shape: f32[16,4], index: 14, kind: input, shape index: {}]   ;;  %s11363_s13 = inlined_call_operand.vmem [shape: f32[1,16], index: 13, kind: input, shape index: {}]   ;;  %s11364_s15 = inlined_call_operand.vmem [shape: f32[1,4], index: 15, kind: input, shape index: {}]   ;;  %s11365_s16 = inlined_call_operand.vmem [shape: f32[8,4], index: 16, kind: output, shape index: {0}]  }
   0x1   :  { %11451 = sst [smem:[#allocation52_spill]] %s11348_s3  ;;  %7540 = vmatprep.subr.bf16.mxu1 %v11369_v0  ;;  %7324 = vmatprep.mubr.msk.f32.mxu1 %vm8423_vm0, %v11372_v4  ;;  %v206_v11 = vld [vmem:[%s11350_s5] sm:$0xff]  ;;  %v207_v12 = vld [vmem:[%s11350_s5 + $0x8] sm:$0xff]  ;;  %s8425_s5 = smov 80   ;;  %v57_v17 = vld [vmem:[%s11351_s0 + $0x10] sm:$0xff]  ;;  %vm819_vm2 = vcmask 1041409  }
   0x2   :  { %11452 = sst [smem:[#allocation53_spill]] %s11349_s4  ;;  %s11453_s26 = sld [smem:[#allocation52_spill]]  ;;  %v55_v13 = vld [vmem:[%s11351_s0] sm:$0xff]  ;;  %v8557_v14 = vpack.c.bf16 %v207_v12, %v206_v11  ;;  %v56_v16 = vld [vmem:[%s11351_s0 + $0x8] sm:$0xff]  ;;  %v58_v18 = vld [vmem:[%s11351_s0 + $0x18] sm:$0xff]  ;;  %vm822_vm3 = vcmask 1042434  }
   0x3   :  { %s11454_s30 = sld [smem:[#allocation53_spill]]  ;;  %7308 = vmatprep.mubr.msk.f32.mxu0 %vm74_vm1, %v55_v13  ;;  %v7028_v15 = vld [vmem:[%s11352_s7] ss:$0 sm:$0xff]  ;;  %v60_v20 = vld [vmem:[%s11351_s0 + $0x28] sm:$0xff]  ;;  %v61_v21 = vld [vmem:[%s11351_s0 + $0x30] sm:$0xff]  ;;  %s8426_s3 = smov 96  }
   0x4   :  { %505 = vrot.lane.b32.xlu0 %v7028_v15, %s8425_s5  ;;  %v59_v19 = vld [vmem:[%s11351_s0 + $0x20] sm:$0xff]  ;;  %v62_v22 = vld [vmem:[%s11351_s0 + $0x38] sm:$0xff]  ;;  %s8427_s0 = smov 48   ;;  %s8430_s4 = smov 112   ;;  %vm825_vm4 = vcmask 1043459   ;;  %vm828_vm5 = vcmask 1044484  }
   0x5   :  { %v7019_v52 = vld [vmem:[%s11353_s6] ss:$0 sm:$0xff]  ;;  %s8429_s6 = smov 32   ;;  %vm831_vm6 = vcmask 1045509   ;;  %vm834_vm7 = vcmask 1046534   ;;  %vm11450_vm8 = vcmask 1047559  }
   0x6   :  { %vm215_vm9 = vcmask 130048   ;;  %vm5516_vm10 = vcmask 1041408   ;;  %vm5507_vm11 = vcmask 1040384   ;;  %vm5525_vm12 = vcmask 1042432  }
   0x7   :  { %vm5534_vm13 = vcmask 1043456   ;;  %vm5543_vm14 = vcmask 1044480   ;;  %vm5552_vm15 = vcmask 1045504  }
   0x8   :  { %v63_v1 = vld [vmem:[%s11453_s26] sm:$0xff]  ;;  %v64_v2 = vld [vmem:[%s11453_s26 + $0x8] sm:$0xff]  ;;  %v65_v7 = vld [vmem:[%s11453_s26 + $0x10] sm:$0xff] }
   0x9   :  { %v204_v3 = vld [vmem:[%s11454_s30] sm:$0xff]  ;;  %v7532_v5 = vpack.c.bf16 %v64_v2, %v63_v1  ;;  %v205_v6 = vld [vmem:[%s11454_s30 + $0x8] sm:$0xff]  ;;  %v66_v8 = vld [vmem:[%s11453_s26 + $0x18] sm:$0xff]  ;;  %s8428_s30 = smov 16  }
   0xa   :  { %v8544_v9 = vpack.c.bf16 %v205_v6, %v204_v3  ;;  %v7536_v10 = vpack.c.bf16 %v66_v8, %v65_v7 }
   0xb   :  { %7533 = vmatprep.subr.bf16.mxu0 %v7532_v5 }
   0xc   :  { %11455 = vst [vmem:[#allocation2_spill] sm:$0xff] %v8544_v9  ;;  %7542 = vmatpush3.bf16.msra.mxu1 %v8544_v9  ;;  %7535 = vmatpush3.bf16.msra.mxu0 %v7532_v5 }
   0xd   :  { %7543 = vmatprep.subr.bf16.mxu1 %v11369_v0  ;;  %7537 = vmatprep.subr.bf16.mxu0 %v7536_v10 }
   0xf   :  { %7325 = vmatmul.mubr.f32.vlgmr.msra.gmra.mrb[0].mxu1 %v11372_v4 }
  0x10   :  { %7545 = vmatpush3.bf16.msra.mxu1 %v8557_v14  ;;  %7539 = vmatpush3.bf16.msra.mxu0 %v7536_v10 }
  0x11   :  { %7331 = vmatprep.mubr.msk.f32.mxu1 %vm8423_vm0, %v11372_v4  ;;  %7546 = vmatprep.subr.bf16.mxu1 %v11369_v0 }
  0x12   :  { %7555 = vmatprep.subr.bf16.mxu0 %v11369_v0 }
  0x13   :  { %7332 = vmatmul.mubr.f32.vlgmr.msra.gmra.mrb[2].mxu1 %v11372_v4  ;;  %7309 = vmatmul.mubr.msk.f32.vlgmr.msra.gmra.mrb[0].mxu0 %vm74_vm1, %v56_v16 }
  0x14   :  { %7311 = vmatprep.mubr.msk.f32.mxu0 %vm74_vm1, %v57_v17  ;;  %7548 = vmatpush3.bf16.msra.mxu1 %v8544_v9 }
  0x15   :  { %7338 = vmatprep.mubr.msk.f32.mxu1 %vm8423_vm0, %v11372_v4  ;;  %7549 = vmatprep.subr.bf16.mxu1 %v11369_v0 }
  0x16   :  { %7557 = vmatpush3.bf16.msra.mxu0 %v8557_v14 }
  0x17   :  { %7312 = vmatmul.mubr.msk.f32.gmra.mrb[2].mxu0 %vm74_vm1, %v58_v18  ;;  %7561 = vmatprep.subr.bf16.mxu0 %v11369_v0 }
  0x18   :  { %7314 = vmatprep.mubr.msk.f32.mxu0 %vm74_vm1, %v59_v19 }
  0x1b   :  { %7315 = vmatmul.mubr.msk.f32.gmra.mrb[4].mxu0 %vm74_vm1, %v60_v20 }
  0x1c   :  { %7317 = vmatprep.mubr.msk.f32.mxu0 %vm74_vm1, %v61_v21 }
  0x1f   :  { %7318 = vmatmul.mubr.msk.f32.gmra.mrb[6].mxu0 %vm74_vm1, %v62_v22 }
  0x20   :  { %7359 = vmatprep.mubr.msk.f32.mxu0 %vm8423_vm0, %v11372_v4 }
  0x76   :  { %v8609_v26 = vpop.permute.xlu0 %505 }
  0x77   :  { %11456 = vst [vmem:[#allocation3_spill] sm:$0xff] %v8609_v26 }
  0xe2   :  { %v285_v23 = vpop.f32.mrb[0].mxu1 }
  0xe3   :  { %v8607_v24 = vadd.f32 %v7028_v15, %v285_v23  ;;  %v7326_v25 = vpop.f32.mrb[1].mxu1 }
  0xe5   :  { %v290_v27 = vrot.slane %v8607_v24, 1  ;;  %v291_v46 = vrot.slane %v8607_v24, 2  ;;  %v292_v47 = vrot.slane %v8607_v24, 3  ;;  %v293_v48 = vrot.slane %v8607_v24, 4 }
  0xe6   :  { %v574_v28 = vpop.f32.mrb[2].mxu1  ;;  %v7310_v29 = vpop.f32.mrb[0].mxu0  ;;  %v294_v49 = vrot.slane %v8607_v24, 5  ;;  %v295_v50 = vrot.slane %v8607_v24, 6  ;;  %v296_v51 = vrot.slane %v8607_v24, 7 }
  0xe7   :  { %v575_v30 = vadd.f32 %v574_v28, %v8609_v26  ;;  %363 = vrot.lane.b32.xlu1 %v290_v27, %s8426_s3  ;;  %v7333_v31 = vpop.f32.mrb[3].mxu1  ;;  %v165_v32 = vpop.f32.mrb[1].mxu0  ;;  %v8647_v53 = vadd.f32 %v7310_v29, %v7019_v52 }
  0xe8   :  { %v8651_v55 = vadd.f32 %v7019_v52, %v165_v32 }
  0xe9   :  { %600 = vrot.lane.b32.xlu0 %v575_v30, %s8427_s0  ;;  %v580_v33 = vrot.slane %v575_v30, 2  ;;  %v579_v36 = vrot.slane %v575_v30, 1  ;;  %v581_v37 = vrot.slane %v575_v30, 3  ;;  %v582_v40 = vrot.slane %v575_v30, 4 }
  0xea   :  { %v7313_v34 = vpop.f32.mrb[2].mxu0  ;;  %v583_v41 = vrot.slane %v575_v30, 5  ;;  %v584_v44 = vrot.slane %v575_v30, 6  ;;  %v585_v45 = vrot.slane %v575_v30, 7  ;;  %v306_v56 = vadd.f32 %v290_v27, %v8647_v53 }
  0xeb   :  { %588 = vrot.lane.b32.xlu1 %v580_v33, %s8427_s0  ;;  %v175_v35 = vpop.f32.mrb[3].mxu0  ;;  %v8654_v57 = vadd.f32 %v7313_v34, %v7019_v52  ;;  %v305_v60 = vadd.f32 %v8607_v24, %v8651_v55 }
  0xec   :  { %v8649_v54 = vadd.f32 %v7019_v52, %v175_v35  ;;  %v7030_v61 = vmul.f32 -1.442695, %v306_v56 }
  0xed   :  { %586 = vrot.lane.b32.xlu0 %v579_v36, %s8427_s0  ;;  %v308_v62 = vadd.f32 %v292_v47, %v8654_v57  ;;  %v7029_v5 = vmul.f32 -1.442695, %v305_v60 }
  0xee   :  { %v7316_v38 = vpop.f32.mrb[4].mxu0  ;;  %v307_v58 = vadd.f32 %v291_v46, %v8649_v54  ;;  %7628 = vpow2.f32 %v7030_v61 }
  0xef   :  { %590 = vrot.lane.b32.xlu1 %v581_v37, %s8427_s0  ;;  %v185_v39 = vpop.f32.mrb[5].mxu0  ;;  %v8657_v59 = vadd.f32 %v7316_v38, %v7019_v52  ;;  %v7032_v6 = vmul.f32 -1.442695, %v308_v62 }
  0xf0   :  { %v8662_v63 = vadd.f32 %v7019_v52, %v185_v39  ;;  %v7031_v1 = vmul.f32 -1.442695, %v307_v58 }
  0xf1   :  { %592 = vrot.lane.b32.xlu0 %v582_v40, %s8427_s0  ;;  %11457 = vst [vmem:[#allocation4_spill] sm:$0xff] %v8657_v59  ;;  %v310_v3 = vadd.f32 %v294_v49, %v8657_v59 }
  0xf2   :  { %v7319_v42 = vpop.f32.mrb[6].mxu0  ;;  %11458 = vst [vmem:[#allocation5_spill] sm:$0xff] %v8662_v63  ;;  %7630 = vpow2.f32 %v7031_v1  ;;  %v309_v7 = vadd.f32 %v293_v48, %v8662_v63 }
  0xf3   :  { %594 = vrot.lane.b32.xlu1 %v583_v41, %s8427_s0  ;;  %v195_v43 = vpop.f32.mrb[7].mxu0  ;;  %v7034_v8 = vmul.f32 -1.442695, %v310_v3  ;;  %7632 = vpow2.f32 %v7029_v5  ;;  %v8669_v11 = vadd.f32 %v7319_v42, %v7019_v52 }
  0xf4   :  { %v8664_v2 = vadd.f32 %v7019_v52, %v195_v43  ;;  %7634 = vpow2.f32 %v7032_v6  ;;  %v7033_v12 = vmul.f32 -1.442695, %v309_v7 }
  0xf5   :  { %596 = vrot.lane.b32.xlu0 %v584_v44, %s8427_s0  ;;  %11460 = vst [vmem:[#allocation7_spill] sm:$0xff] %v8669_v11  ;;  %7636 = vpow2.f32 %v7034_v8  ;;  %v312_v15 = vadd.f32 %v296_v51, %v8669_v11 }
  0xf6   :  { %11459 = vst [vmem:[#allocation6_spill] sm:$0xff] %v8664_v2  ;;  %v311_v10 = vadd.f32 %v295_v50, %v8664_v2  ;;  %7638 = vpow2.f32 %v7033_v12 }
  0xf7   :  { %598 = vrot.lane.b32.xlu1 %v585_v45, %s8427_s0  ;;  %v7036_v19 = vmul.f32 -1.442695, %v312_v15 }
  0xf8   :  { %v7035_v13 = vmul.f32 -1.442695, %v311_v10  ;;  %v7629_v16 = vpop.eup %7628 }
  0xf9   :  { %365 = vrot.lane.b32.xlu0 %v291_v46, %s8426_s3  ;;  %v338_v22 = vadd.f32 1.0, %v7629_v16 }
  0xfa   :  { %7640 = vpow2.f32 %v7035_v13 }
  0xfb   :  { %361 = vrot.lane.b32.xlu1 %v8607_v24, %s8426_s3  ;;  %7642 = vpow2.f32 %v7036_v19 }
  0xfc   :  { %v7631_v18 = vpop.eup %7630  ;;  %7644 = vrcp.f32 %v338_v22 }
  0xfd   :  { %367 = vrot.lane.b32.xlu0 %v292_v47, %s8426_s3  ;;  %v7633_v21 = vpop.eup %7632  ;;  %v339_v24 = vadd.f32 1.0, %v7631_v18 }
  0xfe   :  { %v7635_v23 = vpop.eup %7634  ;;  %v337_v29 = vadd.f32 1.0, %v7633_v21 }
  0xff   :  { %369 = vrot.lane.b32.xlu1 %v293_v48, %s8426_s3  ;;  %v340_v31 = vadd.f32 1.0, %v7635_v23  ;;  %7646 = vrcp.f32 %v339_v24 }
 0x101   :  { %371 = vrot.lane.b32.xlu0 %v294_v49, %s8426_s3 }
 0x103   :  { %373 = vrot.lane.b32.xlu1 %v295_v50, %s8426_s3 }
 0x105   :  { %668 = vrot.lane.b32.xlu0 %v580_v33, %s8428_s30 }
 0x107   :  { %375 = vrot.lane.b32.xlu1 %v296_v51, %s8426_s3 }
 0x109   :  { %670 = vrot.lane.b32.xlu0 %v581_v37, %s8428_s30 }
 0x10b   :  { %666 = vrot.lane.b32.xlu1 %v579_v36, %s8428_s30 }
 0x10d   :  { %672 = vrot.lane.b32.xlu0 %v582_v40, %s8428_s30 }
 0x10f   :  { %674 = vrot.lane.b32.xlu1 %v583_v41, %s8428_s30 }
 0x111   :  { %676 = vrot.lane.b32.xlu0 %v584_v44, %s8428_s30 }
 0x113   :  { %678 = vrot.lane.b32.xlu1 %v585_v45, %s8428_s30 }
 0x115   :  { %680 = vrot.lane.b32.xlu0 %v575_v30, %s8428_s30  ;;  %v7637_v30 = vpop.eup %7636 }
 0x116   :  { %v7639_v35 = vpop.eup %7638  ;;  %v342_v38 = vadd.f32 1.0, %v7637_v30 }
 0x117   :  { %v7641_v40 = vpop.eup %7640  ;;  %v341_v43 = vadd.f32 1.0, %v7639_v35 }
 0x118   :  { %v343_v48 = vadd.f32 1.0, %v7641_v40  ;;  %v7643_v52 = vpop.eup %7642 }
 0x119   :  { %v8681_v60 = vpop.eup %7644  ;;  %v344_v15 = vadd.f32 1.0, %v7643_v52 }
 0x11a   :  { %v8684_v1 = vpop.eup %7646 }
 0x159   :  { %v8672_v17 = vpop.permute.xlu1 %363 }
 0x15b   :  { %v601_v20 = vpop.permute.xlu0 %600 }
 0x15c   :  { %v617_v44 = vadd.f32 %v601_v20, %v8669_v11 }
 0x15d   :  { %v589_v25 = vpop.permute.xlu1 %588 }
 0x15e   :  { %v611_v27 = vadd.f32 %v589_v25, %v8647_v53  ;;  %v7044_v56 = vmul.f32 -1.442695, %v617_v44 }
 0x15f   :  { %v587_v28 = vpop.permute.xlu0 %586 }
 0x160   :  { %v7038_v32 = vmul.f32 -1.442695, %v611_v27  ;;  %v610_v33 = vadd.f32 %v587_v28, %v8651_v55  ;;  %v386_v27 = vmul.f32 %v8681_v60, %v8672_v17 }
 0x161   :  { %v591_v34 = vpop.permute.xlu1 %590 }
 0x162   :  { %7648 = vpow2.f32 %v7038_v32  ;;  %v7037_v36 = vmul.f32 -1.442695, %v610_v33  ;;  %v612_v37 = vadd.f32 %v591_v34, %v8649_v54 }
 0x163   :  { %v593_v39 = vpop.permute.xlu0 %592  ;;  %7650 = vrcp.f32 %v337_v29 }
 0x164   :  { %7652 = vrcp.f32 %v340_v31  ;;  %v7039_v41 = vmul.f32 -1.442695, %v612_v37  ;;  %v613_v42 = vadd.f32 %v593_v39, %v8654_v57 }
 0x165   :  { %7654 = vpow2.f32 %v7037_v36  ;;  %v595_v45 = vpop.permute.xlu1 %594 }
 0x166   :  { %7656 = vpow2.f32 %v7039_v41  ;;  %v7040_v46 = vmul.f32 -1.442695, %v613_v42  ;;  %v614_v47 = vadd.f32 %v595_v45, %v8662_v63 }
 0x167   :  { %7658 = vrcp.f32 %v342_v38  ;;  %v597_v49 = vpop.permute.xlu0 %596 }
 0x168   :  { %7660 = vpow2.f32 %v7040_v46  ;;  %v7041_v50 = vmul.f32 -1.442695, %v614_v47  ;;  %v615_v51 = vadd.f32 %v597_v49, %v8657_v59 }
 0x169   :  { %7662 = vrcp.f32 %v341_v43  ;;  %v599_v58 = vpop.permute.xlu1 %598 }
 0x16a   :  { %7664 = vpow2.f32 %v7041_v50  ;;  %v7042_v61 = vmul.f32 -1.442695, %v615_v51  ;;  %v616_v62 = vadd.f32 %v599_v58, %v8664_v2 }
 0x16b   :  { %7666 = vrcp.f32 %v343_v48  ;;  %v366_v3 = vpop.permute.xlu0 %365 }
 0x16c   :  { %v7649_v5 = vpop.eup %7648  ;;  %7668 = vpow2.f32 %v7042_v61  ;;  %v7043_v6 = vmul.f32 -1.442695, %v616_v62  ;;  %v387_v7 = vmul.f32 %v8684_v1, %v366_v3 }
 0x16d   :  { %v8687_v8 = vpop.eup %7650  ;;  %7670 = vpow2.f32 %v7044_v56  ;;  %v643_v10 = vadd.f32 1.0, %v7649_v5  ;;  %v362_v12 = vpop.permute.xlu1 %361 }
 0x16e   :  { %v8689_v13 = vpop.eup %7652  ;;  %7672 = vpow2.f32 %v7043_v6  ;;  %v385_v16 = vmul.f32 %v8687_v8, %v362_v12  ;;  %405 = vrot.lane.b32.xlu0 %v387_v7, %s8429_s6 }
 0x16f   :  { %v7655_v18 = vpop.eup %7654  ;;  %7674 = vrcp.f32 %v643_v10  ;;  %v368_v19 = vpop.permute.xlu0 %367 }
 0x170   :  { %v7657_v20 = vpop.eup %7656  ;;  %v388_v21 = vmul.f32 %v8689_v13, %v368_v19  ;;  %401 = vrot.lane.b32.xlu1 %v385_v16, %s8429_s6  ;;  %7676 = vrcp.f32 %v344_v15  ;;  %v642_v29 = vadd.f32 1.0, %v7655_v18 }
 0x171   :  { %v8695_v22 = vpop.eup %7658  ;;  %v644_v23 = vadd.f32 1.0, %v7657_v20  ;;  %v370_v24 = vpop.permute.xlu1 %369 }
 0x172   :  { %v7661_v25 = vpop.eup %7660  ;;  %407 = vrot.lane.b32.xlu0 %v388_v21, %s8429_s6 }
 0x173   :  { %v8700_v28 = vpop.eup %7662  ;;  %7678 = vrcp.f32 %v644_v23  ;;  %v645_v30 = vadd.f32 1.0, %v7661_v25  ;;  %v372_v31 = vpop.permute.xlu0 %371 }
 0x174   :  { %v7665_v32 = vpop.eup %7664  ;;  %v390_v33 = vmul.f32 %v8695_v22, %v372_v31  ;;  %403 = vrot.lane.b32.xlu1 %v386_v27, %s8429_s6  ;;  %v389_v17 = vmul.f32 %v8700_v28, %v370_v24 }
 0x175   :  { %v8704_v34 = vpop.eup %7666  ;;  %7680 = vrcp.f32 %v645_v30  ;;  %v646_v35 = vadd.f32 1.0, %v7665_v32  ;;  %v374_v36 = vpop.permute.xlu1 %373 }
 0x176   :  { %v7669_v37 = vpop.eup %7668  ;;  %411 = vrot.lane.b32.xlu0 %v390_v33, %s8429_s6  ;;  %7682 = vrcp.f32 %v642_v29  ;;  %v391_v45 = vmul.f32 %v8704_v34, %v374_v36 }
 0x177   :  { %v7671_v38 = vpop.eup %7670  ;;  %v647_v39 = vadd.f32 1.0, %v7669_v37  ;;  %v669_v40 = vpop.permute.xlu0 %668  ;;  %7684 = vrcp.f32 %v646_v35 }
 0x178   :  { %v7673_v41 = vpop.eup %7672  ;;  %409 = vrot.lane.b32.xlu1 %v389_v17, %s8429_s6  ;;  %v649_v47 = vadd.f32 1.0, %v7671_v38 }
 0x179   :  { %v8709_v42 = vpop.eup %7674  ;;  %7686 = vrcp.f32 %v647_v39  ;;  %v648_v43 = vadd.f32 1.0, %v7673_v41  ;;  %v376_v44 = vpop.permute.xlu1 %375 }
 0x17a   :  { %v691_v46 = vmul.f32 %v8709_v42, %v669_v40  ;;  %v8713_v49 = vpop.eup %7676 }
 0x17b   :  { %v671_v48 = vpop.permute.xlu0 %670  ;;  %7688 = vrcp.f32 %v648_v43  ;;  %v392_v52 = vmul.f32 %v8713_v49, %v376_v44 }
 0x17c   :  { %708 = vrot.lane.b32.xlu0 %v691_v46, %s8429_s6  ;;  %413 = vrot.lane.b32.xlu1 %v391_v45, %s8429_s6  ;;  %7690 = vrcp.f32 %v649_v47 }
 0x17d   :  { %v8717_v50 = vpop.eup %7678  ;;  %v667_v51 = vpop.permute.xlu1 %666 }
 0x17e   :  { %v692_v56 = vmul.f32 %v8717_v50, %v671_v48 }
 0x17f   :  { %v8721_v58 = vpop.eup %7680  ;;  %v673_v61 = vpop.permute.xlu0 %672 }
 0x180   :  { %710 = vrot.lane.b32.xlu0 %v692_v56, %s8429_s6  ;;  %415 = vrot.lane.b32.xlu1 %v392_v52, %s8429_s6  ;;  %v8725_v62 = vpop.eup %7682  ;;  %v693_v7 = vmul.f32 %v8721_v58, %v673_v61 }
 0x181   :  { %v675_v3 = vpop.permute.xlu1 %674  ;;  %v8727_v5 = vpop.eup %7684  ;;  %v690_v6 = vmul.f32 %v8725_v62, %v667_v51 }
 0x182   :  { %v694_v15 = vmul.f32 %v8727_v5, %v675_v3 }
 0x183   :  { %v8731_v10 = vpop.eup %7686  ;;  %v677_v12 = vpop.permute.xlu0 %676 }
 0x184   :  { %712 = vrot.lane.b32.xlu0 %v693_v7, %s8429_s6  ;;  %706 = vrot.lane.b32.xlu1 %v690_v6, %s8429_s6  ;;  %v695_v16 = vmul.f32 %v8731_v10, %v677_v12 }
 0x185   :  { %v8737_v18 = vpop.eup %7688  ;;  %v679_v19 = vpop.permute.xlu1 %678 }
 0x186   :  { %v8741_v21 = vpop.eup %7690  ;;  %v696_v23 = vmul.f32 %v8737_v18, %v679_v19 }
 0x187   :  { %v681_v20 = vpop.permute.xlu0 %680 }
 0x188   :  { %716 = vrot.lane.b32.xlu0 %v695_v16, %s8429_s6  ;;  %714 = vrot.lane.b32.xlu1 %v694_v15, %s8429_s6  ;;  %v697_v24 = vmul.f32 %v8741_v21, %v681_v20 }
 0x18c   :  { %720 = vrot.lane.b32.xlu0 %v697_v24, %s8429_s6  ;;  %718 = vrot.lane.b32.xlu1 %v696_v23, %s8429_s6 }
 0x1e0   :  { %v406_v25 = vpop.permute.xlu0 %405 }
 0x1e1   :  { %v427_v27 = vadd.f32 %v406_v25, %v8649_v54 }
 0x1e2   :  { %v402_v29 = vpop.permute.xlu1 %401 }
 0x1e3   :  { %7692 = vtanh.f32 %v427_v27  ;;  %v425_v30 = vadd.f32 %v402_v29, %v8651_v55 }
 0x1e4   :  { %v408_v31 = vpop.permute.xlu0 %407 }
 0x1e5   :  { %7694 = vtanh.f32 %v425_v30  ;;  %v428_v32 = vadd.f32 %v408_v31, %v8654_v57 }
 0x1e6   :  { %v404_v33 = vpop.permute.xlu1 %403 }
 0x1e7   :  { %7696 = vtanh.f32 %v428_v32  ;;  %v426_v35 = vadd.f32 %v404_v33, %v8647_v53 }
 0x1e8   :  { %v412_v36 = vpop.permute.xlu0 %411 }
 0x1e9   :  { %7698 = vtanh.f32 %v426_v35  ;;  %v430_v37 = vadd.f32 %v412_v36, %v8657_v59 }
 0x1ea   :  { %v410_v17 = vpop.permute.xlu1 %409 }
 0x1eb   :  { %7700 = vtanh.f32 %v430_v37  ;;  %v429_v38 = vadd.f32 %v410_v17, %v8662_v63 }
 0x1ed   :  { %v7693_v39 = vpop.eup %7692  ;;  %7702 = vtanh.f32 %v429_v38 }
 0x1ee   :  { %461 = vrot.lane.b32.xlu0 %v7693_v39, %s8430_s4  ;;  %v709_v40 = vpop.permute.xlu0 %708  ;;  %v414_v41 = vpop.permute.xlu1 %413 }
 0x1ef   :  { %v7695_v43 = vpop.eup %7694  ;;  %v731_v44 = vadd.f32 %v709_v40, %v8647_v53  ;;  %v431_v45 = vadd.f32 %v414_v41, %v8664_v2 }
 0x1f0   :  { %457 = vrot.lane.b32.xlu1 %v7695_v43, %s8430_s4  ;;  %v443_v43 = vsub.f32 1.0, %v8684_v1 }
 0x1f1   :  { %v7697_v46 = vpop.eup %7696  ;;  %7704 = vtanh.f32 %v731_v44 }
 0x1f2   :  { %7706 = vtanh.f32 %v431_v45  ;;  %463 = vrot.lane.b32.xlu0 %v7697_v46, %s8430_s4  ;;  %v711_v47 = vpop.permute.xlu0 %710  ;;  %v416_v48 = vpop.permute.xlu1 %415  ;;  %v441_v46 = vsub.f32 1.0, %v8687_v8 }
 0x1f3   :  { %v7699_v51 = vpop.eup %7698  ;;  %v732_v52 = vadd.f32 %v711_v47, %v8649_v54  ;;  %v432_v56 = vadd.f32 %v416_v48, %v8669_v11  ;;  %v442_v47 = vsub.f32 1.0, %v8681_v60  ;;  %v444_v48 = vsub.f32 1.0, %v8689_v13 }
 0x1f4   :  { %459 = vrot.lane.b32.xlu1 %v7699_v51, %s8430_s4 }
 0x1f5   :  { %v7701_v61 = vpop.eup %7700  ;;  %7708 = vtanh.f32 %v732_v52  ;;  %v491_v52 = vmul.f32 0.0, %v8684_v1 }
 0x1f6   :  { %7710 = vtanh.f32 %v432_v56  ;;  %467 = vrot.lane.b32.xlu0 %v7701_v61, %s8430_s4  ;;  %v713_v3 = vpop.permute.xlu0 %712  ;;  %v707_v6 = vpop.permute.xlu1 %706  ;;  %v490_v61 = vmul.f32 0.0, %v8681_v60  ;;  %v493_v60 = vmul.f32 0.0, %v8700_v28 }
 0x1f7   :  { %v7703_v7 = vpop.eup %7702  ;;  %v733_v12 = vadd.f32 %v713_v3, %v8654_v57  ;;  %v730_v15 = vadd.f32 %v707_v6, %v8651_v55 }
 0x1f8   :  { %465 = vrot.lane.b32.xlu1 %v7703_v7, %s8430_s4 }
 0x1f9   :  { %7712 = vtanh.f32 %v733_v12  ;;  %v489_v12 = vmul.f32 0.0, %v8687_v8  ;;  %v446_v8 = vsub.f32 1.0, %v8695_v22 }
 0x1fa   :  { %7714 = vtanh.f32 %v730_v15  ;;  %v717_v16 = vpop.permute.xlu0 %716  ;;  %v715_v19 = vpop.permute.xlu1 %714 }
 0x1fb   :  { %v7705_v20 = vpop.eup %7704  ;;  %v735_v23 = vadd.f32 %v717_v16, %v8657_v59  ;;  %v734_v24 = vadd.f32 %v715_v19, %v8662_v63  ;;  %v445_v16 = vsub.f32 1.0, %v8700_v28  ;;  %v492_v19 = vmul.f32 0.0, %v8689_v13 }
 0x1fc   :  { %v7707_v25 = vpop.eup %7706  ;;  %764 = vrot.lane.b32.xlu0 %v7705_v20, %s8430_s4 }
 0x1fd   :  { %7716 = vtanh.f32 %v735_v23  ;;  %469 = vrot.lane.b32.xlu1 %v7707_v25, %s8430_s4 }
 0x1fe   :  { %7718 = vtanh.f32 %v734_v24  ;;  %v721_v27 = vpop.permute.xlu0 %720  ;;  %v719_v29 = vpop.permute.xlu1 %718 }
 0x1ff   :  { %v7709_v30 = vpop.eup %7708  ;;  %v737_v31 = vadd.f32 %v721_v27, %v8669_v11  ;;  %v736_v32 = vadd.f32 %v719_v29, %v8664_v2 }
 0x200   :  { %v7711_v33 = vpop.eup %7710  ;;  %766 = vrot.lane.b32.xlu0 %v7709_v30, %s8430_s4 }
 0x201   :  { %7720 = vtanh.f32 %v737_v31  ;;  %471 = vrot.lane.b32.xlu1 %v7711_v33, %s8430_s4  ;;  %v447_v33 = vsub.f32 1.0, %v8704_v34 }
 0x202   :  { %7722 = vtanh.f32 %v736_v32 }
 0x203   :  { %v7713_v35 = vpop.eup %7712 }
 0x204   :  { %v7715_v36 = vpop.eup %7714  ;;  %768 = vrot.lane.b32.xlu0 %v7713_v35, %s8430_s4 }
 0x205   :  { %762 = vrot.lane.b32.xlu1 %v7715_v36, %s8430_s4 }
 0x207   :  { %v7717_v37 = vpop.eup %7716 }
 0x208   :  { %v7719_v17 = vpop.eup %7718  ;;  %772 = vrot.lane.b32.xlu0 %v7717_v37, %s8430_s4  ;;  %v494_v37 = vmul.f32 0.0, %v8695_v22  ;;  %v748_v22 = vsub.f32 1.0, %v8717_v50 }
 0x209   :  { %770 = vrot.lane.b32.xlu1 %v7719_v17, %s8430_s4  ;;  %v495_v17 = vmul.f32 0.0, %v8704_v34  ;;  %v496_v34 = vmul.f32 0.0, %v8713_v49 }
 0x20b   :  { %v7721_v38 = vpop.eup %7720 }
 0x20c   :  { %v7723_v39 = vpop.eup %7722  ;;  %776 = vrot.lane.b32.xlu0 %v7721_v38, %s8430_s4 }
 0x20d   :  { %774 = vrot.lane.b32.xlu1 %v7723_v39, %s8430_s4 }
 0x260   :  { %v462_v40 = vpop.permute.xlu0 %461 }
 0x261   :  { %v483_v45 = vmul.f32 %v462_v40, %v443_v43  ;;  %v747_v40 = vsub.f32 1.0, %v8709_v42 }
 0x262   :  { %v458_v41 = vpop.permute.xlu1 %457 }
 0x263   :  { %v481_v56 = vmul.f32 %v458_v41, %v441_v46  ;;  %v8785_v7 = vadd.f32 %v491_v52, %v483_v45  ;;  %v448_v41 = vsub.f32 1.0, %v8713_v49  ;;  %v794_v49 = vmul.f32 0.0, %v8725_v62 }
 0x264   :  { %v464_v44 = vpop.permute.xlu0 %463 }
 0x265   :  { %v484_v6 = vmul.f32 %v464_v44, %v444_v48  ;;  %v8792_v24 = vadd.f32 %v489_v12, %v481_v56  ;;  %v821_v29 = vrot.slane %v8785_v7, 6  ;;  %v749_v56 = vsub.f32 1.0, %v8721_v58 }
 0x266   :  { %v460_v51 = vpop.permute.xlu1 %459 }
 0x267   :  { %v482_v3 = vmul.f32 %v460_v51, %v442_v47  ;;  %v8796_v27 = vadd.f32 %v492_v19, %v484_v6  ;;  %v795_v47 = vmul.f32 0.0, %v8709_v42 }
 0x268   :  { %v468_v20 = vpop.permute.xlu0 %467 }
 0x269   :  { %v8788_v15 = vadd.f32 %v490_v61, %v482_v3  ;;  %v486_v31 = vmul.f32 %v468_v20, %v446_v8  ;;  %v824_v36 = vrot.slane %v8796_v27, 5  ;;  %v746_v61 = vsub.f32 1.0, %v8725_v62 }
 0x26a   :  { %v466_v23 = vpop.permute.xlu1 %465  ;;  %v796_v20 = vmul.f32 0.0, %v8717_v50 }
 0x26b   :  { %v818_v1 = vrot.slane %v8788_v15, 7  ;;  %v485_v25 = vmul.f32 %v466_v23, %v445_v16  ;;  %v8814_v43 = vadd.f32 %v494_v37, %v486_v31  ;;  %v797_v23 = vmul.f32 0.0, %v8721_v58 }
 0x26c   :  { %v799_v37 = vmul.f32 0.0, %v8731_v10 }
 0x26d   :  { %v820_v13 = vsel %vm819_vm2, %v818_v1, %v8792_v24  ;;  %v8804_v30 = vadd.f32 %v493_v60, %v485_v25  ;;  %v830_v16 = vrot.slane %v8814_v43, 3 }
 0x26e   :  { %v765_v32 = vpop.permute.xlu0 %764  ;;  %v823_v28 = vsel %vm822_vm3, %v821_v29, %v820_v13 }
 0x26f   :  { %v470_v35 = vpop.permute.xlu1 %469  ;;  %v827_v39 = vrot.slane %v8804_v30, 4  ;;  %v826_v46 = vsel %vm825_vm4, %v824_v36, %v823_v28  ;;  %v787_v51 = vmul.f32 %v765_v32, %v747_v40  ;;  %v750_v36 = vsub.f32 1.0, %v8727_v5 }
 0x270   :  { %v487_v38 = vmul.f32 %v470_v35, %v447_v33  ;;  %v751_v33 = vsub.f32 1.0, %v8731_v10 }
 0x271   :  { %v829_v12 = vsel %vm828_vm5, %v827_v39, %v826_v46  ;;  %v8832_v8 = vadd.f32 %v795_v47, %v787_v51  ;;  %v752_v51 = vsub.f32 1.0, %v8737_v18 }
 0x272   :  { %v8816_v44 = vadd.f32 %v495_v17, %v487_v38  ;;  %v767_v45 = vpop.permute.xlu0 %766  ;;  %v832_v13 = vsel %vm831_vm6, %v830_v16, %v829_v12 }
 0x273   :  { %v472_v48 = vpop.permute.xlu1 %471  ;;  %v788_v6 = vmul.f32 %v767_v45, %v748_v22  ;;  %11462 = vst [vmem:[#allocation9_spill] sm:$0xff] %v8832_v8  ;;  %v1153_v39 = vrot.slane %v8832_v8, 6 }
 0x274   :  { %v488_v52 = vmul.f32 %v472_v48, %v448_v41  ;;  %v833_v3 = vrot.slane %v8816_v44, 2  ;;  %v798_v41 = vmul.f32 0.0, %v8727_v5 }
 0x275   :  { %v8836_v32 = vadd.f32 %v796_v20, %v788_v6 }
 0x276   :  { %v8827_v42 = vadd.f32 %v496_v34, %v488_v52  ;;  %v769_v19 = vpop.permute.xlu0 %768  ;;  %v835_v62 = vsel %vm834_vm7, %v833_v3, %v832_v13  ;;  %v753_v52 = vsub.f32 1.0, %v8741_v21  ;;  %v800_v3 = vmul.f32 0.0, %v8737_v18 }
 0x277   :  { %v789_v60 = vmul.f32 %v769_v19, %v749_v56  ;;  %v763_v25 = vpop.permute.xlu1 %762  ;;  %11463 = vst [vmem:[#allocation10_spill] sm:$0xff] %v8836_v32  ;;  %v1155_v46 = vrot.slane %v8836_v32, 5 }
 0x278   :  { %11461 = vst [vmem:[#allocation8_spill] sm:$0xff] %v8827_v42  ;;  %v786_v29 = vmul.f32 %v763_v25, %v746_v61  ;;  %v836_v31 = vrot.slane %v8827_v42, 1 }
 0x279   :  { %v8840_v28 = vadd.f32 %v797_v23, %v789_v60  ;;  %v801_v23 = vmul.f32 0.0, %v8741_v21 }
 0x27a   :  { %v8842_v50 = vadd.f32 %v794_v49, %v786_v29  ;;  %v773_v58 = vpop.permute.xlu0 %772  ;;  %v838_v35 = vsel %vm11450_vm8, %v836_v31, %v835_v62 }
 0x27b   :  { %11464 = vst [vmem:[#allocation11_spill] sm:$0xff] %v8840_v28  ;;  %v791_v17 = vmul.f32 %v773_v58, %v751_v33  ;;  %839 = vrot.lane.b32.xlu1 %v838_v35, %s8430_s4  ;;  %v771_v38 = vpop.permute.xlu1 %770  ;;  %v1157_v22 = vrot.slane %v8840_v28, 4 }
 0x27c   :  { %11465 = vst [vmem:[#allocation12_spill] sm:$0xff] %v8842_v50  ;;  %v1152_v40 = vrot.slane %v8842_v50, 7  ;;  %v790_v45 = vmul.f32 %v771_v38, %v750_v36 }
 0x27d   :  { %v8852_v47 = vadd.f32 %v799_v37, %v791_v17 }
 0x27e   :  { %v1154_v34 = vsel %vm819_vm2, %v1153_v39, %v1152_v40  ;;  %v8856_v10 = vadd.f32 %v798_v41, %v790_v45  ;;  %v777_v48 = vpop.permute.xlu0 %776 }
 0x27f   :  { %11466 = vst [vmem:[#allocation13_spill] sm:$0xff] %v8852_v47  ;;  %v775_v56 = vpop.permute.xlu1 %774  ;;  %v1156_v61 = vsel %vm822_vm3, %v1155_v46, %v1154_v34  ;;  %v1161_v16 = vrot.slane %v8852_v47, 2  ;;  %v793_v19 = vmul.f32 %v777_v48, %v753_v52 }
 0x280   :  { %11467 = vst [vmem:[#allocation14_spill] sm:$0xff] %v8856_v10  ;;  %v1159_v5 = vrot.slane %v8856_v10, 3  ;;  %v792_v6 = vmul.f32 %v775_v56, %v752_v51  ;;  %v1158_v12 = vsel %vm825_vm4, %v1157_v22, %v1156_v61 }
 0x281   :  { %v8870_v25 = vadd.f32 %v801_v23, %v793_v19 }
 0x282   :  { %v8865_v49 = vadd.f32 %v800_v3, %v792_v6  ;;  %v1160_v20 = vsel %vm828_vm5, %v1159_v5, %v1158_v12 }
 0x283   :  { %11469 = vst [vmem:[#allocation16_spill] sm:$0xff] %v8870_v25  ;;  %v1162_v29 = vsel %vm831_vm6, %v1161_v16, %v1160_v20 }
 0x284   :  { %11468 = vst [vmem:[#allocation15_spill] sm:$0xff] %v8865_v49  ;;  %v1163_v60 = vrot.slane %v8865_v49, 1 }
 0x286   :  { %v1164_v18 = vsel %vm834_vm7, %v1163_v60, %v1162_v29 }
 0x287   :  { %v1165_v13 = vsel %vm11450_vm8, %v8870_v25, %v1164_v18 }
 0x288   :  { %1166 = vrot.lane.b32.xlu0 %v1165_v13, %s8431_s20 }
 0x2ed   :  { %v840_v31 = vpop.permute.xlu1 %839 }
 0x2ee   :  { %7339 = vmatmul.mubr.msk.f32.vlgmr.msra.gmra.mrb[4].mxu1 %vm215_vm9, %v840_v31 }
 0x2ef   :  { %7551 = vmatpush3.bf16.msra.mxu1 %v8557_v14  ;;  %7345 = vmatprep.mubr.msk.f32.mxu1 %vm8423_vm0, %v11372_v4 }
 0x2f0   :  { %7552 = vmatprep.subr.bf16.mxu1 %v11369_v0 }
 0x2fa   :  { %v1167_v21 = vpop.permute.xlu0 %1166 }
 0x2fb   :  { %7346 = vmatmul.mubr.msk.f32.vlgmr.msra.gmra.mrb[6].mxu1 %vm215_vm9, %v1167_v21 }
 0x2fc   :  { %7554 = vmatpush3.bf16.msra.mxu1 %v8544_v9  ;;  %7352 = vmatprep.mubr.msk.f32.mxu1 %vm8423_vm0, %v11372_v4 }
 0x2fd   :  { %7558 = vmatprep.subr.bf16.mxu1 %v11369_v0 }
 0x3c1   :  { %v8889_v33 = vpop.f32.mrb[4].mxu1 }
 0x3c2   :  { %v7340_v62 = vpop.f32.mrb[5].mxu1 }
 0x3ce   :  { %v1236_v58 = vpop.f32.mrb[6].mxu1 }
 0x3cf   :  { %v1237_v35 = vadd.f32 %v1236_v58, %v8609_v26  ;;  %v7347_v36 = vpop.f32.mrb[7].mxu1 }
 0x3d1   :  { %v1242_v37 = vrot.slane %v1237_v35, 3  ;;  %v1241_v17 = vrot.slane %v1237_v35, 2  ;;  %v1244_v38 = vrot.slane %v1237_v35, 5  ;;  %v1243_v39 = vrot.slane %v1237_v35, 4 }
 0x3d2   :  { %v1246_v40 = vrot.slane %v1237_v35, 7  ;;  %v1245_v41 = vrot.slane %v1237_v35, 6  ;;  %v1247_v45 = vrot.slane %v1237_v35, 1 }
 0x3d3   :  { %1250 = vrot.lane.b32.xlu0 %v1242_v37, %s8427_s0  ;;  %1248 = vrot.lane.b32.xlu1 %v1241_v17, %s8427_s0 }
 0x3d7   :  { %1254 = vrot.lane.b32.xlu0 %v1244_v38, %s8427_s0  ;;  %1252 = vrot.lane.b32.xlu1 %v1243_v39, %s8427_s0 }
 0x3db   :  { %1258 = vrot.lane.b32.xlu0 %v1246_v40, %s8427_s0  ;;  %1256 = vrot.lane.b32.xlu1 %v1245_v41, %s8427_s0 }
 0x3df   :  { %1260 = vrot.lane.b32.xlu0 %v1237_v35, %s8427_s0  ;;  %1262 = vrot.lane.b32.xlu1 %v1247_v45, %s8427_s0 }
 0x3e3   :  { %1330 = vrot.lane.b32.xlu0 %v1242_v37, %s8428_s30  ;;  %1328 = vrot.lane.b32.xlu1 %v1241_v17, %s8428_s30 }
 0x3e7   :  { %1334 = vrot.lane.b32.xlu0 %v1244_v38, %s8428_s30  ;;  %1332 = vrot.lane.b32.xlu1 %v1243_v39, %s8428_s30 }
 0x3eb   :  { %1338 = vrot.lane.b32.xlu0 %v1246_v40, %s8428_s30  ;;  %1336 = vrot.lane.b32.xlu1 %v1245_v41, %s8428_s30 }
 0x3ef   :  { %1340 = vrot.lane.b32.xlu0 %v1237_v35, %s8428_s30  ;;  %1342 = vrot.lane.b32.xlu1 %v1247_v45, %s8428_s30 }
 0x445   :  { %v1251_v46 = vpop.permute.xlu0 %1250  ;;  %v1249_v22 = vpop.permute.xlu1 %1248 }
 0x446   :  { %v1273_v34 = vadd.f32 %v1251_v46, %v8647_v53  ;;  %v1272_v48 = vadd.f32 %v1249_v22, %v8651_v55 }
 0x448   :  { %v7056_v51 = vmul.f32 -1.442695, %v1273_v34  ;;  %v7055_v52 = vmul.f32 -1.442695, %v1272_v48 }
 0x449   :  { %v1255_v56 = vpop.permute.xlu0 %1254  ;;  %v1253_v61 = vpop.permute.xlu1 %1252 }
 0x44a   :  { %7724 = vpow2.f32 %v7056_v51  ;;  %v1275_v5 = vadd.f32 %v1255_v56, %v8654_v57  ;;  %v1274_v3 = vadd.f32 %v1253_v61, %v8649_v54 }
 0x44b   :  { %7726 = vpow2.f32 %v7055_v52 }
 0x44c   :  { %v7058_v6 = vmul.f32 -1.442695, %v1275_v5  ;;  %v7057_v12 = vmul.f32 -1.442695, %v1274_v3 }
 0x44d   :  { %v1259_v16 = vpop.permute.xlu0 %1258  ;;  %v1257_v19 = vpop.permute.xlu1 %1256 }
 0x44e   :  { %7728 = vpow2.f32 %v7058_v6  ;;  %v1277_v20 = vadd.f32 %v1259_v16, %v8657_v59  ;;  %v1276_v23 = vadd.f32 %v1257_v19, %v8662_v63 }
 0x44f   :  { %7730 = vpow2.f32 %v7057_v12 }
 0x450   :  { %v7060_v29 = vmul.f32 -1.442695, %v1277_v20  ;;  %v7059_v18 = vmul.f32 -1.442695, %v1276_v23 }
 0x451   :  { %v1261_v13 = vpop.permute.xlu0 %1260  ;;  %v1263_v31 = vpop.permute.xlu1 %1262 }
 0x452   :  { %7732 = vpow2.f32 %v7060_v29  ;;  %v1278_v21 = vadd.f32 %v1261_v13, %v8664_v2  ;;  %v1279_v62 = vadd.f32 %v1263_v31, %v8669_v11 }
 0x453   :  { %7734 = vpow2.f32 %v7059_v18 }
 0x454   :  { %v7725_v58 = vpop.eup %7724  ;;  %v7061_v35 = vmul.f32 -1.442695, %v1278_v21  ;;  %v7062_v17 = vmul.f32 -1.442695, %v1279_v62 }
 0x455   :  { %v7727_v36 = vpop.eup %7726  ;;  %v1305_v37 = vadd.f32 1.0, %v7725_v58  ;;  %v1331_v46 = vpop.permute.xlu0 %1330 }
 0x456   :  { %v1304_v38 = vadd.f32 1.0, %v7727_v36  ;;  %7736 = vpow2.f32 %v7061_v35  ;;  %v1329_v52 = vpop.permute.xlu1 %1328 }
 0x457   :  { %7738 = vrcp.f32 %v1305_v37 }
 0x458   :  { %v7729_v39 = vpop.eup %7728  ;;  %7740 = vrcp.f32 %v1304_v38 }
 0x459   :  { %v7731_v40 = vpop.eup %7730  ;;  %v1307_v41 = vadd.f32 1.0, %v7729_v39  ;;  %7742 = vpow2.f32 %v7062_v17  ;;  %v1335_v3 = vpop.permute.xlu0 %1334 }
 0x45a   :  { %v1306_v45 = vadd.f32 1.0, %v7731_v40  ;;  %v1333_v23 = vpop.permute.xlu1 %1332 }
 0x45b   :  { %7744 = vrcp.f32 %v1307_v41 }
 0x45c   :  { %v7733_v22 = vpop.eup %7732  ;;  %7746 = vrcp.f32 %v1306_v45 }
 0x45d   :  { %v7735_v34 = vpop.eup %7734  ;;  %v1309_v48 = vadd.f32 1.0, %v7733_v22  ;;  %v1339_v21 = vpop.permute.xlu0 %1338 }
 0x45e   :  { %v1308_v51 = vadd.f32 1.0, %v7735_v34  ;;  %v1337_v36 = vpop.permute.xlu1 %1336 }
 0x45f   :  { %7748 = vrcp.f32 %v1309_v48 }
 0x460   :  { %v7737_v56 = vpop.eup %7736  ;;  %7750 = vrcp.f32 %v1308_v51 }
 0x461   :  { %v8916_v61 = vpop.eup %7738  ;;  %v1310_v5 = vadd.f32 1.0, %v7737_v56  ;;  %v1341_v38 = vpop.permute.xlu0 %1340 }
 0x462   :  { %v8918_v6 = vpop.eup %7740  ;;  %v1353_v12 = vmul.f32 %v8916_v61, %v1331_v46  ;;  %v1343_v41 = vpop.permute.xlu1 %1342 }
 0x463   :  { %v7743_v16 = vpop.eup %7742  ;;  %7752 = vrcp.f32 %v1310_v5  ;;  %v1352_v19 = vmul.f32 %v8918_v6, %v1329_v52 }
 0x464   :  { %v1311_v20 = vadd.f32 1.0, %v7743_v16  ;;  %1370 = vrot.lane.b32.xlu0 %v1353_v12, %s8429_s6 }
 0x465   :  { %v8923_v29 = vpop.eup %7744  ;;  %1368 = vrot.lane.b32.xlu1 %v1352_v19, %s8429_s6 }
 0x466   :  { %v8926_v18 = vpop.eup %7746  ;;  %7754 = vrcp.f32 %v1311_v20  ;;  %v1355_v13 = vmul.f32 %v8923_v29, %v1335_v3 }
 0x467   :  { %v1354_v31 = vmul.f32 %v8926_v18, %v1333_v23 }
 0x468   :  { %1374 = vrot.lane.b32.xlu0 %v1355_v13, %s8429_s6 }
 0x469   :  { %v8931_v62 = vpop.eup %7748  ;;  %1372 = vrot.lane.b32.xlu1 %v1354_v31, %s8429_s6 }
 0x46a   :  { %v8934_v58 = vpop.eup %7750  ;;  %v1357_v35 = vmul.f32 %v8931_v62, %v1339_v21 }
 0x46b   :  { %v1356_v37 = vmul.f32 %v8934_v58, %v1337_v36 }
 0x46c   :  { %1378 = vrot.lane.b32.xlu0 %v1357_v35, %s8429_s6 }
 0x46d   :  { %v8939_v17 = vpop.eup %7752  ;;  %1376 = vrot.lane.b32.xlu1 %v1356_v37, %s8429_s6 }
 0x46e   :  { %v1358_v39 = vmul.f32 %v8939_v17, %v1341_v38 }
 0x470   :  { %v8943_v40 = vpop.eup %7754  ;;  %1380 = vrot.lane.b32.xlu0 %v1358_v39, %s8429_s6 }
 0x471   :  { %v1359_v45 = vmul.f32 %v8943_v40, %v1343_v41  ;;  %v8965_v41 = vld [vmem:[%s11352_s7] ss:$0 sm:$0xff] }
 0x473   :  { %1382 = vrot.lane.b32.xlu1 %v1359_v45, %s8429_s6  ;;  %v910_v45 = vadd.f32 %v8965_v41, %v8889_v33 }
 0x475   :  { %v917_v33 = vrot.slane %v910_v45, 3 }
 0x4d6   :  { %v1371_v46 = vpop.permute.xlu0 %1370 }
 0x4d7   :  { %v1393_v22 = vadd.f32 %v1371_v46, %v8647_v53  ;;  %v1369_v34 = vpop.permute.xlu1 %1368 }
 0x4d8   :  { %v1392_v48 = vadd.f32 %v1369_v34, %v8651_v55  ;;  %v915_v34 = vrot.slane %v910_v45, 1 }
 0x4d9   :  { %7756 = vtanh.f32 %v1393_v22 }
 0x4da   :  { %7758 = vtanh.f32 %v1392_v48  ;;  %v1375_v51 = vpop.permute.xlu0 %1374  ;;  %v914_v48 = vrot.slane %v910_v45, 7 }
 0x4db   :  { %v1395_v52 = vadd.f32 %v1375_v51, %v8654_v57  ;;  %v1373_v56 = vpop.permute.xlu1 %1372  ;;  %v916_v51 = vrot.slane %v910_v45, 2 }
 0x4dc   :  { %v1394_v5 = vadd.f32 %v1373_v56, %v8649_v54  ;;  %v920_v56 = vrot.slane %v910_v45, 6 }
 0x4dd   :  { %7760 = vtanh.f32 %v1395_v52  ;;  %v918_v52 = vrot.slane %v910_v45, 4 }
 0x4de   :  { %7762 = vtanh.f32 %v1394_v5  ;;  %v1379_v3 = vpop.permute.xlu0 %1378  ;;  %v919_v5 = vrot.slane %v910_v45, 5 }
 0x4df   :  { %v1397_v12 = vadd.f32 %v1379_v3, %v8657_v59  ;;  %v1377_v16 = vpop.permute.xlu1 %1376  ;;  %v929_v3 = vadd.f32 %v914_v48, %v8651_v55 }
 0x4e0   :  { %v1396_v19 = vadd.f32 %v1377_v16, %v8662_v63 }
 0x4e1   :  { %7764 = vtanh.f32 %v1397_v12  ;;  %v930_v12 = vadd.f32 %v910_v45, %v8647_v53  ;;  %v7046_v16 = vmul.f32 -1.442695, %v929_v3 }
 0x4e2   :  { %7766 = vtanh.f32 %v1396_v19  ;;  %v1381_v20 = vpop.permute.xlu0 %1380  ;;  %v931_v19 = vadd.f32 %v915_v34, %v8649_v54 }
 0x4e3   :  { %v7757_v23 = vpop.eup %7756  ;;  %v1398_v13 = vadd.f32 %v1381_v20, %v8664_v2  ;;  %v7047_v20 = vmul.f32 -1.442695, %v930_v12 }
 0x4e4   :  { %v7759_v31 = vpop.eup %7758  ;;  %1426 = vrot.lane.b32.xlu0 %v7757_v23, %s8430_s4  ;;  %v933_v23 = vadd.f32 %v917_v33, %v8662_v63 }
 0x4e5   :  { %7768 = vtanh.f32 %v1398_v13  ;;  %v1383_v21 = vpop.permute.xlu1 %1382  ;;  %1424 = vrot.lane.b32.xlu1 %v7759_v31, %s8430_s4  ;;  %v7048_v13 = vmul.f32 -1.442695, %v931_v19  ;;  %v932_v31 = vadd.f32 %v916_v51, %v8654_v57 }
 0x4e6   :  { %v1399_v35 = vadd.f32 %v1383_v21, %v8669_v11  ;;  %v7050_v21 = vmul.f32 -1.442695, %v933_v23  ;;  %v1458_v23 = vrot.slane %v8836_v32, 1 }
 0x4e7   :  { %v7761_v36 = vpop.eup %7760 }
 0x4e8   :  { %v7763_v37 = vpop.eup %7762  ;;  %7770 = vtanh.f32 %v1399_v35  ;;  %1430 = vrot.lane.b32.xlu0 %v7761_v36, %s8430_s4  ;;  %v935_v35 = vadd.f32 %v919_v5, %v8664_v2  ;;  %v7049_v36 = vmul.f32 -1.442695, %v932_v31 }
 0x4e9   :  { %1428 = vrot.lane.b32.xlu1 %v7763_v37, %s8430_s4  ;;  %7772 = vpow2.f32 %v7046_v16  ;;  %v934_v37 = vadd.f32 %v918_v52, %v8657_v59 }
 0x4ea   :  { %7774 = vpow2.f32 %v7047_v20  ;;  %v1411_v20 = vsub.f32 1.0, %v8923_v29 }
 0x4eb   :  { %v7765_v38 = vpop.eup %7764  ;;  %7776 = vpow2.f32 %v7048_v13 }
 0x4ec   :  { %v7767_v39 = vpop.eup %7766  ;;  %1434 = vrot.lane.b32.xlu0 %v7765_v38, %s8430_s4  ;;  %v1409_v38 = vsub.f32 1.0, %v8916_v61  ;;  %7778 = vpow2.f32 %v7050_v21 }
 0x4ed   :  { %1432 = vrot.lane.b32.xlu1 %v7767_v39, %s8430_s4  ;;  %v1457_v39 = vrot.slane %v8832_v8, 1  ;;  %7780 = vpow2.f32 %v7049_v36 }
 0x4ef   :  { %v7769_v46 = vpop.eup %7768 }
 0x4f0   :  { %1436 = vrot.lane.b32.xlu0 %v7769_v46, %s8430_s4  ;;  %v936_v46 = vadd.f32 %v920_v56, %v8669_v11 }
 0x4f2   :  { %v7771_v22 = vpop.eup %7770  ;;  %v7053_v13 = vmul.f32 -1.442695, %v936_v46  ;;  %v1460_v46 = vrot.slane %v8856_v10, 1 }
 0x4f3   :  { %1438 = vrot.lane.b32.xlu1 %v7771_v22, %s8430_s4  ;;  %v7052_v22 = vmul.f32 -1.442695, %v935_v35 }
 0x4f4   :  { %989 = vrot.lane.b32.xlu0 %v915_v34, %s8426_s3 }
 0x4f5   :  { %7782 = vpow2.f32 %v7052_v22 }
 0x4f7   :  { %985 = vrot.lane.b32.xlu1 %v914_v48, %s8426_s3  ;;  %v1408_v48 = vsub.f32 1.0, %v8918_v6 }
 0x4f8   :  { %991 = vrot.lane.b32.xlu0 %v916_v51, %s8426_s3  ;;  %v7051_v51 = vmul.f32 -1.442695, %v934_v37 }
 0x4fa   :  { %7784 = vpow2.f32 %v7051_v51  ;;  %v1413_v51 = vsub.f32 1.0, %v8931_v62 }
 0x4fb   :  { %987 = vrot.lane.b32.xlu1 %v910_v45, %s8426_s3  ;;  %v1456_v45 = vrot.slane %v8842_v50, 1  ;;  %7786 = vpow2.f32 %v7053_v13 }
 0x4fc   :  { %995 = vrot.lane.b32.xlu0 %v918_v52, %s8426_s3  ;;  %v7773_v52 = vpop.eup %7772 }
 0x4fd   :  { %v1471_v12 = vmul.f32 %v8918_v6, %v1456_v45  ;;  %v7775_v35 = vpop.eup %7774  ;;  %v961_v36 = vadd.f32 1.0, %v7773_v52 }
 0x4fe   :  { %v7777_v22 = vpop.eup %7776  ;;  %v962_v52 = vadd.f32 1.0, %v7775_v35  ;;  %v1414_v35 = vsub.f32 1.0, %v8939_v17 }
 0x4ff   :  { %993 = vrot.lane.b32.xlu1 %v917_v33, %s8426_s3  ;;  %v1472_v33 = vmul.f32 %v8916_v61, %v1457_v39  ;;  %v1410_v61 = vsub.f32 1.0, %v8926_v18  ;;  %v1473_v39 = vmul.f32 %v8926_v18, %v1458_v23  ;;  %v1412_v18 = vsub.f32 1.0, %v8934_v58 }
 0x500   :  { %999 = vrot.lane.b32.xlu0 %v920_v56, %s8426_s3  ;;  %v1459_v56 = vrot.slane %v8840_v28, 1  ;;  %7788 = vrcp.f32 %v961_v36  ;;  %v963_v23 = vadd.f32 1.0, %v7777_v22 }
 0x501   :  { %7790 = vrcp.f32 %v962_v52 }
 0x502   :  { %v1474_v6 = vmul.f32 %v8923_v29, %v1459_v56  ;;  %v7779_v56 = vpop.eup %7778  ;;  %7792 = vrcp.f32 %v963_v23 }
 0x503   :  { %997 = vrot.lane.b32.xlu1 %v919_v5, %s8426_s3  ;;  %v965_v22 = vadd.f32 1.0, %v7779_v56 }
 0x505   :  { %7794 = vrcp.f32 %v965_v22 }
 0x556   :  { %v1427_v34 = vpop.permute.xlu0 %1426 }
 0x557   :  { %v1449_v5 = vmul.f32 %v1427_v34, %v1409_v38  ;;  %v1425_v3 = vpop.permute.xlu1 %1424  ;;  %v1461_v34 = vrot.slane %v8852_v47, 1 }
 0x558   :  { %v1448_v16 = vmul.f32 %v1425_v3, %v1408_v48 }
 0x559   :  { %v8993_v19 = vadd.f32 %v1472_v33, %v1449_v5 }
 0x55a   :  { %v8998_v31 = vadd.f32 %v1471_v12, %v1448_v16  ;;  %v1431_v21 = vpop.permute.xlu0 %1430  ;;  %v1476_v12 = vmul.f32 %v8931_v62, %v1461_v34  ;;  %v1462_v34 = vrot.slane %v8870_v25, 1 }
 0x55b   :  { %11470 = vst [vmem:[#allocation17_spill] sm:$0xff] %v8993_v19  ;;  %v1451_v37 = vmul.f32 %v1431_v21, %v1411_v20  ;;  %v1429_v38 = vpop.permute.xlu1 %1428  ;;  %v1823_v48 = vrot.slane %v8993_v19, 5 }
 0x55c   :  { %11471 = vst [vmem:[#allocation18_spill] sm:$0xff] %v8998_v31  ;;  %v1450_v45 = vmul.f32 %v1429_v38, %v1410_v61  ;;  %v1822_v33 = vrot.slane %v8998_v31, 6  ;;  %v1475_v61 = vmul.f32 %v8934_v58, %v1460_v46  ;;  %v1477_v46 = vmul.f32 %v8939_v17, %v1163_v60 }
 0x55d   :  { %v9007_v5 = vadd.f32 %v1474_v6, %v1451_v37  ;;  %v7781_v37 = vpop.eup %7780  ;;  %v1478_v56 = vmul.f32 %v8943_v40, %v1462_v34 }
 0x55e   :  { %v9010_v29 = vadd.f32 %v1473_v39, %v1450_v45  ;;  %v1435_v3 = vpop.permute.xlu0 %1434  ;;  %v1824_v13 = vsel %vm819_vm2, %v1823_v48, %v1822_v33  ;;  %v7783_v33 = vpop.eup %7782 }
 0x55f   :  { %11472 = vst [vmem:[#allocation19_spill] sm:$0xff] %v9007_v5  ;;  %v1453_v16 = vmul.f32 %v1435_v3, %v1413_v51  ;;  %v1433_v20 = vpop.permute.xlu1 %1432  ;;  %v1827_v38 = vrot.slane %v9007_v5, 3  ;;  %v964_v51 = vadd.f32 1.0, %v7781_v37  ;;  %v967_v17 = vadd.f32 1.0, %v7783_v33 }
 0x560   :  { %11473 = vst [vmem:[#allocation20_spill] sm:$0xff] %v9010_v29  ;;  %v1825_v21 = vrot.slane %v9010_v29, 4  ;;  %v1452_v6 = vmul.f32 %v1433_v20, %v1412_v18  ;;  %v1415_v18 = vsub.f32 1.0, %v8943_v40 }
 0x561   :  { %v9018_v39 = vadd.f32 %v1476_v12, %v1453_v16  ;;  %v7785_v12 = vpop.eup %7784  ;;  %7796 = vrcp.f32 %v964_v51 }
 0x562   :  { %v1826_v62 = vsel %vm822_vm3, %v1825_v21, %v1824_v13  ;;  %v9022_v36 = vadd.f32 %v1475_v61, %v1452_v6  ;;  %v1437_v45 = vpop.permute.xlu0 %1436  ;;  %v7787_v6 = vpop.eup %7786  ;;  %v966_v37 = vadd.f32 1.0, %v7785_v12  ;;  %7798 = vrcp.f32 %v967_v17 }
 0x563   :  { %11474 = vst [vmem:[#allocation21_spill] sm:$0xff] %v9018_v39  ;;  %v11368_v58 = vrot.slane %v9018_v39, 1  ;;  %v1454_v48 = vmul.f32 %v1437_v45, %v1414_v35  ;;  %v1828_v52 = vsel %vm825_vm4, %v1827_v38, %v1826_v62  ;;  %v9041_v35 = vpop.eup %7788  ;;  %v968_v22 = vadd.f32 1.0, %v7787_v6 }
 0x564   :  { %11475 = vst [vmem:[#allocation22_spill] sm:$0xff] %v9022_v36  ;;  %v1829_v3 = vrot.slane %v9022_v36, 2  ;;  %v9047_v34 = vpop.eup %7790  ;;  %7800 = vrcp.f32 %v966_v37 }
 0x565   :  { %v9031_v16 = vadd.f32 %v1477_v46, %v1454_v48  ;;  %v1439_v20 = vpop.permute.xlu1 %1438  ;;  %v9052_v51 = vpop.eup %7792  ;;  %7802 = vrcp.f32 %v968_v22 }
 0x566   :  { %v1455_v21 = vmul.f32 %v1439_v20, %v1415_v18  ;;  %v990_v61 = vpop.permute.xlu0 %989  ;;  %v1830_v60 = vsel %vm828_vm5, %v1829_v3, %v1828_v52  ;;  %v9057_v12 = vpop.eup %7794 }
 0x567   :  { %11476 = vst [vmem:[#allocation23_spill] sm:$0xff] %v9031_v16  ;;  %v1832_v23 = vsel %vm831_vm6, %v11368_v58, %v1830_v60  ;;  %v1011_v18 = vmul.f32 %v9052_v51, %v990_v61 }
 0x568   :  { %v9039_v13 = vadd.f32 %v1478_v56, %v1455_v21  ;;  %v1833_v40 = vsel %vm834_vm7, %v9031_v16, %v1832_v23 }
 0x569   :  { %v986_v38 = vpop.permute.xlu1 %985 }
 0x56a   :  { %11477 = vst [vmem:[#allocation24_spill] sm:$0xff] %v9039_v13  ;;  %v1009_v62 = vmul.f32 %v9041_v35, %v986_v38  ;;  %v1834_v45 = vrot.slane %v9039_v13, 7  ;;  %v992_v46 = vpop.permute.xlu0 %991 }
 0x56b   :  { %v9060_v52 = vpop.eup %7796 }
 0x56c   :  { %1025 = vrot.lane.b32.xlu0 %v1009_v62, %s8429_s6  ;;  %v1835_v48 = vsel %vm11450_vm8, %v1834_v45, %v1833_v40  ;;  %v1012_v60 = vmul.f32 %v9060_v52, %v992_v46  ;;  %v9065_v17 = vpop.eup %7798 }
 0x56d   :  { %1836 = vrot.lane.b32.xlu1 %v1835_v48, %s8431_s20  ;;  %v988_v33 = vpop.permute.xlu1 %987 }
 0x56e   :  { %v1010_v3 = vmul.f32 %v9047_v34, %v988_v33  ;;  %v996_v56 = vpop.permute.xlu0 %995  ;;  %v9068_v23 = vpop.eup %7800 }
 0x56f   :  { %v1014_v37 = vmul.f32 %v9068_v23, %v996_v56  ;;  %v9074_v40 = vpop.eup %7802 }
 0x570   :  { %1027 = vrot.lane.b32.xlu0 %v1010_v3, %s8429_s6 }
 0x571   :  { %1029 = vrot.lane.b32.xlu1 %v1011_v18, %s8429_s6  ;;  %v994_v20 = vpop.permute.xlu1 %993 }
 0x572   :  { %v1013_v21 = vmul.f32 %v9057_v12, %v994_v20  ;;  %v1000_v38 = vpop.permute.xlu0 %999 }
 0x573   :  { %v1016_v62 = vmul.f32 %v9074_v40, %v1000_v38 }
 0x574   :  { %1033 = vrot.lane.b32.xlu0 %v1013_v21, %s8429_s6 }
 0x575   :  { %1031 = vrot.lane.b32.xlu1 %v1012_v60, %s8429_s6  ;;  %v998_v61 = vpop.permute.xlu1 %997 }
 0x576   :  { %v1015_v6 = vmul.f32 %v9065_v17, %v998_v61 }
 0x578   :  { %1037 = vrot.lane.b32.xlu0 %v1015_v6, %s8429_s6 }
 0x579   :  { %1035 = vrot.lane.b32.xlu1 %v1014_v37, %s8429_s6 }
 0x57d   :  { %1039 = vrot.lane.b32.xlu1 %v1016_v62, %s8429_s6 }
 0x5de   :  { %v1026_v45 = vpop.permute.xlu0 %1025 }
 0x5df   :  { %v1049_v22 = vadd.f32 %v1026_v45, %v8651_v55  ;;  %v1837_v46 = vpop.permute.xlu1 %1836 }
 0x5e0   :  { %7360 = vmatmul.mubr.msk.f32.vlgmr.msra.gmra.mrb[8].mxu0 %vm215_vm9, %v1837_v46 }
 0x5e1   :  { %7804 = vtanh.f32 %v1049_v22  ;;  %7563 = vmatpush3.bf16.msra.mxu0 %v8557_v14  ;;  %7373 = vmatprep.mubr.msk.f32.mxu0 %vm8423_vm0, %v11372_v4 }
 0x5e2   :  { %v1028_v48 = vpop.permute.xlu0 %1027  ;;  %7567 = vmatprep.subr.bf16.mxu0 %v11369_v0  ;;  %v1068_v0 = vsub.f32 1.0, %v9060_v52 }
 0x5e3   :  { %v1050_v33 = vadd.f32 %v1028_v48, %v8647_v53  ;;  %v1030_v3 = vpop.permute.xlu1 %1029 }
 0x5e4   :  { %v1051_v18 = vadd.f32 %v1030_v3, %v8649_v54 }
 0x5e5   :  { %7806 = vtanh.f32 %v1050_v33 }
 0x5e6   :  { %7808 = vtanh.f32 %v1051_v18  ;;  %v1034_v20 = vpop.permute.xlu0 %1033 }
 0x5e7   :  { %v1053_v56 = vadd.f32 %v1034_v20, %v8662_v63  ;;  %v1032_v21 = vpop.permute.xlu1 %1031 }
 0x5e8   :  { %v1052_v60 = vadd.f32 %v1032_v21, %v8654_v57 }
 0x5e9   :  { %7810 = vtanh.f32 %v1053_v56 }
 0x5ea   :  { %7812 = vtanh.f32 %v1052_v60  ;;  %v1038_v61 = vpop.permute.xlu0 %1037  ;;  %v1065_v60 = vsub.f32 1.0, %v9041_v35 }
 0x5eb   :  { %v7805_v6 = vpop.eup %7804  ;;  %v1055_v37 = vadd.f32 %v1038_v61, %v8664_v2  ;;  %v1036_v38 = vpop.permute.xlu1 %1035  ;;  %v1114_v61 = vrot.slane %v8785_v7, 7 }
 0x5ec   :  { %v1054_v62 = vadd.f32 %v1036_v38, %v8657_v59  ;;  %1081 = vrot.lane.b32.xlu0 %v7805_v6, %s8430_s4  ;;  %v1113_v6 = vrot.slane %v8792_v24, 7  ;;  %v1066_v38 = vsub.f32 1.0, %v9047_v34 }
 0x5ed   :  { %7814 = vtanh.f32 %v1055_v37 }
 0x5ee   :  { %7816 = vtanh.f32 %v1054_v62 }
 0x5ef   :  { %v7807_v45 = vpop.eup %7806  ;;  %v1040_v22 = vpop.permute.xlu1 %1039 }
 0x5f0   :  { %v7809_v46 = vpop.eup %7808  ;;  %v1056_v48 = vadd.f32 %v1040_v22, %v8669_v11  ;;  %1083 = vrot.lane.b32.xlu0 %v7807_v45, %s8430_s4  ;;  %v1067_v45 = vsub.f32 1.0, %v9052_v51 }
 0x5f1   :  { %1085 = vrot.lane.b32.xlu1 %v7809_v46, %s8430_s4  ;;  %v1128_v46 = vmul.f32 %v9041_v35, %v1113_v6  ;;  %v1116_v35 = vrot.slane %v8804_v30, 7 }
 0x5f2   :  { %7818 = vtanh.f32 %v1056_v48 }
 0x5f3   :  { %v7811_v33 = vpop.eup %7810 }
 0x5f4   :  { %v7813_v3 = vpop.eup %7812  ;;  %1089 = vrot.lane.b32.xlu0 %v7811_v33, %s8430_s4  ;;  %v1130_v33 = vmul.f32 %v9052_v51, %v1114_v61 }
 0x5f5   :  { %1087 = vrot.lane.b32.xlu1 %v7813_v3, %s8430_s4 }
 0x5f7   :  { %v7815_v18 = vpop.eup %7814 }
 0x5f8   :  { %v7817_v20 = vpop.eup %7816  ;;  %1093 = vrot.lane.b32.xlu0 %v7815_v18, %s8430_s4  ;;  %v1069_v18 = vsub.f32 1.0, %v9057_v12 }
 0x5f9   :  { %1091 = vrot.lane.b32.xlu1 %v7817_v20, %s8430_s4  ;;  %v1115_v20 = vrot.slane %v8796_v27, 7 }
 0x5fc   :  { %v7819_v56 = vpop.eup %7818 }
 0x5fd   :  { %1095 = vrot.lane.b32.xlu1 %v7819_v56, %s8430_s4 }
 0x65e   :  { %v1082_v21 = vpop.permute.xlu0 %1081 }
 0x65f   :  { %v1105_v37 = vmul.f32 %v1082_v21, %v1065_v60  ;;  %v1129_v21 = vmul.f32 %v9047_v34, %v818_v1  ;;  %v1071_v1 = vsub.f32 1.0, %v9065_v17 }
 0x661   :  { %v9108_v56 = vadd.f32 %v1128_v46, %v1105_v37 }
 0x662   :  { %v1084_v62 = vpop.permute.xlu0 %1083 }
 0x663   :  { %v1086_v22 = vpop.permute.xlu1 %1085  ;;  %v1106_v48 = vmul.f32 %v1084_v62, %v1066_v38  ;;  %v1131_v38 = vmul.f32 %v9060_v52, %v1115_v20  ;;  %v1495_v34 = vrot.slane %v9108_v56, 1  ;;  %v1118_v52 = vrot.slane %v8816_v44, 7 }
 0x664   :  { %v1107_v3 = vmul.f32 %v1086_v22, %v1067_v45  ;;  %v1132_v45 = vmul.f32 %v9057_v12, %v1116_v35 }
 0x665   :  { %v9117_v61 = vadd.f32 %v1129_v21, %v1106_v48 }
 0x666   :  { %v9113_v60 = vadd.f32 %v1130_v33, %v1107_v3  ;;  %v1090_v58 = vpop.permute.xlu0 %1089  ;;  %v1070_v33 = vsub.f32 1.0, %v9068_v23 }
 0x667   :  { %v1109_v6 = vmul.f32 %v1090_v58, %v1069_v18  ;;  %v1088_v51 = vpop.permute.xlu1 %1087  ;;  %v1117_v58 = vrot.slane %v8814_v43, 7  ;;  %v1496_v12 = vsel %vm819_vm2, %v9117_v61, %v1495_v34 }
 0x668   :  { %v1108_v62 = vmul.f32 %v1088_v51, %v1068_v0  ;;  %v11371_v37 = vrot.slane %v9113_v60, 7  ;;  %v1134_v51 = vmul.f32 %v9065_v17, %v1118_v52 }
 0x669   :  { %v9128_v48 = vadd.f32 %v1132_v45, %v1109_v6  ;;  %v1133_v20 = vmul.f32 %v9068_v23, %v1117_v58 }
 0x66a   :  { %v9124_v22 = vadd.f32 %v1131_v38, %v1108_v62  ;;  %v1094_v46 = vpop.permute.xlu0 %1093  ;;  %v1498_v35 = vsel %vm822_vm3, %v11371_v37, %v1496_v12  ;;  %v1072_v38 = vsub.f32 1.0, %v9074_v40  ;;  %v1119_v62 = vrot.slane %v8827_v42, 7 }
 0x66b   :  { %v1111_v0 = vmul.f32 %v1094_v46, %v1071_v1  ;;  %v1092_v3 = vpop.permute.xlu1 %1091  ;;  %v1501_v1 = vrot.slane %v9128_v48, 5 }
 0x66c   :  { %v1499_v18 = vrot.slane %v9124_v22, 6  ;;  %v1110_v21 = vmul.f32 %v1092_v3, %v1070_v33  ;;  %v1135_v33 = vmul.f32 %v9074_v40, %v1119_v62 }
 0x66d   :  { %v9145_v34 = vadd.f32 %v1134_v51, %v1111_v0 }
 0x66e   :  { %v9139_v6 = vadd.f32 %v1133_v20, %v1110_v21  ;;  %v1500_v45 = vsel %vm825_vm4, %v1499_v18, %v1498_v35 }
 0x66f   :  { %v1096_v23 = vpop.permute.xlu1 %1095  ;;  %v1502_v17 = vsel %vm828_vm5, %v1501_v1, %v1500_v45  ;;  %v1505_v12 = vrot.slane %v9145_v34, 3 }
 0x670   :  { %v1503_v46 = vrot.slane %v9139_v6, 4  ;;  %v1112_v58 = vmul.f32 %v1096_v23, %v1072_v38 }
 0x672   :  { %v9150_v52 = vadd.f32 %v1135_v33, %v1112_v58  ;;  %v1504_v3 = vsel %vm831_vm6, %v1503_v46, %v1502_v17  ;;  %v11478_v58 = vmov 0.0|0.0  }
 0x673   :  { %v1506_v20 = vsel %vm834_vm7, %v1505_v12, %v1504_v3 }
 0x674   :  { %v1507_v18 = vrot.slane %v9150_v52, 2 }
 0x676   :  { %v1508_v0 = vsel %vm11450_vm8, %v1507_v18, %v1506_v20 }
 0x677   :  { %1509 = vrot.lane.b32.xlu0 %v1508_v0, %s8430_s4 }
 0x6b3   :  { %v1906_v21 = vpop.f32.mrb[8].mxu0 }
 0x6b4   :  { %v1907_v40 = vadd.f32 %v1906_v21, %v8609_v26  ;;  %v7361_v35 = vpop.f32.mrb[9].mxu0 }
 0x6b6   :  { %v1911_v51 = vrot.slane %v1907_v40, 3  ;;  %v1912_v38 = vrot.slane %v1907_v40, 4  ;;  %v1913_v62 = vrot.slane %v1907_v40, 5  ;;  %v1914_v45 = vrot.slane %v1907_v40, 6 }
 0x6b7   :  { %v1915_v1 = vrot.slane %v1907_v40, 7  ;;  %v1916_v23 = vrot.slane %v1907_v40, 1  ;;  %v1917_v46 = vrot.slane %v1907_v40, 2 }
 0x6b8   :  { %1918 = vrot.lane.b32.xlu1 %v1911_v51, %s8427_s0  ;;  %1920 = vrot.lane.b32.xlu0 %v1912_v38, %s8427_s0 }
 0x6bc   :  { %1922 = vrot.lane.b32.xlu1 %v1913_v62, %s8427_s0  ;;  %1924 = vrot.lane.b32.xlu0 %v1914_v45, %s8427_s0 }
 0x6c0   :  { %1926 = vrot.lane.b32.xlu1 %v1915_v1, %s8427_s0  ;;  %1930 = vrot.lane.b32.xlu0 %v1916_v23, %s8427_s0 }
 0x6c4   :  { %1928 = vrot.lane.b32.xlu1 %v1907_v40, %s8427_s0  ;;  %1932 = vrot.lane.b32.xlu0 %v1917_v46, %s8427_s0 }
 0x6c8   :  { %1998 = vrot.lane.b32.xlu1 %v1911_v51, %s8428_s30  ;;  %2000 = vrot.lane.b32.xlu0 %v1912_v38, %s8428_s30 }
 0x6cc   :  { %2002 = vrot.lane.b32.xlu1 %v1913_v62, %s8428_s30  ;;  %2004 = vrot.lane.b32.xlu0 %v1914_v45, %s8428_s30 }
 0x6d0   :  { %2006 = vrot.lane.b32.xlu1 %v1915_v1, %s8428_s30  ;;  %2010 = vrot.lane.b32.xlu0 %v1916_v23, %s8428_s30 }
 0x6d4   :  { %2008 = vrot.lane.b32.xlu1 %v1907_v40, %s8428_s30  ;;  %2012 = vrot.lane.b32.xlu0 %v1917_v46, %s8428_s30 }
 0x6e9   :  { %v1510_v33 = vpop.permute.xlu0 %1509 }
 0x6ea   :  { %7353 = vmatmul.mubr.msk.f32.vlgmr.msra.gmra.mrb[8].mxu1 %vm215_vm9, %v1510_v33 }
 0x6eb   :  { %7560 = vmatpush3.bf16.msra.mxu1 %v8544_v9  ;;  %7366 = vmatprep.mubr.msk.f32.mxu1 %vm8423_vm0, %v11372_v4 }
 0x6ec   :  { %7564 = vmatprep.subr.bf16.mxu1 %v11478_v58 }
 0x72a   :  { %v1921_v17 = vpop.permute.xlu0 %1920  ;;  %v1919_v3 = vpop.permute.xlu1 %1918 }
 0x72b   :  { %v1943_v12 = vadd.f32 %v1921_v17, %v8647_v53  ;;  %v1942_v18 = vadd.f32 %v1919_v3, %v8651_v55 }
 0x72d   :  { %v7074_v20 = vmul.f32 -1.442695, %v1943_v12  ;;  %v7073_v0 = vmul.f32 -1.442695, %v1942_v18 }
 0x72e   :  { %v1925_v21 = vpop.permute.xlu0 %1924  ;;  %v1923_v40 = vpop.permute.xlu1 %1922 }
 0x72f   :  { %7820 = vpow2.f32 %v7074_v20  ;;  %v1945_v35 = vadd.f32 %v1925_v21, %v8654_v57  ;;  %v1944_v51 = vadd.f32 %v1923_v40, %v8649_v54 }
 0x730   :  { %7822 = vpow2.f32 %v7073_v0 }
 0x731   :  { %v7076_v38 = vmul.f32 -1.442695, %v1945_v35  ;;  %v7075_v62 = vmul.f32 -1.442695, %v1944_v51 }
 0x732   :  { %v1931_v45 = vpop.permute.xlu0 %1930  ;;  %v1927_v1 = vpop.permute.xlu1 %1926 }
 0x733   :  { %7824 = vpow2.f32 %v7076_v38  ;;  %v1948_v23 = vadd.f32 %v1931_v45, %v8664_v2  ;;  %v1946_v46 = vadd.f32 %v1927_v1, %v8662_v63 }
 0x734   :  { %7826 = vpow2.f32 %v7075_v62 }
 0x735   :  { %v7079_v33 = vmul.f32 -1.442695, %v1948_v23  ;;  %v7077_v17 = vmul.f32 -1.442695, %v1946_v46 }
 0x736   :  { %v1933_v3 = vpop.permute.xlu0 %1932  ;;  %v1929_v12 = vpop.permute.xlu1 %1928 }
 0x737   :  { %7828 = vpow2.f32 %v7079_v33  ;;  %v1949_v18 = vadd.f32 %v1933_v3, %v8669_v11  ;;  %v1947_v20 = vadd.f32 %v1929_v12, %v8657_v59 }
 0x738   :  { %7830 = vpow2.f32 %v7077_v17 }
 0x739   :  { %v7821_v0 = vpop.eup %7820  ;;  %v7080_v21 = vmul.f32 -1.442695, %v1949_v18  ;;  %v7078_v51 = vmul.f32 -1.442695, %v1947_v20 }
 0x73a   :  { %v7823_v40 = vpop.eup %7822  ;;  %v1975_v35 = vadd.f32 1.0, %v7821_v0  ;;  %v2001_v46 = vpop.permute.xlu0 %2000 }
 0x73b   :  { %v1974_v38 = vadd.f32 1.0, %v7823_v40  ;;  %7832 = vpow2.f32 %v7080_v21  ;;  %v1999_v18 = vpop.permute.xlu1 %1998 }
 0x73c   :  { %7834 = vrcp.f32 %v1975_v35 }
 0x73d   :  { %v7825_v45 = vpop.eup %7824  ;;  %7836 = vrcp.f32 %v1974_v38 }
 0x73e   :  { %v7827_v62 = vpop.eup %7826  ;;  %v1977_v1 = vadd.f32 1.0, %v7825_v45  ;;  %7838 = vpow2.f32 %v7078_v51  ;;  %v2005_v40 = vpop.permute.xlu0 %2004 }
 0x73f   :  { %v1976_v23 = vadd.f32 1.0, %v7827_v62 }
 0x740   :  { %7840 = vrcp.f32 %v1977_v1  ;;  %v2003_v1 = vpop.permute.xlu1 %2002 }
 0x741   :  { %v7829_v33 = vpop.eup %7828  ;;  %7842 = vrcp.f32 %v1976_v23 }
 0x742   :  { %v7831_v3 = vpop.eup %7830  ;;  %v1980_v17 = vadd.f32 1.0, %v7829_v33 }
 0x743   :  { %v1978_v12 = vadd.f32 1.0, %v7831_v3 }
 0x744   :  { %7844 = vrcp.f32 %v1980_v17 }
 0x745   :  { %v7833_v0 = vpop.eup %7832  ;;  %7846 = vrcp.f32 %v1978_v12 }
 0x746   :  { %v9188_v20 = vpop.eup %7834  ;;  %v1981_v21 = vadd.f32 1.0, %v7833_v0 }
 0x747   :  { %v9190_v35 = vpop.eup %7836  ;;  %v2023_v51 = vmul.f32 %v9188_v20, %v2001_v46  ;;  %v2011_v46 = vpop.permute.xlu0 %2010 }
 0x748   :  { %v7839_v38 = vpop.eup %7838  ;;  %7848 = vrcp.f32 %v1981_v21  ;;  %v2022_v45 = vmul.f32 %v9190_v35, %v1999_v18  ;;  %v2007_v21 = vpop.permute.xlu1 %2006 }
 0x749   :  { %v1979_v62 = vadd.f32 1.0, %v7839_v38  ;;  %2040 = vrot.lane.b32.xlu0 %v2023_v51, %s8429_s6 }
 0x74a   :  { %v9195_v23 = vpop.eup %7840  ;;  %2038 = vrot.lane.b32.xlu1 %v2022_v45, %s8429_s6 }
 0x74b   :  { %v9198_v33 = vpop.eup %7842  ;;  %7850 = vrcp.f32 %v1979_v62  ;;  %v2025_v3 = vmul.f32 %v9195_v23, %v2005_v40  ;;  %v2013_v40 = vpop.permute.xlu0 %2012 }
 0x74c   :  { %v2024_v17 = vmul.f32 %v9198_v33, %v2003_v1  ;;  %v2009_v1 = vpop.permute.xlu1 %2008 }
 0x74d   :  { %2044 = vrot.lane.b32.xlu0 %v2025_v3, %s8429_s6 }
 0x74e   :  { %v9203_v12 = vpop.eup %7844  ;;  %2042 = vrot.lane.b32.xlu1 %v2024_v17, %s8429_s6 }
 0x74f   :  { %v9206_v18 = vpop.eup %7846  ;;  %v2028_v0 = vmul.f32 %v9203_v12, %v2011_v46 }
 0x750   :  { %v2026_v51 = vmul.f32 %v9206_v18, %v2007_v21 }
 0x751   :  { %2050 = vrot.lane.b32.xlu0 %v2028_v0, %s8429_s6 }
 0x752   :  { %v9211_v38 = vpop.eup %7848  ;;  %2046 = vrot.lane.b32.xlu1 %v2026_v51, %s8429_s6 }
 0x753   :  { %v2029_v45 = vmul.f32 %v9211_v38, %v2013_v40 }
 0x755   :  { %v9215_v62 = vpop.eup %7850  ;;  %2052 = vrot.lane.b32.xlu0 %v2029_v45, %s8429_s6 }
 0x756   :  { %v2027_v3 = vmul.f32 %v9215_v62, %v2009_v1 }
 0x758   :  { %2048 = vrot.lane.b32.xlu1 %v2027_v3, %s8429_s6 }
 0x7bb   :  { %v2041_v17 = vpop.permute.xlu0 %2040 }
 0x7bc   :  { %v2063_v46 = vadd.f32 %v2041_v17, %v8647_v53  ;;  %v2039_v0 = vpop.permute.xlu1 %2038 }
 0x7bd   :  { %v1579_v21 = vpop.f32.mrb[8].mxu1 }
 0x7be   :  { %7852 = vtanh.f32 %v2063_v46  ;;  %v7354_v37 = vpop.f32.mrb[9].mxu1 }
 0x7bf   :  { %v2045_v4 = vpop.permute.xlu0 %2044 }
 0x7c0   :  { %v2065_v51 = vadd.f32 %v2045_v4, %v8654_v57  ;;  %v2043_v40 = vpop.permute.xlu1 %2042  ;;  %v2062_v4 = vadd.f32 %v2039_v0, %v8651_v55 }
 0x7c2   :  { %7854 = vtanh.f32 %v2065_v51 }
 0x7c3   :  { %v2051_v25 = vpop.permute.xlu0 %2050 }
 0x7c4   :  { %v2068_v49 = vadd.f32 %v2051_v25, %v8664_v2  ;;  %v2047_v45 = vpop.permute.xlu1 %2046  ;;  %v1580_v25 = vadd.f32 %v8965_v41, %v1579_v21 }
 0x7c6   :  { %7856 = vtanh.f32 %v2068_v49  ;;  %v2064_v49 = vadd.f32 %v2043_v40, %v8649_v54  ;;  %v1588_v41 = vrot.slane %v1580_v25, 3  ;;  %v1601_v50 = vadd.f32 %v1580_v25, %v8649_v54 }
 0x7c7   :  { %v2053_v1 = vpop.permute.xlu0 %2052 }
 0x7c8   :  { %v7853_v47 = vpop.eup %7852  ;;  %v2069_v3 = vadd.f32 %v2053_v1, %v8669_v11 }
 0x7c9   :  { %2096 = vrot.lane.b32.xlu0 %v7853_v47, %s8430_s4  ;;  %v2066_v47 = vadd.f32 %v2047_v45, %v8662_v63  ;;  %v1590_v45 = vrot.slane %v1580_v25, 5 }
 0x7ca   :  { %7858 = vtanh.f32 %v2069_v3  ;;  %v2049_v17 = vpop.permute.xlu1 %2048 }
 0x7cb   :  { %v2067_v37 = vadd.f32 %v2049_v17, %v8657_v59  ;;  %v1585_v17 = vrot.slane %v1580_v25, 7 }
 0x7cc   :  { %v7855_v46 = vpop.eup %7854 }
 0x7cd   :  { %7860 = vtanh.f32 %v2067_v37  ;;  %2100 = vrot.lane.b32.xlu0 %v7855_v46, %s8430_s4  ;;  %v1584_v37 = vrot.slane %v1580_v25, 6  ;;  %v1586_v46 = vrot.slane %v1580_v25, 1 }
 0x7ce   :  { %7862 = vtanh.f32 %v2062_v4  ;;  %v1587_v4 = vrot.slane %v1580_v25, 2 }
 0x7cf   :  { %7864 = vtanh.f32 %v2064_v49  ;;  %v1600_v49 = vadd.f32 %v1585_v17, %v8647_v53 }
 0x7d0   :  { %v7857_v51 = vpop.eup %7856  ;;  %7866 = vtanh.f32 %v2066_v47  ;;  %v1599_v47 = vadd.f32 %v1584_v37, %v8651_v55  ;;  %v1603_v28 = vadd.f32 %v1587_v4, %v8662_v63 }
 0x7d1   :  { %2106 = vrot.lane.b32.xlu0 %v7857_v51, %s8430_s4  ;;  %v1589_v51 = vrot.slane %v1580_v25, 4 }
 0x7d4   :  { %v7859_v1 = vpop.eup %7858 }
 0x7d5   :  { %2108 = vrot.lane.b32.xlu0 %v7859_v1, %s8430_s4  ;;  %v7065_v1 = vmul.f32 -1.442695, %v1600_v49  ;;  %v7068_v49 = vmul.f32 -1.442695, %v1603_v28 }
 0x7d7   :  { %v7861_v3 = vpop.eup %7860  ;;  %7868 = vpow2.f32 %v7065_v1 }
 0x7d8   :  { %2104 = vrot.lane.b32.xlu1 %v7861_v3, %s8430_s4  ;;  %v7863_v0 = vpop.eup %7862 }
 0x7d9   :  { %1657 = vrot.lane.b32.xlu0 %v1585_v17, %s8426_s3  ;;  %v7865_v40 = vpop.eup %7864  ;;  %v1604_v17 = vadd.f32 %v1588_v41, %v8657_v59 }
 0x7da   :  { %v7867_v21 = vpop.eup %7866 }
 0x7db   :  { %v7069_v9 = vmul.f32 -1.442695, %v1604_v17  ;;  %v2127_v17 = vrot.slane %v8993_v19, 1 }
 0x7dc   :  { %2094 = vrot.lane.b32.xlu1 %v7863_v0, %s8430_s4  ;;  %v7064_v0 = vmul.f32 -1.442695, %v1599_v47  ;;  %v7066_v47 = vmul.f32 -1.442695, %v1601_v50 }
 0x7dd   :  { %1659 = vrot.lane.b32.xlu0 %v1580_v25, %s8426_s3 }
 0x7de   :  { %7870 = vpow2.f32 %v7064_v0 }
 0x7e0   :  { %2098 = vrot.lane.b32.xlu1 %v7865_v40, %s8430_s4  ;;  %v1602_v40 = vadd.f32 %v1586_v46, %v8654_v57 }
 0x7e1   :  { %1665 = vrot.lane.b32.xlu0 %v1588_v41, %s8426_s3  ;;  %v7869_v3 = vpop.eup %7868  ;;  %v2079_v41 = vsub.f32 1.0, %v9188_v20 }
 0x7e2   :  { %v1632_v10 = vadd.f32 1.0, %v7869_v3  ;;  %v7067_v32 = vmul.f32 -1.442695, %v1602_v40 }
 0x7e4   :  { %2102 = vrot.lane.b32.xlu1 %v7867_v21, %s8430_s4  ;;  %7872 = vrcp.f32 %v1632_v10 }
 0x7e5   :  { %1669 = vrot.lane.b32.xlu0 %v1590_v45, %s8426_s3  ;;  %7874 = vpow2.f32 %v7067_v32 }
 0x7e6   :  { %7876 = vpow2.f32 %v7068_v49  ;;  %v2126_v49 = vrot.slane %v8998_v31, 1 }
 0x7e7   :  { %7878 = vpow2.f32 %v7066_v47 }
 0x7e8   :  { %1655 = vrot.lane.b32.xlu1 %v1584_v37, %s8426_s3  ;;  %v1605_v37 = vadd.f32 %v1589_v51, %v8664_v2  ;;  %v7871_v0 = vpop.eup %7870  ;;  %7880 = vpow2.f32 %v7069_v9  ;;  %v2129_v9 = vrot.slane %v9007_v5, 1 }
 0x7e9   :  { %v1631_v32 = vadd.f32 1.0, %v7871_v0  ;;  %v2131_v0 = vrot.slane %v9031_v16, 1 }
 0x7ea   :  { %v7070_v3 = vmul.f32 -1.442695, %v1605_v37 }
 0x7ec   :  { %1661 = vrot.lane.b32.xlu1 %v1586_v46, %s8426_s3  ;;  %v1606_v46 = vadd.f32 %v1590_v45, %v8669_v11  ;;  %7882 = vpow2.f32 %v7070_v3  ;;  %v2078_v45 = vsub.f32 1.0, %v9190_v35  ;;  %v2130_v3 = vrot.slane %v9022_v36, 1 }
 0x7ee   :  { %v9253_v25 = vpop.eup %7872  ;;  %v7071_v10 = vmul.f32 -1.442695, %v1606_v46  ;;  %v2128_v46 = vrot.slane %v9010_v29, 1  ;;  %v2132_v29 = vrot.slane %v9039_v13, 1 }
 0x7f0   :  { %1663 = vrot.lane.b32.xlu1 %v1587_v4, %s8426_s3  ;;  %7884 = vpow2.f32 %v7071_v10  ;;  %v2080_v10 = vsub.f32 1.0, %v9198_v33 }
 0x7f1   :  { %7886 = vrcp.f32 %v1631_v32  ;;  %v2143_v32 = vmul.f32 %v9198_v33, %v2128_v46 }
 0x7f4   :  { %1667 = vrot.lane.b32.xlu1 %v1589_v51, %s8426_s3  ;;  %v7875_v51 = vpop.eup %7874 }
 0x7f5   :  { %v7877_v26 = vpop.eup %7876  ;;  %v1634_v42 = vadd.f32 1.0, %v7875_v51 }
 0x7f6   :  { %v7879_v5 = vpop.eup %7878 }
 0x7f7   :  { %7888 = vrcp.f32 %v1634_v42  ;;  %v2083_v42 = vsub.f32 1.0, %v9215_v62 }
 0x83b   :  { %v2097_v21 = vpop.permute.xlu0 %2096 }
 0x83c   :  { %v2119_v37 = vmul.f32 %v2097_v21, %v2079_v41  ;;  %v2142_v21 = vmul.f32 %v9188_v20, %v2127_v17  ;;  %v2081_v41 = vsub.f32 1.0, %v9195_v23  ;;  %v1635_v20 = vadd.f32 1.0, %v7877_v26 }
 0x83d   :  { %v2147_v17 = vmul.f32 %v9203_v12, %v2131_v0  ;;  %v2145_v26 = vmul.f32 %v9206_v18, %v2130_v3 }
 0x83e   :  { %v9273_v16 = vadd.f32 %v2142_v21, %v2119_v37  ;;  %v1633_v37 = vadd.f32 1.0, %v7879_v5  ;;  %v2148_v21 = vmul.f32 %v9211_v38, %v2132_v29  ;;  %7890 = vrcp.f32 %v1635_v20 }
 0x83f   :  { %v2101_v8 = vpop.permute.xlu0 %2100  ;;  %v11486_v20 = vrot.slane %v9018_v39, 1 }
 0x840   :  { %11480 = vst [vmem:[#allocation26_spill] sm:$0xff] %v9273_v16  ;;  %v2493_v33 = vrot.slane %v9273_v16, 4  ;;  %7892 = vrcp.f32 %v1633_v37 }
 0x843   :  { %v2107_v1 = vpop.permute.xlu0 %2106 }
 0x847   :  { %v2109_v4 = vpop.permute.xlu0 %2108 }
 0x84a   :  { %v2105_v40 = vpop.permute.xlu1 %2104 }
 0x84b   :  { %v1658_v28 = vpop.permute.xlu0 %1657 }
 0x84c   :  { %v1680_v50 = vmul.f32 %v9253_v25, %v1658_v28  ;;  %v2141_v28 = vmul.f32 %v9190_v35, %v2126_v49  ;;  %v2121_v35 = vmul.f32 %v2101_v8, %v2081_v41 }
 0x84e   :  { %v2095_v47 = vpop.permute.xlu1 %2094  ;;  %1697 = vrot.lane.b32.xlu1 %v1680_v50, %s8429_s6  ;;  %v2144_v50 = vmul.f32 %v9195_v23, %v2129_v9  ;;  %v2082_v23 = vsub.f32 1.0, %v9206_v18  ;;  %v7881_v9 = vpop.eup %7880 }
 0x84f   :  { %v2118_v19 = vmul.f32 %v2095_v47, %v2078_v45  ;;  %v2084_v45 = vsub.f32 1.0, %v9203_v12 }
 0x850   :  { %v9286_v12 = vadd.f32 %v2144_v50, %v2121_v35 }
 0x851   :  { %v9270_v31 = vadd.f32 %v2141_v28, %v2118_v19  ;;  %v2085_v19 = vsub.f32 1.0, %v9211_v38  ;;  %v7883_v28 = vpop.eup %7882  ;;  %v2124_v8 = vmul.f32 %v2107_v1, %v2084_v45  ;;  %v2123_v45 = vmul.f32 %v2105_v40, %v2083_v42 }
 0x852   :  { %v2099_v51 = vpop.permute.xlu1 %2098  ;;  %11482 = vst [vmem:[#allocation28_spill] sm:$0xff] %v9286_v12  ;;  %v1637_v1 = vadd.f32 1.0, %v7883_v28  ;;  %v7885_v38 = vpop.eup %7884  ;;  %v2497_v35 = vrot.slane %v9286_v12, 2  ;;  %v2146_v40 = vmul.f32 %v9215_v62, %v11486_v20 }
 0x853   :  { %11479 = vst [vmem:[#allocation25_spill] sm:$0xff] %v9270_v31  ;;  %v2120_v49 = vmul.f32 %v2099_v51, %v2080_v10  ;;  %v2492_v47 = vrot.slane %v9270_v31, 5  ;;  %v2125_v46 = vmul.f32 %v2109_v4, %v2085_v19  ;;  %v1636_v10 = vadd.f32 1.0, %v7881_v9  ;;  %v9296_v4 = vpop.eup %7886 }
 0x854   :  { %v9291_v18 = vadd.f32 %v2147_v17, %v2124_v8  ;;  %v1638_v9 = vadd.f32 1.0, %v7885_v38  ;;  %v9306_v19 = vadd.f32 %v2146_v40, %v2123_v45  ;;  %v9314_v8 = vpop.eup %7888 }
 0x855   :  { %v9282_v41 = vadd.f32 %v2143_v32, %v2120_v49  ;;  %v2494_v29 = vsel %vm819_vm2, %v2493_v33, %v2492_v47  ;;  %v9299_v32 = vadd.f32 %v2148_v21, %v2125_v46  ;;  %7894 = vrcp.f32 %v1636_v10  ;;  %v1660_v47 = vpop.permute.xlu0 %1659  ;;  %v9322_v10 = vpop.eup %7890 }
 0x856   :  { %v2103_v0 = vpop.permute.xlu1 %2102  ;;  %11483 = vst [vmem:[#allocation29_spill] sm:$0xff] %v9291_v18  ;;  %7896 = vrcp.f32 %v1637_v1  ;;  %11487 = vst [vmem:[#allocation32_spill] sm:$0xff] %v9306_v19  ;;  %v2502_v28 = vrot.slane %v9291_v18, 7 }
 0x857   :  { %11481 = vst [vmem:[#allocation27_spill] sm:$0xff] %v9282_v41  ;;  %v2495_v5 = vrot.slane %v9282_v41, 3  ;;  %v2122_v51 = vmul.f32 %v2103_v0, %v2082_v23  ;;  %11485 = vst [vmem:[#allocation31_spill] sm:$0xff] %v9299_v32  ;;  %v2504_v33 = vrot.slane %v9299_v32, 6  ;;  %7898 = vrcp.f32 %v1638_v9 }
 0x859   :  { %v2496_v3 = vsel %vm822_vm3, %v2495_v5, %v2494_v29  ;;  %v9294_v50 = vadd.f32 %v2145_v26, %v2122_v51  ;;  %v9326_v5 = vpop.eup %7892  ;;  %v1666_v51 = vpop.permute.xlu0 %1665 }
 0x85a   :  { %v1656_v49 = vpop.permute.xlu1 %1655  ;;  %v2498_v37 = vsel %vm825_vm4, %v2497_v35, %v2496_v3  ;;  %v1681_v45 = vmul.f32 %v9326_v5, %v1660_v47 }
 0x85b   :  { %11484 = vst [vmem:[#allocation30_spill] sm:$0xff] %v9294_v50  ;;  %v11393_v23 = vrot.slane %v9294_v50, 1  ;;  %v1679_v17 = vmul.f32 %v9296_v4, %v1656_v49 }
 0x85d   :  { %1695 = vrot.lane.b32.xlu0 %v1679_v17, %s8429_s6  ;;  %v2500_v62 = vsel %vm828_vm5, %v11393_v23, %v2498_v37  ;;  %v1670_v49 = vpop.permute.xlu0 %1669 }
 0x85e   :  { %v1662_v21 = vpop.permute.xlu1 %1661  ;;  %v2501_v26 = vsel %vm831_vm6, %v9306_v19, %v2500_v62 }
 0x85f   :  { %v1682_v46 = vmul.f32 %v9314_v8, %v1662_v21  ;;  %v2503_v42 = vsel %vm834_vm7, %v2502_v28, %v2501_v26  ;;  %v9330_v38 = vpop.eup %7894 }
 0x860   :  { %v2505_v0 = vsel %vm11450_vm8, %v2504_v33, %v2503_v42  ;;  %v9334_v3 = vpop.eup %7896  ;;  %v1684_v20 = vmul.f32 %v9330_v38, %v1666_v51  ;;  %v11488_v42 = vmov 0.0  }
 0x861   :  { %2506 = vrot.lane.b32.xlu1 %v2505_v0, %s8431_s20  ;;  %1701 = vrot.lane.b32.xlu0 %v1682_v46, %s8429_s6  ;;  %v9340_v17 = vpop.eup %7898 }
 0x862   :  { %v1664_v1 = vpop.permute.xlu1 %1663  ;;  %v1686_v9 = vmul.f32 %v9340_v17, %v1670_v49 }
 0x863   :  { %v1683_v29 = vmul.f32 %v9322_v10, %v1664_v1 }
 0x865   :  { %1699 = vrot.lane.b32.xlu1 %v1681_v45, %s8429_s6  ;;  %1703 = vrot.lane.b32.xlu0 %v1683_v29, %s8429_s6 }
 0x866   :  { %v1668_v35 = vpop.permute.xlu1 %1667 }
 0x867   :  { %v1685_v40 = vmul.f32 %v9334_v3, %v1668_v35 }
 0x869   :  { %1705 = vrot.lane.b32.xlu1 %v1684_v20, %s8429_s6  ;;  %1707 = vrot.lane.b32.xlu0 %v1685_v40, %s8429_s6 }
 0x86d   :  { %1709 = vrot.lane.b32.xlu1 %v1686_v9, %s8429_s6 }
 0x8c0   :  { %v1698_v47 = vpop.permute.xlu1 %1697 }
 0x8c1   :  { %v1720_v37 = vadd.f32 %v1698_v47, %v8647_v53 }
 0x8c3   :  { %7900 = vtanh.f32 %v1720_v37 }
 0x8cd   :  { %v7901_v28 = vpop.eup %7900 }
 0x8ce   :  { %1753 = vrot.lane.b32.xlu1 %v7901_v28, %s8430_s4 }
 0x8cf   :  { %v1696_v62 = vpop.permute.xlu0 %1695 }
 0x8d0   :  { %v1719_v21 = vadd.f32 %v1696_v62, %v8651_v55 }
 0x8d2   :  { %7902 = vtanh.f32 %v1719_v21 }
 0x8d3   :  { %v2507_v26 = vpop.permute.xlu1 %2506  ;;  %v1702_v33 = vpop.permute.xlu0 %1701 }
 0x8d4   :  { %v1722_v46 = vadd.f32 %v1702_v33, %v8654_v57  ;;  %7374 = vmatmul.mubr.msk.f32.vlgmr.msra.gmra.mrb[10].mxu0 %vm215_vm9, %v2507_v26 }
 0x8d5   :  { %7569 = vmatpush3.bf16.msra.mxu0 %v8557_v14  ;;  %7387 = vmatprep.mubr.msk.f32.mxu0 %vm8423_vm0, %v11488_v42 }
 0x8d6   :  { %7904 = vtanh.f32 %v1722_v46  ;;  %7573 = vmatprep.subr.bf16.mxu0 %v11478_v58  ;;  %v1736_v46 = vsub.f32 1.0, %v9253_v25 }
 0x8d7   :  { %v1700_v0 = vpop.permute.xlu1 %1699  ;;  %v1704_v51 = vpop.permute.xlu0 %1703 }
 0x8d8   :  { %v1721_v1 = vadd.f32 %v1700_v0, %v8649_v54  ;;  %v1723_v45 = vadd.f32 %v1704_v51, %v8662_v63  ;;  %v1784_v0 = vrot.slane %v9117_v61, 7 }
 0x8da   :  { %7906 = vtanh.f32 %v1721_v1  ;;  %v1799_v1 = vmul.f32 %v9253_v25, %v1784_v0 }
 0x8db   :  { %7908 = vtanh.f32 %v1723_v45  ;;  %v1706_v29 = vpop.permute.xlu1 %1705  ;;  %v1708_v35 = vpop.permute.xlu0 %1707 }
 0x8dc   :  { %v7903_v20 = vpop.eup %7902  ;;  %v1724_v40 = vadd.f32 %v1706_v29, %v8657_v59  ;;  %v1725_v49 = vadd.f32 %v1708_v35, %v8664_v2  ;;  %v5509_v35 = vsel %vm5507_vm11, %v8788_v15, %v9117_v61  ;;  %v5508_v15 = vsel %vm5507_vm11, %v8792_v24, %v9108_v56 }
 0x8dd   :  { %1751 = vrot.lane.b32.xlu0 %v7903_v20, %s8430_s4  ;;  %v5511_v24 = vsel %vm5507_vm11, %v8796_v27, %v9124_v22 }
 0x8de   :  { %7910 = vtanh.f32 %v1724_v40  ;;  %v1735_v40 = vsub.f32 1.0, %v9296_v4 }
 0x8df   :  { %7912 = vtanh.f32 %v1725_v49  ;;  %v1710_v9 = vpop.permute.xlu1 %1709  ;;  %v1783_v49 = vrot.slane %v9108_v56, 7 }
 0x8e0   :  { %v7905_v47 = vpop.eup %7904  ;;  %v1726_v37 = vadd.f32 %v1710_v9, %v8669_v11 }
 0x8e1   :  { %1757 = vrot.lane.b32.xlu0 %v7905_v47, %s8430_s4  ;;  %v1798_v25 = vmul.f32 %v9296_v4, %v1783_v49 }
 0x8e2   :  { %7914 = vtanh.f32 %v1726_v37  ;;  %v1785_v37 = vrot.slane %v9124_v22, 7 }
 0x8e4   :  { %v7907_v28 = vpop.eup %7906  ;;  %v1801_v61 = vmul.f32 %v9314_v8, %v1785_v37  ;;  %v1787_v37 = vrot.slane %v9139_v6, 7 }
 0x8e5   :  { %v7909_v62 = vpop.eup %7908  ;;  %1755 = vrot.lane.b32.xlu1 %v7907_v28, %s8430_s4 }
 0x8e6   :  { %1759 = vrot.lane.b32.xlu0 %v7909_v62, %s8430_s4  ;;  %v1738_v62 = vsub.f32 1.0, %v9314_v8  ;;  %v1739_v8 = vsub.f32 1.0, %v9322_v10 }
 0x8e8   :  { %v7911_v21 = vpop.eup %7910 }
 0x8e9   :  { %v7913_v26 = vpop.eup %7912  ;;  %1761 = vrot.lane.b32.xlu1 %v7911_v21, %s8430_s4 }
 0x8ea   :  { %1763 = vrot.lane.b32.xlu0 %v7913_v26, %s8430_s4 }
 0x8ec   :  { %v7915_v33 = vpop.eup %7914 }
 0x8ed   :  { %1765 = vrot.lane.b32.xlu1 %v7915_v33, %s8430_s4 }
 0x940   :  { %v1754_v51 = vpop.permute.xlu1 %1753 }
 0x941   :  { %v1776_v45 = vmul.f32 %v1754_v51, %v1736_v46  ;;  %v1737_v51 = vsub.f32 1.0, %v9326_v5 }
 0x943   :  { %v9368_v29 = vadd.f32 %v1799_v1, %v1776_v45  ;;  %v1786_v45 = vrot.slane %v9128_v48, 7 }
 0x945   :  { %v9375_v20 = vsel %vm5516_vm10, %v5509_v35, %v9368_v29  ;;  %v2166_v26 = vrot.slane %v9368_v29, 1  ;;  %v1802_v27 = vmul.f32 %v9322_v10, %v1786_v45  ;;  %v1741_v10 = vsub.f32 1.0, %v9334_v3 }
 0x946   :  { %v1742_v45 = vsub.f32 1.0, %v9340_v17 }
 0x94f   :  { %v1752_v9 = vpop.permute.xlu0 %1751 }
 0x950   :  { %v1775_v47 = vmul.f32 %v1752_v9, %v1735_v40  ;;  %v11489_v40 = vrot.slane %v9113_v60, 7 }
 0x952   :  { %v9381_v28 = vadd.f32 %v1798_v25, %v1775_v47  ;;  %v1800_v49 = vmul.f32 %v9326_v5, %v11489_v40  ;;  %v5510_v47 = vsel %vm5507_vm11, %v8785_v7, %v9113_v60  ;;  %v1788_v5 = vrot.slane %v9145_v34, 7 }
 0x953   :  { %v1758_v21 = vpop.permute.xlu0 %1757  ;;  %v1803_v7 = vmul.f32 %v9330_v38, %v1787_v37  ;;  %v1789_v40 = vrot.slane %v9150_v52, 7 }
 0x954   :  { %v2165_v33 = vrot.slane %v9381_v28, 2  ;;  %v9392_v4 = vsel %vm5516_vm10, %v5508_v15, %v9381_v28  ;;  %v1778_v46 = vmul.f32 %v1758_v21, %v1738_v62  ;;  %v5512_v62 = vsel %vm5507_vm11, %v8804_v30, %v9128_v48 }
 0x955   :  { %v1805_v37 = vmul.f32 %v9340_v17, %v1789_v40 }
 0x956   :  { %v9394_v0 = vadd.f32 %v1801_v61, %v1778_v46  ;;  %v2167_v1 = vsel %vm819_vm2, %v2166_v26, %v2165_v33  ;;  %v1740_v61 = vsub.f32 1.0, %v9330_v38  ;;  %v1804_v46 = vmul.f32 %v9334_v3, %v1788_v5 }
 0x957   :  { %v1756_v56 = vpop.permute.xlu1 %1755  ;;  %v5514_v3 = vsel %vm5507_vm11, %v8816_v44, %v9145_v34 }
 0x958   :  { %v9405_v35 = vsel %vm5516_vm10, %v5511_v24, %v9394_v0  ;;  %v1777_v9 = vmul.f32 %v1756_v56, %v1737_v51  ;;  %v1760_v25 = vpop.permute.xlu0 %1759  ;;  %v11392_v21 = vrot.slane %v9394_v0, 7 }
 0x959   :  { %v1779_v22 = vmul.f32 %v1760_v25, %v1739_v8 }
 0x95a   :  { %v9418_v15 = vadd.f32 %v1800_v49, %v1777_v9  ;;  %v5513_v49 = vsel %vm5507_vm11, %v8814_v43, %v9139_v6 }
 0x95b   :  { %v9423_v26 = vadd.f32 %v1802_v27, %v1779_v22  ;;  %v1762_v60 = vpop.permute.xlu1 %1761 }
 0x95c   :  { %v2168_v33 = vsel %vm822_vm3, %v9418_v15, %v2167_v1  ;;  %v9431_v30 = vsel %vm5516_vm10, %v5510_v47, %v9418_v15  ;;  %v1780_v48 = vmul.f32 %v1762_v60, %v1740_v61  ;;  %v1764_v51 = vpop.permute.xlu0 %1763  ;;  %v11491_v61 = vld [vmem:[#allocation8_spill] sm:$0xff] }
 0x95d   :  { %v2170_v24 = vsel %vm825_vm4, %v11392_v21, %v2168_v33  ;;  %v2171_v38 = vrot.slane %v9423_v26, 6  ;;  %v9440_v56 = vsel %vm5516_vm10, %v5512_v62, %v9423_v26  ;;  %v1781_v8 = vmul.f32 %v1764_v51, %v1741_v10 }
 0x95e   :  { %v9442_v1 = vadd.f32 %v1803_v7, %v1780_v48  ;;  %v5515_v5 = vsel %vm5507_vm11, %v11491_v61, %v9150_v52  ;;  %v11493_v48 = vld [vmem:[#allocation3_spill] sm:$0xff] }
 0x95f   :  { %v9452_v9 = vadd.f32 %v1804_v46, %v1781_v8  ;;  %v1766_v25 = vpop.permute.xlu1 %1765  ;;  %v2172_v47 = vsel %vm828_vm5, %v2171_v38, %v2170_v24 }
 0x960   :  { %v2173_v27 = vrot.slane %v9442_v1, 5  ;;  %v9458_v22 = vsel %vm5516_vm10, %v5513_v49, %v9442_v1  ;;  %v1782_v62 = vmul.f32 %v1766_v25, %v1742_v45  ;;  %v11494_v25 = vld [vmem:[#allocation2_spill] sm:$0xff] }
 0x961   :  { %v2175_v44 = vrot.slane %v9452_v9, 4  ;;  %v9464_v34 = vsel %vm5516_vm10, %v5514_v3, %v9452_v9 }
 0x962   :  { %11490 = vst [vmem:[#allocation33_spill] sm:$0xff] %v9464_v34  ;;  %v9466_v43 = vadd.f32 %v1805_v37, %v1782_v62  ;;  %v2174_v6 = vsel %vm831_vm6, %v2173_v27, %v2172_v47 }
 0x963   :  { %v2176_v7 = vsel %vm834_vm7, %v2175_v44, %v2174_v6 }
 0x964   :  { %v9475_v17 = vsel %vm5516_vm10, %v5515_v5, %v9466_v43  ;;  %v2177_v60 = vrot.slane %v9466_v43, 3 }
 0x965   :  { %11492 = vst [vmem:[#allocation8_spill] sm:$0xff] %v9475_v17 }
 0x966   :  { %v2178_v10 = vsel %vm11450_vm8, %v2177_v60, %v2176_v7 }
 0x967   :  { %2179 = vrot.lane.b32.xlu0 %v2178_v10, %s8430_s4 }
 0x9a7   :  { %v2576_v33 = vpop.f32.mrb[10].mxu0 }
 0x9a8   :  { %v2577_v46 = vadd.f32 %v2576_v33, %v11493_v48  ;;  %v7375_v51 = vpop.f32.mrb[11].mxu0 }
 0x9aa   :  { %2596 = vrot.lane.b32.xlu0 %v2577_v46, %s8427_s0  ;;  %v2581_v24 = vrot.slane %v2577_v46, 4  ;;  %v2582_v52 = vrot.slane %v2577_v46, 5  ;;  %v2583_v38 = vrot.slane %v2577_v46, 6  ;;  %v2584_v8 = vrot.slane %v2577_v46, 7 }
 0x9ab   :  { %v2585_v45 = vrot.slane %v2577_v46, 1  ;;  %v2587_v40 = vrot.slane %v2577_v46, 3  ;;  %v2586_v3 = vrot.slane %v2577_v46, 2 }
 0x9ac   :  { %2588 = vrot.lane.b32.xlu1 %v2581_v24, %s8427_s0 }
 0x9ae   :  { %2590 = vrot.lane.b32.xlu0 %v2582_v52, %s8427_s0 }
 0x9b0   :  { %2592 = vrot.lane.b32.xlu1 %v2583_v38, %s8427_s0 }
 0x9b2   :  { %2594 = vrot.lane.b32.xlu0 %v2584_v8, %s8427_s0 }
 0x9b4   :  { %2598 = vrot.lane.b32.xlu1 %v2585_v45, %s8427_s0 }
 0x9b6   :  { %2602 = vrot.lane.b32.xlu0 %v2587_v40, %s8427_s0 }
 0x9b8   :  { %2600 = vrot.lane.b32.xlu1 %v2586_v3, %s8427_s0 }
 0x9ba   :  { %2676 = vrot.lane.b32.xlu0 %v2577_v46, %s8428_s30 }
 0x9bc   :  { %2668 = vrot.lane.b32.xlu1 %v2581_v24, %s8428_s30 }
 0x9be   :  { %2670 = vrot.lane.b32.xlu0 %v2582_v52, %s8428_s30 }
 0x9c0   :  { %2672 = vrot.lane.b32.xlu1 %v2583_v38, %s8428_s30 }
 0x9c2   :  { %2674 = vrot.lane.b32.xlu0 %v2584_v8, %s8428_s30 }
 0x9c4   :  { %2678 = vrot.lane.b32.xlu1 %v2585_v45, %s8428_s30 }
 0x9c6   :  { %2682 = vrot.lane.b32.xlu0 %v2587_v40, %s8428_s30 }
 0x9c8   :  { %2680 = vrot.lane.b32.xlu1 %v2586_v3, %s8428_s30 }
 0x9d9   :  { %v2180_v49 = vpop.permute.xlu0 %2179 }
 0x9da   :  { %7367 = vmatmul.mubr.msk.f32.vlgmr.msra.gmra.mrb[10].mxu1 %vm215_vm9, %v2180_v49 }
 0x9db   :  { %7566 = vmatpush3.bf16.msra.mxu1 %v11494_v25  ;;  %7380 = vmatprep.mubr.msk.f32.mxu1 %vm8423_vm0, %v11488_v42 }
 0x9dc   :  { %7570 = vmatprep.subr.bf16.mxu1 %v11478_v58 }
 0xa1c   :  { %v2597_v47 = vpop.permute.xlu0 %2596 }
 0xa1d   :  { %v2616_v27 = vadd.f32 %v2597_v47, %v8662_v63 }
 0xa1e   :  { %v2589_v37 = vpop.permute.xlu1 %2588 }
 0xa1f   :  { %v7095_v62 = vmul.f32 -1.442695, %v2616_v27  ;;  %v2612_v44 = vadd.f32 %v2589_v37, %v8651_v55 }
 0xa20   :  { %v2591_v6 = vpop.permute.xlu0 %2590 }
 0xa21   :  { %7916 = vpow2.f32 %v7095_v62  ;;  %v7091_v61 = vmul.f32 -1.442695, %v2612_v44  ;;  %v2613_v5 = vadd.f32 %v2591_v6, %v8647_v53 }
 0xa22   :  { %v2593_v7 = vpop.permute.xlu1 %2592 }
 0xa23   :  { %7918 = vpow2.f32 %v7091_v61  ;;  %v7092_v60 = vmul.f32 -1.442695, %v2613_v5  ;;  %v2614_v10 = vadd.f32 %v2593_v7, %v8649_v54 }
 0xa24   :  { %v2595_v33 = vpop.permute.xlu0 %2594 }
 0xa25   :  { %7920 = vpow2.f32 %v7092_v60  ;;  %v7093_v46 = vmul.f32 -1.442695, %v2614_v10  ;;  %v2615_v51 = vadd.f32 %v2595_v33, %v8654_v57 }
 0xa26   :  { %v2599_v24 = vpop.permute.xlu1 %2598 }
 0xa27   :  { %7922 = vpow2.f32 %v7093_v46  ;;  %v7094_v52 = vmul.f32 -1.442695, %v2615_v51  ;;  %v2617_v38 = vadd.f32 %v2599_v24, %v8657_v59 }
 0xa28   :  { %v2603_v8 = vpop.permute.xlu0 %2602 }
 0xa29   :  { %7924 = vpow2.f32 %v7094_v52  ;;  %v7096_v45 = vmul.f32 -1.442695, %v2617_v38  ;;  %v2619_v40 = vadd.f32 %v2603_v8, %v8669_v11 }
 0xa2a   :  { %v2601_v3 = vpop.permute.xlu1 %2600 }
 0xa2b   :  { %v7917_v49 = vpop.eup %7916  ;;  %7926 = vpow2.f32 %v7096_v45  ;;  %v7098_v47 = vmul.f32 -1.442695, %v2619_v40  ;;  %v2618_v27 = vadd.f32 %v2601_v3, %v8664_v2 }
 0xa2c   :  { %v2648_v37 = vadd.f32 1.0, %v7917_v49  ;;  %v2677_v10 = vpop.permute.xlu0 %2676 }
 0xa2d   :  { %v7919_v62 = vpop.eup %7918  ;;  %7928 = vpow2.f32 %v7098_v47  ;;  %v7097_v44 = vmul.f32 -1.442695, %v2618_v27 }
 0xa2e   :  { %7930 = vrcp.f32 %v2648_v37  ;;  %v2644_v6 = vadd.f32 1.0, %v7919_v62  ;;  %v2669_v51 = vpop.permute.xlu1 %2668 }
 0xa2f   :  { %v7921_v61 = vpop.eup %7920  ;;  %7932 = vpow2.f32 %v7097_v44 }
 0xa30   :  { %7934 = vrcp.f32 %v2644_v6  ;;  %v2645_v5 = vadd.f32 1.0, %v7921_v61  ;;  %v2671_v40 = vpop.permute.xlu0 %2670 }
 0xa31   :  { %v7923_v7 = vpop.eup %7922 }
 0xa32   :  { %7936 = vrcp.f32 %v2645_v5  ;;  %v2646_v60 = vadd.f32 1.0, %v7923_v7  ;;  %v2673_v37 = vpop.permute.xlu1 %2672 }
 0xa33   :  { %v7925_v33 = vpop.eup %7924 }
 0xa34   :  { %7938 = vrcp.f32 %v2646_v60  ;;  %v2647_v46 = vadd.f32 1.0, %v7925_v33  ;;  %v2675_v5 = vpop.permute.xlu0 %2674 }
 0xa35   :  { %v7927_v24 = vpop.eup %7926 }
 0xa36   :  { %7940 = vrcp.f32 %v2647_v46  ;;  %v2649_v52 = vadd.f32 1.0, %v7927_v24 }
 0xa37   :  { %v7929_v38 = vpop.eup %7928 }
 0xa38   :  { %v9510_v8 = vpop.eup %7930  ;;  %7942 = vrcp.f32 %v2649_v52  ;;  %v2651_v45 = vadd.f32 1.0, %v7929_v38  ;;  %v2683_v52 = vpop.permute.xlu0 %2682 }
 0xa39   :  { %v7933_v3 = vpop.eup %7932  ;;  %v2696_v49 = vmul.f32 %v9510_v8, %v2677_v10  ;;  %v2679_v10 = vpop.permute.xlu1 %2678 }
 0xa3a   :  { %v9513_v47 = vpop.eup %7934  ;;  %7944 = vrcp.f32 %v2651_v45  ;;  %v2650_v27 = vadd.f32 1.0, %v7933_v3 }
 0xa3b   :  { %v2692_v62 = vmul.f32 %v9513_v47, %v2669_v51  ;;  %2716 = vrot.lane.b32.xlu0 %v2696_v49, %s8429_s6 }
 0xa3c   :  { %v9517_v44 = vpop.eup %7936  ;;  %7946 = vrcp.f32 %v2650_v27 }
 0xa3d   :  { %v2693_v6 = vmul.f32 %v9517_v44, %v2671_v40  ;;  %2708 = vrot.lane.b32.xlu1 %v2692_v62, %s8429_s6  ;;  %v2681_v40 = vpop.permute.xlu1 %2680  ;;  %v2749_v25 = vsub.f32 1.0, %v9517_v44 }
 0xa3e   :  { %v9521_v61 = vpop.eup %7938 }
 0xa3f   :  { %v2694_v7 = vmul.f32 %v9521_v61, %v2673_v37  ;;  %2710 = vrot.lane.b32.xlu0 %v2693_v6, %s8429_s6  ;;  %v9545_v37 = vld [vmem:[%s11352_s7] ss:$0 sm:$0xff] }
 0xa40   :  { %v9525_v60 = vpop.eup %7940  ;;  %11495 = vst [vmem:[#allocation34_spill] sm:$0xff] %v9545_v37 }
 0xa41   :  { %v2695_v33 = vmul.f32 %v9525_v60, %v2675_v5  ;;  %2712 = vrot.lane.b32.xlu1 %v2694_v7, %s8429_s6 }
 0xa42   :  { %v9529_v46 = vpop.eup %7942 }
 0xa43   :  { %v2697_v51 = vmul.f32 %v9529_v46, %v2679_v10  ;;  %2714 = vrot.lane.b32.xlu0 %v2695_v33, %s8429_s6 }
 0xa44   :  { %v9533_v24 = vpop.eup %7944 }
 0xa45   :  { %v2699_v38 = vmul.f32 %v9533_v24, %v2683_v52  ;;  %2718 = vrot.lane.b32.xlu1 %v2697_v51, %s8429_s6 }
 0xa46   :  { %v9537_v45 = vpop.eup %7946 }
 0xa47   :  { %v2698_v3 = vmul.f32 %v9537_v45, %v2681_v40  ;;  %2722 = vrot.lane.b32.xlu0 %v2699_v38, %s8429_s6 }
 0xa49   :  { %2720 = vrot.lane.b32.xlu1 %v2698_v3, %s8429_s6 }
 0xaad   :  { %v2717_v49 = vpop.permute.xlu0 %2716  ;;  %v2249_v27 = vpop.f32.mrb[10].mxu1 }
 0xaae   :  { %v9548_v62 = vadd.f32 %v9545_v37, %v2249_v27  ;;  %v7368_v6 = vpop.f32.mrb[11].mxu1  ;;  %v2736_v51 = vadd.f32 %v2717_v49, %v8662_v63 }
 0xaaf   :  { %v2709_v5 = vpop.permute.xlu1 %2708 }
 0xab0   :  { %v2255_v7 = vrot.slane %v9548_v62, 6  ;;  %v2254_v10 = vrot.slane %v9548_v62, 5  ;;  %v2732_v52 = vadd.f32 %v2709_v5, %v8651_v55  ;;  %v2257_v40 = vrot.slane %v9548_v62, 1 }
 0xab1   :  { %v2711_v33 = vpop.permute.xlu0 %2710  ;;  %v2256_v3 = vrot.slane %v9548_v62, 7  ;;  %7948 = vtanh.f32 %v2736_v51  ;;  %v2258_v23 = vrot.slane %v9548_v62, 2 }
 0xab2   :  { %2327 = vrot.lane.b32.xlu0 %v2255_v7, %s8426_s3  ;;  %2325 = vrot.lane.b32.xlu1 %v2254_v10, %s8426_s3  ;;  %v2733_v6 = vadd.f32 %v2711_v33, %v8647_v53  ;;  %7950 = vtanh.f32 %v2732_v52  ;;  %v2260_v52 = vrot.slane %v9548_v62, 4 }
 0xab3   :  { %v2713_v38 = vpop.permute.xlu1 %2712 }
 0xab4   :  { %v2734_v49 = vadd.f32 %v2713_v38, %v8649_v54  ;;  %7952 = vtanh.f32 %v2733_v6  ;;  %v2259_v38 = vrot.slane %v9548_v62, 3 }
 0xab5   :  { %v2715_v27 = vpop.permute.xlu0 %2714 }
 0xab6   :  { %2333 = vrot.lane.b32.xlu0 %v2257_v40, %s8426_s3  ;;  %2329 = vrot.lane.b32.xlu1 %v2256_v3, %s8426_s3  ;;  %v2735_v5 = vadd.f32 %v2715_v27, %v8654_v57  ;;  %7954 = vtanh.f32 %v2734_v49 }
 0xab7   :  { %v2719_v21 = vpop.permute.xlu1 %2718 }
 0xab8   :  { %v2737_v33 = vadd.f32 %v2719_v21, %v8657_v59  ;;  %7956 = vtanh.f32 %v2735_v5 }
 0xab9   :  { %v2723_v51 = vpop.permute.xlu0 %2722 }
 0xaba   :  { %2335 = vrot.lane.b32.xlu0 %v2258_v23, %s8426_s3  ;;  %2331 = vrot.lane.b32.xlu1 %v9548_v62, %s8426_s3  ;;  %v2739_v39 = vadd.f32 %v2723_v51, %v8669_v11  ;;  %7958 = vtanh.f32 %v2737_v33 }
 0xabb   :  { %v2721_v13 = vpop.permute.xlu1 %2720  ;;  %v7949_v6 = vpop.eup %7948 }
 0xabc   :  { %v2738_v27 = vadd.f32 %v2721_v13, %v8664_v2  ;;  %v7951_v49 = vpop.eup %7950  ;;  %7960 = vtanh.f32 %v2739_v39  ;;  %v2270_v39 = vadd.f32 %v2255_v7, %v8647_v53  ;;  %v2276_v7 = vadd.f32 %v2260_v52, %v8669_v11 }
 0xabe   :  { %2339 = vrot.lane.b32.xlu0 %v2260_v52, %s8426_s3  ;;  %2337 = vrot.lane.b32.xlu1 %v2259_v38, %s8426_s3  ;;  %7962 = vtanh.f32 %v2738_v27  ;;  %v7953_v21 = vpop.eup %7952  ;;  %v2269_v27 = vadd.f32 %v2254_v10, %v8651_v55  ;;  %v2275_v10 = vadd.f32 %v2259_v38, %v8664_v2 }
 0xac0   :  { %v7955_v36 = vpop.eup %7954 }
 0xac2   :  { %2772 = vrot.lane.b32.xlu0 %v7949_v6, %s8430_s4  ;;  %2764 = vrot.lane.b32.xlu1 %v7951_v49, %s8430_s4  ;;  %v7957_v5 = vpop.eup %7956  ;;  %v7083_v6 = vmul.f32 -1.442695, %v2270_v39  ;;  %v2273_v49 = vadd.f32 %v2257_v40, %v8662_v63  ;;  %v7089_v39 = vmul.f32 -1.442695, %v2276_v7 }
 0xac4   :  { %v7959_v51 = vpop.eup %7958  ;;  %7964 = vpow2.f32 %v7083_v6 }
 0xac6   :  { %2766 = vrot.lane.b32.xlu0 %v7953_v21, %s8430_s4  ;;  %2768 = vrot.lane.b32.xlu1 %v7955_v36, %s8430_s4  ;;  %v7961_v13 = vpop.eup %7960  ;;  %v7082_v36 = vmul.f32 -1.442695, %v2269_v27  ;;  %v2271_v21 = vadd.f32 %v2256_v3, %v8649_v54  ;;  %v7088_v3 = vmul.f32 -1.442695, %v2275_v10 }
 0xac8   :  { %v7963_v33 = vpop.eup %7962  ;;  %7966 = vpow2.f32 %v7082_v36  ;;  %v7084_v37 = vmul.f32 -1.442695, %v2271_v21 }
 0xaca   :  { %2770 = vrot.lane.b32.xlu0 %v7957_v5, %s8430_s4  ;;  %2774 = vrot.lane.b32.xlu1 %v7959_v51, %s8430_s4  ;;  %v7086_v5 = vmul.f32 -1.442695, %v2273_v49  ;;  %v2274_v51 = vadd.f32 %v2258_v23, %v8657_v59 }
 0xacc   :  { %7968 = vpow2.f32 %v7086_v5 }
 0xacd   :  { %7970 = vpow2.f32 %v7084_v37 }
 0xace   :  { %2778 = vrot.lane.b32.xlu0 %v7961_v13, %s8430_s4  ;;  %2776 = vrot.lane.b32.xlu1 %v7963_v33, %s8430_s4  ;;  %v2272_v13 = vadd.f32 %v9548_v62, %v8654_v57  ;;  %v7087_v33 = vmul.f32 -1.442695, %v2274_v51  ;;  %v7965_v27 = vpop.eup %7964 }
 0xacf   :  { %v2302_v23 = vadd.f32 1.0, %v7965_v27 }
 0xad0   :  { %v7085_v40 = vmul.f32 -1.442695, %v2272_v13  ;;  %7972 = vpow2.f32 %v7087_v33 }
 0xad2   :  { %7974 = vpow2.f32 %v7085_v40  ;;  %v7967_v6 = vpop.eup %7966 }
 0xad3   :  { %7976 = vpow2.f32 %v7089_v39  ;;  %v2301_v36 = vadd.f32 1.0, %v7967_v6 }
 0xad4   :  { %7978 = vpow2.f32 %v7088_v3 }
 0xad5   :  { %7980 = vrcp.f32 %v2302_v23 }
 0xad6   :  { %v7969_v49 = vpop.eup %7968  ;;  %7982 = vrcp.f32 %v2301_v36 }
 0xad7   :  { %v7971_v62 = vpop.eup %7970  ;;  %v2305_v21 = vadd.f32 1.0, %v7969_v49 }
 0xad8   :  { %v2303_v37 = vadd.f32 1.0, %v7971_v62 }
 0xad9   :  { %7984 = vrcp.f32 %v2305_v21 }
 0xada   :  { %v7973_v5 = vpop.eup %7972  ;;  %7986 = vrcp.f32 %v2303_v37 }
 0xadb   :  { %v2306_v38 = vadd.f32 1.0, %v7973_v5 }
 0xadc   :  { %v7975_v52 = vpop.eup %7974 }
 0xadd   :  { %v7977_v51 = vpop.eup %7976  ;;  %v2304_v13 = vadd.f32 1.0, %v7975_v52  ;;  %7988 = vrcp.f32 %v2306_v38 }
 0xade   :  { %v7979_v33 = vpop.eup %7978  ;;  %v2308_v7 = vadd.f32 1.0, %v7977_v51 }
 0xadf   :  { %v2307_v10 = vadd.f32 1.0, %v7979_v33  ;;  %7990 = vrcp.f32 %v2304_v13  ;;  %v9591_v40 = vpop.eup %7980 }
 0xae0   :  { %v9593_v39 = vpop.eup %7982  ;;  %7992 = vrcp.f32 %v2308_v7 }
 0xae1   :  { %7994 = vrcp.f32 %v2307_v10 }
 0xae3   :  { %v9597_v49 = vpop.eup %7984 }
 0xae4   :  { %v9601_v36 = vpop.eup %7986 }
 0xae7   :  { %v9605_v52 = vpop.eup %7988 }
 0xae9   :  { %v9609_v38 = vpop.eup %7990 }
 0xaea   :  { %v9613_v10 = vpop.eup %7992 }
 0xb24   :  { %v2328_v3 = vpop.permute.xlu0 %2327  ;;  %v2326_v27 = vpop.permute.xlu1 %2325 }
 0xb25   :  { %v2350_v6 = vmul.f32 %v9591_v40, %v2328_v3  ;;  %v2349_v23 = vmul.f32 %v9593_v39, %v2326_v27  ;;  %v9617_v3 = vpop.eup %7994 }
 0xb27   :  { %2367 = vrot.lane.b32.xlu0 %v2350_v6, %s8429_s6  ;;  %2365 = vrot.lane.b32.xlu1 %v2349_v23, %s8429_s6 }
 0xb28   :  { %v2334_v62 = vpop.permute.xlu0 %2333  ;;  %v2330_v21 = vpop.permute.xlu1 %2329 }
 0xb29   :  { %v2353_v5 = vmul.f32 %v9597_v49, %v2334_v62  ;;  %v2351_v37 = vmul.f32 %v9601_v36, %v2330_v21  ;;  %v2748_v21 = vsub.f32 1.0, %v9513_v47 }
 0xb2b   :  { %2373 = vrot.lane.b32.xlu0 %v2353_v5, %s8429_s6  ;;  %2369 = vrot.lane.b32.xlu1 %v2351_v37, %s8429_s6 }
 0xb2c   :  { %v2336_v51 = vpop.permute.xlu0 %2335  ;;  %v2332_v13 = vpop.permute.xlu1 %2331 }
 0xb2d   :  { %v2354_v33 = vmul.f32 %v9605_v52, %v2336_v51  ;;  %v2352_v7 = vmul.f32 %v9609_v38, %v2332_v13  ;;  %v2796_v51 = vrot.slane %v9270_v31, 1 }
 0xb2f   :  { %2375 = vrot.lane.b32.xlu0 %v2354_v33, %s8429_s6  ;;  %2371 = vrot.lane.b32.xlu1 %v2352_v7, %s8429_s6  ;;  %v2797_v33 = vrot.slane %v9273_v16, 1  ;;  %v2811_v7 = vmul.f32 %v9513_v47, %v2796_v51  ;;  %v2800_v47 = vrot.slane %v9306_v19, 1  ;;  %v2802_v19 = vrot.slane %v9299_v32, 1 }
 0xb30   :  { %v2340_v27 = vpop.permute.xlu0 %2339  ;;  %v2338_v6 = vpop.permute.xlu1 %2337 }
 0xb31   :  { %v2356_v23 = vmul.f32 %v9613_v10, %v2340_v27  ;;  %v2355_v62 = vmul.f32 %v9617_v3, %v2338_v6  ;;  %v2750_v27 = vsub.f32 1.0, %v9521_v61  ;;  %v2798_v6 = vrot.slane %v9282_v41, 1 }
 0xb32   :  { %v2751_v41 = vsub.f32 1.0, %v9525_v60 }
 0xb33   :  { %2379 = vrot.lane.b32.xlu0 %v2356_v23, %s8429_s6  ;;  %2377 = vrot.lane.b32.xlu1 %v2355_v62, %s8429_s6  ;;  %v2812_v23 = vmul.f32 %v9517_v44, %v2797_v33  ;;  %v2813_v31 = vmul.f32 %v9521_v61, %v2798_v6  ;;  %v2753_v44 = vsub.f32 1.0, %v9529_v46  ;;  %v2752_v33 = vsub.f32 1.0, %v9510_v8 }
 0xb34   :  { %v2773_v5 = vpop.permute.xlu0 %2772  ;;  %v2765_v37 = vpop.permute.xlu1 %2764  ;;  %v2816_v61 = vmul.f32 %v9529_v46, %v2800_v47  ;;  %v2754_v47 = vsub.f32 1.0, %v9537_v45 }
 0xb35   :  { %v2788_v13 = vmul.f32 %v2765_v37, %v2748_v21  ;;  %v2799_v37 = vrot.slane %v9286_v12, 1 }
 0xb37   :  { %v9631_v34 = vadd.f32 %v2811_v7, %v2788_v13  ;;  %v2814_v13 = vmul.f32 %v9525_v60, %v2799_v37  ;;  %v2801_v7 = vrot.slane %v9291_v18, 1  ;;  %v11501_v18 = vrot.slane %v9294_v50, 1 }
 0xb38   :  { %v2767_v62 = vpop.permute.xlu0 %2766  ;;  %v2769_v48 = vpop.permute.xlu1 %2768 }
 0xb39   :  { %11496 = vst [vmem:[#allocation35_spill] sm:$0xff] %v9631_v34  ;;  %v2789_v17 = vmul.f32 %v2767_v62, %v2749_v25  ;;  %v2790_v21 = vmul.f32 %v2769_v48, %v2750_v27  ;;  %v3162_v27 = vrot.slane %v9631_v34, 4  ;;  %v2817_v32 = vmul.f32 %v9537_v45, %v2801_v7 }
 0xb3b   :  { %v9636_v51 = vadd.f32 %v2812_v23, %v2789_v17  ;;  %v9638_v16 = vadd.f32 %v2813_v31, %v2790_v21  ;;  %v2792_v23 = vmul.f32 %v2773_v5, %v2752_v33  ;;  %v2755_v21 = vsub.f32 1.0, %v9533_v24 }
 0xb3c   :  { %v2771_v25 = vpop.permute.xlu0 %2770  ;;  %v2775_v48 = vpop.permute.xlu1 %2774  ;;  %v2818_v5 = vmul.f32 %v9533_v24, %v2802_v19 }
 0xb3d   :  { %11497 = vst [vmem:[#allocation36_spill] sm:$0xff] %v9636_v51  ;;  %11498 = vst [vmem:[#allocation37_spill] sm:$0xff] %v9638_v16  ;;  %v3163_v17 = vrot.slane %v9636_v51, 3  ;;  %v2791_v31 = vmul.f32 %v2771_v25, %v2751_v41  ;;  %v2793_v6 = vmul.f32 %v2775_v48, %v2753_v44  ;;  %v3165_v62 = vrot.slane %v9638_v16, 2 }
 0xb3e   :  { %v2815_v41 = vmul.f32 %v9510_v8, %v11501_v18 }
 0xb3f   :  { %v3164_v60 = vsel %vm819_vm2, %v3163_v17, %v3162_v27  ;;  %v9652_v37 = vadd.f32 %v2814_v13, %v2791_v31  ;;  %v9654_v46 = vadd.f32 %v2816_v61, %v2793_v6 }
 0xb40   :  { %v2779_v44 = vpop.permute.xlu0 %2778  ;;  %v2777_v33 = vpop.permute.xlu1 %2776  ;;  %v9663_v13 = vadd.f32 %v2815_v41, %v2792_v23  ;;  %v3166_v61 = vsel %vm822_vm3, %v3165_v62, %v3164_v60 }
 0xb41   :  { %11499 = vst [vmem:[#allocation38_spill] sm:$0xff] %v9652_v37  ;;  %11500 = vst [vmem:[#allocation39_spill] sm:$0xff] %v9654_v46  ;;  %v11405_v25 = vrot.slane %v9652_v37, 1  ;;  %v2795_v48 = vmul.f32 %v2779_v44, %v2755_v21  ;;  %v2794_v27 = vmul.f32 %v2777_v33, %v2754_v47  ;;  %v3170_v18 = vrot.slane %v9654_v46, 7 }
 0xb42   :  { %11502 = vst [vmem:[#allocation40_spill] sm:$0xff] %v9663_v13 }
 0xb43   :  { %v3168_v17 = vsel %vm825_vm4, %v11405_v25, %v3166_v61  ;;  %v9670_v8 = vadd.f32 %v2818_v5, %v2795_v48  ;;  %v9672_v19 = vadd.f32 %v2817_v32, %v2794_v27 }
 0xb44   :  { %v3169_v24 = vsel %vm828_vm5, %v9663_v13, %v3168_v17 }
 0xb45   :  { %11503 = vst [vmem:[#allocation41_spill] sm:$0xff] %v9670_v8  ;;  %11504 = vst [vmem:[#allocation42_spill] sm:$0xff] %v9672_v19  ;;  %v3172_v45 = vrot.slane %v9672_v19, 6  ;;  %v3171_v7 = vsel %vm831_vm6, %v3170_v18, %v3169_v24  ;;  %v3174_v31 = vrot.slane %v9670_v8, 5 }
 0xb47   :  { %v3173_v6 = vsel %vm834_vm7, %v3172_v45, %v3171_v7 }
 0xb48   :  { %v3175_v23 = vsel %vm11450_vm8, %v3174_v31, %v3173_v6 }
 0xb49   :  { %3176 = vrot.lane.b32.xlu1 %v3175_v23, %s8431_s20 }
 0xb99   :  { %v2368_v62 = vpop.permute.xlu0 %2367  ;;  %v2366_v21 = vpop.permute.xlu1 %2365 }
 0xb9a   :  { %v2390_v32 = vadd.f32 %v2368_v62, %v8647_v53  ;;  %v2389_v60 = vadd.f32 %v2366_v21, %v8651_v55 }
 0xb9c   :  { %7996 = vtanh.f32 %v2390_v32 }
 0xb9d   :  { %7998 = vtanh.f32 %v2389_v60  ;;  %v2374_v47 = vpop.permute.xlu0 %2373  ;;  %v2370_v41 = vpop.permute.xlu1 %2369 }
 0xb9e   :  { %v2393_v5 = vadd.f32 %v2374_v47, %v8662_v63  ;;  %v2391_v44 = vadd.f32 %v2370_v41, %v8649_v54  ;;  %v2406_v41 = vsub.f32 1.0, %v9591_v40 }
 0xba0   :  { %8000 = vtanh.f32 %v2393_v5  ;;  %v2454_v5 = vrot.slane %v9368_v29, 7 }
 0xba1   :  { %8002 = vtanh.f32 %v2391_v44  ;;  %v2376_v33 = vpop.permute.xlu0 %2375  ;;  %v2372_v48 = vpop.permute.xlu1 %2371  ;;  %v2405_v44 = vsub.f32 1.0, %v9593_v39 }
 0xba2   :  { %v2394_v27 = vadd.f32 %v2376_v33, %v8657_v59  ;;  %v2392_v61 = vadd.f32 %v2372_v48, %v8654_v57  ;;  %v2453_v33 = vrot.slane %v9381_v28, 7  ;;  %v2455_v28 = vrot.slane %v9418_v15, 7 }
 0xba4   :  { %8004 = vtanh.f32 %v2394_v27  ;;  %v2470_v15 = vmul.f32 %v9601_v36, %v2455_v28 }
 0xba5   :  { %8006 = vtanh.f32 %v2392_v61  ;;  %v2380_v17 = vpop.permute.xlu0 %2379  ;;  %v2378_v18 = vpop.permute.xlu1 %2377  ;;  %v2469_v61 = vmul.f32 %v9591_v40, %v2454_v5  ;;  %v2410_v5 = vsub.f32 1.0, %v9605_v52 }
 0xba6   :  { %v7997_v24 = vpop.eup %7996  ;;  %v2396_v45 = vadd.f32 %v2380_v17, %v8669_v11  ;;  %v2395_v7 = vadd.f32 %v2378_v18, %v8664_v2  ;;  %v2468_v18 = vmul.f32 %v9593_v39, %v2453_v33 }
 0xba7   :  { %v7999_v31 = vpop.eup %7998  ;;  %2423 = vrot.lane.b32.xlu1 %v7997_v24, %s8430_s4 }
 0xba8   :  { %8008 = vtanh.f32 %v2396_v45  ;;  %2421 = vrot.lane.b32.xlu0 %v7999_v31, %s8430_s4  ;;  %v2456_v31 = vrot.slane %v9423_v26, 7 }
 0xba9   :  { %8010 = vtanh.f32 %v2395_v7  ;;  %v2409_v7 = vsub.f32 1.0, %v9597_v49 }
 0xbaa   :  { %v8001_v6 = vpop.eup %8000 }
 0xbab   :  { %v8003_v23 = vpop.eup %8002  ;;  %2429 = vrot.lane.b32.xlu1 %v8001_v6, %s8430_s4  ;;  %v2407_v6 = vsub.f32 1.0, %v9601_v36 }
 0xbac   :  { %2425 = vrot.lane.b32.xlu0 %v8003_v23, %s8430_s4 }
 0xbae   :  { %v8005_v62 = vpop.eup %8004 }
 0xbaf   :  { %v8007_v21 = vpop.eup %8006  ;;  %2431 = vrot.lane.b32.xlu1 %v8005_v62, %s8430_s4 }
 0xbb0   :  { %2427 = vrot.lane.b32.xlu0 %v8007_v21, %s8430_s4  ;;  %v2472_v21 = vmul.f32 %v9597_v49, %v2456_v31  ;;  %v2408_v49 = vsub.f32 1.0, %v9609_v38 }
 0xbb2   :  { %v8009_v32 = vpop.eup %8008 }
 0xbb3   :  { %v8011_v60 = vpop.eup %8010  ;;  %2435 = vrot.lane.b32.xlu1 %v8009_v32, %s8430_s4 }
 0xbb4   :  { %2433 = vrot.lane.b32.xlu0 %v8011_v60, %s8430_s4 }
 0xbbb   :  { %v3177_v47 = vpop.permute.xlu1 %3176 }
 0xbbc   :  { %7388 = vmatmul.mubr.msk.f32.vlgmr.msra.gmra.mrb[12].mxu0 %vm215_vm9, %v3177_v47 }
 0xbbd   :  { %7575 = vmatpush3.bf16.msra.mxu0 %v8557_v14  ;;  %7401 = vmatprep.mubr.msk.f32.mxu0 %vm8423_vm0, %v11488_v42 }
 0xbbe   :  { %7579 = vmatprep.subr.bf16.mxu0 %v11478_v58 }
 0xc19   :  { %v2424_v48 = vpop.permute.xlu1 %2423 }
 0xc1a   :  { %v2422_v27 = vpop.permute.xlu0 %2421  ;;  %v2446_v17 = vmul.f32 %v2424_v48, %v2406_v41 }
 0xc1b   :  { %v2445_v24 = vmul.f32 %v2422_v27, %v2405_v44 }
 0xc1c   :  { %v9709_v45 = vadd.f32 %v2469_v61, %v2446_v17  ;;  %v2459_v17 = vrot.slane %v9466_v43, 7 }
 0xc1d   :  { %v9713_v29 = vadd.f32 %v2468_v18, %v2445_v24  ;;  %v2430_v23 = vpop.permute.xlu1 %2429  ;;  %v11506_v24 = vrot.slane %v9394_v0, 7 }
 0xc1e   :  { %v2836_v40 = vrot.slane %v9709_v45, 2  ;;  %v9721_v39 = vsel %vm5525_vm12, %v9375_v20, %v9709_v45  ;;  %v2426_v62 = vpop.permute.xlu0 %2425  ;;  %v2449_v32 = vmul.f32 %v2430_v23, %v2409_v7  ;;  %v2457_v20 = vrot.slane %v9442_v1, 7 }
 0xc1f   :  { %v2835_v26 = vrot.slane %v9713_v29, 3  ;;  %v9728_v60 = vsel %vm5525_vm12, %v9392_v4, %v9713_v29  ;;  %v2447_v47 = vmul.f32 %v2426_v62, %v2407_v6  ;;  %v2471_v7 = vmul.f32 %v9609_v38, %v11506_v24 }
 0xc20   :  { %v9731_v41 = vadd.f32 %v2472_v21, %v2449_v32  ;;  %v2473_v27 = vmul.f32 %v9605_v52, %v2457_v20  ;;  %v2458_v6 = vrot.slane %v9452_v9, 7  ;;  %v2412_v52 = vsub.f32 1.0, %v9613_v10 }
 0xc21   :  { %v9735_v44 = vadd.f32 %v2470_v15, %v2447_v47  ;;  %v2837_v33 = vsel %vm819_vm2, %v2836_v40, %v2835_v26  ;;  %v2432_v48 = vpop.permute.xlu1 %2431  ;;  %v2411_v23 = vsub.f32 1.0, %v9617_v3 }
 0xc22   :  { %v9742_v4 = vsel %vm5525_vm12, %v9440_v56, %v9731_v41  ;;  %v2428_v36 = vpop.permute.xlu0 %2427  ;;  %v2450_v61 = vmul.f32 %v2432_v48, %v2410_v5  ;;  %v11404_v0 = vrot.slane %v9731_v41, 7  ;;  %v11510_v48 = vld [vmem:[#allocation33_spill] sm:$0xff] }
 0xc23   :  { %11505 = vst [vmem:[#allocation43_spill] sm:$0xff] %v9742_v4  ;;  %v2838_v1 = vrot.slane %v9735_v44, 1  ;;  %v9750_v18 = vsel %vm5525_vm12, %v9431_v30, %v9735_v44  ;;  %v2448_v31 = vmul.f32 %v2428_v36, %v2408_v49  ;;  %v2475_v30 = vmul.f32 %v9613_v10, %v2459_v17  ;;  %v11508_v49 = vld [vmem:[#allocation8_spill] sm:$0xff] }
 0xc24   :  { %v9755_v56 = vadd.f32 %v2473_v27, %v2450_v61  ;;  %v2474_v10 = vmul.f32 %v9617_v3, %v2458_v6 }
 0xc25   :  { %v9759_v28 = vadd.f32 %v2471_v7, %v2448_v31  ;;  %v2839_v43 = vsel %vm822_vm3, %v2838_v1, %v2837_v33  ;;  %v2436_v40 = vpop.permute.xlu1 %2435  ;;  %v11512_v1 = vld [vmem:[#allocation3_spill] sm:$0xff] }
 0xc26   :  { %v2843_v38 = vrot.slane %v9755_v56, 6  ;;  %v9769_v62 = vsel %vm5525_vm12, %v9458_v22, %v9755_v56  ;;  %v2434_v9 = vpop.permute.xlu0 %2433  ;;  %v2452_v21 = vmul.f32 %v2436_v40, %v2412_v52 }
 0xc27   :  { %11507 = vst [vmem:[#allocation44_spill] sm:$0xff] %v9769_v62  ;;  %v2840_v32 = vsel %vm825_vm4, %v9759_v28, %v2839_v43  ;;  %v9776_v26 = vsel %vm5525_vm12, %v9405_v35, %v9759_v28  ;;  %v2451_v15 = vmul.f32 %v2434_v9, %v2411_v23  ;;  %v11513_v9 = vld [vmem:[#allocation2_spill] sm:$0xff] }
 0xc28   :  { %v9779_v47 = vadd.f32 %v2475_v30, %v2452_v21  ;;  %v2842_v22 = vsel %vm828_vm5, %v11404_v0, %v2840_v32 }
 0xc29   :  { %v9784_v5 = vadd.f32 %v2474_v10, %v2451_v15  ;;  %v2844_v20 = vsel %vm831_vm6, %v2843_v38, %v2842_v22 }
 0xc2a   :  { %v9790_v33 = vsel %vm5525_vm12, %v11508_v49, %v9779_v47  ;;  %v2847_v35 = vrot.slane %v9779_v47, 4 }
 0xc2b   :  { %11509 = vst [vmem:[#allocation8_spill] sm:$0xff] %v9790_v33  ;;  %v2845_v3 = vrot.slane %v9784_v5, 5  ;;  %v9797_v36 = vsel %vm5525_vm12, %v11510_v48, %v9784_v5 }
 0xc2c   :  { %11511 = vst [vmem:[#allocation33_spill] sm:$0xff] %v9797_v36 }
 0xc2d   :  { %v2846_v27 = vsel %vm834_vm7, %v2845_v3, %v2844_v20 }
 0xc2e   :  { %v2848_v61 = vsel %vm11450_vm8, %v2847_v35, %v2846_v27 }
 0xc2f   :  { %2849 = vrot.lane.b32.xlu0 %v2848_v61, %s8430_s4 }
 0xc8f   :  { %v3246_v17 = vpop.f32.mrb[12].mxu0 }
 0xc90   :  { %v3247_v24 = vadd.f32 %v3246_v17, %v11512_v1  ;;  %v7389_v7 = vpop.f32.mrb[13].mxu0 }
 0xc92   :  { %3264 = vrot.lane.b32.xlu1 %v3247_v24, %s8427_s0  ;;  %v3252_v31 = vrot.slane %v3247_v24, 6  ;;  %v3251_v6 = vrot.slane %v3247_v24, 5  ;;  %v3254_v52 = vrot.slane %v3247_v24, 1  ;;  %v3253_v43 = vrot.slane %v3247_v24, 7 }
 0xc93   :  { %v3255_v23 = vrot.slane %v3247_v24, 2  ;;  %v3256_v30 = vrot.slane %v3247_v24, 3  ;;  %v3257_v40 = vrot.slane %v3247_v24, 4 }
 0xc94   :  { %3260 = vrot.lane.b32.xlu0 %v3252_v31, %s8427_s0 }
 0xc96   :  { %3258 = vrot.lane.b32.xlu1 %v3251_v6, %s8427_s0 }
 0xc98   :  { %3266 = vrot.lane.b32.xlu0 %v3254_v52, %s8427_s0 }
 0xc9a   :  { %3262 = vrot.lane.b32.xlu1 %v3253_v43, %s8427_s0 }
 0xc9c   :  { %3268 = vrot.lane.b32.xlu0 %v3255_v23, %s8427_s0 }
 0xc9e   :  { %3270 = vrot.lane.b32.xlu1 %v3256_v30, %s8427_s0 }
 0xca0   :  { %3272 = vrot.lane.b32.xlu0 %v3257_v40, %s8427_s0 }
 0xca1   :  { %v2850_v38 = vpop.permute.xlu0 %2849 }
 0xca2   :  { %7381 = vmatmul.mubr.msk.f32.vlgmr.msra.gmra.mrb[12].mxu1 %vm215_vm9, %v2850_v38  ;;  %3344 = vrot.lane.b32.xlu1 %v3247_v24, %s8428_s30 }
 0xca3   :  { %7572 = vmatpush3.bf16.msra.mxu1 %v11513_v9  ;;  %7394 = vmatprep.mubr.msk.f32.mxu1 %vm8423_vm0, %v11488_v42 }
 0xca4   :  { %3340 = vrot.lane.b32.xlu0 %v3252_v31, %s8428_s30  ;;  %7576 = vmatprep.subr.bf16.mxu1 %v11478_v58 }
 0xca6   :  { %3338 = vrot.lane.b32.xlu1 %v3251_v6, %s8428_s30 }
 0xca8   :  { %3346 = vrot.lane.b32.xlu0 %v3254_v52, %s8428_s30 }
 0xcaa   :  { %3342 = vrot.lane.b32.xlu1 %v3253_v43, %s8428_s30 }
 0xcac   :  { %3348 = vrot.lane.b32.xlu0 %v3255_v23, %s8428_s30 }
 0xcae   :  { %3350 = vrot.lane.b32.xlu1 %v3256_v30, %s8428_s30 }
 0xcb0   :  { %3352 = vrot.lane.b32.xlu0 %v3257_v40, %s8428_s30 }
 0xd04   :  { %v3265_v21 = vpop.permute.xlu1 %3264 }
 0xd05   :  { %v3285_v32 = vadd.f32 %v3265_v21, %v8654_v57 }
 0xd06   :  { %v3261_v10 = vpop.permute.xlu0 %3260 }
 0xd07   :  { %v7112_v15 = vmul.f32 -1.442695, %v3285_v32  ;;  %v3283_v22 = vadd.f32 %v3261_v10, %v8647_v53 }
 0xd08   :  { %v3259_v20 = vpop.permute.xlu1 %3258 }
 0xd09   :  { %8012 = vpow2.f32 %v7112_v15  ;;  %v7110_v49 = vmul.f32 -1.442695, %v3283_v22  ;;  %v3282_v35 = vadd.f32 %v3259_v20, %v8651_v55 }
 0xd0a   :  { %v3267_v3 = vpop.permute.xlu0 %3266 }
 0xd0b   :  { %8014 = vpow2.f32 %v7110_v49  ;;  %v7109_v48 = vmul.f32 -1.442695, %v3282_v35  ;;  %v3286_v27 = vadd.f32 %v3267_v3, %v8662_v63 }
 0xd0c   :  { %v3263_v61 = vpop.permute.xlu1 %3262 }
 0xd0d   :  { %8016 = vpow2.f32 %v7109_v48  ;;  %v7113_v17 = vmul.f32 -1.442695, %v3286_v27  ;;  %v3284_v24 = vadd.f32 %v3263_v61, %v8649_v54 }
 0xd0e   :  { %v3269_v7 = vpop.permute.xlu0 %3268 }
 0xd0f   :  { %8018 = vpow2.f32 %v7113_v17  ;;  %v7111_v31 = vmul.f32 -1.442695, %v3284_v24  ;;  %v3287_v6 = vadd.f32 %v3269_v7, %v8657_v59 }
 0xd10   :  { %v3271_v52 = vpop.permute.xlu1 %3270 }
 0xd11   :  { %8020 = vpow2.f32 %v7111_v31  ;;  %v7114_v43 = vmul.f32 -1.442695, %v3287_v6  ;;  %v3288_v23 = vadd.f32 %v3271_v52, %v8664_v2 }
 0xd12   :  { %v3273_v30 = vpop.permute.xlu0 %3272 }
 0xd13   :  { %v8013_v40 = vpop.eup %8012  ;;  %8022 = vpow2.f32 %v7114_v43  ;;  %v7115_v38 = vmul.f32 -1.442695, %v3288_v23  ;;  %v3289_v21 = vadd.f32 %v3273_v30, %v8669_v11 }
 0xd14   :  { %v3317_v32 = vadd.f32 1.0, %v8013_v40  ;;  %v3345_v48 = vpop.permute.xlu1 %3344 }
 0xd15   :  { %v8015_v10 = vpop.eup %8014  ;;  %8024 = vpow2.f32 %v7115_v38  ;;  %v7116_v15 = vmul.f32 -1.442695, %v3289_v21 }
 0xd16   :  { %8026 = vrcp.f32 %v3317_v32  ;;  %v3315_v22 = vadd.f32 1.0, %v8015_v10  ;;  %v3341_v17 = vpop.permute.xlu0 %3340 }
 0xd17   :  { %v8017_v20 = vpop.eup %8016  ;;  %8028 = vpow2.f32 %v7116_v15 }
 0xd18   :  { %8030 = vrcp.f32 %v3315_v22  ;;  %v3314_v49 = vadd.f32 1.0, %v8017_v20  ;;  %v3339_v43 = vpop.permute.xlu1 %3338 }
 0xd19   :  { %v8019_v35 = vpop.eup %8018 }
 0xd1a   :  { %8032 = vrcp.f32 %v3314_v49  ;;  %v3318_v3 = vadd.f32 1.0, %v8019_v35  ;;  %v3347_v21 = vpop.permute.xlu0 %3346 }
 0xd1b   :  { %v8021_v27 = vpop.eup %8020 }
 0xd1c   :  { %8034 = vrcp.f32 %v3318_v3  ;;  %v3316_v61 = vadd.f32 1.0, %v8021_v27  ;;  %v3343_v20 = vpop.permute.xlu1 %3342 }
 0xd1d   :  { %v8023_v24 = vpop.eup %8022 }
 0xd1e   :  { %8036 = vrcp.f32 %v3316_v61  ;;  %v3319_v7 = vadd.f32 1.0, %v8023_v24  ;;  %v3349_v3 = vpop.permute.xlu0 %3348 }
 0xd1f   :  { %v8025_v31 = vpop.eup %8024 }
 0xd20   :  { %v9832_v6 = vpop.eup %8026  ;;  %8038 = vrcp.f32 %v3319_v7  ;;  %v3320_v52 = vadd.f32 1.0, %v8025_v31  ;;  %v3351_v24 = vpop.permute.xlu1 %3350 }
 0xd21   :  { %v8029_v23 = vpop.eup %8028  ;;  %v3365_v30 = vmul.f32 %v9832_v6, %v3345_v48 }
 0xd22   :  { %v9835_v40 = vpop.eup %8030  ;;  %8040 = vrcp.f32 %v3320_v52  ;;  %v3321_v38 = vadd.f32 1.0, %v8029_v23  ;;  %v3353_v52 = vpop.permute.xlu0 %3352 }
 0xd23   :  { %v3363_v32 = vmul.f32 %v9835_v40, %v3341_v17  ;;  %3384 = vrot.lane.b32.xlu1 %v3365_v30, %s8429_s6  ;;  %v11514_v30 = vld [vmem:[#allocation34_spill] sm:$0xff] }
 0xd24   :  { %v9839_v10 = vpop.eup %8032  ;;  %8042 = vrcp.f32 %v3321_v38 }
 0xd25   :  { %v3362_v15 = vmul.f32 %v9839_v10, %v3339_v43  ;;  %3380 = vrot.lane.b32.xlu0 %v3363_v32, %s8429_s6 }
 0xd26   :  { %v9843_v22 = vpop.eup %8034 }
 0xd27   :  { %v3366_v49 = vmul.f32 %v9843_v22, %v3347_v21  ;;  %3378 = vrot.lane.b32.xlu1 %v3362_v15, %s8429_s6 }
 0xd28   :  { %v9847_v35 = vpop.eup %8036 }
 0xd29   :  { %v3364_v48 = vmul.f32 %v9847_v35, %v3343_v20  ;;  %3386 = vrot.lane.b32.xlu0 %v3366_v49, %s8429_s6  ;;  %v3420_v4 = vsub.f32 1.0, %v9847_v35 }
 0xd2a   :  { %v9851_v27 = vpop.eup %8038 }
 0xd2b   :  { %v3367_v61 = vmul.f32 %v9851_v27, %v3349_v3  ;;  %3382 = vrot.lane.b32.xlu1 %v3364_v48, %s8429_s6 }
 0xd2c   :  { %v9855_v17 = vpop.eup %8040 }
 0xd2d   :  { %v3368_v7 = vmul.f32 %v9855_v17, %v3351_v24  ;;  %3388 = vrot.lane.b32.xlu0 %v3367_v61, %s8429_s6 }
 0xd2e   :  { %v9859_v31 = vpop.eup %8042 }
 0xd2f   :  { %v3369_v43 = vmul.f32 %v9859_v31, %v3353_v52  ;;  %3390 = vrot.lane.b32.xlu1 %v3368_v7, %s8429_s6 }
 0xd31   :  { %3392 = vrot.lane.b32.xlu0 %v3369_v43, %s8429_s6 }
 0xd75   :  { %v2919_v23 = vpop.f32.mrb[12].mxu1 }
 0xd76   :  { %v9865_v38 = vadd.f32 %v11514_v30, %v2919_v23  ;;  %v7382_v21 = vpop.f32.mrb[13].mxu1 }
 0xd78   :  { %v2925_v32 = vrot.slane %v9865_v38, 5  ;;  %v2924_v15 = vrot.slane %v9865_v38, 4  ;;  %v2927_v20 = vrot.slane %v9865_v38, 7  ;;  %v2926_v49 = vrot.slane %v9865_v38, 6 }
 0xd79   :  { %v2928_v3 = vrot.slane %v9865_v38, 1  ;;  %v2930_v48 = vrot.slane %v9865_v38, 3  ;;  %v2929_v61 = vrot.slane %v9865_v38, 2 }
 0xd7a   :  { %2997 = vrot.lane.b32.xlu0 %v2925_v32, %s8426_s3  ;;  %2995 = vrot.lane.b32.xlu1 %v2924_v15, %s8426_s3 }
 0xd7e   :  { %3001 = vrot.lane.b32.xlu0 %v2927_v20, %s8426_s3  ;;  %2999 = vrot.lane.b32.xlu1 %v2926_v49, %s8426_s3 }
 0xd82   :  { %3003 = vrot.lane.b32.xlu0 %v9865_v38, %s8426_s3  ;;  %3005 = vrot.lane.b32.xlu1 %v2928_v3, %s8426_s3 }
 0xd86   :  { %3009 = vrot.lane.b32.xlu0 %v2930_v48, %s8426_s3  ;;  %3007 = vrot.lane.b32.xlu1 %v2929_v61, %s8426_s3 }
 0xd95   :  { %v3385_v24 = vpop.permute.xlu1 %3384 }
 0xd96   :  { %v3405_v7 = vadd.f32 %v3385_v24, %v8654_v57 }
 0xd97   :  { %v3381_v52 = vpop.permute.xlu0 %3380 }
 0xd98   :  { %8044 = vtanh.f32 %v3405_v7  ;;  %v3403_v43 = vadd.f32 %v3381_v52, %v8647_v53 }
 0xd99   :  { %v3379_v23 = vpop.permute.xlu1 %3378 }
 0xd9a   :  { %8046 = vtanh.f32 %v3403_v43  ;;  %v3402_v30 = vadd.f32 %v3379_v23, %v8651_v55 }
 0xd9b   :  { %v3387_v21 = vpop.permute.xlu0 %3386 }
 0xd9c   :  { %8048 = vtanh.f32 %v3402_v30  ;;  %v3406_v0 = vadd.f32 %v3387_v21, %v8662_v63 }
 0xd9d   :  { %v3383_v25 = vpop.permute.xlu1 %3382 }
 0xd9e   :  { %8050 = vtanh.f32 %v3406_v0  ;;  %v3404_v50 = vadd.f32 %v3383_v25, %v8649_v54 }
 0xd9f   :  { %v3389_v12 = vpop.permute.xlu0 %3388 }
 0xda0   :  { %8052 = vtanh.f32 %v3404_v50  ;;  %v3407_v24 = vadd.f32 %v3389_v12, %v8657_v59 }
 0xda1   :  { %v3391_v1 = vpop.permute.xlu1 %3390 }
 0xda2   :  { %v8045_v7 = vpop.eup %8044  ;;  %8054 = vtanh.f32 %v3407_v24  ;;  %v3408_v52 = vadd.f32 %v3391_v1, %v8664_v2  ;;  %v2940_v24 = vadd.f32 %v2925_v32, %v8647_v53  ;;  %v2946_v32 = vadd.f32 %v2930_v48, %v8669_v11 }
 0xda3   :  { %v3393_v43 = vpop.permute.xlu0 %3392  ;;  %3440 = vrot.lane.b32.xlu1 %v8045_v7, %s8430_s4  ;;  %v2939_v7 = vadd.f32 %v2924_v15, %v8651_v55  ;;  %v2945_v15 = vadd.f32 %v2929_v61, %v8664_v2 }
 0xda4   :  { %v8047_v23 = vpop.eup %8046  ;;  %8056 = vtanh.f32 %v3408_v52  ;;  %v3409_v30 = vadd.f32 %v3393_v43, %v8669_v11  ;;  %v7101_v52 = vmul.f32 -1.442695, %v2940_v24  ;;  %v2942_v43 = vadd.f32 %v2927_v20, %v8654_v57 }
 0xda5   :  { %3436 = vrot.lane.b32.xlu0 %v8047_v23, %s8430_s4  ;;  %v7100_v23 = vmul.f32 -1.442695, %v2939_v7 }
 0xda6   :  { %v8049_v0 = vpop.eup %8048  ;;  %8058 = vtanh.f32 %v3409_v30  ;;  %v2941_v30 = vadd.f32 %v2926_v49, %v8649_v54  ;;  %v7106_v49 = vmul.f32 -1.442695, %v2945_v15 }
 0xda7   :  { %3434 = vrot.lane.b32.xlu1 %v8049_v0, %s8430_s4  ;;  %8060 = vpow2.f32 %v7101_v52  ;;  %v7103_v0 = vmul.f32 -1.442695, %v2942_v43 }
 0xda8   :  { %v8051_v50 = vpop.eup %8050  ;;  %8062 = vpow2.f32 %v7100_v23 }
 0xda9   :  { %3442 = vrot.lane.b32.xlu0 %v8051_v50, %s8430_s4  ;;  %v2944_v50 = vadd.f32 %v2928_v3, %v8657_v59  ;;  %8064 = vpow2.f32 %v7103_v0 }
 0xdaa   :  { %v8053_v12 = vpop.eup %8052 }
 0xdab   :  { %3438 = vrot.lane.b32.xlu1 %v8053_v12, %s8430_s4  ;;  %v7102_v12 = vmul.f32 -1.442695, %v2941_v30 }
 0xdac   :  { %v8055_v25 = vpop.eup %8054 }
 0xdad   :  { %3444 = vrot.lane.b32.xlu0 %v8055_v25, %s8430_s4  ;;  %v2943_v25 = vadd.f32 %v9865_v38, %v8662_v63  ;;  %8066 = vpow2.f32 %v7102_v12 }
 0xdae   :  { %v8057_v1 = vpop.eup %8056 }
 0xdaf   :  { %3446 = vrot.lane.b32.xlu1 %v8057_v1, %s8430_s4  ;;  %v7105_v1 = vmul.f32 -1.442695, %v2944_v50  ;;  %v7104_v20 = vmul.f32 -1.442695, %v2943_v25 }
 0xdb0   :  { %v8059_v21 = vpop.eup %8058 }
 0xdb1   :  { %3448 = vrot.lane.b32.xlu0 %v8059_v21, %s8430_s4  ;;  %8068 = vpow2.f32 %v7105_v1  ;;  %v7107_v21 = vmul.f32 -1.442695, %v2946_v32  ;;  %v8061_v24 = vpop.eup %8060 }
 0xdb2   :  { %8070 = vpow2.f32 %v7104_v20  ;;  %v8063_v7 = vpop.eup %8062  ;;  %v2972_v3 = vadd.f32 1.0, %v8061_v24 }
 0xdb3   :  { %8072 = vpow2.f32 %v7107_v21  ;;  %v8065_v52 = vpop.eup %8064  ;;  %v2971_v43 = vadd.f32 1.0, %v8063_v7 }
 0xdb4   :  { %8074 = vpow2.f32 %v7106_v49  ;;  %v2974_v23 = vadd.f32 1.0, %v8065_v52 }
 0xdb5   :  { %8076 = vrcp.f32 %v2972_v3 }
 0xdb6   :  { %8078 = vrcp.f32 %v2971_v43 }
 0xdb7   :  { %v8067_v38 = vpop.eup %8066  ;;  %8080 = vrcp.f32 %v2974_v23 }
 0xdb8   :  { %v2973_v48 = vadd.f32 1.0, %v8067_v38 }
 0xdba   :  { %8082 = vrcp.f32 %v2973_v48 }
 0xdbb   :  { %v8069_v30 = vpop.eup %8068 }
 0xdbc   :  { %v8071_v0 = vpop.eup %8070  ;;  %v2976_v61 = vadd.f32 1.0, %v8069_v30 }
 0xdbd   :  { %v8073_v50 = vpop.eup %8072  ;;  %v2975_v12 = vadd.f32 1.0, %v8071_v0 }
 0xdbe   :  { %v8075_v25 = vpop.eup %8074  ;;  %8084 = vrcp.f32 %v2976_v61  ;;  %v2978_v1 = vadd.f32 1.0, %v8073_v50 }
 0xdbf   :  { %v2977_v32 = vadd.f32 1.0, %v8075_v25  ;;  %8086 = vrcp.f32 %v2975_v12  ;;  %v9908_v15 = vpop.eup %8076 }
 0xdc0   :  { %v9910_v20 = vpop.eup %8078  ;;  %8088 = vrcp.f32 %v2978_v1 }
 0xdc1   :  { %8090 = vrcp.f32 %v2977_v32  ;;  %v9914_v3 = vpop.eup %8080 }
 0xdc4   :  { %v9918_v52 = vpop.eup %8082 }
 0xdc8   :  { %v9922_v48 = vpop.eup %8084 }
 0xdc9   :  { %v9926_v0 = vpop.eup %8086 }
 0xdca   :  { %v9930_v1 = vpop.eup %8088 }
 0xdcb   :  { %v9934_v32 = vpop.eup %8090 }
 0xdec   :  { %v2998_v21 = vpop.permute.xlu0 %2997  ;;  %v2996_v49 = vpop.permute.xlu1 %2995 }
 0xded   :  { %v3020_v24 = vmul.f32 %v9908_v15, %v2998_v21  ;;  %v3019_v7 = vmul.f32 %v9910_v20, %v2996_v49 }
 0xdef   :  { %3037 = vrot.lane.b32.xlu0 %v3020_v24, %s8429_s6  ;;  %3035 = vrot.lane.b32.xlu1 %v3019_v7, %s8429_s6 }
 0xdf0   :  { %v3002_v43 = vpop.permute.xlu0 %3001  ;;  %v3000_v38 = vpop.permute.xlu1 %2999 }
 0xdf1   :  { %v3022_v23 = vmul.f32 %v9914_v3, %v3002_v43  ;;  %v3021_v30 = vmul.f32 %v9918_v52, %v3000_v38  ;;  %v3419_v38 = vsub.f32 1.0, %v9835_v40 }
 0xdf3   :  { %3041 = vrot.lane.b32.xlu0 %v3022_v23, %s8429_s6  ;;  %3039 = vrot.lane.b32.xlu1 %v3021_v30, %s8429_s6  ;;  %v3418_v30 = vsub.f32 1.0, %v9839_v10 }
 0xdf4   :  { %v3004_v61 = vpop.permute.xlu0 %3003  ;;  %v3006_v50 = vpop.permute.xlu1 %3005 }
 0xdf5   :  { %v3023_v12 = vmul.f32 %v9926_v0, %v3004_v61  ;;  %v3024_v25 = vmul.f32 %v9922_v48, %v3006_v50  ;;  %v3466_v61 = vrot.slane %v9631_v34, 1  ;;  %v3467_v50 = vrot.slane %v9636_v51, 1 }
 0xdf6   :  { %v3468_v34 = vrot.slane %v9638_v16, 1 }
 0xdf7   :  { %3043 = vrot.lane.b32.xlu0 %v3023_v12, %s8429_s6  ;;  %3045 = vrot.lane.b32.xlu1 %v3024_v25, %s8429_s6 }
 0xdf8   :  { %v3010_v21 = vpop.permute.xlu0 %3009  ;;  %v3008_v49 = vpop.permute.xlu1 %3007 }
 0xdf9   :  { %v3026_v24 = vmul.f32 %v9930_v1, %v3010_v21  ;;  %v3025_v7 = vmul.f32 %v9934_v32, %v3008_v49  ;;  %v3481_v21 = vmul.f32 %v9839_v10, %v3466_v61  ;;  %v3422_v49 = vsub.f32 1.0, %v9843_v22 }
 0xdfa   :  { %v3483_v61 = vmul.f32 %v9847_v35, %v3468_v34  ;;  %v3424_v34 = vsub.f32 1.0, %v9855_v17 }
 0xdfb   :  { %3049 = vrot.lane.b32.xlu0 %v3026_v24, %s8429_s6  ;;  %3047 = vrot.lane.b32.xlu1 %v3025_v7, %s8429_s6  ;;  %v3482_v24 = vmul.f32 %v9835_v40, %v3467_v50  ;;  %v3469_v7 = vrot.slane %v9663_v13, 1  ;;  %v3423_v50 = vsub.f32 1.0, %v9851_v27  ;;  %v3471_v13 = vrot.slane %v9672_v19, 1 }
 0xdfd   :  { %v3485_v10 = vmul.f32 %v9843_v22, %v3469_v7  ;;  %v3487_v7 = vmul.f32 %v9855_v17, %v3471_v13 }
 0xe15   :  { %v3441_v43 = vpop.permute.xlu1 %3440 }
 0xe17   :  { %v3437_v23 = vpop.permute.xlu0 %3436 }
 0xe18   :  { %v3459_v12 = vmul.f32 %v3437_v23, %v3419_v38  ;;  %v3421_v38 = vsub.f32 1.0, %v9832_v6 }
 0xe19   :  { %v3435_v25 = vpop.permute.xlu1 %3434 }
 0xe1a   :  { %v3458_v9 = vmul.f32 %v3435_v25, %v3418_v30  ;;  %v9953_v23 = vadd.f32 %v3482_v24, %v3459_v12  ;;  %v3461_v25 = vmul.f32 %v3441_v43, %v3421_v38  ;;  %v3472_v38 = vrot.slane %v9670_v8, 1 }
 0xe1b   :  { %v3443_v36 = vpop.permute.xlu0 %3442 }
 0xe1c   :  { %v9948_v33 = vadd.f32 %v3481_v21, %v3458_v9  ;;  %v3462_v62 = vmul.f32 %v3443_v36, %v3422_v49  ;;  %11516 = vst [vmem:[#allocation45_spill] sm:$0xff] %v9953_v23  ;;  %v3470_v9 = vrot.slane %v9654_v46, 1  ;;  %v3833_v43 = vrot.slane %v9953_v23, 2 }
 0xe1d   :  { %v3439_v30 = vpop.permute.xlu1 %3438 }
 0xe1e   :  { %11515 = vst [vmem:[#allocation34_spill] sm:$0xff] %v9948_v33  ;;  %v3460_v40 = vmul.f32 %v3439_v30, %v3420_v4  ;;  %v3832_v36 = vrot.slane %v9948_v33, 3  ;;  %v9960_v21 = vadd.f32 %v3485_v10, %v3462_v62  ;;  %v3486_v22 = vmul.f32 %v9851_v27, %v3470_v9 }
 0xe1f   :  { %v3445_v49 = vpop.permute.xlu0 %3444  ;;  %v11519_v4 = vrot.slane %v9652_v37, 1  ;;  %v3425_v27 = vsub.f32 1.0, %v9859_v31  ;;  %v3488_v9 = vmul.f32 %v9859_v31, %v3472_v38 }
 0xe20   :  { %11517 = vst [vmem:[#allocation46_spill] sm:$0xff] %v9960_v21  ;;  %v9963_v12 = vadd.f32 %v3483_v61, %v3460_v40  ;;  %v3463_v24 = vmul.f32 %v3445_v49, %v3423_v50  ;;  %v3838_v50 = vrot.slane %v9960_v21, 7 }
 0xe21   :  { %v3484_v35 = vmul.f32 %v9832_v6, %v11519_v4  ;;  %v3447_v62 = vpop.permute.xlu1 %3446  ;;  %v3834_v6 = vsel %vm819_vm2, %v3833_v43, %v3832_v36 }
 0xe22   :  { %11518 = vst [vmem:[#allocation47_spill] sm:$0xff] %v9963_v12  ;;  %v11411_v10 = vrot.slane %v9963_v12, 1  ;;  %v9974_v30 = vadd.f32 %v3486_v22, %v3463_v24  ;;  %v3464_v61 = vmul.f32 %v3447_v62, %v3424_v34 }
 0xe23   :  { %v9977_v40 = vadd.f32 %v3484_v35, %v3461_v25  ;;  %v3449_v49 = vpop.permute.xlu0 %3448 }
 0xe24   :  { %11520 = vst [vmem:[#allocation48_spill] sm:$0xff] %v9974_v30  ;;  %v3836_v13 = vsel %vm822_vm3, %v11411_v10, %v3834_v6  ;;  %v3840_v17 = vrot.slane %v9974_v30, 6  ;;  %v9986_v22 = vadd.f32 %v3487_v7, %v3464_v61  ;;  %v3465_v24 = vmul.f32 %v3449_v49, %v3425_v27 }
 0xe25   :  { %11521 = vst [vmem:[#allocation49_spill] sm:$0xff] %v9977_v40  ;;  %v3837_v25 = vsel %vm825_vm4, %v9977_v40, %v3836_v13 }
 0xe26   :  { %11522 = vst [vmem:[#allocation50_spill] sm:$0xff] %v9986_v22  ;;  %v3842_v34 = vrot.slane %v9986_v22, 5  ;;  %v9991_v4 = vadd.f32 %v3488_v9, %v3465_v24  ;;  %v3839_v36 = vsel %vm828_vm5, %v3838_v50, %v3837_v25 }
 0xe27   :  { %v3841_v31 = vsel %vm831_vm6, %v3840_v17, %v3839_v36 }
 0xe28   :  { %11523 = vst [vmem:[#allocation51_spill] sm:$0xff] %v9991_v4  ;;  %v3843_v35 = vsel %vm834_vm7, %v3842_v34, %v3841_v31  ;;  %v3844_v43 = vrot.slane %v9991_v4, 4 }
 0xe2a   :  { %v3845_v62 = vsel %vm11450_vm8, %v3844_v43, %v3843_v35 }
 0xe2b   :  { %3846 = vrot.lane.b32.xlu1 %v3845_v62, %s8431_s20 }
 0xe61   :  { %v3038_v7 = vpop.permute.xlu0 %3037  ;;  %v3036_v38 = vpop.permute.xlu1 %3035 }
 0xe62   :  { %v3060_v61 = vadd.f32 %v3038_v7, %v8647_v53  ;;  %v3059_v27 = vadd.f32 %v3036_v38, %v8651_v55 }
 0xe64   :  { %8092 = vtanh.f32 %v3060_v61 }
 0xe65   :  { %8094 = vtanh.f32 %v3059_v27  ;;  %v3042_v6 = vpop.permute.xlu0 %3041  ;;  %v3040_v50 = vpop.permute.xlu1 %3039 }
 0xe66   :  { %v3062_v9 = vadd.f32 %v3042_v6, %v8654_v57  ;;  %v3061_v49 = vadd.f32 %v3040_v50, %v8649_v54 }
 0xe68   :  { %8096 = vtanh.f32 %v3062_v9 }
 0xe69   :  { %8098 = vtanh.f32 %v3061_v49  ;;  %v3044_v13 = vpop.permute.xlu0 %3043  ;;  %v3046_v17 = vpop.permute.xlu1 %3045  ;;  %v3076_v49 = vsub.f32 1.0, %v9908_v15 }
 0xe6a   :  { %v3063_v24 = vadd.f32 %v3044_v13, %v8662_v63  ;;  %v3064_v25 = vadd.f32 %v3046_v17, %v8657_v59  ;;  %v3124_v13 = vrot.slane %v9709_v45, 7  ;;  %v3075_v17 = vsub.f32 1.0, %v9910_v20 }
 0xe6c   :  { %8100 = vtanh.f32 %v3063_v24  ;;  %v3123_v24 = vrot.slane %v9713_v29, 7  ;;  %v3125_v29 = vrot.slane %v9735_v44, 7 }
 0xe6d   :  { %8102 = vtanh.f32 %v3064_v25  ;;  %v3050_v34 = vpop.permute.xlu0 %3049  ;;  %v3048_v36 = vpop.permute.xlu1 %3047 }
 0xe6e   :  { %v8093_v31 = vpop.eup %8092  ;;  %v3066_v35 = vadd.f32 %v3050_v34, %v8669_v11  ;;  %v3065_v43 = vadd.f32 %v3048_v36, %v8664_v2  ;;  %v3139_v36 = vmul.f32 %v9908_v15, %v3124_v13  ;;  %v3140_v44 = vmul.f32 %v9918_v52, %v3125_v29 }
 0xe6f   :  { %v8095_v62 = vpop.eup %8094  ;;  %3093 = vrot.lane.b32.xlu1 %v8093_v31, %s8430_s4 }
 0xe70   :  { %8104 = vtanh.f32 %v3066_v35  ;;  %3091 = vrot.lane.b32.xlu0 %v8095_v62, %s8430_s4  ;;  %v3138_v35 = vmul.f32 %v9910_v20, %v3123_v24  ;;  %v3079_v24 = vsub.f32 1.0, %v9926_v0 }
 0xe71   :  { %8106 = vtanh.f32 %v3065_v43 }
 0xe72   :  { %v8097_v7 = vpop.eup %8096 }
 0xe73   :  { %v8099_v38 = vpop.eup %8098  ;;  %3097 = vrot.lane.b32.xlu1 %v8097_v7, %s8430_s4  ;;  %v3078_v7 = vsub.f32 1.0, %v9914_v3 }
 0xe74   :  { %3095 = vrot.lane.b32.xlu0 %v8099_v38, %s8430_s4  ;;  %v3126_v38 = vrot.slane %v9759_v28, 7 }
 0xe76   :  { %v8101_v61 = vpop.eup %8100 }
 0xe77   :  { %v8103_v27 = vpop.eup %8102  ;;  %3099 = vrot.lane.b32.xlu1 %v8101_v61, %s8430_s4  ;;  %v3077_v61 = vsub.f32 1.0, %v9918_v52 }
 0xe78   :  { %3101 = vrot.lane.b32.xlu0 %v8103_v27, %s8430_s4 }
 0xe7a   :  { %v8105_v6 = vpop.eup %8104 }
 0xe7b   :  { %v8107_v50 = vpop.eup %8106  ;;  %3105 = vrot.lane.b32.xlu1 %v8105_v6, %s8430_s4 }
 0xe7c   :  { %3103 = vrot.lane.b32.xlu0 %v8107_v50, %s8430_s4  ;;  %v3141_v50 = vmul.f32 %v9914_v3, %v3126_v38  ;;  %v3080_v3 = vsub.f32 1.0, %v9922_v48 }
 0xe9d   :  { %v3847_v9 = vpop.permute.xlu1 %3846 }
 0xe9e   :  { %7402 = vmatmul.mubr.msk.f32.vlgmr.msra.gmra.mrb[14].mxu0 %vm215_vm9, %v3847_v9 }
 0xe9f   :  { %7581 = vmatpush3.bf16.msra.mxu0 %v8557_v14  ;;  %7415 = vmatprep.mubr.msk.f32.mxu0 %vm8423_vm0, %v11488_v42 }
 0xea0   :  { %7585 = vmatprep.subr.bf16.mxu0 %v11478_v58 }
 0xee1   :  { %v3094_v25 = vpop.permute.xlu1 %3093 }
 0xee2   :  { %v3092_v34 = vpop.permute.xlu0 %3091  ;;  %v3116_v31 = vmul.f32 %v3094_v25, %v3076_v49 }
 0xee3   :  { %v3115_v43 = vmul.f32 %v3092_v34, %v3075_v17  ;;  %v3127_v34 = vrot.slane %v9755_v56, 7 }
 0xee4   :  { %v10026_v62 = vadd.f32 %v3139_v36, %v3116_v31 }
 0xee5   :  { %v10030_v45 = vadd.f32 %v3138_v35, %v3115_v43  ;;  %v3098_v27 = vpop.permute.xlu1 %3097  ;;  %v11524_v35 = vrot.slane %v9731_v41, 7 }
 0xee6   :  { %v3506_v15 = vrot.slane %v10026_v62, 3  ;;  %v10038_v20 = vsel %vm5534_vm13, %v9721_v39, %v10026_v62  ;;  %v3096_v6 = vpop.permute.xlu0 %3095  ;;  %v3118_v9 = vmul.f32 %v3098_v27, %v3078_v7 }
 0xee7   :  { %v3505_v28 = vrot.slane %v10030_v45, 4  ;;  %v10045_v49 = vsel %vm5534_vm13, %v9728_v60, %v10030_v45  ;;  %v3117_v13 = vmul.f32 %v3096_v6, %v3077_v61  ;;  %v3142_v43 = vmul.f32 %v9926_v0, %v11524_v35 }
 0xee8   :  { %v10048_v17 = vadd.f32 %v3141_v50, %v3118_v9  ;;  %v3143_v61 = vmul.f32 %v9922_v48, %v3127_v34  ;;  %v3081_v6 = vsub.f32 1.0, %v9934_v32  ;;  %v3128_v50 = vrot.slane %v9784_v5, 7  ;;  %v11525_v48 = vld [vmem:[#allocation43_spill] sm:$0xff] }
 0xee9   :  { %v3507_v39 = vsel %vm819_vm2, %v3506_v15, %v3505_v28  ;;  %v10052_v25 = vadd.f32 %v3140_v44, %v3117_v13  ;;  %v3100_v36 = vpop.permute.xlu1 %3099  ;;  %v3129_v15 = vrot.slane %v9779_v47, 7 }
 0xeea   :  { %v3510_v31 = vrot.slane %v10048_v17, 1  ;;  %v10060_v60 = vsel %vm5534_vm13, %v9776_v26, %v10048_v17  ;;  %v3102_v52 = vpop.permute.xlu0 %3101  ;;  %v3119_v7 = vmul.f32 %v3100_v36, %v3079_v24  ;;  %v3082_v26 = vsub.f32 1.0, %v9930_v1  ;;  %v11526_v24 = vld [vmem:[#allocation44_spill] sm:$0xff] }
 0xeeb   :  { %v3508_v38 = vrot.slane %v10052_v25, 2  ;;  %v10069_v56 = vsel %vm5534_vm13, %v9750_v18, %v10052_v25  ;;  %v3120_v29 = vmul.f32 %v3102_v52, %v3080_v3  ;;  %v3145_v13 = vmul.f32 %v9930_v1, %v3129_v15  ;;  %v11527_v1 = vld [vmem:[#allocation8_spill] sm:$0xff] }
 0xeec   :  { %v10072_v27 = vadd.f32 %v3142_v43, %v3119_v7  ;;  %v3144_v3 = vmul.f32 %v9934_v32, %v3128_v50  ;;  %v11528_v32 = vld [vmem:[#allocation33_spill] sm:$0xff]  ;;  %v11530_v50 = vld [vmem:[#allocation3_spill] sm:$0xff] }
 0xeed   :  { %v10076_v41 = vadd.f32 %v3143_v61, %v3120_v29  ;;  %v3509_v0 = vsel %vm822_vm3, %v3508_v38, %v3507_v39  ;;  %v3106_v9 = vpop.permute.xlu1 %3105 }
 0xeee   :  { %v3511_v18 = vsel %vm825_vm4, %v3510_v31, %v3509_v0  ;;  %v10085_v28 = vsel %vm5534_vm13, %v11525_v48, %v10072_v27  ;;  %v3104_v44 = vpop.permute.xlu0 %3103  ;;  %v3122_v47 = vmul.f32 %v3106_v9, %v3082_v26  ;;  %v11529_v0 = vld [vmem:[#allocation2_spill] sm:$0xff] }
 0xeef   :  { %v10091_v39 = vsel %vm5534_vm13, %v11526_v24, %v10076_v41  ;;  %v3121_v5 = vmul.f32 %v3104_v44, %v3081_v6  ;;  %v11410_v34 = vrot.slane %v10076_v41, 7  ;;  %v3512_v31 = vsel %vm828_vm5, %v10072_v27, %v3511_v18 }
 0xef0   :  { %v10095_v36 = vadd.f32 %v3145_v13, %v3122_v47 }
 0xef1   :  { %v10099_v52 = vadd.f32 %v3144_v3, %v3121_v5  ;;  %v3514_v61 = vsel %vm831_vm6, %v11410_v34, %v3512_v31 }
 0xef2   :  { %v10104_v35 = vsel %vm5534_vm13, %v11527_v1, %v10095_v36  ;;  %v3517_v43 = vrot.slane %v10095_v36, 5 }
 0xef3   :  { %v3515_v7 = vrot.slane %v10099_v52, 6  ;;  %v10111_v38 = vsel %vm5534_vm13, %v11528_v32, %v10099_v52 }
 0xef5   :  { %v3516_v29 = vsel %vm834_vm7, %v3515_v7, %v3514_v61 }
 0xef6   :  { %v3518_v26 = vsel %vm11450_vm8, %v3517_v43, %v3516_v29 }
 0xef7   :  { %3519 = vrot.lane.b32.xlu0 %v3518_v26, %s8430_s4 }
 0xf69   :  { %v3520_v15 = vpop.permute.xlu0 %3519 }
 0xf6a   :  { %7395 = vmatmul.mubr.msk.f32.vlgmr.msra.gmra.mrb[14].mxu1 %vm215_vm9, %v3520_v15 }
 0xf6b   :  { %7578 = vmatpush3.bf16.msra.mxu1 %v11529_v0  ;;  %7408 = vmatprep.mubr.msk.f32.mxu1 %vm8423_vm0, %v11488_v42 }
 0xf6c   :  { %7582 = vmatprep.subr.bf16.mxu1 %v11478_v58 }
 0xf71   :  { %v3916_v6 = vpop.f32.mrb[14].mxu0 }
 0xf72   :  { %v3917_v9 = vadd.f32 %v3916_v6, %v11530_v50  ;;  %v7403_v18 = vpop.f32.mrb[15].mxu0 }
 0xf74   :  { %3932 = vrot.lane.b32.xlu0 %v3917_v9, %s8427_s0  ;;  %v3921_v48 = vrot.slane %v3917_v9, 6  ;;  %v3922_v44 = vrot.slane %v3917_v9, 7  ;;  %v3923_v13 = vrot.slane %v3917_v9, 1  ;;  %v3925_v47 = vrot.slane %v3917_v9, 3 }
 0xf75   :  { %v3924_v24 = vrot.slane %v3917_v9, 2  ;;  %v3927_v3 = vrot.slane %v3917_v9, 5  ;;  %v3926_v5 = vrot.slane %v3917_v9, 4 }
 0xf76   :  { %3928 = vrot.lane.b32.xlu1 %v3921_v48, %s8427_s0 }
 0xf78   :  { %3930 = vrot.lane.b32.xlu0 %v3922_v44, %s8427_s0 }
 0xf7a   :  { %3934 = vrot.lane.b32.xlu1 %v3923_v13, %s8427_s0 }
 0xf7c   :  { %3938 = vrot.lane.b32.xlu0 %v3925_v47, %s8427_s0 }
 0xf7e   :  { %3936 = vrot.lane.b32.xlu1 %v3924_v24, %s8427_s0 }
 0xf80   :  { %3942 = vrot.lane.b32.xlu0 %v3927_v3, %s8427_s0 }
 0xf82   :  { %3940 = vrot.lane.b32.xlu1 %v3926_v5, %s8427_s0 }
 0xf84   :  { %4012 = vrot.lane.b32.xlu0 %v3917_v9, %s8428_s30 }
 0xf86   :  { %4008 = vrot.lane.b32.xlu1 %v3921_v48, %s8428_s30 }
 0xf88   :  { %4010 = vrot.lane.b32.xlu0 %v3922_v44, %s8428_s30 }
 0xf8a   :  { %4014 = vrot.lane.b32.xlu1 %v3923_v13, %s8428_s30 }
 0xf8c   :  { %4018 = vrot.lane.b32.xlu0 %v3925_v47, %s8428_s30 }
 0xf8e   :  { %4016 = vrot.lane.b32.xlu1 %v3924_v24, %s8428_s30 }
 0xf90   :  { %4022 = vrot.lane.b32.xlu0 %v3927_v3, %s8428_s30 }
 0xf92   :  { %4020 = vrot.lane.b32.xlu1 %v3926_v5, %s8428_s30 }
 0xfe6   :  { %v3933_v1 = vpop.permute.xlu0 %3932 }
 0xfe7   :  { %v3954_v7 = vadd.f32 %v3933_v1, %v8649_v54 }
 0xfe8   :  { %v3929_v31 = vpop.permute.xlu1 %3928 }
 0xfe9   :  { %v7129_v29 = vmul.f32 -1.442695, %v3954_v7  ;;  %v3952_v15 = vadd.f32 %v3929_v31, %v8651_v55 }
 0xfea   :  { %v3931_v32 = vpop.permute.xlu0 %3930 }
 0xfeb   :  { %v3953_v26 = vadd.f32 %v3931_v32, %v8647_v53  ;;  %8108 = vpow2.f32 %v7129_v29  ;;  %v7127_v44 = vmul.f32 -1.442695, %v3952_v15 }
 0xfec   :  { %v3935_v43 = vpop.permute.xlu1 %3934 }
 0xfed   :  { %v7128_v9 = vmul.f32 -1.442695, %v3953_v26  ;;  %v3955_v18 = vadd.f32 %v3935_v43, %v8654_v57 }
 0xfee   :  { %v3939_v6 = vpop.permute.xlu0 %3938 }
 0xfef   :  { %8110 = vpow2.f32 %v7128_v9  ;;  %v7130_v47 = vmul.f32 -1.442695, %v3955_v18  ;;  %v3957_v5 = vadd.f32 %v3939_v6, %v8657_v59 }
 0xff0   :  { %v3937_v61 = vpop.permute.xlu1 %3936  ;;  %8112 = vpow2.f32 %v7127_v44  ;;  %v10152_v44 = vld [vmem:[%s11352_s7] ss:$0 sm:$0xff] }
 0xff1   :  { %v3956_v13 = vadd.f32 %v3937_v61, %v8662_v63  ;;  %8114 = vpow2.f32 %v7130_v47  ;;  %v7132_v29 = vmul.f32 -1.442695, %v3957_v5  ;;  %11531 = vst [vmem:[#allocation43_spill] sm:$0xff] %v10152_v44 }
 0xff2   :  { %v3943_v3 = vpop.permute.xlu0 %3942 }
 0xff3   :  { %v7131_v1 = vmul.f32 -1.442695, %v3956_v13  ;;  %v3959_v31 = vadd.f32 %v3943_v3, %v8669_v11 }
 0xff4   :  { %v3941_v48 = vpop.permute.xlu1 %3940 }
 0xff5   :  { %v3958_v24 = vadd.f32 %v3941_v48, %v8664_v2  ;;  %v8109_v32 = vpop.eup %8108  ;;  %8116 = vpow2.f32 %v7131_v1  ;;  %v7134_v43 = vmul.f32 -1.442695, %v3959_v31 }
 0xff6   :  { %v3986_v26 = vadd.f32 1.0, %v8109_v32 }
 0xff7   :  { %v7133_v7 = vmul.f32 -1.442695, %v3958_v24 }
 0xff9   :  { %8118 = vpow2.f32 %v7133_v7  ;;  %v8111_v61 = vpop.eup %8110  ;;  %v4009_v7 = vpop.permute.xlu1 %4008 }
 0xffa   :  { %8120 = vpow2.f32 %v7132_v29  ;;  %v8113_v15 = vpop.eup %8112  ;;  %v3985_v9 = vadd.f32 1.0, %v8111_v61 }
 0xffb   :  { %8122 = vpow2.f32 %v7134_v43  ;;  %v8115_v18 = vpop.eup %8114  ;;  %v3984_v6 = vadd.f32 1.0, %v8113_v15 }
 0xffc   :  { %8124 = vrcp.f32 %v3986_v26  ;;  %v3987_v3 = vadd.f32 1.0, %v8115_v18  ;;  %v4013_v18 = vpop.permute.xlu0 %4012 }
 0xffd   :  { %8126 = vrcp.f32 %v3985_v9 }
 0xffe   :  { %8128 = vrcp.f32 %v3984_v6 }
 0xfff   :  { %v8117_v24 = vpop.eup %8116  ;;  %8130 = vrcp.f32 %v3987_v3 }
0x1000   :  { %v3988_v32 = vadd.f32 1.0, %v8117_v24 }
0x1002   :  { %8132 = vrcp.f32 %v3988_v32  ;;  %v4011_v32 = vpop.permute.xlu0 %4010 }
0x1003   :  { %v8119_v5 = vpop.eup %8118 }
0x1004   :  { %v8121_v29 = vpop.eup %8120  ;;  %v3990_v43 = vadd.f32 1.0, %v8119_v5 }
0x1005   :  { %v8123_v26 = vpop.eup %8122 }
0x1006   :  { %v10163_v9 = vpop.eup %8124  ;;  %v3991_v6 = vadd.f32 1.0, %v8123_v26  ;;  %8134 = vrcp.f32 %v3990_v43  ;;  %v4019_v8 = vpop.permute.xlu0 %4018 }
0x1007   :  { %v4034_v24 = vmul.f32 %v10163_v9, %v4013_v18  ;;  %v10169_v5 = vpop.eup %8126 }
0x1008   :  { %v4033_v34 = vmul.f32 %v10169_v5, %v4011_v32 }
0x103d   :  { %v3589_v48 = vpop.f32.mrb[14].mxu1 }
0x103e   :  { %v10155_v13 = vadd.f32 %v10152_v44, %v3589_v48  ;;  %v7396_v47 = vpop.f32.mrb[15].mxu1  ;;  %v3989_v48 = vadd.f32 1.0, %v8121_v29  ;;  %v10173_v29 = vpop.eup %8128 }
0x103f   :  { %v4015_v47 = vpop.permute.xlu1 %4014  ;;  %v10177_v26 = vpop.eup %8130 }
0x1040   :  { %v3595_v1 = vrot.slane %v10155_v13, 4  ;;  %v3594_v31 = vrot.slane %v10155_v13, 3  ;;  %v3598_v61 = vrot.slane %v10155_v13, 7  ;;  %v3596_v15 = vrot.slane %v10155_v13, 5 }
0x1041   :  { %v3597_v3 = vrot.slane %v10155_v13, 6  ;;  %8136 = vrcp.f32 %v3989_v48  ;;  %v3599_v43 = vrot.slane %v10155_v13, 1  ;;  %v10181_v48 = vpop.eup %8132 }
0x1042   :  { %3667 = vrot.lane.b32.xlu0 %v3595_v1, %s8426_s3  ;;  %3665 = vrot.lane.b32.xlu1 %v3594_v31, %s8426_s3  ;;  %8138 = vrcp.f32 %v3991_v6  ;;  %v4035_v6 = vmul.f32 %v10177_v26, %v4015_v47  ;;  %v10185_v10 = vpop.eup %8134 }
0x1043   :  { %v4017_v18 = vpop.permute.xlu1 %4016  ;;  %v3615_v44 = vadd.f32 %v3599_v43, %v8664_v2 }
0x1046   :  { %3673 = vrot.lane.b32.xlu0 %v3598_v61, %s8426_s3  ;;  %3669 = vrot.lane.b32.xlu1 %v3596_v15, %s8426_s3 }
0x1047   :  { %v4021_v32 = vpop.permute.xlu1 %4020 }
0x1048   :  { %v4038_v46 = vmul.f32 %v10185_v10, %v4021_v32 }
0x104a   :  { %4052 = vrot.lane.b32.xlu0 %v4034_v24, %s8429_s6  ;;  %3671 = vrot.lane.b32.xlu1 %v3597_v3, %s8426_s3  ;;  %v4032_v24 = vmul.f32 %v10173_v29, %v4009_v7  ;;  %v4023_v7 = vpop.permute.xlu0 %4022 }
0x104b   :  { %v10189_v19 = vpop.eup %8136 }
0x104c   :  { %v10193_v37 = vpop.eup %8138  ;;  %v4037_v47 = vmul.f32 %v10189_v19, %v4019_v8  ;;  %v3611_v8 = vadd.f32 %v3596_v15, %v8649_v54 }
0x104e   :  { %4050 = vrot.lane.b32.xlu0 %v4033_v34, %s8429_s6  ;;  %3677 = vrot.lane.b32.xlu1 %v3599_v43, %s8426_s3  ;;  %v4036_v34 = vmul.f32 %v10181_v48, %v4017_v18  ;;  %v3609_v18 = vadd.f32 %v3594_v31, %v8651_v55  ;;  %v3614_v43 = vadd.f32 %v10155_v13, %v8657_v59 }
0x1052   :  { %4054 = vrot.lane.b32.xlu0 %v4035_v6, %s8429_s6  ;;  %4048 = vrot.lane.b32.xlu1 %v4032_v24, %s8429_s6  ;;  %v4039_v6 = vmul.f32 %v10193_v37, %v4023_v7  ;;  %v3600_v24 = vrot.slane %v10155_v13, 2  ;;  %v3613_v7 = vadd.f32 %v3598_v61, %v8662_v63 }
0x1054   :  { %v7122_v16 = vmul.f32 -1.442695, %v3613_v7 }
0x1056   :  { %4060 = vrot.lane.b32.xlu0 %v4038_v46, %s8429_s6  ;;  %4056 = vrot.lane.b32.xlu1 %v4036_v34, %s8429_s6  ;;  %v3610_v46 = vadd.f32 %v3595_v1, %v8647_v53  ;;  %v7118_v34 = vmul.f32 -1.442695, %v3609_v18  ;;  %v7124_v1 = vmul.f32 -1.442695, %v3615_v44 }
0x1058   :  { %v7119_v32 = vmul.f32 -1.442695, %v3610_v46 }
0x105a   :  { %4062 = vrot.lane.b32.xlu0 %v4039_v6, %s8429_s6  ;;  %4058 = vrot.lane.b32.xlu1 %v4037_v47, %s8429_s6  ;;  %8140 = vpow2.f32 %v7119_v32  ;;  %v7120_v47 = vmul.f32 -1.442695, %v3611_v8  ;;  %v3612_v6 = vadd.f32 %v3597_v3, %v8654_v57  ;;  %v3616_v3 = vadd.f32 %v3600_v24, %v8669_v11 }
0x105b   :  { %8142 = vpow2.f32 %v7118_v34 }
0x105c   :  { %8144 = vpow2.f32 %v7120_v47  ;;  %v7121_v51 = vmul.f32 -1.442695, %v3612_v6  ;;  %v7125_v44 = vmul.f32 -1.442695, %v3616_v3  ;;  %v7123_v47 = vmul.f32 -1.442695, %v3614_v43 }
0x105d   :  { %8146 = vpow2.f32 %v7122_v16 }
0x105e   :  { %3679 = vrot.lane.b32.xlu0 %v3600_v24, %s8426_s3  ;;  %3675 = vrot.lane.b32.xlu1 %v10155_v13, %s8426_s3  ;;  %8148 = vpow2.f32 %v7121_v51 }
0x105f   :  { %8150 = vpow2.f32 %v7124_v1 }
0x1064   :  { %v8141_v31 = vpop.eup %8140 }
0x1065   :  { %v8143_v46 = vpop.eup %8142  ;;  %v3642_v18 = vadd.f32 1.0, %v8141_v31 }
0x1066   :  { %v3641_v15 = vadd.f32 1.0, %v8143_v46  ;;  %v8145_v32 = vpop.eup %8144 }
0x1067   :  { %8152 = vrcp.f32 %v3642_v18  ;;  %v8147_v61 = vpop.eup %8146  ;;  %v3643_v34 = vadd.f32 1.0, %v8145_v32 }
0x1068   :  { %8154 = vrcp.f32 %v3641_v15  ;;  %v8149_v8 = vpop.eup %8148  ;;  %v3645_v7 = vadd.f32 1.0, %v8147_v61 }
0x1069   :  { %8156 = vrcp.f32 %v3643_v34  ;;  %v3644_v16 = vadd.f32 1.0, %v8149_v8  ;;  %v8151_v51 = vpop.eup %8150 }
0x106a   :  { %8158 = vrcp.f32 %v3645_v7  ;;  %v3647_v6 = vadd.f32 1.0, %v8151_v51 }
0x106b   :  { %8160 = vrcp.f32 %v3644_v16 }
0x106c   :  { %8162 = vpow2.f32 %v7125_v44 }
0x106d   :  { %8164 = vpow2.f32 %v7123_v47 }
0x106e   :  { %8166 = vrcp.f32 %v3647_v6 }
0x1071   :  { %v10214_v1 = vpop.eup %8152 }
0x1072   :  { %v10216_v31 = vpop.eup %8154 }
0x1073   :  { %v10222_v13 = vpop.eup %8156 }
0x1074   :  { %v10225_v8 = vpop.eup %8158 }
0x1075   :  { %v10228_v3 = vpop.eup %8160 }
0x1076   :  { %v8163_v44 = vpop.eup %8162 }
0x1077   :  { %v8165_v47 = vpop.eup %8164 }
0x1078   :  { %v10234_v6 = vpop.eup %8166 }
0x10b4   :  { %v3668_v46 = vpop.permute.xlu0 %3667  ;;  %v3666_v18 = vpop.permute.xlu1 %3665 }
0x10b5   :  { %v3690_v24 = vmul.f32 %v10214_v1, %v3668_v46  ;;  %v3689_v15 = vmul.f32 %v10216_v31, %v3666_v18 }
0x10b7   :  { %3707 = vrot.lane.b32.xlu0 %v3690_v24, %s8429_s6  ;;  %3705 = vrot.lane.b32.xlu1 %v3689_v15, %s8429_s6  ;;  %v3648_v24 = vadd.f32 1.0, %v8163_v44 }
0x10b8   :  { %v3674_v32 = vpop.permute.xlu0 %3673  ;;  %v3670_v61 = vpop.permute.xlu1 %3669 }
0x10b9   :  { %v3691_v34 = vmul.f32 %v10222_v13, %v3670_v61  ;;  %v3693_v16 = vmul.f32 %v10225_v8, %v3674_v32  ;;  %v3646_v61 = vadd.f32 1.0, %v8165_v47  ;;  %8168 = vrcp.f32 %v3648_v24 }
0x10bb   :  { %3709 = vrot.lane.b32.xlu1 %v3691_v34, %s8429_s6  ;;  %8170 = vrcp.f32 %v3646_v61 }
0x10bc   :  { %v4053_v7 = vpop.permute.xlu0 %4052  ;;  %v3672_v43 = vpop.permute.xlu1 %3671 }
0x10bd   :  { %v3692_v51 = vmul.f32 %v10228_v3, %v3672_v43  ;;  %v4074_v43 = vadd.f32 %v4053_v7, %v8649_v54 }
0x10bf   :  { %3711 = vrot.lane.b32.xlu0 %v3692_v51, %s8429_s6  ;;  %3713 = vrot.lane.b32.xlu1 %v3693_v16, %s8429_s6  ;;  %8172 = vtanh.f32 %v4074_v43 }
0x10c0   :  { %v4051_v46 = vpop.permute.xlu0 %4050  ;;  %v3678_v18 = vpop.permute.xlu1 %3677 }
0x10c1   :  { %v3695_v15 = vmul.f32 %v10234_v6, %v3678_v18  ;;  %v4073_v58 = vadd.f32 %v4051_v46, %v8647_v53 }
0x10c3   :  { %3717 = vrot.lane.b32.xlu0 %v3695_v15, %s8429_s6  ;;  %v10242_v0 = vpop.eup %8168 }
0x10c4   :  { %v4055_v34 = vpop.permute.xlu0 %4054  ;;  %v4049_v32 = vpop.permute.xlu1 %4048 }
0x10c5   :  { %v4072_v51 = vadd.f32 %v4049_v32, %v8651_v55  ;;  %v4075_v44 = vadd.f32 %v4055_v34, %v8654_v57  ;;  %v10245_v15 = vpop.eup %8170 }
0x10c7   :  { %8174 = vtanh.f32 %v4072_v51 }
0x10c8   :  { %v4061_v50 = vpop.permute.xlu0 %4060  ;;  %v4057_v16 = vpop.permute.xlu1 %4056  ;;  %8176 = vtanh.f32 %v4073_v58 }
0x10c9   :  { %v4076_v24 = vadd.f32 %v4057_v16, %v8662_v63  ;;  %8178 = vtanh.f32 %v4075_v44  ;;  %v4078_v34 = vadd.f32 %v4061_v50, %v8664_v2  ;;  %v8173_v51 = vpop.eup %8172 }
0x10cb   :  { %8180 = vtanh.f32 %v4076_v24 }
0x10cc   :  { %v4063_v18 = vpop.permute.xlu0 %4062  ;;  %v4059_v47 = vpop.permute.xlu1 %4058 }
0x10cd   :  { %v4077_v7 = vadd.f32 %v4059_v47, %v8657_v59  ;;  %v4079_v58 = vadd.f32 %v4063_v18, %v8669_v11 }
0x10cf   :  { %8182 = vtanh.f32 %v4077_v7 }
0x10d0   :  { %v3680_v61 = vpop.permute.xlu0 %3679  ;;  %v3676_v32 = vpop.permute.xlu1 %3675  ;;  %8184 = vtanh.f32 %v4078_v34 }
0x10d1   :  { %v3696_v43 = vmul.f32 %v10242_v0, %v3680_v61  ;;  %v3694_v46 = vmul.f32 %v10245_v15, %v3676_v32  ;;  %v8175_v16 = vpop.eup %8174  ;;  %8186 = vtanh.f32 %v4079_v58 }
0x10d2   :  { %v8177_v44 = vpop.eup %8176 }
0x10d3   :  { %3719 = vrot.lane.b32.xlu0 %v3696_v43, %s8429_s6  ;;  %3715 = vrot.lane.b32.xlu1 %v3694_v46, %s8429_s6  ;;  %v8179_v47 = vpop.eup %8178 }
0x10d5   :  { %v8181_v50 = vpop.eup %8180 }
0x10d7   :  { %4108 = vrot.lane.b32.xlu0 %v8173_v51, %s8430_s4  ;;  %4104 = vrot.lane.b32.xlu1 %v8175_v16, %s8430_s4 }
0x10d9   :  { %v8183_v24 = vpop.eup %8182 }
0x10da   :  { %v8185_v18 = vpop.eup %8184 }
0x10db   :  { %4106 = vrot.lane.b32.xlu0 %v8177_v44, %s8430_s4  ;;  %4110 = vrot.lane.b32.xlu1 %v8179_v47, %s8430_s4  ;;  %v8187_v7 = vpop.eup %8186 }
0x10df   :  { %4114 = vrot.lane.b32.xlu0 %v8183_v24, %s8430_s4  ;;  %4112 = vrot.lane.b32.xlu1 %v8181_v50, %s8430_s4 }
0x10e3   :  { %4118 = vrot.lane.b32.xlu0 %v8187_v7, %s8430_s4  ;;  %4116 = vrot.lane.b32.xlu1 %v8185_v18, %s8430_s4 }
0x1129   :  { %v3708_v61 = vpop.permute.xlu0 %3707  ;;  %v3706_v32 = vpop.permute.xlu1 %3705 }
0x112a   :  { %v3730_v43 = vadd.f32 %v3708_v61, %v8647_v53  ;;  %v3729_v46 = vadd.f32 %v3706_v32, %v8651_v55 }
0x112c   :  { %8188 = vtanh.f32 %v3730_v43 }
0x112d   :  { %8190 = vtanh.f32 %v3729_v46  ;;  %v3710_v34 = vpop.permute.xlu1 %3709 }
0x112e   :  { %v3731_v58 = vadd.f32 %v3710_v34, %v8649_v54 }
0x1130   :  { %8192 = vtanh.f32 %v3731_v58 }
0x1131   :  { %v3712_v51 = vpop.permute.xlu0 %3711  ;;  %v3714_v16 = vpop.permute.xlu1 %3713 }
0x1132   :  { %v3732_v44 = vadd.f32 %v3712_v51, %v8654_v57  ;;  %v3733_v47 = vadd.f32 %v3714_v16, %v8662_v63 }
0x1134   :  { %8194 = vtanh.f32 %v3732_v44  ;;  %v4088_v44 = vsub.f32 1.0, %v10173_v29 }
0x1135   :  { %8196 = vtanh.f32 %v3733_v47  ;;  %v3718_v50 = vpop.permute.xlu0 %3717 }
0x1136   :  { %v8189_v24 = vpop.eup %8188  ;;  %v3735_v18 = vadd.f32 %v3718_v50, %v8664_v2 }
0x1137   :  { %v8191_v7 = vpop.eup %8190  ;;  %3763 = vrot.lane.b32.xlu0 %v8189_v24, %s8430_s4  ;;  %v4136_v24 = vrot.slane %v9948_v33, 1 }
0x1138   :  { %8198 = vtanh.f32 %v3735_v18  ;;  %3761 = vrot.lane.b32.xlu1 %v8191_v7, %s8430_s4 }
0x1139   :  { %v4151_v7 = vmul.f32 %v10173_v29, %v4136_v24  ;;  %v4140_v24 = vrot.slane %v9974_v30, 1 }
0x113a   :  { %v8193_v61 = vpop.eup %8192 }
0x113c   :  { %3765 = vrot.lane.b32.xlu1 %v8193_v61, %s8430_s4  ;;  %v4089_v61 = vsub.f32 1.0, %v10169_v5 }
0x113e   :  { %v8195_v32 = vpop.eup %8194 }
0x113f   :  { %v8197_v43 = vpop.eup %8196  ;;  %3767 = vrot.lane.b32.xlu0 %v8195_v32, %s8430_s4  ;;  %v4137_v32 = vrot.slane %v9953_v23, 1  ;;  %v4139_v23 = vrot.slane %v9960_v21, 1 }
0x1140   :  { %3769 = vrot.lane.b32.xlu1 %v8197_v43, %s8430_s4  ;;  %v4091_v43 = vsub.f32 1.0, %v10177_v26 }
0x1142   :  { %v8199_v46 = vpop.eup %8198 }
0x1143   :  { %3773 = vrot.lane.b32.xlu0 %v8199_v46, %s8430_s4  ;;  %v4090_v46 = vsub.f32 1.0, %v10163_v9 }
0x1145   :  { %v3720_v34 = vpop.permute.xlu0 %3719  ;;  %v3716_v58 = vpop.permute.xlu1 %3715 }
0x1146   :  { %v3736_v51 = vadd.f32 %v3720_v34, %v8669_v11  ;;  %v3734_v16 = vadd.f32 %v3716_v58, %v8657_v59  ;;  %v4138_v58 = vrot.slane %v9977_v40, 1  ;;  %v4152_v11 = vmul.f32 %v10169_v5, %v4137_v32 }
0x1147   :  { %v4093_v59 = vsub.f32 1.0, %v10189_v19  ;;  %v4092_v40 = vsub.f32 1.0, %v10181_v48 }
0x1148   :  { %8200 = vtanh.f32 %v3736_v51  ;;  %v4154_v29 = vmul.f32 %v10177_v26, %v4138_v58  ;;  %v4155_v26 = vmul.f32 %v10181_v48, %v4139_v23 }
0x1149   :  { %8202 = vtanh.f32 %v3734_v16  ;;  %v4109_v47 = vpop.permute.xlu0 %4108  ;;  %v4105_v50 = vpop.permute.xlu1 %4104 }
0x114a   :  { %v4128_v18 = vmul.f32 %v4105_v50, %v4088_v44  ;;  %v4130_v50 = vmul.f32 %v4109_v47, %v4090_v46  ;;  %v4156_v47 = vmul.f32 %v10189_v19, %v4140_v24  ;;  %v4142_v19 = vrot.slane %v9991_v4, 1 }
0x114c   :  { %v10284_v16 = vadd.f32 %v4151_v7, %v4128_v18  ;;  %v11533_v18 = vrot.slane %v9963_v12, 1  ;;  %v4158_v24 = vmul.f32 %v10193_v37, %v4142_v19 }
0x114d   :  { %v4107_v34 = vpop.permute.xlu0 %4106  ;;  %v4111_v51 = vpop.permute.xlu1 %4110 }
0x114e   :  { %11532 = vst [vmem:[#allocation44_spill] sm:$0xff] %v10284_v16  ;;  %v4129_v33 = vmul.f32 %v4107_v34, %v4089_v61  ;;  %v4131_v44 = vmul.f32 %v4111_v51, %v4091_v43  ;;  %v4153_v7 = vmul.f32 %v10163_v9, %v11533_v18  ;;  %v4095_v9 = vsub.f32 1.0, %v10193_v37 }
0x1150   :  { %v10290_v2 = vadd.f32 %v4152_v11, %v4129_v33  ;;  %v10297_v5 = vadd.f32 %v4154_v29, %v4131_v44  ;;  %v4502_v11 = vrot.slane %v10284_v16, 2  ;;  %v10303_v51 = vadd.f32 %v4153_v7, %v4130_v50 }
0x1151   :  { %v4115_v61 = vpop.permute.xlu0 %4114  ;;  %v4113_v32 = vpop.permute.xlu1 %4112  ;;  %v4141_v44 = vrot.slane %v9986_v22, 1 }
0x1152   :  { %v8201_v43 = vpop.eup %8200  ;;  %v11430_v33 = vrot.slane %v10290_v2, 1  ;;  %v4133_v46 = vmul.f32 %v4115_v61, %v4093_v59  ;;  %v4132_v34 = vmul.f32 %v4113_v32, %v4092_v40  ;;  %v4094_v59 = vsub.f32 1.0, %v10185_v10 }
0x1153   :  { %v8203_v58 = vpop.eup %8202  ;;  %3775 = vrot.lane.b32.xlu0 %v8201_v43, %s8430_s4  ;;  %v4506_v50 = vrot.slane %v10297_v5, 7 }
0x1154   :  { %v4504_v23 = vsel %vm819_vm2, %v11430_v33, %v4502_v11  ;;  %v10312_v48 = vadd.f32 %v4156_v47, %v4133_v46  ;;  %v10314_v29 = vadd.f32 %v4155_v26, %v4132_v34  ;;  %3771 = vrot.lane.b32.xlu1 %v8203_v58, %s8430_s4  ;;  %v4157_v47 = vmul.f32 %v10185_v10, %v4141_v44 }
0x1155   :  { %v4505_v40 = vsel %vm822_vm3, %v10303_v51, %v4504_v23  ;;  %v4119_v18 = vpop.permute.xlu0 %4118  ;;  %v4117_v7 = vpop.permute.xlu1 %4116  ;;  %v3746_v44 = vsub.f32 1.0, %v10214_v1 }
0x1156   :  { %v4508_v61 = vrot.slane %v10314_v29, 6  ;;  %v4135_v32 = vmul.f32 %v4119_v18, %v4095_v9  ;;  %v4134_v26 = vmul.f32 %v4117_v7, %v4094_v59  ;;  %v4510_v43 = vrot.slane %v10312_v48, 5 }
0x1157   :  { %v4507_v11 = vsel %vm825_vm4, %v4506_v50, %v4505_v40  ;;  %v3794_v59 = vrot.slane %v10026_v62, 7  ;;  %v3745_v50 = vsub.f32 1.0, %v10216_v31  ;;  %v3795_v62 = vrot.slane %v10052_v25, 7 }
0x1158   :  { %v10326_v46 = vadd.f32 %v4158_v24, %v4135_v32  ;;  %v10328_v34 = vadd.f32 %v4157_v47, %v4134_v26  ;;  %v4509_v58 = vsel %vm828_vm5, %v4508_v61, %v4507_v11  ;;  %v3793_v24 = vrot.slane %v10030_v45, 7 }
0x1159   :  { %v4511_v23 = vsel %vm831_vm6, %v4510_v43, %v4509_v58  ;;  %v3809_v18 = vmul.f32 %v10214_v1, %v3794_v59  ;;  %v3747_v11 = vsub.f32 1.0, %v10222_v13  ;;  %v3748_v25 = vsub.f32 1.0, %v10228_v3 }
0x115a   :  { %11534 = vst [vmem:[#allocation8_spill] sm:$0xff] %v10326_v46  ;;  %v4512_v37 = vrot.slane %v10328_v34, 4  ;;  %v4514_v19 = vrot.slane %v10326_v46, 3  ;;  %v3808_v32 = vmul.f32 %v10216_v31, %v3793_v24  ;;  %v3810_v31 = vmul.f32 %v10222_v13, %v3795_v62 }
0x115b   :  { %v3749_v59 = vsub.f32 1.0, %v10225_v8 }
0x115c   :  { %v4513_v9 = vsel %vm834_vm7, %v4512_v37, %v4511_v23 }
0x115d   :  { %v4515_v10 = vsel %vm11450_vm8, %v4514_v19, %v4513_v9  ;;  %v3796_v9 = vrot.slane %v10048_v17, 7 }
0x115e   :  { %4516 = vrot.lane.b32.xlu1 %v4515_v10, %s8431_s20 }
0x115f   :  { %v3811_v13 = vmul.f32 %v10228_v3, %v3796_v9 }
0x11a9   :  { %v3764_v40 = vpop.permute.xlu0 %3763 }
0x11aa   :  { %v3786_v7 = vmul.f32 %v3764_v40, %v3746_v44  ;;  %v3762_v61 = vpop.permute.xlu1 %3761  ;;  %v3797_v40 = vrot.slane %v10072_v27, 7  ;;  %v3798_v27 = vrot.slane %v10099_v52, 7 }
0x11ab   :  { %v3785_v47 = vmul.f32 %v3762_v61, %v3745_v50 }
0x11ac   :  { %v10343_v26 = vadd.f32 %v3809_v18, %v3786_v7  ;;  %v3812_v18 = vmul.f32 %v10225_v8, %v3797_v40  ;;  %v3814_v8 = vmul.f32 %v10234_v6, %v3798_v27  ;;  %v11535_v40 = vrot.slane %v10076_v41, 7 }
0x11ad   :  { %v10345_v43 = vadd.f32 %v3808_v32, %v3785_v47  ;;  %v3751_v32 = vsub.f32 1.0, %v10234_v6  ;;  %v11537_v27 = vmov 0.0|0.0  }
0x11ae   :  { %v4176_v58 = vrot.slane %v10343_v26, 4  ;;  %v3766_v37 = vpop.permute.xlu1 %3765  ;;  %v10353_v45 = vsel %vm5543_vm14, %v10038_v20, %v10343_v26 }
0x11af   :  { %v4175_v1 = vrot.slane %v10345_v43, 5  ;;  %v3787_v19 = vmul.f32 %v3766_v37, %v3747_v11  ;;  %v10360_v23 = vsel %vm5543_vm14, %v10045_v49, %v10345_v43 }
0x11b1   :  { %v4177_v10 = vsel %vm819_vm2, %v4176_v58, %v4175_v1  ;;  %v10365_v44 = vadd.f32 %v3810_v31, %v3787_v19  ;;  %v3768_v20 = vpop.permute.xlu0 %3767 }
0x11b2   :  { %v3788_v50 = vmul.f32 %v3768_v20, %v3748_v25  ;;  %v3770_v24 = vpop.permute.xlu1 %3769  ;;  %v3799_v25 = vrot.slane %v10095_v36, 7 }
0x11b3   :  { %v4178_v49 = vrot.slane %v10365_v44, 3  ;;  %v3789_v7 = vmul.f32 %v3770_v24, %v3749_v59  ;;  %v10375_v17 = vsel %vm5543_vm14, %v10069_v56, %v10365_v44 }
0x11b4   :  { %v10377_v61 = vadd.f32 %v3811_v13, %v3788_v50  ;;  %v3813_v13 = vmul.f32 %v10245_v15, %v11535_v40 }
0x11b5   :  { %v4179_v3 = vsel %vm822_vm3, %v4178_v49, %v4177_v10  ;;  %v10382_v47 = vadd.f32 %v3812_v18, %v3789_v7  ;;  %v3774_v11 = vpop.permute.xlu0 %3773  ;;  %v3750_v10 = vsub.f32 1.0, %v10245_v15 }
0x11b6   :  { %v4180_v62 = vrot.slane %v10377_v61, 2  ;;  %v3791_v58 = vmul.f32 %v3774_v11, %v3751_v32  ;;  %v10389_v56 = vsel %vm5543_vm14, %v10060_v60, %v10377_v61  ;;  %v3752_v60 = vsub.f32 1.0, %v10242_v0  ;;  %v11538_v11 = vld [vmem:[#allocation3_spill] sm:$0xff] }
0x11b7   :  { %v4182_v37 = vrot.slane %v10382_v47, 1  ;;  %v10395_v52 = vsel %vm5543_vm14, %v10085_v28, %v10382_v47  ;;  %v3815_v28 = vmul.f32 %v10242_v0, %v3799_v25 }
0x11b8   :  { %v10397_v1 = vadd.f32 %v3814_v8, %v3791_v58  ;;  %v4181_v31 = vsel %vm825_vm4, %v4180_v62, %v4179_v3 }
0x11b9   :  { %v4183_v19 = vsel %vm828_vm5, %v4182_v37, %v4181_v31 }
0x11ba   :  { %v10404_v6 = vsel %vm5543_vm14, %v10111_v38, %v10397_v1  ;;  %v11429_v49 = vrot.slane %v10397_v1, 7 }
0x11c5   :  { %v3776_v9 = vpop.permute.xlu0 %3775 }
0x11c6   :  { %v3792_v20 = vmul.f32 %v3776_v9, %v3752_v60  ;;  %v3772_v59 = vpop.permute.xlu1 %3771 }
0x11c7   :  { %v3790_v50 = vmul.f32 %v3772_v59, %v3750_v10  ;;  %v11539_v10 = vld [vmem:[#allocation43_spill] sm:$0xff] }
0x11c8   :  { %v10413_v24 = vadd.f32 %v3815_v28, %v3792_v20 }
0x11c9   :  { %v10415_v38 = vadd.f32 %v3813_v13, %v3790_v50 }
0x11ca   :  { %v4187_v36 = vrot.slane %v10413_v24, 6  ;;  %v10422_v18 = vsel %vm5543_vm14, %v10104_v35, %v10413_v24 }
0x11cb   :  { %v4184_v0 = vsel %vm831_vm6, %v10415_v38, %v4183_v19  ;;  %v10429_v41 = vsel %vm5543_vm14, %v10091_v39, %v10415_v38  ;;  %v11536_v39 = vld [vmem:[#allocation2_spill] sm:$0xff] }
0x11cc   :  { %v4186_v15 = vsel %vm834_vm7, %v11429_v49, %v4184_v0 }
0x11cd   :  { %v4188_v7 = vsel %vm11450_vm8, %v4187_v36, %v4186_v15 }
0x11ce   :  { %4189 = vrot.lane.b32.xlu0 %v4188_v7, %s8430_s4 }
0x11d0   :  { %v4517_v32 = vpop.permute.xlu1 %4516 }
0x11d1   :  { %7416 = vmatmul.mubr.msk.f32.vlgmr.msra.gmra.mrb[16].mxu0 %vm215_vm9, %v4517_v32 }
0x11d2   :  { %7587 = vmatpush3.bf16.msra.mxu0 %v8557_v14  ;;  %7429 = vmatprep.mubr.msk.f32.mxu0 %vm8423_vm0, %v11488_v42 }
0x1240   :  { %v4190_v35 = vpop.permute.xlu0 %4189 }
0x1241   :  { %7409 = vmatmul.mubr.msk.f32.vlgmr.msra.gmra.mrb[16].mxu1 %vm215_vm9, %v4190_v35 }
0x1242   :  { %7584 = vmatpush3.bf16.msra.mxu1 %v11536_v39  ;;  %7422 = vmatprep.mubr.msk.f32.mxu1 %vm8423_vm0, %v11488_v42 }
0x1243   :  { %7588 = vmatprep.subr.bf16.mxu1 %v11537_v27 }
0x12a4   :  { %v4586_v3 = vpop.f32.mrb[16].mxu0 }
0x12a5   :  { %v4587_v62 = vadd.f32 %v4586_v3, %v11538_v11  ;;  %v7417_v8 = vpop.f32.mrb[17].mxu0 }
0x12a7   :  { %4600 = vrot.lane.b32.xlu1 %v4587_v62, %s8427_s0  ;;  %v4592_v14 = vrot.slane %v4587_v62, 1  ;;  %v4591_v58 = vrot.slane %v4587_v62, 7  ;;  %v4593_v37 = vrot.slane %v4587_v62, 2  ;;  %v4594_v31 = vrot.slane %v4587_v62, 3 }
0x12a8   :  { %v4595_v19 = vrot.slane %v4587_v62, 4  ;;  %v4596_v60 = vrot.slane %v4587_v62, 5  ;;  %v4597_v25 = vrot.slane %v4587_v62, 6 }
0x12a9   :  { %4602 = vrot.lane.b32.xlu0 %v4592_v14, %s8427_s0 }
0x12ab   :  { %4598 = vrot.lane.b32.xlu1 %v4591_v58, %s8427_s0 }
0x12ad   :  { %4604 = vrot.lane.b32.xlu0 %v4593_v37, %s8427_s0 }
0x12af   :  { %4606 = vrot.lane.b32.xlu1 %v4594_v31, %s8427_s0 }
0x12b1   :  { %4608 = vrot.lane.b32.xlu0 %v4595_v19, %s8427_s0 }
0x12b3   :  { %4610 = vrot.lane.b32.xlu1 %v4596_v60, %s8427_s0 }
0x12b5   :  { %4612 = vrot.lane.b32.xlu0 %v4597_v25, %s8427_s0 }
0x12b7   :  { %4680 = vrot.lane.b32.xlu1 %v4587_v62, %s8428_s30 }
0x12b9   :  { %4682 = vrot.lane.b32.xlu0 %v4592_v14, %s8428_s30 }
0x12bb   :  { %4678 = vrot.lane.b32.xlu1 %v4591_v58, %s8428_s30 }
0x12bd   :  { %4684 = vrot.lane.b32.xlu0 %v4593_v37, %s8428_s30 }
0x12bf   :  { %4686 = vrot.lane.b32.xlu1 %v4594_v31, %s8428_s30 }
0x12c1   :  { %4688 = vrot.lane.b32.xlu0 %v4595_v19, %s8428_s30 }
0x12c3   :  { %4690 = vrot.lane.b32.xlu1 %v4596_v60, %s8428_s30 }
0x12c5   :  { %4692 = vrot.lane.b32.xlu0 %v4597_v25, %s8428_s30 }
0x1314   :  { %v4259_v9 = vpop.f32.mrb[16].mxu1 }
0x1315   :  { %v10463_v28 = vadd.f32 %v11539_v10, %v4259_v9  ;;  %v7410_v20 = vpop.f32.mrb[17].mxu1 }
0x1316   :  { %v11540_v20 = vld [vmem:[#allocation4_spill] sm:$0xff] }
0x1317   :  { %v4265_v59 = vrot.slane %v10463_v28, 3  ;;  %v4264_v40 = vrot.slane %v10463_v28, 2  ;;  %v4267_v0 = vrot.slane %v10463_v28, 5  ;;  %v4266_v15 = vrot.slane %v10463_v28, 4 }
0x1318   :  { %v4269_v8 = vrot.slane %v10463_v28, 7  ;;  %v11432_v14 = vrot.slane %v10463_v28, 6  ;;  %v11431_v9 = vrot.slane %v10463_v28, 1 }
0x1319   :  { %4337 = vrot.lane.b32.xlu0 %v4265_v59, %s8426_s3  ;;  %4335 = vrot.lane.b32.xlu1 %v4264_v40, %s8426_s3  ;;  %v4601_v13 = vpop.permute.xlu1 %4600 }
0x131a   :  { %v4623_v50 = vadd.f32 %v4601_v13, %v8647_v53 }
0x131b   :  { %v4603_v36 = vpop.permute.xlu0 %4602 }
0x131c   :  { %v7146_v7 = vmul.f32 -1.442695, %v4623_v50  ;;  %v4624_v32 = vadd.f32 %v4603_v36, %v8649_v54 }
0x131d   :  { %4341 = vrot.lane.b32.xlu0 %v4267_v0, %s8426_s3  ;;  %4339 = vrot.lane.b32.xlu1 %v4266_v15, %s8426_s3  ;;  %v4599_v35 = vpop.permute.xlu1 %4598 }
0x131e   :  { %v7147_v39 = vmul.f32 -1.442695, %v4624_v32  ;;  %v4622_v3 = vadd.f32 %v4599_v35, %v8651_v55  ;;  %8204 = vpow2.f32 %v7146_v7 }
0x131f   :  { %v4605_v62 = vpop.permute.xlu0 %4604 }
0x1320   :  { %8206 = vpow2.f32 %v7147_v39  ;;  %v7145_v58 = vmul.f32 -1.442695, %v4622_v3  ;;  %v4625_v37 = vadd.f32 %v4605_v62, %v8654_v57 }
0x1321   :  { %4345 = vrot.lane.b32.xlu0 %v4269_v8, %s8426_s3  ;;  %4343 = vrot.lane.b32.xlu1 %v11432_v14, %s8426_s3  ;;  %v4607_v31 = vpop.permute.xlu1 %4606 }
0x1322   :  { %v7148_v19 = vmul.f32 -1.442695, %v4625_v37  ;;  %v4626_v60 = vadd.f32 %v4607_v31, %v8662_v63  ;;  %8208 = vpow2.f32 %v7145_v58 }
0x1323   :  { %v4609_v25 = vpop.permute.xlu0 %4608 }
0x1324   :  { %8210 = vpow2.f32 %v7148_v19  ;;  %v7149_v10 = vmul.f32 -1.442695, %v4626_v60  ;;  %v4627_v13 = vadd.f32 %v4609_v25, %v11540_v20  ;;  %v11541_v19 = vld [vmem:[#allocation6_spill] sm:$0xff]  ;;  %v11542_v25 = vld [vmem:[#allocation7_spill] sm:$0xff] }
0x1325   :  { %4347 = vrot.lane.b32.xlu0 %v10463_v28, %s8426_s3  ;;  %4349 = vrot.lane.b32.xlu1 %v11431_v9, %s8426_s3  ;;  %v4611_v39 = vpop.permute.xlu1 %4610 }
0x1326   :  { %v7150_v50 = vmul.f32 -1.442695, %v4627_v13  ;;  %8212 = vpow2.f32 %v7149_v10  ;;  %v4628_v60 = vadd.f32 %v4611_v39, %v11541_v19 }
0x1327   :  { %v4613_v62 = vpop.permute.xlu0 %4612 }
0x1328   :  { %8214 = vpow2.f32 %v7150_v50  ;;  %v8205_v36 = vpop.eup %8204  ;;  %v4629_v49 = vadd.f32 %v4613_v62, %v11542_v25 }
0x1329   :  { %v4655_v32 = vadd.f32 1.0, %v8205_v36  ;;  %v4681_v33 = vpop.permute.xlu1 %4680 }
0x132a   :  { %v8207_v7 = vpop.eup %8206  ;;  %v7152_v9 = vmul.f32 -1.442695, %v4629_v49 }
0x132b   :  { %v4656_v35 = vadd.f32 1.0, %v8207_v7  ;;  %8216 = vrcp.f32 %v4655_v32  ;;  %v7151_v7 = vmul.f32 -1.442695, %v4628_v60  ;;  %v4683_v32 = vpop.permute.xlu0 %4682 }
0x132c   :  { %v8209_v3 = vpop.eup %8208 }
0x132d   :  { %8218 = vrcp.f32 %v4656_v35  ;;  %v4654_v37 = vadd.f32 1.0, %v8209_v3 }
0x132e   :  { %v8211_v58 = vpop.eup %8210 }
0x132f   :  { %v4657_v31 = vadd.f32 1.0, %v8211_v58  ;;  %8220 = vrcp.f32 %v4654_v37  ;;  %v4679_v58 = vpop.permute.xlu1 %4678  ;;  %v4685_v37 = vpop.permute.xlu0 %4684 }
0x1330   :  { %v8213_v13 = vpop.eup %8212 }
0x1331   :  { %8222 = vrcp.f32 %v4657_v31  ;;  %v4658_v50 = vadd.f32 1.0, %v8213_v13 }
0x1332   :  { %v8215_v10 = vpop.eup %8214 }
0x1333   :  { %v4659_v36 = vadd.f32 1.0, %v8215_v10  ;;  %8224 = vrcp.f32 %v4658_v50 }
0x1335   :  { %8226 = vrcp.f32 %v4659_v36  ;;  %v10503_v35 = vpop.eup %8216  ;;  %v4689_v36 = vpop.permute.xlu0 %4688 }
0x1336   :  { %8228 = vpow2.f32 %v7151_v7  ;;  %v4703_v39 = vmul.f32 %v10503_v35, %v4681_v33 }
0x1337   :  { %v10505_v3 = vpop.eup %8218  ;;  %8230 = vpow2.f32 %v7152_v9  ;;  %v4687_v9 = vpop.permute.xlu1 %4686 }
0x1338   :  { %v4704_v62 = vmul.f32 %v10505_v3, %v4683_v32  ;;  %4720 = vrot.lane.b32.xlu1 %v4703_v39, %s8429_s6 }
0x1339   :  { %v10510_v31 = vpop.eup %8220  ;;  %v4693_v14 = vpop.permute.xlu0 %4692 }
0x133a   :  { %4722 = vrot.lane.b32.xlu0 %v4704_v62, %s8429_s6  ;;  %v4702_v60 = vmul.f32 %v10510_v31, %v4679_v58 }
0x133b   :  { %v10513_v49 = vpop.eup %8222 }
0x133c   :  { %v4705_v13 = vmul.f32 %v10513_v49, %v4685_v37  ;;  %4718 = vrot.lane.b32.xlu1 %v4702_v60, %s8429_s6  ;;  %v4691_v60 = vpop.permute.xlu1 %4690 }
0x133d   :  { %v10518_v33 = vpop.eup %8224 }
0x133e   :  { %4724 = vrot.lane.b32.xlu0 %v4705_v13, %s8429_s6  ;;  %v4706_v50 = vmul.f32 %v10518_v33, %v4687_v9 }
0x133f   :  { %v10521_v10 = vpop.eup %8226 }
0x1340   :  { %v4707_v7 = vmul.f32 %v10521_v10, %v4689_v36  ;;  %v8229_v32 = vpop.eup %8228  ;;  %4726 = vrot.lane.b32.xlu1 %v4706_v50, %s8429_s6  ;;  %v4280_v50 = vadd.f32 %v4265_v59, %v8647_v53  ;;  %v4284_v59 = vadd.f32 %v4269_v8, %v11540_v20 }
0x1341   :  { %v8231_v39 = vpop.eup %8230  ;;  %v4660_v62 = vadd.f32 1.0, %v8229_v32 }
0x1342   :  { %4728 = vrot.lane.b32.xlu0 %v4707_v7, %s8429_s6  ;;  %v4661_v58 = vadd.f32 1.0, %v8231_v39  ;;  %v4279_v7 = vadd.f32 %v4264_v40, %v8651_v55  ;;  %v7137_v32 = vmul.f32 -1.442695, %v4280_v50  ;;  %v4282_v39 = vadd.f32 %v4267_v0, %v8654_v57 }
0x1343   :  { %8232 = vrcp.f32 %v4660_v62  ;;  %v11543_v40 = vrot.slane %v10463_v28, 6  ;;  %v11544_v0 = vrot.slane %v10463_v28, 1 }
0x1344   :  { %8234 = vrcp.f32 %v4661_v58  ;;  %v7136_v62 = vmul.f32 -1.442695, %v4279_v7  ;;  %v7139_v58 = vmul.f32 -1.442695, %v4282_v39  ;;  %v4285_v7 = vadd.f32 %v10463_v28, %v11541_v19 }
0x1345   :  { %8236 = vpow2.f32 %v7137_v32  ;;  %v4286_v50 = vadd.f32 %v11544_v0, %v11542_v25 }
0x1346   :  { %8238 = vpow2.f32 %v7136_v62  ;;  %v7142_v8 = vmul.f32 -1.442695, %v4285_v7 }
0x1347   :  { %8240 = vpow2.f32 %v7139_v58  ;;  %v7143_v32 = vmul.f32 -1.442695, %v4286_v50 }
0x134d   :  { %v10527_v37 = vpop.eup %8232 }
0x134e   :  { %v10529_v13 = vpop.eup %8234  ;;  %v4708_v9 = vmul.f32 %v10527_v37, %v4691_v60 }
0x134f   :  { %v4709_v36 = vmul.f32 %v10529_v13, %v4693_v14  ;;  %v4281_v14 = vadd.f32 %v4266_v15, %v8649_v54  ;;  %v8237_v39 = vpop.eup %8236 }
0x1350   :  { %4730 = vrot.lane.b32.xlu1 %v4708_v9, %s8429_s6  ;;  %v4283_v9 = vadd.f32 %v11543_v40, %v8662_v63  ;;  %v8239_v62 = vpop.eup %8238 }
0x1351   :  { %4732 = vrot.lane.b32.xlu0 %v4709_v36, %s8429_s6  ;;  %v7138_v60 = vmul.f32 -1.442695, %v4281_v14  ;;  %v7141_v36 = vmul.f32 -1.442695, %v4284_v59  ;;  %v4312_v14 = vadd.f32 1.0, %v8237_v39  ;;  %v8241_v58 = vpop.eup %8240  ;;  %v4311_v59 = vadd.f32 1.0, %v8239_v62 }
0x1352   :  { %v7140_v15 = vmul.f32 -1.442695, %v4283_v9  ;;  %v4314_v4 = vadd.f32 1.0, %v8241_v58 }
0x1353   :  { %8242 = vpow2.f32 %v7138_v60 }
0x1354   :  { %8244 = vpow2.f32 %v7141_v36 }
0x1355   :  { %8246 = vpow2.f32 %v7140_v15 }
0x1356   :  { %8248 = vpow2.f32 %v7143_v32 }
0x1357   :  { %8250 = vpow2.f32 %v7142_v8 }
0x1358   :  { %8252 = vrcp.f32 %v4312_v14 }
0x1359   :  { %8254 = vrcp.f32 %v4311_v59 }
0x135a   :  { %8256 = vrcp.f32 %v4314_v4 }
0x135d   :  { %v8243_v40 = vpop.eup %8242 }
0x135e   :  { %v8245_v0 = vpop.eup %8244  ;;  %v4313_v60 = vadd.f32 1.0, %v8243_v40 }
0x135f   :  { %v8247_v9 = vpop.eup %8246  ;;  %v4316_v28 = vadd.f32 1.0, %v8245_v0 }
0x1360   :  { %v8249_v36 = vpop.eup %8248  ;;  %8258 = vrcp.f32 %v4313_v60  ;;  %v4315_v50 = vadd.f32 1.0, %v8247_v9 }
0x1361   :  { %v8251_v15 = vpop.eup %8250  ;;  %8260 = vrcp.f32 %v4316_v28  ;;  %v4318_v7 = vadd.f32 1.0, %v8249_v36 }
0x1362   :  { %8262 = vrcp.f32 %v4315_v50  ;;  %v4317_v32 = vadd.f32 1.0, %v8251_v15  ;;  %v10558_v8 = vpop.eup %8252 }
0x1363   :  { %v10560_v39 = vpop.eup %8254  ;;  %8264 = vrcp.f32 %v4318_v7 }
0x1364   :  { %8266 = vrcp.f32 %v4317_v32  ;;  %v10564_v59 = vpop.eup %8256 }
0x136a   :  { %v10568_v40 = vpop.eup %8258 }
0x136b   :  { %v10572_v36 = vpop.eup %8260 }
0x136c   :  { %v10576_v50 = vpop.eup %8262 }
0x138b   :  { %v4338_v62 = vpop.permute.xlu0 %4337  ;;  %v4336_v14 = vpop.permute.xlu1 %4335 }
0x138c   :  { %v4360_v58 = vmul.f32 %v10558_v8, %v4338_v62  ;;  %v4359_v4 = vmul.f32 %v10560_v39, %v4336_v14  ;;  %v10580_v14 = vpop.eup %8264 }
0x138e   :  { %4377 = vrot.lane.b32.xlu0 %v4360_v58, %s8429_s6  ;;  %4375 = vrot.lane.b32.xlu1 %v4359_v4, %s8429_s6  ;;  %v10584_v58 = vpop.eup %8266 }
0x138f   :  { %v4342_v0 = vpop.permute.xlu0 %4341  ;;  %v4340_v60 = vpop.permute.xlu1 %4339 }
0x1390   :  { %v4362_v9 = vmul.f32 %v10564_v59, %v4342_v0  ;;  %v4361_v28 = vmul.f32 %v10568_v40, %v4340_v60 }
0x1392   :  { %4381 = vrot.lane.b32.xlu0 %v4362_v9, %s8429_s6  ;;  %4379 = vrot.lane.b32.xlu1 %v4361_v28, %s8429_s6 }
0x1393   :  { %v4346_v15 = vpop.permute.xlu0 %4345  ;;  %v4344_v7 = vpop.permute.xlu1 %4343 }
0x1394   :  { %v4364_v32 = vmul.f32 %v10572_v36, %v4346_v15  ;;  %v4363_v62 = vmul.f32 %v10576_v50, %v4344_v7 }
0x1396   :  { %4385 = vrot.lane.b32.xlu0 %v4364_v32, %s8429_s6  ;;  %4383 = vrot.lane.b32.xlu1 %v4363_v62, %s8429_s6 }
0x1397   :  { %v4348_v4 = vpop.permute.xlu0 %4347  ;;  %v4350_v0 = vpop.permute.xlu1 %4349 }
0x1398   :  { %v4365_v60 = vmul.f32 %v10584_v58, %v4348_v4  ;;  %v4366_v9 = vmul.f32 %v10580_v14, %v4350_v0 }
0x139a   :  { %4387 = vrot.lane.b32.xlu0 %v4365_v60, %s8429_s6  ;;  %4389 = vrot.lane.b32.xlu1 %v4366_v9, %s8429_s6 }
0x13aa   :  { %v4721_v28 = vpop.permute.xlu1 %4720 }
0x13ab   :  { %v4743_v15 = vadd.f32 %v4721_v28, %v8647_v53 }
0x13ac   :  { %v4723_v7 = vpop.permute.xlu0 %4722 }
0x13ad   :  { %v4744_v32 = vadd.f32 %v4723_v7, %v8649_v54  ;;  %8268 = vtanh.f32 %v4743_v15 }
0x13ae   :  { %v4719_v62 = vpop.permute.xlu1 %4718 }
0x13af   :  { %8270 = vtanh.f32 %v4744_v32  ;;  %v4742_v22 = vadd.f32 %v4719_v62, %v8651_v55 }
0x13b0   :  { %v4725_v30 = vpop.permute.xlu0 %4724 }
0x13b1   :  { %v4745_v4 = vadd.f32 %v4725_v30, %v8654_v57  ;;  %8272 = vtanh.f32 %v4742_v22 }
0x13b2   :  { %v4727_v0 = vpop.permute.xlu1 %4726 }
0x13b3   :  { %8274 = vtanh.f32 %v4745_v4  ;;  %v4746_v60 = vadd.f32 %v4727_v0, %v8662_v63 }
0x13b4   :  { %v4729_v9 = vpop.permute.xlu0 %4728 }
0x13b5   :  { %v4747_v21 = vadd.f32 %v4729_v9, %v11540_v20  ;;  %8276 = vtanh.f32 %v4746_v60 }
0x13b7   :  { %8278 = vtanh.f32 %v4747_v21  ;;  %v8269_v28 = vpop.eup %8268 }
0x13b8   :  { %4776 = vrot.lane.b32.xlu1 %v8269_v28, %s8430_s4 }
0x13b9   :  { %v8271_v7 = vpop.eup %8270 }
0x13ba   :  { %4778 = vrot.lane.b32.xlu0 %v8271_v7, %s8430_s4 }
0x13bb   :  { %v8273_v15 = vpop.eup %8272 }
0x13bc   :  { %4774 = vrot.lane.b32.xlu1 %v8273_v15, %s8430_s4 }
0x13bd   :  { %v8275_v32 = vpop.eup %8274 }
0x13be   :  { %4780 = vrot.lane.b32.xlu0 %v8275_v32, %s8430_s4 }
0x13bf   :  { %v8277_v30 = vpop.eup %8276 }
0x13c0   :  { %4782 = vrot.lane.b32.xlu1 %v8277_v30, %s8430_s4 }
0x13c1   :  { %v8279_v22 = vpop.eup %8278 }
0x13c2   :  { %4784 = vrot.lane.b32.xlu0 %v8279_v22, %s8430_s4  ;;  %v4731_v62 = vpop.permute.xlu1 %4730 }
0x13c3   :  { %v4748_v21 = vadd.f32 %v4731_v62, %v11541_v19  ;;  %v4733_v4 = vpop.permute.xlu0 %4732 }
0x13c4   :  { %v4749_v0 = vadd.f32 %v4733_v4, %v11542_v25 }
0x13c5   :  { %8280 = vtanh.f32 %v4748_v21 }
0x13c6   :  { %8282 = vtanh.f32 %v4749_v0 }
0x13cf   :  { %v8281_v60 = vpop.eup %8280 }
0x13d0   :  { %v8283_v9 = vpop.eup %8282  ;;  %4786 = vrot.lane.b32.xlu1 %v8281_v60, %s8430_s4 }
0x13d1   :  { %4788 = vrot.lane.b32.xlu0 %v8283_v9, %s8430_s4 }
0x1400   :  { %v4378_v28 = vpop.permute.xlu0 %4377  ;;  %v4376_v7 = vpop.permute.xlu1 %4375 }
0x1401   :  { %v4400_v15 = vadd.f32 %v4378_v28, %v8647_v53  ;;  %v4399_v32 = vadd.f32 %v4376_v7, %v8651_v55 }
0x1403   :  { %8284 = vtanh.f32 %v4400_v15 }
0x1404   :  { %8286 = vtanh.f32 %v4399_v32  ;;  %v4382_v30 = vpop.permute.xlu0 %4381  ;;  %v4380_v22 = vpop.permute.xlu1 %4379 }
0x1405   :  { %v4402_v62 = vadd.f32 %v4382_v30, %v8654_v57  ;;  %v4401_v21 = vadd.f32 %v4380_v22, %v8649_v54 }
0x1407   :  { %8288 = vtanh.f32 %v4402_v62 }
0x1408   :  { %8290 = vtanh.f32 %v4401_v21  ;;  %v4386_v4 = vpop.permute.xlu0 %4385  ;;  %v4384_v0 = vpop.permute.xlu1 %4383 }
0x1409   :  { %v4404_v60 = vadd.f32 %v4386_v4, %v11540_v20  ;;  %v4403_v9 = vadd.f32 %v4384_v0, %v8662_v63 }
0x140b   :  { %8292 = vtanh.f32 %v4404_v60 }
0x140c   :  { %8294 = vtanh.f32 %v4403_v9  ;;  %v4388_v28 = vpop.permute.xlu0 %4387  ;;  %v4390_v7 = vpop.permute.xlu1 %4389 }
0x140d   :  { %v8285_v15 = vpop.eup %8284  ;;  %v4405_v32 = vadd.f32 %v4388_v28, %v11541_v19  ;;  %v4406_v12 = vadd.f32 %v4390_v7, %v11542_v25  ;;  %v4758_v28 = vsub.f32 1.0, %v10510_v31  ;;  %v4806_v7 = vrot.slane %v10284_v16, 1 }
0x140e   :  { %v8287_v30 = vpop.eup %8286  ;;  %4433 = vrot.lane.b32.xlu0 %v8285_v15, %s8430_s4  ;;  %v4808_v19 = vrot.slane %v10297_v5, 1 }
0x140f   :  { %8296 = vtanh.f32 %v4405_v32  ;;  %4431 = vrot.lane.b32.xlu1 %v8287_v30, %s8430_s4  ;;  %v4821_v30 = vmul.f32 %v10510_v31, %v4806_v7  ;;  %v4762_v31 = vsub.f32 1.0, %v10518_v33  ;;  %v11545_v7 = vrot.slane %v10290_v2, 1 }
0x1410   :  { %8298 = vtanh.f32 %v4406_v12 }
0x1411   :  { %v8289_v22 = vpop.eup %8288 }
0x1412   :  { %v8291_v62 = vpop.eup %8290  ;;  %4437 = vrot.lane.b32.xlu0 %v8289_v22, %s8430_s4  ;;  %v4760_v22 = vsub.f32 1.0, %v10505_v3 }
0x1413   :  { %4435 = vrot.lane.b32.xlu1 %v8291_v62, %s8430_s4 }
0x1415   :  { %v8293_v21 = vpop.eup %8292 }
0x1416   :  { %v8295_v4 = vpop.eup %8294  ;;  %4441 = vrot.lane.b32.xlu0 %v8293_v21, %s8430_s4  ;;  %v4759_v21 = vsub.f32 1.0, %v10503_v35 }
0x1417   :  { %4439 = vrot.lane.b32.xlu1 %v8295_v4, %s8430_s4 }
0x1419   :  { %v8297_v0 = vpop.eup %8296 }
0x141a   :  { %v8299_v60 = vpop.eup %8298  ;;  %4443 = vrot.lane.b32.xlu0 %v8297_v0, %s8430_s4  ;;  %v4761_v0 = vsub.f32 1.0, %v10513_v49 }
0x141b   :  { %4445 = vrot.lane.b32.xlu1 %v8299_v60, %s8430_s4  ;;  %v4807_v60 = vrot.slane %v10303_v51, 1 }
0x142a   :  { %v4777_v9 = vpop.permute.xlu1 %4776 }
0x142b   :  { %v4799_v25 = vmul.f32 %v4777_v9, %v4759_v21  ;;  %v4809_v9 = vrot.slane %v10314_v29, 1 }
0x142c   :  { %v4779_v12 = vpop.permute.xlu0 %4778 }
0x142d   :  { %v4800_v27 = vmul.f32 %v4779_v12, %v4760_v22 }
0x142e   :  { %v4775_v15 = vpop.permute.xlu1 %4774 }
0x142f   :  { %v4798_v32 = vmul.f32 %v4775_v15, %v4758_v28  ;;  %v4823_v28 = vmul.f32 %v10505_v3, %v4807_v60  ;;  %v4822_v15 = vmul.f32 %v10503_v35, %v11545_v7  ;;  %v4763_v3 = vsub.f32 1.0, %v10521_v10 }
0x1430   :  { %v4781_v62 = vpop.permute.xlu0 %4780  ;;  %v4764_v7 = vsub.f32 1.0, %v10527_v37 }
0x1431   :  { %v10627_v4 = vadd.f32 %v4821_v30, %v4798_v32  ;;  %v4801_v16 = vmul.f32 %v4781_v62, %v4761_v0  ;;  %v4824_v30 = vmul.f32 %v10513_v49, %v4808_v19  ;;  %v10639_v63 = vadd.f32 %v4823_v28, %v4800_v27 }
0x1432   :  { %v4783_v20 = vpop.permute.xlu1 %4782  ;;  %v10642_v62 = vadd.f32 %v4822_v15, %v4799_v25  ;;  %v4825_v0 = vmul.f32 %v10518_v33, %v4809_v9  ;;  %v4810_v27 = vrot.slane %v10312_v48, 1  ;;  %v4811_v15 = vrot.slane %v10328_v34, 1 }
0x1433   :  { %v11444_v32 = vrot.slane %v10627_v4, 1  ;;  %v4802_v12 = vmul.f32 %v4783_v20, %v4762_v31  ;;  %v10644_v21 = vadd.f32 %v4824_v30, %v4801_v16  ;;  %v5174_v49 = vrot.slane %v10639_v63, 7 }
0x1434   :  { %v4785_v22 = vpop.permute.xlu0 %4784  ;;  %v4826_v16 = vmul.f32 %v10521_v10, %v4810_v27  ;;  %v4827_v10 = vmul.f32 %v10527_v37, %v4811_v15  ;;  %v4463_v15 = vrot.slane %v10345_v43, 7  ;;  %v4465_v43 = vrot.slane %v10365_v44, 7 }
0x1435   :  { %v5173_v35 = vsel %vm819_vm2, %v10642_v62, %v11444_v32  ;;  %v4803_v19 = vmul.f32 %v4785_v22, %v4763_v3  ;;  %v10654_v20 = vadd.f32 %v4825_v0, %v4802_v12  ;;  %v5176_v25 = vrot.slane %v10644_v21, 6 }
0x1436   :  { %v5175_v60 = vsel %vm822_vm3, %v5174_v49, %v5173_v35  ;;  %v4765_v12 = vsub.f32 1.0, %v10529_v13  ;;  %v4812_v22 = vrot.slane %v10326_v46, 1 }
0x1437   :  { %v10659_v28 = vadd.f32 %v4826_v16, %v4803_v19  ;;  %v5178_v33 = vrot.slane %v10654_v20, 5  ;;  %v5177_v31 = vsel %vm825_vm4, %v5176_v25, %v5175_v60 }
0x1438   :  { %v4828_v27 = vmul.f32 %v10529_v13, %v4812_v22  ;;  %v4464_v13 = vrot.slane %v10343_v26, 7  ;;  %v4478_v22 = vmul.f32 %v10560_v39, %v4463_v15  ;;  %v4419_v15 = vsub.f32 1.0, %v10576_v50 }
0x1439   :  { %v5180_v30 = vrot.slane %v10659_v28, 4  ;;  %v5179_v35 = vsel %vm828_vm5, %v5178_v33, %v5177_v31  ;;  %v4416_v33 = vsub.f32 1.0, %v10558_v8 }
0x143b   :  { %v5181_v16 = vsel %vm831_vm6, %v5180_v30, %v5179_v35  ;;  %v4479_v30 = vmul.f32 %v10558_v8, %v4464_v13  ;;  %v4417_v35 = vsub.f32 1.0, %v10568_v40  ;;  %v4468_v13 = vrot.slane %v10415_v38, 7 }
0x1442   :  { %v4787_v9 = vpop.permute.xlu1 %4786 }
0x1443   :  { %v4804_v3 = vmul.f32 %v4787_v9, %v4764_v7  ;;  %v4789_v0 = vpop.permute.xlu0 %4788  ;;  %v4415_v7 = vsub.f32 1.0, %v10560_v39 }
0x1444   :  { %v4805_v19 = vmul.f32 %v4789_v0, %v4765_v12 }
0x1445   :  { %v10671_v49 = vadd.f32 %v4827_v10, %v4804_v3  ;;  %v4466_v3 = vrot.slane %v10377_v61, 7 }
0x1446   :  { %v10673_v25 = vadd.f32 %v4828_v27, %v4805_v19 }
0x1447   :  { %v5182_v60 = vrot.slane %v10671_v49, 3  ;;  %v4481_v27 = vmul.f32 %v10564_v59, %v4466_v3 }
0x1448   :  { %v5184_v32 = vrot.slane %v10673_v25, 2 }
0x1449   :  { %v5183_v46 = vsel %vm834_vm7, %v5182_v60, %v5181_v16  ;;  %v4480_v60 = vmul.f32 %v10568_v40, %v4465_v43  ;;  %v4467_v40 = vrot.slane %v10382_v47, 7  ;;  %v4422_v43 = vsub.f32 1.0, %v10580_v14 }
0x144a   :  { %v5185_v37 = vsel %vm11450_vm8, %v5184_v32, %v5183_v46  ;;  %v4418_v32 = vsub.f32 1.0, %v10564_v59  ;;  %v4420_v59 = vsub.f32 1.0, %v10572_v36 }
0x144b   :  { %5186 = vrot.lane.b32.xlu1 %v5185_v37, %s8431_s20 }
0x1480   :  { %v4434_v31 = vpop.permute.xlu0 %4433 }
0x1481   :  { %v4456_v9 = vmul.f32 %v4434_v31, %v4416_v33  ;;  %v4432_v12 = vpop.permute.xlu1 %4431 }
0x1482   :  { %v4455_v10 = vmul.f32 %v4432_v12, %v4415_v7 }
0x1483   :  { %v10687_v46 = vadd.f32 %v4479_v30, %v4456_v9 }
0x1484   :  { %v10691_v26 = vadd.f32 %v4478_v22, %v4455_v10  ;;  %v4438_v0 = vpop.permute.xlu0 %4437  ;;  %v4482_v10 = vmul.f32 %v10576_v50, %v4467_v40 }
0x1485   :  { %v4846_v8 = vrot.slane %v10687_v46, 5  ;;  %v4458_v39 = vmul.f32 %v4438_v0, %v4418_v32  ;;  %v4436_v19 = vpop.permute.xlu1 %4435  ;;  %v10700_v16 = vsel %vm5552_vm15, %v10353_v45, %v10687_v46 }
0x1486   :  { %v4845_v61 = vrot.slane %v10691_v26, 6  ;;  %v4457_v37 = vmul.f32 %v4436_v19, %v4417_v35  ;;  %v10707_v44 = vsel %vm5552_vm15, %v10360_v23, %v10691_v26  ;;  %v4483_v23 = vmul.f32 %v10572_v36, %v4468_v13 }
0x1487   :  { %v10709_v33 = vadd.f32 %v4481_v27, %v4458_v39  ;;  %v4421_v36 = vsub.f32 1.0, %v10584_v58  ;;  %v11546_v27 = vrot.slane %v10397_v1, 7 }
0x1488   :  { %v4847_v31 = vsel %vm819_vm2, %v4846_v8, %v4845_v61  ;;  %v10714_v45 = vadd.f32 %v4480_v60, %v4457_v37  ;;  %v4442_v7 = vpop.permute.xlu0 %4441  ;;  %v4469_v8 = vrot.slane %v10413_v24, 7 }
0x1489   :  { %v4850_v30 = vrot.slane %v10709_v33, 3  ;;  %v4460_v9 = vmul.f32 %v4442_v7, %v4420_v59  ;;  %v4440_v12 = vpop.permute.xlu1 %4439  ;;  %v10723_v22 = vsel %vm5552_vm15, %v10389_v56, %v10709_v33 }
0x148a   :  { %v4848_v38 = vrot.slane %v10714_v45, 4  ;;  %v4459_v32 = vmul.f32 %v4440_v12, %v4419_v15  ;;  %v10730_v47 = vsel %vm5552_vm15, %v10375_v17, %v10714_v45  ;;  %v4484_v17 = vmul.f32 %v10584_v58, %v11546_v27 }
0x148b   :  { %v10732_v3 = vadd.f32 %v4483_v23, %v4460_v9  ;;  %v4485_v37 = vmul.f32 %v10580_v14, %v4469_v8 }
0x148c   :  { %v4849_v0 = vsel %vm822_vm3, %v4848_v38, %v4847_v31  ;;  %v10736_v35 = vadd.f32 %v4482_v10, %v4459_v32  ;;  %v4444_v56 = vpop.permute.xlu0 %4443 }
0x148d   :  { %v4854_v50 = vrot.slane %v10732_v3, 1  ;;  %v4461_v39 = vmul.f32 %v4444_v56, %v4421_v36  ;;  %v4446_v19 = vpop.permute.xlu1 %4445  ;;  %v4851_v61 = vsel %vm825_vm4, %v4850_v30, %v4849_v0  ;;  %v10757_v1 = vsel %vm5552_vm15, %v10429_v41, %v10732_v3 }
0x148e   :  { %v4852_v60 = vrot.slane %v10736_v35, 2  ;;  %v4462_v59 = vmul.f32 %v4446_v19, %v4422_v43  ;;  %v10750_v13 = vsel %vm5552_vm15, %v10395_v52, %v10736_v35  ;;  %v8421_v43 = vld [vmem:[%s11352_s7] ss:$0 sm:$0xff] }
0x148f   :  { %v10752_v24 = vadd.f32 %v4484_v17, %v4461_v39 }
0x1490   :  { %v10759_v58 = vadd.f32 %v4485_v37, %v4462_v59  ;;  %v4853_v31 = vsel %vm828_vm5, %v4852_v60, %v4851_v61 }
0x1491   :  { %v4855_v7 = vsel %vm831_vm6, %v4854_v50, %v4853_v31  ;;  %v10766_v14 = vsel %vm5552_vm15, %v10404_v6, %v10752_v24 }
0x1492   :  { %11547 = vst [vmem:[#allocation33_spill] sm:$0xff] %v10759_v58  ;;  %11548 = vst [vmem:[#allocation2_spill] sm:$0xff] %v10766_v14  ;;  %v11446_v52 = vrot.slane %v10759_v58, 7  ;;  %v4856_v15 = vsel %vm834_vm7, %v10752_v24, %v4855_v7  ;;  %v10774_v41 = vsel %vm5552_vm15, %v10422_v18, %v10759_v58 }
0x1493   :  { %11549 = vst [vmem:[#allocation3_spill] sm:$0xff] %v10774_v41 }
0x1494   :  { %v4858_v40 = vsel %vm11450_vm8, %v11446_v52, %v4856_v15  ;;  %vm5561_vm8 = vcmask 1046528  }
0x1495   :  { %4859 = vrot.lane.b32.xlu0 %v4858_v40, %s8430_s4 }
0x14bd   :  { %v5187_v30 = vpop.permute.xlu1 %5186 }
0x14be   :  { %7430 = vmatmul.mubr.msk.f32.vlgmr.msra.gmra.mrb[18].mxu0 %vm215_vm9, %v5187_v30 }
0x1507   :  { %v4860_v6 = vpop.permute.xlu0 %4859 }
0x1508   :  { %7423 = vmatmul.mubr.msk.f32.vlgmr.msra.gmra.mrb[18].mxu1 %vm215_vm9, %v4860_v6 }
0x1509   :  { %7440 = vmatprep.mubr.msk.f32.mxu1 %vm8423_vm0, %v11488_v42 }
0x1591   :  { %v5256_v23 = vpop.f32.mrb[18].mxu0 }
0x1592   :  { %v5257_v9 = vadd.f32 %v5256_v23, %v11538_v11  ;;  %v7431_v18 = vpop.f32.mrb[19].mxu0 }
0x1594   :  { %5268 = vrot.lane.b32.xlu1 %v5257_v9, %s8427_s0  ;;  %v5261_v12 = vrot.slane %v5257_v9, 1  ;;  %v5262_v38 = vrot.slane %v5257_v9, 2  ;;  %v5263_v10 = vrot.slane %v5257_v9, 3  ;;  %v5264_v32 = vrot.slane %v5257_v9, 4 }
0x1595   :  { %v5265_v36 = vrot.slane %v5257_v9, 5  ;;  %v5266_v0 = vrot.slane %v5257_v9, 6  ;;  %v5267_v11 = vrot.slane %v5257_v9, 7 }
0x1596   :  { %5270 = vrot.lane.b32.xlu0 %v5261_v12, %s8427_s0 }
0x1598   :  { %5272 = vrot.lane.b32.xlu1 %v5262_v38, %s8427_s0 }
0x159a   :  { %5274 = vrot.lane.b32.xlu0 %v5263_v10, %s8427_s0 }
0x159c   :  { %5276 = vrot.lane.b32.xlu1 %v5264_v32, %s8427_s0 }
0x159e   :  { %5278 = vrot.lane.b32.xlu0 %v5265_v36, %s8427_s0 }
0x15a0   :  { %5280 = vrot.lane.b32.xlu1 %v5266_v0, %s8427_s0 }
0x15a2   :  { %5282 = vrot.lane.b32.xlu0 %v5267_v11, %s8427_s0 }
0x15a4   :  { %5348 = vrot.lane.b32.xlu1 %v5257_v9, %s8428_s30 }
0x15db   :  { %v4929_v56 = vpop.f32.mrb[18].mxu1 }
0x15dc   :  { %v10797_v8 = vadd.f32 %v8421_v43, %v4929_v56  ;;  %v7424_v50 = vpop.f32.mrb[19].mxu1 }
0x15de   :  { %v4935_v27 = vrot.slane %v10797_v8, 2  ;;  %v4934_v17 = vrot.slane %v10797_v8, 1  ;;  %v4937_v39 = vrot.slane %v10797_v8, 4  ;;  %v4936_v19 = vrot.slane %v10797_v8, 3 }
0x15df   :  { %v4938_v61 = vrot.slane %v10797_v8, 5  ;;  %v4939_v60 = vrot.slane %v10797_v8, 6  ;;  %v4940_v37 = vrot.slane %v10797_v8, 7 }
0x15e0   :  { %5007 = vrot.lane.b32.xlu0 %v4935_v27, %s8426_s3  ;;  %5005 = vrot.lane.b32.xlu1 %v4934_v17, %s8426_s3  ;;  %v4950_v59 = vadd.f32 %v4935_v27, %v8647_v53  ;;  %v4949_v15 = vadd.f32 %v4934_v17, %v8651_v55  ;;  %v4952_v30 = vadd.f32 %v4937_v39, %v8654_v57 }
0x15e1   :  { %v4951_v23 = vadd.f32 %v4936_v19, %v8649_v54 }
0x15e2   :  { %v7155_v40 = vmul.f32 -1.442695, %v4950_v59  ;;  %v7154_v6 = vmul.f32 -1.442695, %v4949_v15  ;;  %v7157_v18 = vmul.f32 -1.442695, %v4952_v30 }
0x15e4   :  { %5011 = vrot.lane.b32.xlu0 %v4937_v39, %s8426_s3  ;;  %5009 = vrot.lane.b32.xlu1 %v4936_v19, %s8426_s3  ;;  %8300 = vpow2.f32 %v7155_v40  ;;  %v11550_v39 = vld [vmem:[#allocation5_spill] sm:$0xff] }
0x15e5   :  { %8302 = vpow2.f32 %v7154_v6 }
0x15e6   :  { %8304 = vpow2.f32 %v7157_v18  ;;  %v11552_v18 = vld [vmem:[#allocation6_spill] sm:$0xff] }
0x15e8   :  { %5350 = vrot.lane.b32.xlu0 %v5261_v12, %s8428_s30  ;;  %5352 = vrot.lane.b32.xlu1 %v5262_v38, %s8428_s30 }
0x15ec   :  { %5354 = vrot.lane.b32.xlu0 %v5263_v10, %s8428_s30  ;;  %5356 = vrot.lane.b32.xlu1 %v5264_v32, %s8428_s30  ;;  %v7156_v10 = vmul.f32 -1.442695, %v4951_v23 }
0x15ee   :  { %8306 = vpow2.f32 %v7156_v10  ;;  %v8301_v27 = vpop.eup %8300  ;;  %v11553_v10 = vld [vmem:[#allocation7_spill] sm:$0xff] }
0x15ef   :  { %v8303_v30 = vpop.eup %8302  ;;  %v4982_v6 = vadd.f32 1.0, %v8301_v27 }
0x15f0   :  { %5358 = vrot.lane.b32.xlu0 %v5265_v36, %s8428_s30  ;;  %5360 = vrot.lane.b32.xlu1 %v5266_v0, %s8428_s30  ;;  %v8305_v23 = vpop.eup %8304 }
0x15f4   :  { %5362 = vrot.lane.b32.xlu0 %v5267_v11, %s8428_s30  ;;  %5013 = vrot.lane.b32.xlu1 %v4938_v61, %s8426_s3 }
0x15f8   :  { %5015 = vrot.lane.b32.xlu0 %v4939_v60, %s8426_s3  ;;  %5017 = vrot.lane.b32.xlu1 %v4940_v37, %s8426_s3 }
0x15fc   :  { %5019 = vrot.lane.b32.xlu0 %v10797_v8, %s8426_s3 }
0x1606   :  { %v5269_v31 = vpop.permute.xlu1 %5268 }
0x1607   :  { %v5292_v38 = vadd.f32 %v5269_v31, %v8651_v55  ;;  %v11551_v31 = vld [vmem:[#allocation4_spill] sm:$0xff] }
0x1608   :  { %v5271_v7 = vpop.permute.xlu0 %5270  ;;  %v4954_v27 = vadd.f32 %v4939_v60, %v11551_v31 }
0x1609   :  { %v5293_v32 = vadd.f32 %v5271_v7, %v8647_v53  ;;  %v7163_v36 = vmul.f32 -1.442695, %v5292_v38 }
0x160a   :  { %v5273_v9 = vpop.permute.xlu1 %5272 }
0x160b   :  { %v5294_v11 = vadd.f32 %v5273_v9, %v8649_v54  ;;  %v7164_v43 = vmul.f32 -1.442695, %v5293_v32  ;;  %8308 = vpow2.f32 %v7163_v36  ;;  %v4981_v36 = vadd.f32 1.0, %v8303_v30 }
0x160c   :  { %v5275_v12 = vpop.permute.xlu0 %5274  ;;  %v4956_v30 = vadd.f32 %v10797_v8, %v11553_v10 }
0x160d   :  { %v5295_v50 = vadd.f32 %v5275_v12, %v8654_v57  ;;  %v7165_v17 = vmul.f32 -1.442695, %v5294_v11  ;;  %8310 = vpow2.f32 %v7164_v43  ;;  %v8307_v11 = vpop.eup %8306  ;;  %v4953_v43 = vadd.f32 %v4938_v61, %v11550_v39 }
0x160e   :  { %v5277_v0 = vpop.permute.xlu1 %5276  ;;  %v7159_v61 = vmul.f32 -1.442695, %v4954_v27 }
0x160f   :  { %v5296_v19 = vadd.f32 %v5277_v0, %v11550_v39  ;;  %v7166_v59 = vmul.f32 -1.442695, %v5295_v50  ;;  %8312 = vpow2.f32 %v7165_v17  ;;  %v4984_v0 = vadd.f32 1.0, %v8305_v23 }
0x1610   :  { %v5279_v56 = vpop.permute.xlu0 %5278 }
0x1611   :  { %v5297_v15 = vadd.f32 %v5279_v56, %v11551_v31  ;;  %v7167_v9 = vmul.f32 -1.442695, %v5296_v19  ;;  %8314 = vpow2.f32 %v7166_v59  ;;  %v4983_v19 = vadd.f32 1.0, %v8307_v11 }
0x1612   :  { %v5281_v7 = vpop.permute.xlu1 %5280  ;;  %8316 = vrcp.f32 %v4982_v6  ;;  %v7158_v59 = vmul.f32 -1.442695, %v4953_v43 }
0x1613   :  { %v5298_v38 = vadd.f32 %v5281_v7, %v11552_v18  ;;  %v7168_v12 = vmul.f32 -1.442695, %v5297_v15  ;;  %8318 = vpow2.f32 %v7167_v9  ;;  %v4955_v15 = vadd.f32 %v4940_v37, %v11552_v18 }
0x1614   :  { %v5283_v40 = vpop.permute.xlu0 %5282 }
0x1615   :  { %v5299_v32 = vadd.f32 %v5283_v40, %v11553_v10  ;;  %v7169_v56 = vmul.f32 -1.442695, %v5298_v38  ;;  %v8309_v50 = vpop.eup %8308  ;;  %8320 = vpow2.f32 %v7168_v12  ;;  %v7160_v9 = vmul.f32 -1.442695, %v4955_v15 }
0x1616   :  { %8322 = vrcp.f32 %v4981_v36  ;;  %v5324_v40 = vadd.f32 1.0, %v8309_v50  ;;  %v5349_v38 = vpop.permute.xlu1 %5348  ;;  %v7161_v12 = vmul.f32 -1.442695, %v4956_v30 }
0x1617   :  { %v7170_v17 = vmul.f32 -1.442695, %v5299_v32  ;;  %v8311_v7 = vpop.eup %8310  ;;  %8324 = vrcp.f32 %v4984_v0 }
0x1618   :  { %8326 = vpow2.f32 %v7169_v56  ;;  %v5325_v23 = vadd.f32 1.0, %v8311_v7 }
0x1619   :  { %8328 = vpow2.f32 %v7170_v17  ;;  %v8313_v6 = vpop.eup %8312 }
0x161a   :  { %8330 = vrcp.f32 %v4983_v19  ;;  %v5326_v37 = vadd.f32 1.0, %v8313_v6 }
0x161b   :  { %v8315_v60 = vpop.eup %8314  ;;  %8332 = vpow2.f32 %v7158_v59 }
0x161c   :  { %8334 = vrcp.f32 %v5324_v40  ;;  %v10839_v32 = vpop.eup %8316  ;;  %v5327_v11 = vadd.f32 1.0, %v8315_v60 }
0x161d   :  { %8336 = vpow2.f32 %v7159_v61  ;;  %v8319_v36 = vpop.eup %8318 }
0x161e   :  { %8338 = vrcp.f32 %v5325_v23  ;;  %v5328_v27 = vadd.f32 1.0, %v8319_v36 }
0x161f   :  { %v8321_v0 = vpop.eup %8320  ;;  %8340 = vpow2.f32 %v7160_v9 }
0x1620   :  { %v10841_v8 = vpop.eup %8322  ;;  %8342 = vpow2.f32 %v7161_v12  ;;  %v5329_v59 = vadd.f32 1.0, %v8321_v0 }
0x1621   :  { %v10843_v50 = vpop.eup %8324  ;;  %8344 = vrcp.f32 %v5326_v37 }
0x1622   :  { %v8327_v7 = vpop.eup %8326  ;;  %8346 = vrcp.f32 %v5327_v11 }
0x1623   :  { %v8329_v15 = vpop.eup %8328  ;;  %8348 = vrcp.f32 %v5328_v27  ;;  %v5330_v23 = vadd.f32 1.0, %v8327_v7 }
0x1624   :  { %v10849_v40 = vpop.eup %8330  ;;  %8350 = vrcp.f32 %v5329_v59  ;;  %v5331_v37 = vadd.f32 1.0, %v8329_v15 }
0x1625   :  { %v8333_v6 = vpop.eup %8332  ;;  %8352 = vrcp.f32 %v5330_v23 }
0x1626   :  { %v10853_v12 = vpop.eup %8334  ;;  %v4985_v27 = vadd.f32 1.0, %v8333_v6  ;;  %8354 = vrcp.f32 %v5331_v37 }
0x1627   :  { %v8337_v36 = vpop.eup %8336 }
0x1628   :  { %v10857_v11 = vpop.eup %8338  ;;  %8356 = vrcp.f32 %v4985_v27 }
0x1652   :  { %v5008_v43 = vpop.permute.xlu0 %5007  ;;  %v5006_v56 = vpop.permute.xlu1 %5005 }
0x1653   :  { %v5030_v17 = vmul.f32 %v10839_v32, %v5008_v43  ;;  %v5029_v19 = vmul.f32 %v10841_v8, %v5006_v56  ;;  %v8341_v56 = vpop.eup %8340 }
0x1654   :  { %v8343_v7 = vpop.eup %8342  ;;  %v4987_v6 = vadd.f32 1.0, %v8341_v56 }
0x1655   :  { %5047 = vrot.lane.b32.xlu0 %v5030_v17, %s8429_s6  ;;  %5045 = vrot.lane.b32.xlu1 %v5029_v19, %s8429_s6  ;;  %v5372_v17 = vmul.f32 %v10853_v12, %v5349_v38  ;;  %v10861_v59 = vpop.eup %8344 }
0x1656   :  { %v5012_v30 = vpop.permute.xlu0 %5011  ;;  %v5010_v61 = vpop.permute.xlu1 %5009 }
0x1657   :  { %v5032_v60 = vmul.f32 %v10843_v50, %v5012_v30  ;;  %v5031_v9 = vmul.f32 %v10849_v40, %v5010_v61  ;;  %v4986_v30 = vadd.f32 1.0, %v8337_v36  ;;  %v10865_v15 = vpop.eup %8346 }
0x1658   :  { %v10869_v36 = vpop.eup %8348 }
0x1659   :  { %5051 = vrot.lane.b32.xlu0 %v5032_v60, %s8429_s6  ;;  %5049 = vrot.lane.b32.xlu1 %v5031_v9, %s8429_s6  ;;  %8358 = vrcp.f32 %v4986_v30  ;;  %v4988_v9 = vadd.f32 1.0, %v8343_v7  ;;  %v10873_v37 = vpop.eup %8350 }
0x165a   :  { %v5351_v0 = vpop.permute.xlu0 %5350  ;;  %v5353_v43 = vpop.permute.xlu1 %5352  ;;  %8360 = vrcp.f32 %v4987_v6 }
0x165b   :  { %v5373_v19 = vmul.f32 %v10857_v11, %v5351_v0  ;;  %v5374_v23 = vmul.f32 %v10861_v59, %v5353_v43  ;;  %8362 = vrcp.f32 %v4988_v9  ;;  %v10877_v43 = vpop.eup %8352 }
0x165d   :  { %5390 = vrot.lane.b32.xlu0 %v5373_v19, %s8429_s6  ;;  %5388 = vrot.lane.b32.xlu1 %v5372_v17, %s8429_s6  ;;  %v10881_v19 = vpop.eup %8354 }
0x165e   :  { %v5355_v61 = vpop.permute.xlu0 %5354  ;;  %v5357_v60 = vpop.permute.xlu1 %5356 }
0x165f   :  { %v5375_v38 = vmul.f32 %v10865_v15, %v5355_v61  ;;  %v5376_v27 = vmul.f32 %v10869_v36, %v5357_v60  ;;  %v10885_v6 = vpop.eup %8356 }
0x1661   :  { %5394 = vrot.lane.b32.xlu0 %v5375_v38, %s8429_s6  ;;  %5392 = vrot.lane.b32.xlu1 %v5374_v23, %s8429_s6 }
0x1662   :  { %v5359_v0 = vpop.permute.xlu0 %5358  ;;  %v5361_v17 = vpop.permute.xlu1 %5360 }
0x1663   :  { %v5377_v56 = vmul.f32 %v10873_v37, %v5359_v0  ;;  %v5378_v61 = vmul.f32 %v10877_v43, %v5361_v17  ;;  %v10889_v60 = vpop.eup %8358 }
0x1665   :  { %5398 = vrot.lane.b32.xlu0 %v5377_v56, %s8429_s6  ;;  %5396 = vrot.lane.b32.xlu1 %v5376_v27, %s8429_s6  ;;  %v10893_v56 = vpop.eup %8360 }
0x1666   :  { %v5363_v7 = vpop.permute.xlu0 %5362  ;;  %v5014_v30 = vpop.permute.xlu1 %5013 }
0x1667   :  { %v5379_v23 = vmul.f32 %v10881_v19, %v5363_v7  ;;  %v5033_v9 = vmul.f32 %v10885_v6, %v5014_v30  ;;  %v10897_v17 = vpop.eup %8362 }
0x1668   :  { %11554 = vst [vmem:[#allocation43_spill] sm:$0xff] %v10897_v17 }
0x1669   :  { %5402 = vrot.lane.b32.xlu0 %v5379_v23, %s8429_s6  ;;  %5400 = vrot.lane.b32.xlu1 %v5378_v61, %s8429_s6 }
0x166a   :  { %v5016_v38 = vpop.permute.xlu0 %5015  ;;  %v5018_v27 = vpop.permute.xlu1 %5017 }
0x166b   :  { %v5034_v0 = vmul.f32 %v10889_v60, %v5016_v38  ;;  %v5035_v23 = vmul.f32 %v10893_v56, %v5018_v27 }
0x166d   :  { %5055 = vrot.lane.b32.xlu0 %v5034_v0, %s8429_s6  ;;  %5053 = vrot.lane.b32.xlu1 %v5033_v9, %s8429_s6 }
0x166e   :  { %v5020_v7 = vpop.permute.xlu0 %5019 }
0x166f   :  { %v5036_v61 = vmul.f32 %v10897_v17, %v5020_v7 }
0x1671   :  { %5059 = vrot.lane.b32.xlu0 %v5036_v61, %s8429_s6  ;;  %5057 = vrot.lane.b32.xlu1 %v5035_v23, %s8429_s6 }
0x16c7   :  { %v5048_v30 = vpop.permute.xlu0 %5047  ;;  %v5046_v38 = vpop.permute.xlu1 %5045 }
0x16c8   :  { %v5070_v52 = vadd.f32 %v5048_v30, %v8647_v53  ;;  %v5069_v41 = vadd.f32 %v5046_v38, %v8651_v55 }
0x16ca   :  { %8364 = vtanh.f32 %v5070_v52 }
0x16cb   :  { %8366 = vtanh.f32 %v5069_v41  ;;  %v5052_v9 = vpop.permute.xlu0 %5051  ;;  %v5050_v0 = vpop.permute.xlu1 %5049 }
0x16cc   :  { %v5072_v58 = vadd.f32 %v5052_v9, %v8654_v57  ;;  %v5071_v27 = vadd.f32 %v5050_v0, %v8649_v54 }
0x16ce   :  { %8368 = vtanh.f32 %v5072_v58 }
0x16cf   :  { %8370 = vtanh.f32 %v5071_v27  ;;  %v5391_v7 = vpop.permute.xlu0 %5390  ;;  %v5389_v61 = vpop.permute.xlu1 %5388 }
0x16d0   :  { %v5413_v23 = vadd.f32 %v5391_v7, %v8647_v53  ;;  %v5412_v14 = vadd.f32 %v5389_v61, %v8651_v55 }
0x16d2   :  { %8372 = vtanh.f32 %v5413_v23 }
0x16d3   :  { %8374 = vtanh.f32 %v5412_v14  ;;  %v5395_v30 = vpop.permute.xlu0 %5394  ;;  %v5393_v38 = vpop.permute.xlu1 %5392 }
0x16d4   :  { %v8365_v52 = vpop.eup %8364  ;;  %v5415_v41 = vadd.f32 %v5395_v30, %v8654_v57  ;;  %v5414_v17 = vadd.f32 %v5393_v38, %v8649_v54 }
0x16d5   :  { %v8367_v9 = vpop.eup %8366  ;;  %5103 = vrot.lane.b32.xlu0 %v8365_v52, %s8430_s4 }
0x16d6   :  { %8376 = vtanh.f32 %v5415_v41  ;;  %5101 = vrot.lane.b32.xlu1 %v8367_v9, %s8430_s4 }
0x16d7   :  { %8378 = vtanh.f32 %v5414_v17  ;;  %v5399_v58 = vpop.permute.xlu0 %5398  ;;  %v5397_v53 = vpop.permute.xlu1 %5396 }
0x16d8   :  { %v8369_v0 = vpop.eup %8368  ;;  %v5417_v55 = vadd.f32 %v5399_v58, %v11551_v31  ;;  %v5416_v14 = vadd.f32 %v5397_v53, %v11550_v39 }
0x16d9   :  { %v8371_v27 = vpop.eup %8370  ;;  %5107 = vrot.lane.b32.xlu0 %v8369_v0, %s8430_s4 }
0x16da   :  { %8380 = vtanh.f32 %v5417_v55  ;;  %5105 = vrot.lane.b32.xlu1 %v8371_v27, %s8430_s4 }
0x16db   :  { %8382 = vtanh.f32 %v5416_v14  ;;  %v5403_v54 = vpop.permute.xlu0 %5402  ;;  %v5401_v57 = vpop.permute.xlu1 %5400 }
0x16dc   :  { %v8373_v7 = vpop.eup %8372  ;;  %v5419_v61 = vadd.f32 %v5403_v54, %v11553_v10  ;;  %v5418_v17 = vadd.f32 %v5401_v57, %v11552_v18 }
0x16dd   :  { %v8375_v23 = vpop.eup %8374  ;;  %5446 = vrot.lane.b32.xlu0 %v8373_v7, %s8430_s4 }
0x16de   :  { %8384 = vtanh.f32 %v5419_v61  ;;  %5444 = vrot.lane.b32.xlu1 %v8375_v23, %s8430_s4  ;;  %v5699_v61 = vld [vmem:[%s11354_s8] sm:$0xff]  ;;  %v5086_v23 = vsub.f32 1.0, %v10839_v32 }
0x16df   :  { %8386 = vtanh.f32 %v5418_v17  ;;  %v5056_v30 = vpop.permute.xlu0 %5055  ;;  %v5054_v38 = vpop.permute.xlu1 %5053  ;;  %v5700_v17 = vld [vmem:[%s11354_s8 + $0x8] sm:$0xff] }
0x16e0   :  { %v8377_v52 = vpop.eup %8376  ;;  %v5074_v41 = vadd.f32 %v5056_v30, %v11551_v31  ;;  %v5073_v9 = vadd.f32 %v5054_v38, %v11550_v39  ;;  %v5134_v30 = vrot.slane %v10687_v46, 7  ;;  %v7589_v38 = vpack.c.bf16 %v5700_v17, %v5699_v61 }
0x16e1   :  { %v8379_v58 = vpop.eup %8378  ;;  %5450 = vrot.lane.b32.xlu0 %v8377_v52, %s8430_s4  ;;  %v5087_v61 = vsub.f32 1.0, %v10849_v40  ;;  %v5135_v17 = vrot.slane %v10714_v45, 7 }
0x16e2   :  { %8388 = vtanh.f32 %v5074_v41  ;;  %5448 = vrot.lane.b32.xlu1 %v8379_v58, %s8430_s4  ;;  %v5085_v41 = vsub.f32 1.0, %v10841_v8  ;;  %v5149_v58 = vmul.f32 %v10839_v32, %v5134_v30  ;;  %7590 = vmatpush3.bf16.msra.mxu1 %v7589_v38  ;;  %v5776_v32 = vld [vmem:[%s11355_s9] sm:$0xff] }
0x16e3   :  { %8390 = vtanh.f32 %v5073_v9  ;;  %v5060_v53 = vpop.permute.xlu0 %5059  ;;  %v5058_v0 = vpop.permute.xlu1 %5057  ;;  %v5133_v9 = vrot.slane %v10691_v26, 7  ;;  %v5150_v45 = vmul.f32 %v10849_v40, %v5135_v17 }
0x16e4   :  { %v8381_v55 = vpop.eup %8380  ;;  %v5076_v14 = vadd.f32 %v5060_v53, %v11553_v10  ;;  %v5075_v27 = vadd.f32 %v5058_v0, %v11552_v18 }
0x16e5   :  { %v8383_v54 = vpop.eup %8382  ;;  %5454 = vrot.lane.b32.xlu0 %v8381_v55, %s8430_s4  ;;  %v5701_v55 = vld [vmem:[%s11354_s8 + $0x10] sm:$0xff]  ;;  %v5148_v46 = vmul.f32 %v10841_v8, %v5133_v9  ;;  %v5477_v9 = vrot.slane %v10639_v63, 1 }
0x16e6   :  { %8392 = vtanh.f32 %v5076_v14  ;;  %5452 = vrot.lane.b32.xlu1 %v8383_v54, %s8430_s4  ;;  %v5702_v14 = vld [vmem:[%s11354_s8 + $0x18] sm:$0xff]  ;;  %v11555_v54 = vmov 0.0|0.0  }
0x16e7   :  { %8394 = vtanh.f32 %v5075_v27  ;;  %7591 = vmatprep.subr.bf16.mxu1 %v11555_v54  ;;  %v7592_v26 = vpack.c.bf16 %v5702_v14, %v5701_v55  ;;  %v5480_v55 = vrot.slane %v10659_v28, 1  ;;  %v5479_v14 = vrot.slane %v10654_v20, 1 }
0x16e8   :  { %v8385_v39 = vpop.eup %8384 }
0x16e9   :  { %v8387_v31 = vpop.eup %8386  ;;  %5458 = vrot.lane.b32.xlu0 %v8385_v39, %s8430_s4  ;;  %v5777_v39 = vld [vmem:[%s11355_s9 + $0x8] sm:$0xff]  ;;  %7593 = vmatpush3.bf16.msra.mxu1 %v7592_v26  ;;  %v5481_v26 = vrot.slane %v10671_v49, 1 }
0x16ea   :  { %5456 = vrot.lane.b32.xlu1 %v8387_v31, %s8430_s4  ;;  %7463 = vmatprep.subr.mxu1 %v11488_v42 }
0x16ec   :  { %v8389_v57 = vpop.eup %8388 }
0x16ed   :  { %v8391_v7 = vpop.eup %8390  ;;  %5111 = vrot.lane.b32.xlu0 %v8389_v57, %s8430_s4  ;;  %v5088_v57 = vsub.f32 1.0, %v10843_v50 }
0x16ee   :  { %5109 = vrot.lane.b32.xlu1 %v8391_v7, %s8430_s4  ;;  %v5136_v7 = vrot.slane %v10709_v33, 7  ;;  %v10972_v33 = vld [vmem:[%s11356_s1] sm:$0xff] }
0x16ef   :  { %7441 = vmatmul.mubr.msk.f32.vlgmr.msra.gmra.mrb[20].mxu1 %vm74_vm1, %v10972_v33 }
0x16f0   :  { %v8393_v18 = vpop.eup %8392  ;;  %v5151_v30 = vmul.f32 %v10843_v50, %v5136_v7  ;;  %7465 = vmatprep.mubr.msk.f32.mxu1 %vm8423_vm0, %v11488_v42 }
0x16f1   :  { %v8395_v10 = vpop.eup %8394  ;;  %5115 = vrot.lane.b32.xlu0 %v8393_v18, %s8430_s4  ;;  %v7594_v18 = vpack.c.bf16 %v5777_v39, %v5776_v32  ;;  %v5778_v32 = vld [vmem:[%s11355_s9 + $0x10] sm:$0xff]  ;;  %v5779_v39 = vld [vmem:[%s11355_s9 + $0x18] sm:$0xff] }
0x16f2   :  { %5113 = vrot.lane.b32.xlu1 %v8395_v10, %s8430_s4 }
0x16f3   :  { %7595 = vmatprep.subr.bf16.mxu0 %v7594_v18 }
0x16f4   :  { %7597 = vmatpush3.bf16.msra.mxu0 %v7594_v18 }
0x1747   :  { %v5104_v52 = vpop.permute.xlu0 %5103 }
0x1748   :  { %v5126_v53 = vmul.f32 %v5104_v52, %v5086_v23  ;;  %v5102_v0 = vpop.permute.xlu1 %5101  ;;  %v5476_v23 = vrot.slane %v10642_v62, 1 }
0x1749   :  { %v5125_v27 = vmul.f32 %v5102_v0, %v5085_v41  ;;  %v5429_v0 = vsub.f32 1.0, %v10857_v11 }
0x174a   :  { %v5157_v31 = vadd.f32 %v5149_v58, %v5126_v53  ;;  %v5478_v53 = vrot.slane %v10644_v21, 1 }
0x174b   :  { %v5156_v8 = vadd.f32 %v5148_v46, %v5125_v27  ;;  %v5108_v10 = vpop.permute.xlu0 %5107  ;;  %v5428_v27 = vsub.f32 1.0, %v10853_v12 }
0x174c   :  { %v5128_v38 = vmul.f32 %v5108_v10, %v5088_v57  ;;  %v5106_v52 = vpop.permute.xlu1 %5105  ;;  %v5563_v41 = vsel %vm5561_vm8, %v10700_v16, %v5157_v31  ;;  %v5492_v31 = vmul.f32 %v10857_v11, %v5476_v23  ;;  %v11556_v10 = vrot.slane %v10627_v4, 1 }
0x174d   :  { %v5127_v58 = vmul.f32 %v5106_v52, %v5087_v61  ;;  %v5562_v50 = vsel %vm5561_vm8, %v10707_v44, %v5156_v8  ;;  %v5482_v44 = vrot.slane %v10673_v25, 1  ;;  %v7598_v8 = vpack.c.bf16 %v5779_v39, %v5778_v32 }
0x174e   :  { %v5159_v16 = vadd.f32 %v5151_v30, %v5128_v38  ;;  %5634 = vrot.lane.b32.xlu1 %v5562_v50, %s8430_s4  ;;  %v5491_v61 = vmul.f32 %v10853_v12, %v11556_v10  ;;  %v5138_v38 = vrot.slane %v10732_v3, 7  ;;  %v5431_v23 = vsub.f32 1.0, %v10865_v15 }
0x174f   :  { %v5158_v46 = vadd.f32 %v5150_v45, %v5127_v58  ;;  %v5447_v40 = vpop.permute.xlu0 %5446  ;;  %v5137_v52 = vrot.slane %v10736_v35, 7  ;;  %7599 = vmatprep.subr.bf16.mxu0 %v7598_v8  ;;  %v5494_v58 = vmul.f32 %v10865_v15, %v5478_v53  ;;  %v5430_v50 = vsub.f32 1.0, %v10861_v59 }
0x1750   :  { %v5469_v57 = vmul.f32 %v5447_v40, %v5429_v0  ;;  %v5445_v7 = vpop.permute.xlu1 %5444  ;;  %v5565_v18 = vsel %vm5561_vm8, %v10723_v22, %v5159_v16  ;;  %v5089_v22 = vsub.f32 1.0, %v10885_v6  ;;  %7601 = vmatpush3.bf16.msra.mxu0 %v7598_v8  ;;  %v5495_v40 = vmul.f32 %v10869_v36, %v5479_v14  ;;  %v11559_v14 = vld [vmem:[#allocation34_spill] sm:$0xff] }
0x1751   :  { %v5468_v17 = vmul.f32 %v5445_v7, %v5428_v27  ;;  %v5564_v30 = vsel %vm5561_vm8, %v10730_v47, %v5158_v46  ;;  %v5493_v47 = vmul.f32 %v10861_v59, %v5477_v9  ;;  %v5432_v46 = vsub.f32 1.0, %v10869_v36  ;;  %7483 = vmatprep.subr.mxu0 %v11488_v42  ;;  %v11557_v9 = vld [vmem:[#allocation45_spill] sm:$0xff]  ;;  %v11558_v27 = vld [vmem:[#allocation44_spill] sm:$0xff] }
0x1752   :  { %v5500_v11 = vadd.f32 %v5492_v31, %v5469_v57  ;;  %5636 = vrot.lane.b32.xlu1 %v5563_v41, %s8430_s4  ;;  %v5433_v59 = vsub.f32 1.0, %v10873_v37  ;;  %v5496_v36 = vmul.f32 %v10873_v37, %v5480_v55  ;;  %v11560_v7 = vld [vmem:[#allocation36_spill] sm:$0xff] }
0x1753   :  { %v5499_v45 = vadd.f32 %v5491_v61, %v5468_v17  ;;  %v5451_v12 = vpop.permute.xlu0 %5450 }
0x1754   :  { %v5571_v16 = vsel %vm5507_vm11, %v5500_v11, %v10642_v62  ;;  %v5471_v41 = vmul.f32 %v5451_v12, %v5431_v23  ;;  %v5449_v0 = vpop.permute.xlu1 %5448  ;;  %v11561_v11 = vld [vmem:[#allocation35_spill] sm:$0xff]  ;;  %v11562_v23 = vld [vmem:[#allocation26_spill] sm:$0xff]  ;;  %v11563_v12 = vld [vmem:[#allocation25_spill] sm:$0xff] }
0x1755   :  { %v5579_v35 = vsel %vm5516_vm10, %v5571_v16, %v10290_v2  ;;  %v5570_v15 = vsel %vm5507_vm11, %v5499_v45, %v10627_v4  ;;  %v5470_v53 = vmul.f32 %v5449_v0, %v5430_v50  ;;  %v5434_v4 = vsub.f32 1.0, %v10877_v43  ;;  %v11564_v16 = vld [vmem:[#allocation18_spill] sm:$0xff] }
0x1756   :  { %v5587_v62 = vsel %vm5525_vm12, %v5579_v35, %v11557_v9  ;;  %v5578_v32 = vsel %vm5516_vm10, %v5570_v15, %v11558_v27  ;;  %v5502_v39 = vadd.f32 %v5494_v58, %v5471_v41  ;;  %5638 = vrot.lane.b32.xlu1 %v5564_v30, %s8430_s4  ;;  %v5497_v0 = vmul.f32 %v10877_v43, %v5481_v26  ;;  %v11565_v35 = vld [vmem:[#allocation47_spill] sm:$0xff]  ;;  %v11567_v9 = vld [vmem:[#allocation49_spill] sm:$0xff] }
0x1757   :  { %v5586_v2 = vsel %vm5525_vm12, %v5578_v32, %v11559_v14  ;;  %v5501_v31 = vadd.f32 %v5493_v47, %v5470_v53  ;;  %v5455_v57 = vpop.permute.xlu0 %5454  ;;  %v5595_v8 = vsel %vm5534_vm13, %v5587_v62, %v11560_v7  ;;  %v11566_v53 = vld [vmem:[#allocation12_spill] sm:$0xff]  ;;  %v11568_v43 = vld [vmem:[#allocation17_spill] sm:$0xff]  ;;  %v11570_v14 = vld [vmem:[#allocation27_spill] sm:$0xff]  ;;  %v5152_v7 = vmul.f32 %v10885_v6, %v5137_v52 }
0x1758   :  { %v5573_v10 = vsel %vm5507_vm11, %v5502_v39, %v10644_v21  ;;  %v5473_v61 = vmul.f32 %v5455_v57, %v5433_v59  ;;  %v5453_v17 = vpop.permute.xlu1 %5452  ;;  %v5594_v30 = vsel %vm5534_vm13, %v5586_v2, %v11561_v11  ;;  %v5603_v37 = vsel %vm5543_vm14, %v5595_v8, %v11562_v23  ;;  %v11569_v27 = vld [vmem:[#allocation37_spill] sm:$0xff]  ;;  %v11571_v8 = vld [vmem:[#allocation46_spill] sm:$0xff]  ;;  %v11574_v23 = vld [vmem:[#allocation20_spill] sm:$0xff] }
0x1759   :  { %v5581_v55 = vsel %vm5516_vm10, %v5573_v10, %v10297_v5  ;;  %v5572_v45 = vsel %vm5507_vm11, %v5501_v31, %v10639_v63  ;;  %v5472_v58 = vmul.f32 %v5453_v17, %v5432_v46  ;;  %v5602_v50 = vsel %vm5543_vm14, %v5594_v30, %v11563_v12  ;;  %v11573_v11 = vld [vmem:[#allocation38_spill] sm:$0xff]  ;;  %v11575_v12 = vld [vmem:[#allocation28_spill] sm:$0xff] }
0x175a   :  { %v5580_v21 = vsel %vm5516_vm10, %v5572_v45, %v10303_v51  ;;  %v5504_v47 = vadd.f32 %v5496_v36, %v5473_v61  ;;  %5640 = vrot.lane.b32.xlu1 %v5565_v18, %s8430_s4  ;;  %v5610_v41 = vsel %vm5552_vm15, %v5602_v50, %v11564_v16  ;;  %v5435_v63 = vsub.f32 1.0, %v10881_v19 }
0x175b   :  { %v5588_v5 = vsel %vm5525_vm12, %v5580_v21, %v11565_v35  ;;  %v5503_v15 = vadd.f32 %v5495_v40, %v5472_v58  ;;  %v5459_v46 = vpop.permute.xlu0 %5458  ;;  %v5618_v59 = vsel %vm5561_vm8, %v5610_v41, %v11566_v53  ;;  %v5589_v51 = vsel %vm5525_vm12, %v5581_v55, %v11567_v9  ;;  %v11577_v21 = vld [vmem:[#allocation48_spill] sm:$0xff]  ;;  %v11578_v41 = vld [vmem:[#allocation10_spill] sm:$0xff]  ;;  %v11579_v35 = vld [vmem:[#allocation19_spill] sm:$0xff] }
0x175c   :  { %v5575_v18 = vsel %vm5507_vm11, %v5504_v47, %v10659_v28  ;;  %5666 = vrot.lane.b32.xlu0 %v5618_v59, %s8425_s5  ;;  %v5457_v62 = vpop.permute.xlu1 %5456  ;;  %v5611_v26 = vsel %vm5552_vm15, %v5603_v37, %v11568_v43  ;;  %v5596_v40 = vsel %vm5534_vm13, %v5588_v5, %v11569_v27  ;;  %v5475_v39 = vmul.f32 %v5459_v46, %v5435_v63  ;;  %v11580_v59 = vld [vmem:[#allocation30_spill] sm:$0xff] }
0x175d   :  { %v5574_v32 = vsel %vm5507_vm11, %v5503_v15, %v10654_v20  ;;  %v5474_v36 = vmul.f32 %v5457_v62, %v5434_v4  ;;  %v5604_v2 = vsel %vm5543_vm14, %v5596_v40, %v11570_v14  ;;  %v5498_v31 = vmul.f32 %v10881_v19, %v5482_v44  ;;  %v11572_v4 = vld [vmem:[#allocation9_spill] sm:$0xff]  ;;  %v11585_v40 = vld [vmem:[#allocation8_spill] sm:$0xff]  ;;  %v11587_v14 = vld [vmem:[#allocation2_spill] sm:$0xff] }
0x175e   :  { %v5582_v28 = vsel %vm5516_vm10, %v5574_v32, %v10314_v29  ;;  %v5090_v57 = vsub.f32 1.0, %v10889_v60  ;;  %v5619_v17 = vsel %vm5561_vm8, %v5611_v26, %v11572_v4  ;;  %v5597_v30 = vsel %vm5534_vm13, %v5589_v51, %v11573_v11  ;;  %v11586_v32 = vld [vmem:[#allocation22_spill] sm:$0xff] }
0x175f   :  { %v5590_v10 = vsel %vm5525_vm12, %v5582_v28, %v11571_v8  ;;  %v5505_v20 = vadd.f32 %v5497_v0, %v5474_v36  ;;  %v5112_v61 = vpop.permute.xlu0 %5111  ;;  %v5583_v29 = vsel %vm5516_vm10, %v5575_v18, %v10312_v48  ;;  %v5153_v19 = vmul.f32 %v10889_v60, %v5138_v38  ;;  %v11576_v38 = vld [vmem:[#allocation40_spill] sm:$0xff]  ;;  %v11582_v18 = vld [vmem:[#allocation50_spill] sm:$0xff]  ;;  %v11590_v8 = vld [vmem:[#allocation51_spill] sm:$0xff] }
0x1760   :  { %v5130_v44 = vmul.f32 %v5112_v61, %v5090_v57  ;;  %5668 = vrot.lane.b32.xlu0 %v5619_v17, %s8425_s5  ;;  %v5110_v52 = vpop.permute.xlu1 %5109  ;;  %v5612_v37 = vsel %vm5552_vm15, %v5604_v2, %v11574_v23  ;;  %v5506_v55 = vadd.f32 %v5498_v31, %v5475_v39  ;;  %v5605_v48 = vsel %vm5543_vm14, %v5597_v30, %v11575_v12  ;;  %v11588_v28 = vld [vmem:[#allocation32_spill] sm:$0xff]  ;;  %v11589_v57 = vld [vmem:[#allocation42_spill] sm:$0xff]  ;;  %v11594_v30 = vld [vmem:[#allocation21_spill] sm:$0xff] }
0x1761   :  { %v5576_v45 = vsel %vm5507_vm11, %v5505_v20, %v10671_v49  ;;  %v5129_v58 = vmul.f32 %v5110_v52, %v5089_v22  ;;  %v5139_v60 = vrot.slane %v10752_v24, 7  ;;  %v5598_v50 = vsel %vm5534_vm13, %v5590_v10, %v11576_v38  ;;  %v11591_v20 = vld [vmem:[#allocation33_spill] sm:$0xff]  ;;  %v11593_v17 = vld [vmem:[#allocation14_spill] sm:$0xff] }
0x1762   :  { %v5161_v3 = vadd.f32 %v5153_v19, %v5130_v44  ;;  %v5591_v47 = vsel %vm5525_vm12, %v5583_v29, %v11577_v21  ;;  %v5620_v0 = vsel %vm5561_vm8, %v5612_v37, %v11578_v41  ;;  %v5091_v49 = vsub.f32 1.0, %v10893_v56  ;;  %v11595_v44 = vld [vmem:[#allocation29_spill] sm:$0xff]  ;;  %v11603_v41 = vld [vmem:[#allocation16_spill] sm:$0xff] }
0x1763   :  { %v5160_v16 = vadd.f32 %v5152_v7, %v5129_v58  ;;  %v5584_v6 = vsel %vm5516_vm10, %v5576_v45, %v10328_v34  ;;  %v5154_v22 = vmul.f32 %v10893_v56, %v5139_v60  ;;  %v5613_v5 = vsel %vm5552_vm15, %v5605_v48, %v11579_v35  ;;  %v5116_v9 = vpop.permute.xlu0 %5115  ;;  %v11581_v56 = vld [vmem:[#allocation39_spill] sm:$0xff]  ;;  %v11596_v23 = vld [vmem:[#allocation41_spill] sm:$0xff] }
0x1764   :  { %5670 = vrot.lane.b32.xlu0 %v5620_v0, %s8425_s5  ;;  %v5114_v24 = vpop.permute.xlu1 %5113  ;;  %v5567_v15 = vsel %vm5561_vm8, %v10757_v1, %v5161_v3  ;;  %v5577_v63 = vsel %vm5507_vm11, %v5506_v55, %v10673_v25  ;;  %v5606_v34 = vsel %vm5543_vm14, %v5598_v50, %v11580_v59  ;;  %v5599_v51 = vsel %vm5534_vm13, %v5591_v47, %v11581_v56  ;;  %v11583_v1 = vld [vmem:[#allocation43_spill] sm:$0xff]  ;;  %v11597_v55 = vld [vmem:[#allocation13_spill] sm:$0xff]  ;;  %v11602_v47 = vld [vmem:[#allocation24_spill] sm:$0xff] }
0x1765   :  { %v5131_v46 = vmul.f32 %v5114_v24, %v5091_v49  ;;  %v5566_v53 = vsel %vm5561_vm8, %v10750_v13, %v5160_v16  ;;  %v5592_v62 = vsel %vm5525_vm12, %v5584_v6, %v11582_v18  ;;  %v5092_v43 = vsub.f32 1.0, %v11583_v1  ;;  %v11584_v25 = vld [vmem:[#allocation11_spill] sm:$0xff] }
0x1766   :  { %5642 = vrot.lane.b32.xlu1 %v5566_v53, %s8430_s4  ;;  %v5621_v27 = vsel %vm5561_vm8, %v5613_v5, %v11584_v25  ;;  %v5585_v13 = vsel %vm5516_vm10, %v5577_v63, %v11585_v40  ;;  %v5614_v39 = vsel %vm5552_vm15, %v5606_v34, %v11586_v32  ;;  %v5607_v31 = vsel %vm5543_vm14, %v5599_v51, %v11588_v28  ;;  %v11598_v58 = vld [vmem:[#allocation23_spill] sm:$0xff] }
0x1767   :  { %v5162_v26 = vadd.f32 %v5154_v22, %v5131_v46  ;;  %v5132_v36 = vmul.f32 %v5116_v9, %v5092_v43  ;;  %v5600_v7 = vsel %vm5534_vm13, %v5592_v62, %v11589_v57  ;;  %v5593_v10 = vsel %vm5525_vm12, %v5585_v13, %v11590_v8  ;;  %v11599_v48 = vld [vmem:[#allocation3_spill] sm:$0xff] }
0x1768   :  { %5672 = vrot.lane.b32.xlu0 %v5621_v27, %s8425_s5  ;;  %v11592_v61 = vrot.slane %v11591_v20, 7  ;;  %v5622_v11 = vsel %vm5561_vm8, %v5614_v39, %v11593_v17  ;;  %v5615_v29 = vsel %vm5552_vm15, %v5607_v31, %v11594_v30  ;;  %v5608_v52 = vsel %vm5543_vm14, %v5600_v7, %v11595_v44  ;;  %v11600_v60 = vld [vmem:[#allocation31_spill] sm:$0xff] }
0x1769   :  { %v5568_v2 = vsel %vm5561_vm8, %v11587_v14, %v5162_v26  ;;  %v5601_v37 = vsel %vm5534_vm13, %v5593_v10, %v11596_v23  ;;  %v5623_v45 = vsel %vm5561_vm8, %v5615_v29, %v11597_v55  ;;  %v5616_v12 = vsel %vm5552_vm15, %v5608_v52, %v11598_v58  ;;  %v11601_v50 = vld [vmem:[#allocation15_spill] sm:$0xff] }
0x176a   :  { %5644 = vrot.lane.b32.xlu1 %v5567_v15, %s8430_s4  ;;  %v5155_v4 = vmul.f32 %v11583_v1, %v11592_v61  ;;  %v5609_v38 = vsel %vm5543_vm14, %v5601_v37, %v11600_v60  ;;  %v5624_v21 = vsel %vm5561_vm8, %v5616_v12, %v11601_v50  ;;  %v7180_v50 = vld [vmem:[%s11357_s10] ss:$0 sm:$0xff]  ;;  %vm6107_vm10 = vcmask 64512  }
0x176b   :  { %v5617_v16 = vsel %vm5552_vm15, %v5609_v38, %v11602_v47  ;;  %vm11604_vm11 = vcmask 1047559  }
0x176c   :  { %5674 = vrot.lane.b32.xlu0 %v5622_v11, %s8425_s5  ;;  %v5163_v19 = vadd.f32 %v5155_v4, %v5132_v36  ;;  %v5625_v0 = vsel %vm5561_vm8, %v5617_v16, %v11603_v41  ;;  %v8432_v36 = vmov 1966171168  }
0x176d   :  { %v5912_v14 = vunpack.c.l.s4 %v8432_v36 }
0x176e   :  { %5646 = vrot.lane.b32.xlu1 %v5568_v2, %s8430_s4  ;;  %v5569_v3 = vsel %vm5561_vm8, %v11599_v48, %v5163_v19  ;;  %v5914_v2 = vlaneseq }
0x176f   :  { %v5913_v28 = vunpack.c.0.s8 %v5912_v14 }
0x1770   :  { %5676 = vrot.lane.b32.xlu0 %v5623_v45, %s8425_s5  ;;  %v11210_v31 = vshrl.u32 %v5914_v2, 7 }
0x1772   :  { %5648 = vrot.lane.b32.xlu1 %v5569_v3, %s8430_s4  ;;  %v11213_v57 = vsub.s32 %v5913_v28, %v11210_v31  ;;  %v5961_v20 = vsub.s32 0, %v11210_v31 }
0x1774   :  { %5678 = vrot.lane.b32.xlu0 %v5624_v21, %s8425_s5 }
0x1778   :  { %5680 = vrot.lane.b32.xlu0 %v5625_v0, %s8425_s5 }
0x17c0   :  { %v5635_v49 = vpop.permute.xlu1 %5634 }
0x17c2   :  { %v5772_v32 = vpop.f32.mrb[20].mxu1 }
0x17c3   :  { %v7442_v39 = vpop.f32.mrb[21].mxu1  ;;  %v5917_v7 = vrot.slane %v5772_v32, %v11213_v57  ;;  %v5910_v4 = vcombine.high %v5772_v32, %v5772_v32 }
0x17c4   :  { %v5637_v6 = vpop.permute.xlu1 %5636 }
0x17c5   :  { %v5925_v8 = vcombine.high %v5917_v7, %v5917_v7  ;;  %v5933_v61 = vrot.slane %v5917_v7, %v11213_v57  ;;  %v5924_v29 = vrot.slane %v5910_v4, %v11213_v57 }
0x17c7   :  { %v5947_v10 = vrot.slane %v5925_v8, %v11213_v57  ;;  %v5962_v11 = vrot.slane %v5933_v61, %v5961_v20  ;;  %v5955_v37 = vcombine.high %v5933_v61, %v5933_v61  ;;  %v5926_v55 = vcombine.high %v5924_v29, %v5924_v29 }
0x17c8   :  { %v5639_v22 = vpop.permute.xlu1 %5638  ;;  %v5940_v21 = vrot.slane %v5924_v29, %v11213_v57 }
0x17c9   :  { %v5966_v17 = vrot.slane %v5947_v10, %v5961_v20  ;;  %v5957_v52 = vcombine.high %v5947_v10, %v5947_v10  ;;  %v5970_v58 = vrot.slane %v5955_v37, %v5961_v20  ;;  %v5954_v60 = vrot.slane %v5926_v55, %v11213_v57 }
0x17cb   :  { %v5974_v45 = vrot.slane %v5957_v52, %v5961_v20  ;;  %v5982_v16 = vrot.slane %v5954_v60, %v5961_v20 }
0x17cc   :  { %v5641_v63 = vpop.permute.xlu1 %5640 }
0x17ce   :  { %v5667_v24 = vpop.permute.xlu0 %5666 }
0x17cf   :  { %v5690_v35 = vsel %vm215_vm9, %v5635_v49, %v5667_v24 }
0x17d0   :  { %7451 = vmatprep.mubr.msk.f32.mxu0 %vm74_vm1, %v5690_v35  ;;  %7464 = vmatpush3.msra.mxu1 %v5690_v35 }
0x17d1   :  { %7468 = vmatprep.subr.mxu1 %v11488_v42 }
0x17d2   :  { %v5669_v5 = vpop.permute.xlu0 %5668 }
0x17d3   :  { %v11175_v15 = vsel %vm215_vm9, %v5637_v6, %v5669_v5 }
0x17d4   :  { %7452 = vmatmul.mubr.msk.f32.vlgmr.msra.gmra.mrb[20].mxu0 %vm74_vm1, %v11175_v15 }
0x17d6   :  { %v5671_v46 = vpop.permute.xlu0 %5670 }
0x17d7   :  { %v11180_v53 = vsel %vm215_vm9, %v5639_v22, %v5671_v46  ;;  %v5978_v22 = vrot.slane %v5940_v21, %v5961_v20 }
0x17d8   :  { %7454 = vmatprep.mubr.msk.f32.mxu0 %vm74_vm1, %v11180_v53  ;;  %v5643_v59 = vpop.permute.xlu1 %5642 }
0x17da   :  { %v5673_v34 = vpop.permute.xlu0 %5672 }
0x17db   :  { %v11185_v9 = vsel %vm215_vm9, %v5641_v63, %v5673_v34  ;;  %v5956_v34 = vcombine.high %v5940_v21, %v5940_v21 }
0x17dc   :  { %7455 = vmatmul.mubr.msk.f32.gmra.mrb[22].mxu0 %vm74_vm1, %v11185_v9  ;;  %v5645_v56 = vpop.permute.xlu1 %5644 }
0x17de   :  { %v5675_v51 = vpop.permute.xlu0 %5674 }
0x17df   :  { %v5694_v18 = vsel %vm215_vm9, %v5643_v59, %v5675_v51  ;;  %v5958_v59 = vcombine.high %v5954_v60, %v5954_v60 }
0x17e0   :  { %7457 = vmatprep.mubr.msk.f32.mxu0 %vm74_vm1, %v5694_v18  ;;  %7484 = vmatpush3.msra.mxu0 %v5694_v18  ;;  %v5647_v43 = vpop.permute.xlu1 %5646 }
0x17e1   :  { %7493 = vmatprep.subr.mxu0 %v11488_v42 }
0x17e2   :  { %v5677_v62 = vpop.permute.xlu0 %5676 }
0x17e3   :  { %v11193_v1 = vsel %vm215_vm9, %v5645_v56, %v5677_v62  ;;  %v5990_v62 = vrot.slane %v5958_v59, %v5961_v20 }
0x17e4   :  { %7458 = vmatmul.mubr.msk.f32.gmra.mrb[24].mxu0 %vm74_vm1, %v11193_v1  ;;  %v5649_v27 = vpop.permute.xlu1 %5648 }
0x17e6   :  { %v5679_v26 = vpop.permute.xlu0 %5678 }
0x17e7   :  { %v11198_v25 = vsel %vm215_vm9, %v5647_v43, %v5679_v26 }
0x17e8   :  { %7460 = vmatprep.mubr.msk.f32.mxu0 %vm74_vm1, %v11198_v25 }
0x17ea   :  { %v5681_v40 = vpop.permute.xlu0 %5680 }
0x17eb   :  { %v11203_v13 = vsel %vm215_vm9, %v5649_v27, %v5681_v40  ;;  %v5986_v27 = vrot.slane %v5956_v34, %v5961_v20 }
0x17ec   :  { %7461 = vmatmul.mubr.msk.f32.gmra.mrb[26].mxu0 %vm74_vm1, %v11203_v13 }
0x17ed   :  { %7485 = vmatprep.mubr.msk.f32.mxu0 %vm8423_vm0, %v11488_v42 }
0x18a7   :  { %v7453_v30 = vpop.f32.mrb[20].mxu0 }
0x18a8   :  { %v6000_v19 = vadd.f32 %v7453_v30, %v5966_v17  ;;  %v5870_v44 = vpop.f32.mrb[21].mxu0 }
0x18a9   :  { %v5999_v23 = vadd.f32 %v5962_v11, %v5870_v44  ;;  %v6065_v44 = vand.u32 127, %v5914_v2 }
0x18aa   :  { %8396 = vtanh.f32 %v6000_v19 }
0x18ab   :  { %8398 = vtanh.f32 %v5999_v23  ;;  %v6068_v23 = vsub.s32 %v6065_v44, %v11210_v31  ;;  %v6054_v31 = vld [vmem:[%s11358_s2] sm:$0xff] }
0x18ac   :  { %vm6055_vm8 = vcmp.ne.s32.totalorder %v6054_v31, 0 }
0x18af   :  { %v7456_v12 = vpop.f32.mrb[22].mxu0 }
0x18b0   :  { %v6002_v48 = vadd.f32 %v7456_v12, %v5974_v45  ;;  %v5880_v3 = vpop.f32.mrb[23].mxu0 }
0x18b1   :  { %v6001_v38 = vadd.f32 %v5970_v58, %v5880_v3 }
0x18b2   :  { %8400 = vtanh.f32 %v6002_v48 }
0x18b3   :  { %8402 = vtanh.f32 %v6001_v38 }
0x18b4   :  { %v8397_v47 = vpop.eup %8396 }
0x18b5   :  { %v8399_v41 = vpop.eup %8398  ;;  %v6023_v0 = vmul.f32 %v8397_v47, %v7180_v50 }
0x18b6   :  { %v6022_v49 = vmul.f32 %v8399_v41, %v7180_v50 }
0x18b7   :  { %v7459_v6 = vpop.f32.mrb[24].mxu0  ;;  %v6033_v24 = vsel %vm215_vm9, %v6023_v0, 0.0 }
0x18b8   :  { %v6004_v35 = vadd.f32 %v7459_v6, %v5982_v16  ;;  %v5890_v5 = vpop.f32.mrb[25].mxu0  ;;  %6034 = vadd.xlane.f32.xlu0 %v6033_v24  ;;  %v6030_v63 = vsel %vm215_vm9, %v6022_v49, 0.0 }
0x18b9   :  { %v6003_v46 = vadd.f32 %v5978_v22, %v5890_v5  ;;  %6031 = vadd.xlane.f32.xlu1 %v6030_v63 }
0x18ba   :  { %8404 = vtanh.f32 %v6004_v35 }
0x18bb   :  { %8406 = vtanh.f32 %v6003_v46 }
0x18bc   :  { %v8401_v56 = vpop.eup %8400 }
0x18bd   :  { %v8403_v51 = vpop.eup %8402  ;;  %v6025_v18 = vmul.f32 %v8401_v56, %v7180_v50 }
0x18be   :  { %v6024_v43 = vmul.f32 %v8403_v51, %v7180_v50 }
0x18bf   :  { %v7462_v26 = vpop.f32.mrb[26].mxu0  ;;  %v6039_v40 = vsel %vm215_vm9, %v6025_v18, 0.0 }
0x18c0   :  { %v6006_v32 = vadd.f32 %v7462_v26, %v5990_v62  ;;  %v5900_v39 = vpop.f32.mrb[27].mxu0  ;;  %6040 = vadd.xlane.f32.xlu1 %v6039_v40  ;;  %v6036_v36 = vsel %vm215_vm9, %v6024_v43, 0.0 }
0x18c1   :  { %v6005_v14 = vadd.f32 %v5986_v27, %v5900_v39  ;;  %6037 = vadd.xlane.f32.xlu0 %v6036_v36 }
0x18c2   :  { %8408 = vtanh.f32 %v6006_v32 }
0x18c3   :  { %8410 = vtanh.f32 %v6005_v14 }
0x18c4   :  { %v8405_v28 = vpop.eup %8404 }
0x18c5   :  { %v8407_v7 = vpop.eup %8406  ;;  %v6027_v8 = vmul.f32 %v8405_v28, %v7180_v50 }
0x18c6   :  { %v6026_v10 = vmul.f32 %v8407_v7, %v7180_v50 }
0x18c7   :  { %v6045_v61 = vsel %vm215_vm9, %v6027_v8, 0.0 }
0x18c8   :  { %6046 = vadd.xlane.f32.xlu1 %v6045_v61  ;;  %v6042_v20 = vsel %vm215_vm9, %v6026_v10, 0.0  ;;  %v6747_v61 = vld [vmem:[%s11361_s11 + $0x8] sm:$0xff] }
0x18c9   :  { %6043 = vadd.xlane.f32.xlu0 %v6042_v20 }
0x18cc   :  { %v8409_v4 = vpop.eup %8408 }
0x18cd   :  { %v8411_v17 = vpop.eup %8410  ;;  %v6029_v11 = vmul.f32 %v8409_v4, %v7180_v50  ;;  %v6752_v4 = vld [vmem:[%s11360_s12 + $0x10] sm:$0xff] }
0x18ce   :  { %v6028_v30 = vmul.f32 %v8411_v17, %v7180_v50  ;;  %v6753_v17 = vld [vmem:[%s11360_s12 + $0x18] sm:$0xff] }
0x18cf   :  { %v6051_v29 = vsel %vm215_vm9, %v6029_v11, 0.0  ;;  %v6748_v11 = vld [vmem:[%s11361_s11 + $0x10] sm:$0xff] }
0x18d0   :  { %6052 = vadd.xlane.f32.xlu1 %v6051_v29  ;;  %v6048_v19 = vsel %vm215_vm9, %v6028_v30, 0.0  ;;  %v7606_v30 = vpack.c.bf16 %v6753_v17, %v6752_v4  ;;  %v6749_v29 = vld [vmem:[%s11361_s11 + $0x18] sm:$0xff] }
0x18d1   :  { %6049 = vadd.xlane.f32.xlu0 %v6048_v19  ;;  %v7612_v19 = vpack.c.bf16 %v6749_v29, %v6748_v11 }
0x1945   :  { %v6035_v52 = vpop.xlane.xlu0 %6034 }
0x1946   :  { %v6032_v37 = vpop.xlane.xlu1 %6031  ;;  %v6073_v45 = vrot.slane %v6035_v52, %v6068_v23 }
0x1947   :  { %v6069_v58 = vrot.slane %v6032_v37, %v6068_v23 }
0x1949   :  { %v6098_v60 = vsel %vm819_vm2, %v6073_v45, %v6069_v58 }
0x194d   :  { %v6041_v12 = vpop.xlane.xlu1 %6040 }
0x194e   :  { %v6038_v55 = vpop.xlane.xlu0 %6037  ;;  %v6081_v47 = vrot.slane %v6041_v12, %v6068_v23 }
0x194f   :  { %v6077_v48 = vrot.slane %v6038_v55, %v6068_v23 }
0x1951   :  { %v6099_v38 = vsel %vm822_vm3, %v6077_v48, %v6098_v60 }
0x1952   :  { %v6100_v16 = vsel %vm825_vm4, %v6081_v47, %v6099_v38 }
0x1955   :  { %v6047_v50 = vpop.xlane.xlu1 %6046 }
0x1956   :  { %v6044_v3 = vpop.xlane.xlu0 %6043  ;;  %v6089_v0 = vrot.slane %v6047_v50, %v6068_v23 }
0x1957   :  { %v6085_v21 = vrot.slane %v6044_v3, %v6068_v23 }
0x1959   :  { %v6101_v2 = vsel %vm828_vm5, %v6085_v21, %v6100_v16 }
0x195a   :  { %v6102_v24 = vsel %vm831_vm6, %v6089_v0, %v6101_v2 }
0x195d   :  { %v6053_v41 = vpop.xlane.xlu1 %6052 }
0x195e   :  { %v6050_v49 = vpop.xlane.xlu0 %6049  ;;  %v6097_v22 = vrot.slane %v6053_v41, %v6068_v23 }
0x195f   :  { %v6093_v6 = vrot.slane %v6050_v49, %v6068_v23 }
0x1961   :  { %v6103_v35 = vsel %vm834_vm7, %v6093_v6, %v6102_v24 }
0x1962   :  { %v6104_v5 = vsel %vm11604_vm11, %v6097_v22, %v6103_v35 }
0x1963   :  { %v6106_v63 = vsel %vm6055_vm8, -1e+30, %v6104_v5 }
0x1964   :  { %v6108_v46 = vsel %vm6107_vm10, %v6106_v63, -inf }
0x1965   :  { %6109 = vmax.xlane.f32.xlu0 %v6108_v46 }
0x19f2   :  { %v6110_v59 = vpop.xlane.xlu0 %6109 }
0x19f3   :  { %v6111_v34 = vsub.f32 %v6106_v63, %v6110_v59  ;;  %v6927_v59 = vld [vmem:[%s11362_s14] sm:$0xff] }
0x19f5   :  { %v6112_v56 = vmul.f32 1.442695, %v6111_v34  ;;  %v6928_v34 = vld [vmem:[%s11362_s14 + $0x8] sm:$0xff] }
0x19f7   :  { %8412 = vpow2.f32 %v6112_v56 }
0x1a01   :  { %v8413_v51 = vpop.eup %8412 }
0x1a02   :  { %v6114_v18 = vsel %vm6107_vm10, %v8413_v51, 0.0 }
0x1a03   :  { %6115 = vadd.xlane.f32.xlu1 %v6114_v18 }
0x1a90   :  { %v6116_v62 = vpop.xlane.xlu1 %6115 }
0x1a91   :  { %8414 = vrcp.f32 %v6116_v62  ;;  %v7191_v62 = vld [vmem:[%s11363_s13] ss:$0 sm:$0xff] }
0x1a9b   :  { %v8415_v43 = vpop.eup %8414 }
0x1a9c   :  { %v6118_v26 = vmul.f32 %v8415_v43, %v8413_v51  ;;  %v7615_v51 = vpack.c.bf16 %v6928_v34, %v6927_v59 }
0x1a9e   :  { %6119 = vst.msk [vmem:[%s11359_s17] sm:$0xff] %vm6107_vm10, %v6118_v26  ;;  %v6121_v27 = vcombine.high %v6118_v26, %v6118_v26  ;;  %v6128_v40 = vrot.slane %v6118_v26, %v11213_v57 }
0x1aa0   :  { %v6135_v32 = vrot.slane %v6121_v27, %v11213_v57  ;;  %v6144_v39 = vrot.slane %v6128_v40, %v11213_v57  ;;  %v6136_v36 = vcombine.high %v6128_v40, %v6128_v40 }
0x1aa2   :  { %7466 = vmatmul.mubr.msk.f32.vlgmr.msra.gmra.mrb[22].mxu1 %vm6107_vm10, %v6144_v39  ;;  %v6151_v14 = vrot.slane %v6135_v32, %v11213_v57  ;;  %v6158_v28 = vrot.slane %v6136_v36, %v11213_v57 }
0x1aa3   :  { %7469 = vmatpush3.msra.mxu1 %v11175_v15  ;;  %7470 = vmatprep.mubr.msk.f32.mxu1 %vm8423_vm0, %v11488_v42  ;;  %v6166_v15 = vcombine.high %v6144_v39, %v6144_v39 }
0x1aa4   :  { %7486 = vmatmul.mubr.msk.f32.vlgmr.msra.gmra.mrb[28].mxu0 %vm6107_vm10, %v6151_v14  ;;  %7473 = vmatprep.subr.mxu1 %v11488_v42  ;;  %v6167_v7 = vcombine.high %v6151_v14, %v6151_v14 }
0x1aa5   :  { %7494 = vmatpush3.msra.mxu0 %v11198_v25  ;;  %7495 = vmatprep.mubr.msk.f32.mxu0 %vm8423_vm0, %v11488_v42  ;;  %v6137_v25 = vcombine.high %v6135_v32, %v6135_v32  ;;  %v7192_v32 = vld [vmem:[%s11364_s15] ss:$0 sm:$0xff] }
0x1aa6   :  { %7471 = vmatmul.mubr.msk.f32.vlgmr.msra.gmra.mrb[24].mxu1 %vm6107_vm10, %v6158_v28  ;;  %7602 = vmatprep.subr.bf16.mxu0 %v11555_v54 }
0x1aa7   :  { %7474 = vmatpush3.msra.mxu1 %v11180_v53  ;;  %7475 = vmatprep.mubr.msk.f32.mxu1 %vm8423_vm0, %v11488_v42  ;;  %v6168_v53 = vcombine.high %v6158_v28, %v6158_v28  ;;  %v6165_v8 = vrot.slane %v6137_v25, %v11213_v57  ;;  %v6751_v57 = vld [vmem:[%s11360_s12 + $0x8] sm:$0xff] }
0x1aa8   :  { %7496 = vmatmul.mubr.msk.f32.vlgmr.msra.gmra.mrb[30].mxu0 %vm6107_vm10, %v6167_v7  ;;  %7478 = vmatprep.subr.mxu1 %v11488_v42 }
0x1aa9   :  { %7511 = vmatprep.mubr.msk.f32.mxu0 %vm8423_vm0, %v11488_v42 }
0x1aaa   :  { %7476 = vmatmul.mubr.msk.f32.vlgmr.msra.gmra.mrb[26].mxu1 %vm6107_vm10, %v6166_v15 }
0x1aab   :  { %7479 = vmatpush3.msra.mxu1 %v11185_v9  ;;  %7480 = vmatprep.mubr.msk.f32.mxu1 %vm8423_vm0, %v11488_v42  ;;  %v6169_v9 = vcombine.high %v6165_v8, %v6165_v8 }
0x1aac   :  { %7488 = vmatprep.subr.mxu1 %v11488_v42 }
0x1aae   :  { %7481 = vmatmul.mubr.msk.f32.vlgmr.msra.gmra.mrb[28].mxu1 %vm6107_vm10, %v6168_v53 }
0x1aaf   :  { %7489 = vmatpush3.msra.mxu1 %v11193_v1  ;;  %7490 = vmatprep.mubr.msk.f32.mxu1 %vm8423_vm0, %v11488_v42  ;;  %v6750_v1 = vld [vmem:[%s11360_s12] sm:$0xff] }
0x1ab0   :  { %7498 = vmatprep.subr.mxu1 %v11488_v42  ;;  %v7603_v10 = vpack.c.bf16 %v6751_v57, %v6750_v1 }
0x1ab2   :  { %7491 = vmatmul.mubr.msk.f32.vlgmr.msra.gmra.mrb[30].mxu1 %vm6107_vm10, %v6165_v8  ;;  %7604 = vmatpush3.bf16.msra.mxu0 %v7603_v10 }
0x1ab3   :  { %7499 = vmatpush3.msra.mxu1 %v11203_v13  ;;  %7500 = vmatprep.mubr.msk.f32.mxu1 %vm8423_vm0, %v11488_v42  ;;  %v6746_v13 = vld [vmem:[%s11361_s11] sm:$0xff] }
0x1ab4   :  { %7608 = vmatprep.subr.bf16.mxu1 %v11555_v54  ;;  %v7609_v20 = vpack.c.bf16 %v6747_v61, %v6746_v13  ;;  %7605 = vmatprep.subr.bf16.mxu0 %v11555_v54 }
0x1ab6   :  { %7501 = vmatmul.mubr.msk.f32.vlgmr.msra.gmra.mrb[32].mxu1 %vm6107_vm10, %v6169_v9  ;;  %7607 = vmatpush3.bf16.msra.mxu0 %v7606_v30 }
0x1ab7   :  { %7522 = vmatprep.mubr.msk.f32.mxu1 %vm8423_vm0, %v11488_v42  ;;  %7610 = vmatpush3.bf16.msra.mxu1 %v7609_v20 }
0x1ab8   :  { %7611 = vmatprep.subr.bf16.mxu1 %v11555_v54  ;;  %7614 = vmatprep.subr.bf16.mxu0 %v11555_v54 }
0x1ab9   :  { %7512 = vmatmul.mubr.msk.f32.vlgmr.msra.gmra.mrb[32].mxu0 %vm74_vm1, %v10972_v33 }
0x1aba   :  { %7529 = vmatprep.mubr.msk.f32.mxu0 %vm8423_vm0, %v11488_v42  ;;  %vm11605_vm0 = vmmov %vm11604_vm11  ;;  %7616 = vmatpush3.bf16.msra.mxu0 %v7615_v51 }
0x1abb   :  { %7613 = vmatpush3.bf16.msra.mxu1 %v7612_v19 }
0x1b75   :  { %v6238_v44 = vpop.f32.mrb[22].mxu1 }
0x1b76   :  { %v7467_v52 = vpop.f32.mrb[23].mxu1 }
0x1b77   :  { %v6526_v23 = vpop.f32.mrb[28].mxu0 }
0x1b78   :  { %v7487_v37 = vpop.f32.mrb[29].mxu0  ;;  %v6838_v42 = vrot.slane %v6526_v23, 4 }
0x1b79   :  { %v6310_v55 = vpop.f32.mrb[24].mxu1 }
0x1b7a   :  { %v6832_v45 = vrot.slane %v6310_v55, 7  ;;  %v7472_v58 = vpop.f32.mrb[25].mxu1 }
0x1b7b   :  { %v6670_v12 = vpop.f32.mrb[30].mxu0 }
0x1b7c   :  { %v6833_v48 = vsel %vm819_vm2, %v6832_v45, %v6238_v44  ;;  %v7497_v3 = vpop.f32.mrb[31].mxu0  ;;  %v6842_v49 = vrot.slane %v6670_v12, 2 }
0x1b7d   :  { %v6382_v60 = vpop.f32.mrb[26].mxu1 }
0x1b7e   :  { %v6834_v38 = vrot.slane %v6382_v60, 6  ;;  %v7477_v54 = vpop.f32.mrb[27].mxu1 }
0x1b80   :  { %v6835_v50 = vsel %vm822_vm3, %v6834_v38, %v6833_v48 }
0x1b81   :  { %v6454_v33 = vpop.f32.mrb[28].mxu1 }
0x1b82   :  { %v6836_v21 = vrot.slane %v6454_v33, 5  ;;  %v7482_v47 = vpop.f32.mrb[29].mxu1 }
0x1b84   :  { %v6837_v16 = vsel %vm825_vm4, %v6836_v21, %v6835_v50 }
0x1b85   :  { %v6598_v2 = vpop.f32.mrb[30].mxu1  ;;  %v6839_v41 = vsel %vm828_vm5, %v6838_v42, %v6837_v16 }
0x1b86   :  { %v6840_v31 = vrot.slane %v6598_v2, 3  ;;  %v7492_v0 = vpop.f32.mrb[31].mxu1 }
0x1b88   :  { %v6841_v6 = vsel %vm831_vm6, %v6840_v31, %v6839_v41 }
0x1b89   :  { %v6742_v22 = vpop.f32.mrb[32].mxu1  ;;  %v6843_v24 = vsel %vm834_vm7, %v6842_v49, %v6841_v6 }
0x1b8a   :  { %v6844_v35 = vrot.slane %v6742_v22, 1  ;;  %v7502_v5 = vpop.f32.mrb[33].mxu1 }
0x1b8c   :  { %v6845_v63 = vsel %vm11605_vm0, %v6844_v35, %v6843_v24  ;;  %v6820_v46 = vpop.f32.mrb[32].mxu0 }
0x1b8d   :  { %7523 = vmatmul.mubr.msk.f32.vlgmr.msra.gmra.mrb[34].mxu1 %vm74_vm1, %v6845_v63  ;;  %v7513_v56 = vpop.f32.mrb[33].mxu0  ;;  %vm7009_vm1 = vcmask 31744  }
0x1c60   :  { %v6914_v18 = vpop.f32.mrb[34].mxu1 }
0x1c61   :  { %v6915_v43 = vadd.f32 %v6914_v18, %v6820_v46  ;;  %v7524_v26 = vpop.f32.mrb[35].mxu1 }
0x1c63   :  { %v6925_v27 = vadd.f32 %v7191_v62, %v6915_v43 }
0x1c65   :  { %8416 = vtanh.f32 %v6925_v27 }
0x1c6f   :  { %v8417_v40 = vpop.eup %8416 }
0x1c70   :  { %7530 = vmatmul.mubr.msk.f32.vlgmr.msra.gmra.mrb[34].mxu0 %vm215_vm9, %v8417_v40 }
0x1d43   :  { %v7005_v39 = vpop.f32.mrb[34].mxu0 }
0x1d44   :  { %v7006_v36 = vadd.f32 %v7192_v32, %v7005_v39  ;;  %v7531_v14 = vpop.f32.mrb[35].mxu0 }
0x1d46   :  { %7010 = vst.msk [vmem:[%s11365_s16] sm:$0xff] %vm7009_vm1, %v7006_v36 }

</bundles_post_ra>
